<compile_context>
chip_gen: v7x
topology: tpu7x:2x2x1
jax: 0.10.0
libtpu: 0.0.40
codegen_flags: <defaults>
</compile_context>

<pallas_src>
import numpy as np
import jax
import jax.numpy as jnp
from jax.experimental import pallas as pl
from jax.experimental.pallas import tpu as pltpu


# ----------------------------- fused Pallas kernel -------------------------

def _make_fused_eesp_kernel(nIn, nOut, C2, C8, H, W, d_rates, padl):
    HW = H * W
    K = 5

    def kernel(x_ref, w1t_ref, bn1s_ref, bn1b_ref, a1_ref,
               wd_ref, bnds_ref, bndb_ref, masks_ref,
               bandt_ref, ecab_ref,
               scat_ref, bcat_ref, acat_ref,
               wexpt_ref, sexp_ref, bexp_ref, aout_ref,
               o_ref,
               pad_ref, col_ref):
        f32 = jnp.float32
        bf16 = jnp.bfloat16

        x = x_ref[0]                                               # (nIn, HW) f32

        # ---- REDUCE: grouped 1x1 conv (dense block-diag) + BN + PReLU ----------
        o1 = jnp.dot(w1t_ref[...], x.astype(bf16),
                     preferred_element_type=f32)                   # (C2, HW)
        o1 = o1 * bn1s_ref[...] + bn1b_ref[...]
        o1 = jnp.where(o1 >= 0.0, o1, a1_ref[...] * o1)

        # Zero-padded flat copy of o1 (single shared halo for all 3 dilations).
        pad_ref[...] = jnp.zeros((C2, HW + 2 * padl), f32)
        pad_ref[:, padl:padl + HW] = o1

        masks = masks_ref[...]                                     # (3*25, HW)

        # ---- SPLIT + TRANSFORM: three dilated 5x5 grouped convs ----------------
        # im2col (25*C2, HW) built from shifted/masked slices of the padded o1,
        # then one well-shaped matmul per dilation.
        branches = []
        for bi, d in enumerate(d_rates):
            for t in range(K * K):
                i, j = t // K, t % K
                delta = ((i - 2) * W + (j - 2)) * d
                start = padl + delta
                shifted = pad_ref[:, start:start + HW]             # (C2, HW)
                row = bi * K * K + t
                m = masks[row:row + 1, :]                          # (1, HW)
                col_ref[t * C2:(t + 1) * C2, :] = shifted * m
            br = jnp.dot(wd_ref[bi], col_ref[...].astype(bf16),
                         preferred_element_type=f32)               # (C2, HW)
            branches.append(br * bnds_ref[bi] + bndb_ref[bi])

        # ---- TRANSFORM: ECA attention branch -----------------------------------
        # mean_x(bandT @ o1) == bandT @ mean_x(o1)  (3-tap channel conv of the
        # global-average-pooled vector), done with channels on the sublane axis.
        att = jnp.dot(bandt_ref[...], o1.astype(bf16),
                      preferred_element_type=f32)                  # (C2, HW)
        logits = jnp.sum(att, axis=1, keepdims=True) * (1.0 / HW) + ecab_ref[...]
        eca = o1 * jax.nn.sigmoid(logits)                          # (C2, HW)

        # ---- MERGE: hierarchical sums + concat + BR + expand + residual --------
        b = branches[0]
        outs = [b]
        for br in branches[1:]:
            b = br + b
            outs.append(b)
        b = eca + b
        outs.append(b)
        cat = jnp.concatenate(outs, axis=0)                        # (C8, HW)

        y = cat * scat_ref[...] + bcat_ref[...]                    # BN (folded)
        y = jnp.where(y >= 0.0, y, acat_ref[...] * y)              # PReLU
        z = jnp.dot(wexpt_ref[...], y.astype(bf16),
                    preferred_element_type=f32)                    # grouped 1x1
        z = z * sexp_ref[...] + bexp_ref[...]                      # BN (folded)
        z = z + x                                                  # residual
        z = jnp.where(z >= 0.0, z, aout_ref[...] * z)              # module PReLU
        o_ref[0] = z

    return kernel


# ----------------------------- pallas_call wrapper -------------------------

def _rep_spec(arr):
    nd = arr.ndim
    return pl.BlockSpec(arr.shape, lambda b, _n=nd: (0,) * _n)


def eesp_block_forward_nchw(x_nchw, p):
    B, Cin, H, W = x_nchw.shape
    nIn, nOut = p["nIn"], p["nOut"]
    d_rates = p["d_rates"]
    assert Cin == nIn and nOut == nIn
    C2 = 2 * nIn
    C8 = (len(d_rates) + 1) * C2
    HW = H * W
    max_d = max(d_rates)
    # halo for the flat-shift gather, rounded up to a lane-aligned offset
    padl = ((2 * max_d * (W + 1) + 127) // 128) * 128

    x_flat = x_nchw.reshape(B, nIn, HW)          # NCHW with HW flattened (lane-dense)
    kernel = _make_fused_eesp_kernel(nIn, nOut, C2, C8, H, W, d_rates, padl)

    args = (x_flat, p["w1t"], p["bn1_scale"], p["bn1_bias"], p["prelu1"],
            p["wd"], p["bnd_scale"], p["bnd_bias"], p["tap_masks"],
            p["bandT"], p["eca_bias"],
            p["bncat_scale"], p["bncat_bias"], p["prelu_cat"],
            p["wexpT"], p["bnexp_scale"], p["bnexp_bias"], p["prelu_out"])

    in_specs = [pl.BlockSpec((1, nIn, HW), lambda b: (b, 0, 0))]
    in_specs += [_rep_spec(a) for a in args[1:]]

    out = pl.pallas_call(
        kernel,
        out_shape=jax.ShapeDtypeStruct((B, nOut, HW), jnp.float32),
        grid=(B,),
        in_specs=in_specs,
        out_specs=pl.BlockSpec((1, nOut, HW), lambda b: (b, 0, 0)),
        scratch_shapes=[pltpu.VMEM((C2, HW + 2 * padl), jnp.float32),   # padded o1
                        pltpu.VMEM((25 * C2, HW), jnp.float32)],        # im2col
        compiler_params=pltpu.CompilerParams(
            dimension_semantics=("parallel",)),
    )(*args)
    return out.reshape(B, nOut, H, W)


# ----------------------------- parameter construction ----------------------

def _bn_fold(gamma, beta, mean, var, eps=1e-5):
    scale = gamma / np.sqrt(var + eps)
    bias = beta - mean * scale
    return scale.astype(np.float32), bias.astype(np.float32)


def _block_diag_dense(wg, groups):
    # wg: grouped HWIO weight (kh, kw, Cin/g, Cout) -> dense (kh, kw, Cin, Cout)
    kh, kw, cin_g, cout = wg.shape
    cout_g = cout // groups
    dense = np.zeros((kh, kw, cin_g * groups, cout), np.float32)
    for g in range(groups):
        dense[:, :, g * cin_g:(g + 1) * cin_g, g * cout_g:(g + 1) * cout_g] = \
            wg[:, :, :, g * cout_g:(g + 1) * cout_g]
    return dense


def _make_tap_masks(H, W, d_rates, K=5):
    # mask[bi*25+t, h*W+w] = 1 iff the dilated tap stays inside the image
    masks = np.zeros((len(d_rates) * K * K, H * W), np.float32)
    for bi, d in enumerate(d_rates):
        for t in range(K * K):
            i, j = t // K, t % K
            di, dj = (i - 2) * d, (j - 2) * d
            vh = ((np.arange(H) + di) >= 0) & ((np.arange(H) + di) < H)
            vw = ((np.arange(W) + dj) >= 0) & ((np.arange(W) + dj) < W)
            masks[bi * K * K + t] = (vh[:, None] & vw[None, :]).astype(
                np.float32).reshape(-1)
    return jnp.asarray(masks)


def make_params(nIn, nOut, d_rates, H, W, seed=0):
    k = len(d_rates) + 1                      # = 4
    C2 = 2 * nIn
    C8 = k * C2                               # = 8 * nIn
    rng = np.random.RandomState(seed)

    def rand(*shape):
        return (rng.standard_normal(shape) * 0.1).astype(np.float32)

    def col(v):
        return jnp.asarray(np.asarray(v, np.float32).reshape(-1, 1))

    p = {"nIn": nIn, "nOut": nOut, "d_rates": list(d_rates)}

    # proj_1x1: CBR(nIn, 2*nIn, 1, groups=k)
    w1g = rand(1, 1, nIn // k, C2)
    p["w1_grouped"] = jnp.asarray(w1g)
    dense1 = _block_diag_dense(w1g, k).reshape(nIn, C2)             # (in, out)
    p["w1t"] = jnp.asarray(np.ascontiguousarray(dense1.T)).astype(jnp.bfloat16)
    s, b = _bn_fold(1.0 + rand(C2), rand(C2),
                    np.zeros(C2, np.float32), np.ones(C2, np.float32))
    p["bn1_scale"], p["bn1_bias"] = col(s), col(b)
    p["prelu1"] = jnp.full((C2, 1), 0.25, jnp.float32)

    # spp_dw dilated convs: CDilated_v2(2*nIn, 2*nIn, 5, groups=nIn, d=d)
    wd_rows, bnd_s, bnd_b, wd_grouped = [], [], [], []
    for _ in d_rates:
        wdg = rand(5, 5, C2 // nIn, C2)
        wd_grouped.append(jnp.asarray(wdg))
        dense = _block_diag_dense(wdg, nIn).reshape(25, C2, C2)      # (tap, in, out)
        wd_rows.append(np.transpose(dense, (2, 0, 1)).reshape(C2, 25 * C2))
        s, b = _bn_fold(1.0 + rand(C2), rand(C2),
                        np.zeros(C2, np.float32), np.ones(C2, np.float32))
        bnd_s.append(s.reshape(-1, 1))
        bnd_b.append(b.reshape(-1, 1))
    p["wd_grouped"] = wd_grouped
    p["wd"] = jnp.asarray(np.stack(wd_rows)).astype(jnp.bfloat16)    # (3, C2, 25*C2)
    p["bnd_scale"] = jnp.asarray(np.stack(bnd_s))                    # (3, C2, 1)
    p["bnd_bias"] = jnp.asarray(np.stack(bnd_b))

    # ECA attention: conv1d(1, 1, 3, padding=1) over the channel axis, with bias
    eca_w = rand(3)
    eca_b = float(rand(1)[0])
    bandt = np.zeros((C2, C2), np.float32)                            # (out, in)
    for c in range(C2):
        if c - 1 >= 0:
            bandt[c, c - 1] = eca_w[0]
        bandt[c, c] = eca_w[1]
        if c + 1 < C2:
            bandt[c, c + 1] = eca_w[2]
    p["eca_w"] = jnp.asarray(eca_w)
    p["eca_b"] = jnp.float32(eca_b)
    p["bandT"] = jnp.asarray(bandt).astype(jnp.bfloat16)
    p["eca_bias"] = jnp.full((C2, 1), eca_b, jnp.float32)

    # br_after_cat: BN(8*nIn) + PReLU(8*nIn)
    s, b = _bn_fold(1.0 + rand(C8), rand(C8),
                    np.zeros(C8, np.float32), np.ones(C8, np.float32))
    p["bncat_scale"], p["bncat_bias"] = col(s), col(b)
    p["prelu_cat"] = jnp.full((C8, 1), 0.25, jnp.float32)

    # conv_1x1_exp: CB(8*nIn, nOut, 1, 1, groups=k)
    wexpg = rand(1, 1, C8 // k, nOut)
    p["wexp_grouped"] = jnp.asarray(wexpg)
    dexp = _block_diag_dense(wexpg, k).reshape(C8, nOut)
    p["wexpT"] = jnp.asarray(np.ascontiguousarray(dexp.T)).astype(jnp.bfloat16)
    s, b = _bn_fold(1.0 + rand(nOut), rand(nOut),
                    np.zeros(nOut, np.float32), np.ones(nOut, np.float32))
    p["bnexp_scale"], p["bnexp_bias"] = col(s), col(b)
    p["prelu_out"] = jnp.full((nOut, 1), 0.25, jnp.float32)

    # 0/1 validity masks for the shifted-tap im2col gather
    p["tap_masks"] = _make_tap_masks(H, W, d_rates)
    return p


# ----------------------------- pure-JAX reference (for checking) -----------

def _grouped_conv_bf16(x, wg, dil, groups, pad):
    return jax.lax.conv_general_dilated(
        x.astype(jnp.bfloat16), wg.astype(jnp.bfloat16),
        window_strides=(1, 1), padding=((pad, pad), (pad, pad)),
        rhs_dilation=(dil, dil),
        dimension_numbers=("NHWC", "HWIO", "NHWC"),
        feature_group_count=groups,
        preferred_element_type=jnp.float32)


def reference_forward_nchw(x_nchw, p):
    x = jnp.transpose(x_nchw, (0, 2, 3, 1)).astype(jnp.float32)
    k = len(p["d_rates"]) + 1
    nIn = p["nIn"]

    def aff(y, s, b):
        return y * s.reshape(1, 1, 1, -1) + b.reshape(1, 1, 1, -1)

    def prelu(y, a):
        a = a.reshape(1, 1, 1, -1)
        return jnp.where(y >= 0, y, a * y)

    o1 = prelu(aff(_grouped_conv_bf16(x, p["w1_grouped"], 1, k, 0),
                   p["bn1_scale"], p["bn1_bias"]), p["prelu1"])

    branches = []
    for i, d in enumerate(p["d_rates"]):
        c = _grouped_conv_bf16(o1, p["wd_grouped"][i], d, nIn, 2 * d)
        branches.append(aff(c, p["bnd_scale"][i], p["bnd_bias"][i]))

    pooled = jnp.mean(o1, axis=(1, 2))                       # (B, C2)
    padded = jnp.pad(pooled, ((0, 0), (1, 1)))
    w = p["eca_w"]
    y = (w[0] * padded[:, :-2] + w[1] * padded[:, 1:-1] + w[2] * padded[:, 2:]
         + p["eca_b"])
    eca = o1 * jax.nn.sigmoid(y)[:, None, None, :]

    b = branches[0]
    outs = [b]
    for br in branches[1:]:
        b = br + b
        outs.append(b)
    b = eca + b
    outs.append(b)
    cat = jnp.concatenate(outs, axis=-1)
    cat = prelu(aff(cat, p["bncat_scale"], p["bncat_bias"]), p["prelu_cat"])
    z = aff(_grouped_conv_bf16(cat, p["wexp_grouped"], 1, k, 0),
            p["bnexp_scale"], p["bnexp_bias"])
    z = z + x
    z = prelu(z, p["prelu_out"])
    return jnp.transpose(z, (0, 3, 1, 2))


# ----------------------------- main -----------------------------------------

if __name__ == "__main__":
    B, nIn, H, W = 2, 8, 16, 16          # nOut == nIn, stride == 1 (residual requires it)
    nOut = nIn
    d_rates = [1, 2, 4]

    params = make_params(nIn, nOut, d_rates, H, W, seed=0)

    key = jax.random.PRNGKey(0)
    x_nchw = jax.random.normal(key, (B, nIn, H, W), dtype=jnp.float32)

    out_nchw = eesp_block_forward_nchw(x_nchw, params)
    out_nchw = jax.block_until_ready(out_nchw)

    # sanity check against a pure-JAX reference with the same (bf16-MXU) semantics
    ref_nchw = reference_forward_nchw(x_nchw, params)
    np.testing.assert_allclose(np.asarray(out_nchw), np.asarray(ref_nchw),
                               rtol=2e-3, atol=2e-3)

    print("KERNEL_OK")
</pallas_src>

<mosaic_0001>
module attributes {stable_mosaic.version = 11 : i64} {
  func.func @kernel(%arg0: i32, %arg1: memref<1x8x256xf32, #tpu.memory_space<vmem>>, %arg2: memref<16x8xbf16, #tpu.memory_space<vmem>>, %arg3: memref<16x1xf32, #tpu.memory_space<vmem>>, %arg4: memref<16x1xf32, #tpu.memory_space<vmem>>, %arg5: memref<16x1xf32, #tpu.memory_space<vmem>>, %arg6: memref<3x16x400xbf16, #tpu.memory_space<vmem>>, %arg7: memref<3x16x1xf32, #tpu.memory_space<vmem>>, %arg8: memref<3x16x1xf32, #tpu.memory_space<vmem>>, %arg9: memref<75x256xf32, #tpu.memory_space<vmem>>, %arg10: memref<16x16xbf16, #tpu.memory_space<vmem>>, %arg11: memref<16x1xf32, #tpu.memory_space<vmem>>, %arg12: memref<64x1xf32, #tpu.memory_space<vmem>>, %arg13: memref<64x1xf32, #tpu.memory_space<vmem>>, %arg14: memref<64x1xf32, #tpu.memory_space<vmem>>, %arg15: memref<8x64xbf16, #tpu.memory_space<vmem>>, %arg16: memref<8x1xf32, #tpu.memory_space<vmem>>, %arg17: memref<8x1xf32, #tpu.memory_space<vmem>>, %arg18: memref<8x1xf32, #tpu.memory_space<vmem>>, %arg19: memref<1x8x256xf32, #tpu.memory_space<vmem>>, %arg20: memref<16x768xf32, #tpu.memory_space<vmem>>, %arg21: memref<400x256xf32, #tpu.memory_space<vmem>>) attributes {dimension_semantics = [#tpu.dimension_semantics<parallel>], iteration_bounds = array<i64: 2>, scalar_prefetch = 0 : i64, scratch_operands = 2 : i64, tpu.core_type = #tpu.core_type<tc>, window_params = [{transform_indices = @transform_0, window_bounds = array<i64: 1, 8, 256>}, {pipeline_mode = #tpu.pipeline_mode<synchronous>, transform_indices = @transform_1, window_bounds = array<i64: 16, 8>}, {pipeline_mode = #tpu.pipeline_mode<synchronous>, transform_indices = @transform_2, window_bounds = array<i64: 16, 1>}, {pipeline_mode = #tpu.pipeline_mode<synchronous>, transform_indices = @transform_3, window_bounds = array<i64: 16, 1>}, {pipeline_mode = #tpu.pipeline_mode<synchronous>, transform_indices = @transform_4, window_bounds = array<i64: 16, 1>}, {pipeline_mode = #tpu.pipeline_mode<synchronous>, transform_indices = @transform_5, window_bounds = array<i64: 3, 16, 400>}, {pipeline_mode = #tpu.pipeline_mode<synchronous>, transform_indices = @transform_6, window_bounds = array<i64: 3, 16, 1>}, {pipeline_mode = #tpu.pipeline_mode<synchronous>, transform_indices = @transform_7, window_bounds = array<i64: 3, 16, 1>}, {pipeline_mode = #tpu.pipeline_mode<synchronous>, transform_indices = @transform_8, window_bounds = array<i64: 75, 256>}, {pipeline_mode = #tpu.pipeline_mode<synchronous>, transform_indices = @transform_9, window_bounds = array<i64: 16, 16>}, {pipeline_mode = #tpu.pipeline_mode<synchronous>, transform_indices = @transform_10, window_bounds = array<i64: 16, 1>}, {pipeline_mode = #tpu.pipeline_mode<synchronous>, transform_indices = @transform_11, window_bounds = array<i64: 64, 1>}, {pipeline_mode = #tpu.pipeline_mode<synchronous>, transform_indices = @transform_12, window_bounds = array<i64: 64, 1>}, {pipeline_mode = #tpu.pipeline_mode<synchronous>, transform_indices = @transform_13, window_bounds = array<i64: 64, 1>}, {pipeline_mode = #tpu.pipeline_mode<synchronous>, transform_indices = @transform_14, window_bounds = array<i64: 8, 64>}, {pipeline_mode = #tpu.pipeline_mode<synchronous>, transform_indices = @transform_15, window_bounds = array<i64: 8, 1>}, {pipeline_mode = #tpu.pipeline_mode<synchronous>, transform_indices = @transform_16, window_bounds = array<i64: 8, 1>}, {pipeline_mode = #tpu.pipeline_mode<synchronous>, transform_indices = @transform_17, window_bounds = array<i64: 8, 1>}, {transform_indices = @transform_18, window_bounds = array<i64: 1, 8, 256>}]} {
    %c0 = arith.constant 0 : index
    %c0_0 = arith.constant 0 : index
    %c0_1 = arith.constant 0 : index
    %0 = vector.load %arg1[%c0, %c0_0, %c0_1] : memref<1x8x256xf32, #tpu.memory_space<vmem>>, vector<1x8x256xf32>
    %1 = vector.shape_cast %0 : vector<1x8x256xf32> to vector<8x256xf32>
    %c0_2 = arith.constant 0 : index
    %c0_3 = arith.constant 0 : index
    %2 = vector.load %arg2[%c0_2, %c0_3] : memref<16x8xbf16, #tpu.memory_space<vmem>>, vector<16x8xbf16>
    %3 = arith.truncf %1 : vector<8x256xf32> to vector<8x256xbf16>
    %cst = arith.constant dense<0.000000e+00> : vector<16x256xf32>
    %4 = tpu.matmul %2, %3, %cst {dimension_numbers = #tpu.dot_dimension_numbers<[1], [0], [0], [1], [0, 0, 1, 1], [], []>} : vector<16x8xbf16>, vector<8x256xbf16>, vector<16x256xf32> -> vector<16x256xf32>
    %c0_4 = arith.constant 0 : index
    %c0_5 = arith.constant 0 : index
    %5 = vector.load %arg3[%c0_4, %c0_5] : memref<16x1xf32, #tpu.memory_space<vmem>>, vector<16x1xf32>
    %6 = vector.broadcast %5 : vector<16x1xf32> to vector<16x256xf32>
    %7 = arith.mulf %4, %6 : vector<16x256xf32>
    %c0_6 = arith.constant 0 : index
    %c0_7 = arith.constant 0 : index
    %8 = vector.load %arg4[%c0_6, %c0_7] : memref<16x1xf32, #tpu.memory_space<vmem>>, vector<16x1xf32>
    %9 = vector.broadcast %8 : vector<16x1xf32> to vector<16x256xf32>
    %10 = arith.addf %7, %9 : vector<16x256xf32>
    %cst_8 = arith.constant 0.000000e+00 : f32
    %11 = vector.broadcast %cst_8 : f32 to vector<16x256xf32>
    %12 = arith.cmpf oge, %10, %11 : vector<16x256xf32>
    %c0_9 = arith.constant 0 : index
    %c0_10 = arith.constant 0 : index
    %13 = vector.load %arg5[%c0_9, %c0_10] : memref<16x1xf32, #tpu.memory_space<vmem>>, vector<16x1xf32>
    %14 = vector.broadcast %13 : vector<16x1xf32> to vector<16x256xf32>
    %15 = arith.mulf %14, %10 : vector<16x256xf32>
    %16 = arith.select %12, %10, %15 : vector<16x256xi1>, vector<16x256xf32>
    %cst_11 = arith.constant 0.000000e+00 : f32
    %17 = vector.broadcast %cst_11 : f32 to vector<16x768xf32>
    %c0_12 = arith.constant 0 : index
    %c0_13 = arith.constant 0 : index
    %18 = vector.load %arg20[%c0_12, %c0_13] : memref<16x768xf32, #tpu.memory_space<vmem>>, vector<16x768xf32>
    tpu.vector_store %arg20[%c0_12, %c0_13], %17 {strides = array<i32>} : memref<16x768xf32, #tpu.memory_space<vmem>>, vector<16x768xf32>,
    %c0_14 = arith.constant 0 : index
    %c256 = arith.constant 256 : index
    %19 = vector.load %arg20[%c0_14, %c256] : memref<16x768xf32, #tpu.memory_space<vmem>>, vector<16x256xf32>
    tpu.vector_store %arg20[%c0_14, %c256], %16 {strides = array<i32>} : memref<16x768xf32, #tpu.memory_space<vmem>>, vector<16x256xf32>,
    %c0_15 = arith.constant 0 : index
    %c0_16 = arith.constant 0 : index
    %20 = vector.load %arg9[%c0_15, %c0_16] : memref<75x256xf32, #tpu.memory_space<vmem>>, vector<75x256xf32>
    %c0_17 = arith.constant 0 : index
    %c222 = arith.constant 222 : index
    %21 = vector.load %arg20[%c0_17, %c222] : memref<16x768xf32, #tpu.memory_space<vmem>>, vector<16x256xf32>
    %22 = vector.extract_strided_slice %20 {offsets = [0, 0], sizes = [1, 256], strides = [1, 1]} : vector<75x256xf32> to vector<1x256xf32>
    %23 = vector.broadcast %22 : vector<1x256xf32> to vector<16x256xf32>
    %24 = arith.mulf %21, %23 : vector<16x256xf32>
    %c0_18 = arith.constant 0 : index
    %c0_19 = arith.constant 0 : index
    %25 = vector.load %arg21[%c0_18, %c0_19] : memref<400x256xf32, #tpu.memory_space<vmem>>, vector<16x256xf32>
    tpu.vector_store %arg21[%c0_18, %c0_19], %24 {strides = array<i32>} : memref<400x256xf32, #tpu.memory_space<vmem>>, vector<16x256xf32>,
    %c0_20 = arith.constant 0 : index
    %c223 = arith.constant 223 : index
    %26 = vector.load %arg20[%c0_20, %c223] : memref<16x768xf32, #tpu.memory_space<vmem>>, vector<16x256xf32>
    %27 = vector.extract_strided_slice %20 {offsets = [1, 0], sizes = [1, 256], strides = [1, 1]} : vector<75x256xf32> to vector<1x256xf32>
    %28 = vector.broadcast %27 : vector<1x256xf32> to vector<16x256xf32>
    %29 = arith.mulf %26, %28 : vector<16x256xf32>
    %c16 = arith.constant 16 : index
    %c0_21 = arith.constant 0 : index
    %30 = vector.load %arg21[%c16, %c0_21] : memref<400x256xf32, #tpu.memory_space<vmem>>, vector<16x256xf32>
    tpu.vector_store %arg21[%c16, %c0_21], %29 {strides = array<i32>} : memref<400x256xf32, #tpu.memory_space<vmem>>, vector<16x256xf32>,
    %c0_22 = arith.constant 0 : index
    %c224 = arith.constant 224 : index
    %31 = vector.load %arg20[%c0_22, %c224] : memref<16x768xf32, #tpu.memory_space<vmem>>, vector<16x256xf32>
    %32 = vector.extract_strided_slice %20 {offsets = [2, 0], sizes = [1, 256], strides = [1, 1]} : vector<75x256xf32> to vector<1x256xf32>
    %33 = vector.broadcast %32 : vector<1x256xf32> to vector<16x256xf32>
    %34 = arith.mulf %31, %33 : vector<16x256xf32>
    %c32 = arith.constant 32 : index
    %c0_23 = arith.constant 0 : index
    %35 = vector.load %arg21[%c32, %c0_23] : memref<400x256xf32, #tpu.memory_space<vmem>>, vector<16x256xf32>
    tpu.vector_store %arg21[%c32, %c0_23], %34 {strides = array<i32>} : memref<400x256xf32, #tpu.memory_space<vmem>>, vector<16x256xf32>,
    %c0_24 = arith.constant 0 : index
    %c225 = arith.constant 225 : index
    %36 = vector.load %arg20[%c0_24, %c225] : memref<16x768xf32, #tpu.memory_space<vmem>>, vector<16x256xf32>
    %37 = vector.extract_strided_slice %20 {offsets = [3, 0], sizes = [1, 256], strides = [1, 1]} : vector<75x256xf32> to vector<1x256xf32>
    %38 = vector.broadcast %37 : vector<1x256xf32> to vector<16x256xf32>
    %39 = arith.mulf %36, %38 : vector<16x256xf32>
    %c48 = arith.constant 48 : index
    %c0_25 = arith.constant 0 : index
    %40 = vector.load %arg21[%c48, %c0_25] : memref<400x256xf32, #tpu.memory_space<vmem>>, vector<16x256xf32>
    tpu.vector_store %arg21[%c48, %c0_25], %39 {strides = array<i32>} : memref<400x256xf32, #tpu.memory_space<vmem>>, vector<16x256xf32>,
    %c0_26 = arith.constant 0 : index
    %c226 = arith.constant 226 : index
    %41 = vector.load %arg20[%c0_26, %c226] : memref<16x768xf32, #tpu.memory_space<vmem>>, vector<16x256xf32>
    %42 = vector.extract_strided_slice %20 {offsets = [4, 0], sizes = [1, 256], strides = [1, 1]} : vector<75x256xf32> to vector<1x256xf32>
    %43 = vector.broadcast %42 : vector<1x256xf32> to vector<16x256xf32>
    %44 = arith.mulf %41, %43 : vector<16x256xf32>
    %c64 = arith.constant 64 : index
    %c0_27 = arith.constant 0 : index
    %45 = vector.load %arg21[%c64, %c0_27] : memref<400x256xf32, #tpu.memory_space<vmem>>, vector<16x256xf32>
    tpu.vector_store %arg21[%c64, %c0_27], %44 {strides = array<i32>} : memref<400x256xf32, #tpu.memory_space<vmem>>, vector<16x256xf32>,
    %c0_28 = arith.constant 0 : index
    %c238 = arith.constant 238 : index
    %46 = vector.load %arg20[%c0_28, %c238] : memref<16x768xf32, #tpu.memory_space<vmem>>, vector<16x256xf32>
    %47 = vector.extract_strided_slice %20 {offsets = [5, 0], sizes = [1, 256], strides = [1, 1]} : vector<75x256xf32> to vector<1x256xf32>
    %48 = vector.broadcast %47 : vector<1x256xf32> to vector<16x256xf32>
    %49 = arith.mulf %46, %48 : vector<16x256xf32>
    %c80 = arith.constant 80 : index
    %c0_29 = arith.constant 0 : index
    %50 = vector.load %arg21[%c80, %c0_29] : memref<400x256xf32, #tpu.memory_space<vmem>>, vector<16x256xf32>
    tpu.vector_store %arg21[%c80, %c0_29], %49 {strides = array<i32>} : memref<400x256xf32, #tpu.memory_space<vmem>>, vector<16x256xf32>,
    %c0_30 = arith.constant 0 : index
    %c239 = arith.constant 239 : index
    %51 = vector.load %arg20[%c0_30, %c239] : memref<16x768xf32, #tpu.memory_space<vmem>>, vector<16x256xf32>
    %52 = vector.extract_strided_slice %20 {offsets = [6, 0], sizes = [1, 256], strides = [1, 1]} : vector<75x256xf32> to vector<1x256xf32>
    %53 = vector.broadcast %52 : vector<1x256xf32> to vector<16x256xf32>
    %54 = arith.mulf %51, %53 : vector<16x256xf32>
    %c96 = arith.constant 96 : index
    %c0_31 = arith.constant 0 : index
    %55 = vector.load %arg21[%c96, %c0_31] : memref<400x256xf32, #tpu.memory_space<vmem>>, vector<16x256xf32>
    tpu.vector_store %arg21[%c96, %c0_31], %54 {strides = array<i32>} : memref<400x256xf32, #tpu.memory_space<vmem>>, vector<16x256xf32>,
    %c0_32 = arith.constant 0 : index
    %c240 = arith.constant 240 : index
    %56 = vector.load %arg20[%c0_32, %c240] : memref<16x768xf32, #tpu.memory_space<vmem>>, vector<16x256xf32>
    %57 = vector.extract_strided_slice %20 {offsets = [7, 0], sizes = [1, 256], strides = [1, 1]} : vector<75x256xf32> to vector<1x256xf32>
    %58 = vector.broadcast %57 : vector<1x256xf32> to vector<16x256xf32>
    %59 = arith.mulf %56, %58 : vector<16x256xf32>
    %c112 = arith.constant 112 : index
    %c0_33 = arith.constant 0 : index
    %60 = vector.load %arg21[%c112, %c0_33] : memref<400x256xf32, #tpu.memory_space<vmem>>, vector<16x256xf32>
    tpu.vector_store %arg21[%c112, %c0_33], %59 {strides = array<i32>} : memref<400x256xf32, #tpu.memory_space<vmem>>, vector<16x256xf32>,
    %c0_34 = arith.constant 0 : index
    %c241 = arith.constant 241 : index
    %61 = vector.load %arg20[%c0_34, %c241] : memref<16x768xf32, #tpu.memory_space<vmem>>, vector<16x256xf32>
    %62 = vector.extract_strided_slice %20 {offsets = [8, 0], sizes = [1, 256], strides = [1, 1]} : vector<75x256xf32> to vector<1x256xf32>
    %63 = vector.broadcast %62 : vector<1x256xf32> to vector<16x256xf32>
    %64 = arith.mulf %61, %63 : vector<16x256xf32>
    %c128 = arith.constant 128 : index
    %c0_35 = arith.constant 0 : index
    %65 = vector.load %arg21[%c128, %c0_35] : memref<400x256xf32, #tpu.memory_space<vmem>>, vector<16x256xf32>
    tpu.vector_store %arg21[%c128, %c0_35], %64 {strides = array<i32>} : memref<400x256xf32, #tpu.memory_space<vmem>>, vector<16x256xf32>,
    %c0_36 = arith.constant 0 : index
    %c242 = arith.constant 242 : index
    %66 = vector.load %arg20[%c0_36, %c242] : memref<16x768xf32, #tpu.memory_space<vmem>>, vector<16x256xf32>
    %67 = vector.extract_strided_slice %20 {offsets = [9, 0], sizes = [1, 256], strides = [1, 1]} : vector<75x256xf32> to vector<1x256xf32>
    %68 = vector.broadcast %67 : vector<1x256xf32> to vector<16x256xf32>
    %69 = arith.mulf %66, %68 : vector<16x256xf32>
    %c144 = arith.constant 144 : index
    %c0_37 = arith.constant 0 : index
    %70 = vector.load %arg21[%c144, %c0_37] : memref<400x256xf32, #tpu.memory_space<vmem>>, vector<16x256xf32>
    tpu.vector_store %arg21[%c144, %c0_37], %69 {strides = array<i32>} : memref<400x256xf32, #tpu.memory_space<vmem>>, vector<16x256xf32>,
    %c0_38 = arith.constant 0 : index
    %c254 = arith.constant 254 : index
    %71 = vector.load %arg20[%c0_38, %c254] : memref<16x768xf32, #tpu.memory_space<vmem>>, vector<16x256xf32>
    %72 = vector.extract_strided_slice %20 {offsets = [10, 0], sizes = [1, 256], strides = [1, 1]} : vector<75x256xf32> to vector<1x256xf32>
    %73 = vector.broadcast %72 : vector<1x256xf32> to vector<16x256xf32>
    %74 = arith.mulf %71, %73 : vector<16x256xf32>
    %c160 = arith.constant 160 : index
    %c0_39 = arith.constant 0 : index
    %75 = vector.load %arg21[%c160, %c0_39] : memref<400x256xf32, #tpu.memory_space<vmem>>, vector<16x256xf32>
    tpu.vector_store %arg21[%c160, %c0_39], %74 {strides = array<i32>} : memref<400x256xf32, #tpu.memory_space<vmem>>, vector<16x256xf32>,
    %c0_40 = arith.constant 0 : index
    %c255 = arith.constant 255 : index
    %76 = vector.load %arg20[%c0_40, %c255] : memref<16x768xf32, #tpu.memory_space<vmem>>, vector<16x256xf32>
    %77 = vector.extract_strided_slice %20 {offsets = [11, 0], sizes = [1, 256], strides = [1, 1]} : vector<75x256xf32> to vector<1x256xf32>
    %78 = vector.broadcast %77 : vector<1x256xf32> to vector<16x256xf32>
    %79 = arith.mulf %76, %78 : vector<16x256xf32>
    %c176 = arith.constant 176 : index
    %c0_41 = arith.constant 0 : index
    %80 = vector.load %arg21[%c176, %c0_41] : memref<400x256xf32, #tpu.memory_space<vmem>>, vector<16x256xf32>
    tpu.vector_store %arg21[%c176, %c0_41], %79 {strides = array<i32>} : memref<400x256xf32, #tpu.memory_space<vmem>>, vector<16x256xf32>,
    %c0_42 = arith.constant 0 : index
    %c256_43 = arith.constant 256 : index
    %81 = vector.load %arg20[%c0_42, %c256_43] : memref<16x768xf32, #tpu.memory_space<vmem>>, vector<16x256xf32>
    %82 = vector.extract_strided_slice %20 {offsets = [12, 0], sizes = [1, 256], strides = [1, 1]} : vector<75x256xf32> to vector<1x256xf32>
    %83 = vector.broadcast %82 : vector<1x256xf32> to vector<16x256xf32>
    %84 = arith.mulf %81, %83 : vector<16x256xf32>
    %c192 = arith.constant 192 : index
    %c0_44 = arith.constant 0 : index
    %85 = vector.load %arg21[%c192, %c0_44] : memref<400x256xf32, #tpu.memory_space<vmem>>, vector<16x256xf32>
    tpu.vector_store %arg21[%c192, %c0_44], %84 {strides = array<i32>} : memref<400x256xf32, #tpu.memory_space<vmem>>, vector<16x256xf32>,
    %c0_45 = arith.constant 0 : index
    %c257 = arith.constant 257 : index
    %86 = vector.load %arg20[%c0_45, %c257] : memref<16x768xf32, #tpu.memory_space<vmem>>, vector<16x256xf32>
    %87 = vector.extract_strided_slice %20 {offsets = [13, 0], sizes = [1, 256], strides = [1, 1]} : vector<75x256xf32> to vector<1x256xf32>
    %88 = vector.broadcast %87 : vector<1x256xf32> to vector<16x256xf32>
    %89 = arith.mulf %86, %88 : vector<16x256xf32>
    %c208 = arith.constant 208 : index
    %c0_46 = arith.constant 0 : index
    %90 = vector.load %arg21[%c208, %c0_46] : memref<400x256xf32, #tpu.memory_space<vmem>>, vector<16x256xf32>
    tpu.vector_store %arg21[%c208, %c0_46], %89 {strides = array<i32>} : memref<400x256xf32, #tpu.memory_space<vmem>>, vector<16x256xf32>,
    %c0_47 = arith.constant 0 : index
    %c258 = arith.constant 258 : index
    %91 = vector.load %arg20[%c0_47, %c258] : memref<16x768xf32, #tpu.memory_space<vmem>>, vector<16x256xf32>
    %92 = vector.extract_strided_slice %20 {offsets = [14, 0], sizes = [1, 256], strides = [1, 1]} : vector<75x256xf32> to vector<1x256xf32>
    %93 = vector.broadcast %92 : vector<1x256xf32> to vector<16x256xf32>
    %94 = arith.mulf %91, %93 : vector<16x256xf32>
    %c224_48 = arith.constant 224 : index
    %c0_49 = arith.constant 0 : index
    %95 = vector.load %arg21[%c224_48, %c0_49] : memref<400x256xf32, #tpu.memory_space<vmem>>, vector<16x256xf32>
    tpu.vector_store %arg21[%c224_48, %c0_49], %94 {strides = array<i32>} : memref<400x256xf32, #tpu.memory_space<vmem>>, vector<16x256xf32>,
    %c0_50 = arith.constant 0 : index
    %c270 = arith.constant 270 : index
    %96 = vector.load %arg20[%c0_50, %c270] : memref<16x768xf32, #tpu.memory_space<vmem>>, vector<16x256xf32>
    %97 = vector.extract_strided_slice %20 {offsets = [15, 0], sizes = [1, 256], strides = [1, 1]} : vector<75x256xf32> to vector<1x256xf32>
    %98 = vector.broadcast %97 : vector<1x256xf32> to vector<16x256xf32>
    %99 = arith.mulf %96, %98 : vector<16x256xf32>
    %c240_51 = arith.constant 240 : index
    %c0_52 = arith.constant 0 : index
    %100 = vector.load %arg21[%c240_51, %c0_52] : memref<400x256xf32, #tpu.memory_space<vmem>>, vector<16x256xf32>
    tpu.vector_store %arg21[%c240_51, %c0_52], %99 {strides = array<i32>} : memref<400x256xf32, #tpu.memory_space<vmem>>, vector<16x256xf32>,
    %c0_53 = arith.constant 0 : index
    %c271 = arith.constant 271 : index
    %101 = vector.load %arg20[%c0_53, %c271] : memref<16x768xf32, #tpu.memory_space<vmem>>, vector<16x256xf32>
    %102 = vector.extract_strided_slice %20 {offsets = [16, 0], sizes = [1, 256], strides = [1, 1]} : vector<75x256xf32> to vector<1x256xf32>
    %103 = vector.broadcast %102 : vector<1x256xf32> to vector<16x256xf32>
    %104 = arith.mulf %101, %103 : vector<16x256xf32>
    %c256_54 = arith.constant 256 : index
    %c0_55 = arith.constant 0 : index
    %105 = vector.load %arg21[%c256_54, %c0_55] : memref<400x256xf32, #tpu.memory_space<vmem>>, vector<16x256xf32>
    tpu.vector_store %arg21[%c256_54, %c0_55], %104 {strides = array<i32>} : memref<400x256xf32, #tpu.memory_space<vmem>>, vector<16x256xf32>,
    %c0_56 = arith.constant 0 : index
    %c272 = arith.constant 272 : index
    %106 = vector.load %arg20[%c0_56, %c272] : memref<16x768xf32, #tpu.memory_space<vmem>>, vector<16x256xf32>
    %107 = vector.extract_strided_slice %20 {offsets = [17, 0], sizes = [1, 256], strides = [1, 1]} : vector<75x256xf32> to vector<1x256xf32>
    %108 = vector.broadcast %107 : vector<1x256xf32> to vector<16x256xf32>
    %109 = arith.mulf %106, %108 : vector<16x256xf32>
    %c272_57 = arith.constant 272 : index
    %c0_58 = arith.constant 0 : index
    %110 = vector.load %arg21[%c272_57, %c0_58] : memref<400x256xf32, #tpu.memory_space<vmem>>, vector<16x256xf32>
    tpu.vector_store %arg21[%c272_57, %c0_58], %109 {strides = array<i32>} : memref<400x256xf32, #tpu.memory_space<vmem>>, vector<16x256xf32>,
    %c0_59 = arith.constant 0 : index
    %c273 = arith.constant 273 : index
    %111 = vector.load %arg20[%c0_59, %c273] : memref<16x768xf32, #tpu.memory_space<vmem>>, vector<16x256xf32>
    %112 = vector.extract_strided_slice %20 {offsets = [18, 0], sizes = [1, 256], strides = [1, 1]} : vector<75x256xf32> to vector<1x256xf32>
    %113 = vector.broadcast %112 : vector<1x256xf32> to vector<16x256xf32>
    %114 = arith.mulf %111, %113 : vector<16x256xf32>
    %c288 = arith.constant 288 : index
    %c0_60 = arith.constant 0 : index
    %115 = vector.load %arg21[%c288, %c0_60] : memref<400x256xf32, #tpu.memory_space<vmem>>, vector<16x256xf32>
    tpu.vector_store %arg21[%c288, %c0_60], %114 {strides = array<i32>} : memref<400x256xf32, #tpu.memory_space<vmem>>, vector<16x256xf32>,
    %c0_61 = arith.constant 0 : index
    %c274 = arith.constant 274 : index
    %116 = vector.load %arg20[%c0_61, %c274] : memref<16x768xf32, #tpu.memory_space<vmem>>, vector<16x256xf32>
    %117 = vector.extract_strided_slice %20 {offsets = [19, 0], sizes = [1, 256], strides = [1, 1]} : vector<75x256xf32> to vector<1x256xf32>
    %118 = vector.broadcast %117 : vector<1x256xf32> to vector<16x256xf32>
    %119 = arith.mulf %116, %118 : vector<16x256xf32>
    %c304 = arith.constant 304 : index
    %c0_62 = arith.constant 0 : index
    %120 = vector.load %arg21[%c304, %c0_62] : memref<400x256xf32, #tpu.memory_space<vmem>>, vector<16x256xf32>
    tpu.vector_store %arg21[%c304, %c0_62], %119 {strides = array<i32>} : memref<400x256xf32, #tpu.memory_space<vmem>>, vector<16x256xf32>,
    %c0_63 = arith.constant 0 : index
    %c286 = arith.constant 286 : index
    %121 = vector.load %arg20[%c0_63, %c286] : memref<16x768xf32, #tpu.memory_space<vmem>>, vector<16x256xf32>
    %122 = vector.extract_strided_slice %20 {offsets = [20, 0], sizes = [1, 256], strides = [1, 1]} : vector<75x256xf32> to vector<1x256xf32>
    %123 = vector.broadcast %122 : vector<1x256xf32> to vector<16x256xf32>
    %124 = arith.mulf %121, %123 : vector<16x256xf32>
    %c320 = arith.constant 320 : index
    %c0_64 = arith.constant 0 : index
    %125 = vector.load %arg21[%c320, %c0_64] : memref<400x256xf32, #tpu.memory_space<vmem>>, vector<16x256xf32>
    tpu.vector_store %arg21[%c320, %c0_64], %124 {strides = array<i32>} : memref<400x256xf32, #tpu.memory_space<vmem>>, vector<16x256xf32>,
    %c0_65 = arith.constant 0 : index
    %c287 = arith.constant 287 : index
    %126 = vector.load %arg20[%c0_65, %c287] : memref<16x768xf32, #tpu.memory_space<vmem>>, vector<16x256xf32>
    %127 = vector.extract_strided_slice %20 {offsets = [21, 0], sizes = [1, 256], strides = [1, 1]} : vector<75x256xf32> to vector<1x256xf32>
    %128 = vector.broadcast %127 : vector<1x256xf32> to vector<16x256xf32>
    %129 = arith.mulf %126, %128 : vector<16x256xf32>
    %c336 = arith.constant 336 : index
    %c0_66 = arith.constant 0 : index
    %130 = vector.load %arg21[%c336, %c0_66] : memref<400x256xf32, #tpu.memory_space<vmem>>, vector<16x256xf32>
    tpu.vector_store %arg21[%c336, %c0_66], %129 {strides = array<i32>} : memref<400x256xf32, #tpu.memory_space<vmem>>, vector<16x256xf32>,
    %c0_67 = arith.constant 0 : index
    %c288_68 = arith.constant 288 : index
    %131 = vector.load %arg20[%c0_67, %c288_68] : memref<16x768xf32, #tpu.memory_space<vmem>>, vector<16x256xf32>
    %132 = vector.extract_strided_slice %20 {offsets = [22, 0], sizes = [1, 256], strides = [1, 1]} : vector<75x256xf32> to vector<1x256xf32>
    %133 = vector.broadcast %132 : vector<1x256xf32> to vector<16x256xf32>
    %134 = arith.mulf %131, %133 : vector<16x256xf32>
    %c352 = arith.constant 352 : index
    %c0_69 = arith.constant 0 : index
    %135 = vector.load %arg21[%c352, %c0_69] : memref<400x256xf32, #tpu.memory_space<vmem>>, vector<16x256xf32>
    tpu.vector_store %arg21[%c352, %c0_69], %134 {strides = array<i32>} : memref<400x256xf32, #tpu.memory_space<vmem>>, vector<16x256xf32>,
    %c0_70 = arith.constant 0 : index
    %c289 = arith.constant 289 : index
    %136 = vector.load %arg20[%c0_70, %c289] : memref<16x768xf32, #tpu.memory_space<vmem>>, vector<16x256xf32>
    %137 = vector.extract_strided_slice %20 {offsets = [23, 0], sizes = [1, 256], strides = [1, 1]} : vector<75x256xf32> to vector<1x256xf32>
    %138 = vector.broadcast %137 : vector<1x256xf32> to vector<16x256xf32>
    %139 = arith.mulf %136, %138 : vector<16x256xf32>
    %c368 = arith.constant 368 : index
    %c0_71 = arith.constant 0 : index
    %140 = vector.load %arg21[%c368, %c0_71] : memref<400x256xf32, #tpu.memory_space<vmem>>, vector<16x256xf32>
    tpu.vector_store %arg21[%c368, %c0_71], %139 {strides = array<i32>} : memref<400x256xf32, #tpu.memory_space<vmem>>, vector<16x256xf32>,
    %c0_72 = arith.constant 0 : index
    %c290 = arith.constant 290 : index
    %141 = vector.load %arg20[%c0_72, %c290] : memref<16x768xf32, #tpu.memory_space<vmem>>, vector<16x256xf32>
    %142 = vector.extract_strided_slice %20 {offsets = [24, 0], sizes = [1, 256], strides = [1, 1]} : vector<75x256xf32> to vector<1x256xf32>
    %143 = vector.broadcast %142 : vector<1x256xf32> to vector<16x256xf32>
    %144 = arith.mulf %141, %143 : vector<16x256xf32>
    %c384 = arith.constant 384 : index
    %c0_73 = arith.constant 0 : index
    %145 = vector.load %arg21[%c384, %c0_73] : memref<400x256xf32, #tpu.memory_space<vmem>>, vector<16x256xf32>
    tpu.vector_store %arg21[%c384, %c0_73], %144 {strides = array<i32>} : memref<400x256xf32, #tpu.memory_space<vmem>>, vector<16x256xf32>,
    %c0_74 = arith.constant 0 : index
    %c0_75 = arith.constant 0 : index
    %c0_76 = arith.constant 0 : index
    %146 = vector.load %arg6[%c0_74, %c0_75, %c0_76] : memref<3x16x400xbf16, #tpu.memory_space<vmem>>, vector<1x16x400xbf16>
    %147 = vector.shape_cast %146 : vector<1x16x400xbf16> to vector<16x400xbf16>
    %c0_77 = arith.constant 0 : index
    %c0_78 = arith.constant 0 : index
    %148 = vector.load %arg21[%c0_77, %c0_78] : memref<400x256xf32, #tpu.memory_space<vmem>>, vector<400x256xf32>
    %149 = arith.truncf %148 : vector<400x256xf32> to vector<400x256xbf16>
    %cst_79 = arith.constant dense<0.000000e+00> : vector<16x256xf32>
    %150 = tpu.matmul %147, %149, %cst_79 {dimension_numbers = #tpu.dot_dimension_numbers<[1], [0], [0], [1], [0, 0, 1, 1], [], []>} : vector<16x400xbf16>, vector<400x256xbf16>, vector<16x256xf32> -> vector<16x256xf32>
    %c0_80 = arith.constant 0 : index
    %c0_81 = arith.constant 0 : index
    %c0_82 = arith.constant 0 : index
    %151 = vector.load %arg7[%c0_80, %c0_81, %c0_82] : memref<3x16x1xf32, #tpu.memory_space<vmem>>, vector<1x16x1xf32>
    %152 = vector.shape_cast %151 : vector<1x16x1xf32> to vector<16x1xf32>
    %153 = vector.broadcast %152 : vector<16x1xf32> to vector<16x256xf32>
    %154 = arith.mulf %150, %153 : vector<16x256xf32>
    %c0_83 = arith.constant 0 : index
    %c0_84 = arith.constant 0 : index
    %c0_85 = arith.constant 0 : index
    %155 = vector.load %arg8[%c0_83, %c0_84, %c0_85] : memref<3x16x1xf32, #tpu.memory_space<vmem>>, vector<1x16x1xf32>
    %156 = vector.shape_cast %155 : vector<1x16x1xf32> to vector<16x1xf32>
    %157 = vector.broadcast %156 : vector<16x1xf32> to vector<16x256xf32>
    %158 = arith.addf %154, %157 : vector<16x256xf32>
    %c0_86 = arith.constant 0 : index
    %c188 = arith.constant 188 : index
    %159 = vector.load %arg20[%c0_86, %c188] : memref<16x768xf32, #tpu.memory_space<vmem>>, vector<16x256xf32>
    %160 = vector.extract_strided_slice %20 {offsets = [25, 0], sizes = [1, 256], strides = [1, 1]} : vector<75x256xf32> to vector<1x256xf32>
    %161 = vector.broadcast %160 : vector<1x256xf32> to vector<16x256xf32>
    %162 = arith.mulf %159, %161 : vector<16x256xf32>
    %c0_87 = arith.constant 0 : index
    %c0_88 = arith.constant 0 : index
    %163 = vector.load %arg21[%c0_87, %c0_88] : memref<400x256xf32, #tpu.memory_space<vmem>>, vector<16x256xf32>
    tpu.vector_store %arg21[%c0_87, %c0_88], %162 {strides = array<i32>} : memref<400x256xf32, #tpu.memory_space<vmem>>, vector<16x256xf32>,
    %c0_89 = arith.constant 0 : index
    %c190 = arith.constant 190 : index
    %164 = vector.load %arg20[%c0_89, %c190] : memref<16x768xf32, #tpu.memory_space<vmem>>, vector<16x256xf32>
    %165 = vector.extract_strided_slice %20 {offsets = [26, 0], sizes = [1, 256], strides = [1, 1]} : vector<75x256xf32> to vector<1x256xf32>
    %166 = vector.broadcast %165 : vector<1x256xf32> to vector<16x256xf32>
    %167 = arith.mulf %164, %166 : vector<16x256xf32>
    %c16_90 = arith.constant 16 : index
    %c0_91 = arith.constant 0 : index
    %168 = vector.load %arg21[%c16_90, %c0_91] : memref<400x256xf32, #tpu.memory_space<vmem>>, vector<16x256xf32>
    tpu.vector_store %arg21[%c16_90, %c0_91], %167 {strides = array<i32>} : memref<400x256xf32, #tpu.memory_space<vmem>>, vector<16x256xf32>,
    %c0_92 = arith.constant 0 : index
    %c192_93 = arith.constant 192 : index
    %169 = vector.load %arg20[%c0_92, %c192_93] : memref<16x768xf32, #tpu.memory_space<vmem>>, vector<16x256xf32>
    %170 = vector.extract_strided_slice %20 {offsets = [27, 0], sizes = [1, 256], strides = [1, 1]} : vector<75x256xf32> to vector<1x256xf32>
    %171 = vector.broadcast %170 : vector<1x256xf32> to vector<16x256xf32>
    %172 = arith.mulf %169, %171 : vector<16x256xf32>
    %c32_94 = arith.constant 32 : index
    %c0_95 = arith.constant 0 : index
    %173 = vector.load %arg21[%c32_94, %c0_95] : memref<400x256xf32, #tpu.memory_space<vmem>>, vector<16x256xf32>
    tpu.vector_store %arg21[%c32_94, %c0_95], %172 {strides = array<i32>} : memref<400x256xf32, #tpu.memory_space<vmem>>, vector<16x256xf32>,
    %c0_96 = arith.constant 0 : index
    %c194 = arith.constant 194 : index
    %174 = vector.load %arg20[%c0_96, %c194] : memref<16x768xf32, #tpu.memory_space<vmem>>, vector<16x256xf32>
    %175 = vector.extract_strided_slice %20 {offsets = [28, 0], sizes = [1, 256], strides = [1, 1]} : vector<75x256xf32> to vector<1x256xf32>
    %176 = vector.broadcast %175 : vector<1x256xf32> to vector<16x256xf32>
    %177 = arith.mulf %174, %176 : vector<16x256xf32>
    %c48_97 = arith.constant 48 : index
    %c0_98 = arith.constant 0 : index
    %178 = vector.load %arg21[%c48_97, %c0_98] : memref<400x256xf32, #tpu.memory_space<vmem>>, vector<16x256xf32>
    tpu.vector_store %arg21[%c48_97, %c0_98], %177 {strides = array<i32>} : memref<400x256xf32, #tpu.memory_space<vmem>>, vector<16x256xf32>,
    %c0_99 = arith.constant 0 : index
    %c196 = arith.constant 196 : index
    %179 = vector.load %arg20[%c0_99, %c196] : memref<16x768xf32, #tpu.memory_space<vmem>>, vector<16x256xf32>
    %180 = vector.extract_strided_slice %20 {offsets = [29, 0], sizes = [1, 256], strides = [1, 1]} : vector<75x256xf32> to vector<1x256xf32>
    %181 = vector.broadcast %180 : vector<1x256xf32> to vector<16x256xf32>
    %182 = arith.mulf %179, %181 : vector<16x256xf32>
    %c64_100 = arith.constant 64 : index
    %c0_101 = arith.constant 0 : index
    %183 = vector.load %arg21[%c64_100, %c0_101] : memref<400x256xf32, #tpu.memory_space<vmem>>, vector<16x256xf32>
    tpu.vector_store %arg21[%c64_100, %c0_101], %182 {strides = array<i32>} : memref<400x256xf32, #tpu.memory_space<vmem>>, vector<16x256xf32>,
    %c0_102 = arith.constant 0 : index
    %c220 = arith.constant 220 : index
    %184 = vector.load %arg20[%c0_102, %c220] : memref<16x768xf32, #tpu.memory_space<vmem>>, vector<16x256xf32>
    %185 = vector.extract_strided_slice %20 {offsets = [30, 0], sizes = [1, 256], strides = [1, 1]} : vector<75x256xf32> to vector<1x256xf32>
    %186 = vector.broadcast %185 : vector<1x256xf32> to vector<16x256xf32>
    %187 = arith.mulf %184, %186 : vector<16x256xf32>
    %c80_103 = arith.constant 80 : index
    %c0_104 = arith.constant 0 : index
    %188 = vector.load %arg21[%c80_103, %c0_104] : memref<400x256xf32, #tpu.memory_space<vmem>>, vector<16x256xf32>
    tpu.vector_store %arg21[%c80_103, %c0_104], %187 {strides = array<i32>} : memref<400x256xf32, #tpu.memory_space<vmem>>, vector<16x256xf32>,
    %c0_105 = arith.constant 0 : index
    %c222_106 = arith.constant 222 : index
    %189 = vector.load %arg20[%c0_105, %c222_106] : memref<16x768xf32, #tpu.memory_space<vmem>>, vector<16x256xf32>
    %190 = vector.extract_strided_slice %20 {offsets = [31, 0], sizes = [1, 256], strides = [1, 1]} : vector<75x256xf32> to vector<1x256xf32>
    %191 = vector.broadcast %190 : vector<1x256xf32> to vector<16x256xf32>
    %192 = arith.mulf %189, %191 : vector<16x256xf32>
    %c96_107 = arith.constant 96 : index
    %c0_108 = arith.constant 0 : index
    %193 = vector.load %arg21[%c96_107, %c0_108] : memref<400x256xf32, #tpu.memory_space<vmem>>, vector<16x256xf32>
    tpu.vector_store %arg21[%c96_107, %c0_108], %192 {strides = array<i32>} : memref<400x256xf32, #tpu.memory_space<vmem>>, vector<16x256xf32>,
    %c0_109 = arith.constant 0 : index
    %c224_110 = arith.constant 224 : index
    %194 = vector.load %arg20[%c0_109, %c224_110] : memref<16x768xf32, #tpu.memory_space<vmem>>, vector<16x256xf32>
    %195 = vector.extract_strided_slice %20 {offsets = [32, 0], sizes = [1, 256], strides = [1, 1]} : vector<75x256xf32> to vector<1x256xf32>
    %196 = vector.broadcast %195 : vector<1x256xf32> to vector<16x256xf32>
    %197 = arith.mulf %194, %196 : vector<16x256xf32>
    %c112_111 = arith.constant 112 : index
    %c0_112 = arith.constant 0 : index
    %198 = vector.load %arg21[%c112_111, %c0_112] : memref<400x256xf32, #tpu.memory_space<vmem>>, vector<16x256xf32>
    tpu.vector_store %arg21[%c112_111, %c0_112], %197 {strides = array<i32>} : memref<400x256xf32, #tpu.memory_space<vmem>>, vector<16x256xf32>,
    %c0_113 = arith.constant 0 : index
    %c226_114 = arith.constant 226 : index
    %199 = vector.load %arg20[%c0_113, %c226_114] : memref<16x768xf32, #tpu.memory_space<vmem>>, vector<16x256xf32>
    %200 = vector.extract_strided_slice %20 {offsets = [33, 0], sizes = [1, 256], strides = [1, 1]} : vector<75x256xf32> to vector<1x256xf32>
    %201 = vector.broadcast %200 : vector<1x256xf32> to vector<16x256xf32>
    %202 = arith.mulf %199, %201 : vector<16x256xf32>
    %c128_115 = arith.constant 128 : index
    %c0_116 = arith.constant 0 : index
    %203 = vector.load %arg21[%c128_115, %c0_116] : memref<400x256xf32, #tpu.memory_space<vmem>>, vector<16x256xf32>
    tpu.vector_store %arg21[%c128_115, %c0_116], %202 {strides = array<i32>} : memref<400x256xf32, #tpu.memory_space<vmem>>, vector<16x256xf32>,
    %c0_117 = arith.constant 0 : index
    %c228 = arith.constant 228 : index
    %204 = vector.load %arg20[%c0_117, %c228] : memref<16x768xf32, #tpu.memory_space<vmem>>, vector<16x256xf32>
    %205 = vector.extract_strided_slice %20 {offsets = [34, 0], sizes = [1, 256], strides = [1, 1]} : vector<75x256xf32> to vector<1x256xf32>
    %206 = vector.broadcast %205 : vector<1x256xf32> to vector<16x256xf32>
    %207 = arith.mulf %204, %206 : vector<16x256xf32>
    %c144_118 = arith.constant 144 : index
    %c0_119 = arith.constant 0 : index
    %208 = vector.load %arg21[%c144_118, %c0_119] : memref<400x256xf32, #tpu.memory_space<vmem>>, vector<16x256xf32>
    tpu.vector_store %arg21[%c144_118, %c0_119], %207 {strides = array<i32>} : memref<400x256xf32, #tpu.memory_space<vmem>>, vector<16x256xf32>,
    %c0_120 = arith.constant 0 : index
    %c252 = arith.constant 252 : index
    %209 = vector.load %arg20[%c0_120, %c252] : memref<16x768xf32, #tpu.memory_space<vmem>>, vector<16x256xf32>
    %210 = vector.extract_strided_slice %20 {offsets = [35, 0], sizes = [1, 256], strides = [1, 1]} : vector<75x256xf32> to vector<1x256xf32>
    %211 = vector.broadcast %210 : vector<1x256xf32> to vector<16x256xf32>
    %212 = arith.mulf %209, %211 : vector<16x256xf32>
    %c160_121 = arith.constant 160 : index
    %c0_122 = arith.constant 0 : index
    %213 = vector.load %arg21[%c160_121, %c0_122] : memref<400x256xf32, #tpu.memory_space<vmem>>, vector<16x256xf32>
    tpu.vector_store %arg21[%c160_121, %c0_122], %212 {strides = array<i32>} : memref<400x256xf32, #tpu.memory_space<vmem>>, vector<16x256xf32>,
    %c0_123 = arith.constant 0 : index
    %c254_124 = arith.constant 254 : index
    %214 = vector.load %arg20[%c0_123, %c254_124] : memref<16x768xf32, #tpu.memory_space<vmem>>, vector<16x256xf32>
    %215 = vector.extract_strided_slice %20 {offsets = [36, 0], sizes = [1, 256], strides = [1, 1]} : vector<75x256xf32> to vector<1x256xf32>
    %216 = vector.broadcast %215 : vector<1x256xf32> to vector<16x256xf32>
    %217 = arith.mulf %214, %216 : vector<16x256xf32>
    %c176_125 = arith.constant 176 : index
    %c0_126 = arith.constant 0 : index
    %218 = vector.load %arg21[%c176_125, %c0_126] : memref<400x256xf32, #tpu.memory_space<vmem>>, vector<16x256xf32>
    tpu.vector_store %arg21[%c176_125, %c0_126], %217 {strides = array<i32>} : memref<400x256xf32, #tpu.memory_space<vmem>>, vector<16x256xf32>,
    %c0_127 = arith.constant 0 : index
    %c256_128 = arith.constant 256 : index
    %219 = vector.load %arg20[%c0_127, %c256_128] : memref<16x768xf32, #tpu.memory_space<vmem>>, vector<16x256xf32>
    %220 = vector.extract_strided_slice %20 {offsets = [37, 0], sizes = [1, 256], strides = [1, 1]} : vector<75x256xf32> to vector<1x256xf32>
    %221 = vector.broadcast %220 : vector<1x256xf32> to vector<16x256xf32>
    %222 = arith.mulf %219, %221 : vector<16x256xf32>
    %c192_129 = arith.constant 192 : index
    %c0_130 = arith.constant 0 : index
    %223 = vector.load %arg21[%c192_129, %c0_130] : memref<400x256xf32, #tpu.memory_space<vmem>>, vector<16x256xf32>
    tpu.vector_store %arg21[%c192_129, %c0_130], %222 {strides = array<i32>} : memref<400x256xf32, #tpu.memory_space<vmem>>, vector<16x256xf32>,
    %c0_131 = arith.constant 0 : index
    %c258_132 = arith.constant 258 : index
    %224 = vector.load %arg20[%c0_131, %c258_132] : memref<16x768xf32, #tpu.memory_space<vmem>>, vector<16x256xf32>
    %225 = vector.extract_strided_slice %20 {offsets = [38, 0], sizes = [1, 256], strides = [1, 1]} : vector<75x256xf32> to vector<1x256xf32>
    %226 = vector.broadcast %225 : vector<1x256xf32> to vector<16x256xf32>
    %227 = arith.mulf %224, %226 : vector<16x256xf32>
    %c208_133 = arith.constant 208 : index
    %c0_134 = arith.constant 0 : index
    %228 = vector.load %arg21[%c208_133, %c0_134] : memref<400x256xf32, #tpu.memory_space<vmem>>, vector<16x256xf32>
    tpu.vector_store %arg21[%c208_133, %c0_134], %227 {strides = array<i32>} : memref<400x256xf32, #tpu.memory_space<vmem>>, vector<16x256xf32>,
    %c0_135 = arith.constant 0 : index
    %c260 = arith.constant 260 : index
    %229 = vector.load %arg20[%c0_135, %c260] : memref<16x768xf32, #tpu.memory_space<vmem>>, vector<16x256xf32>
    %230 = vector.extract_strided_slice %20 {offsets = [39, 0], sizes = [1, 256], strides = [1, 1]} : vector<75x256xf32> to vector<1x256xf32>
    %231 = vector.broadcast %230 : vector<1x256xf32> to vector<16x256xf32>
    %232 = arith.mulf %229, %231 : vector<16x256xf32>
    %c224_136 = arith.constant 224 : index
    %c0_137 = arith.constant 0 : index
    %233 = vector.load %arg21[%c224_136, %c0_137] : memref<400x256xf32, #tpu.memory_space<vmem>>, vector<16x256xf32>
    tpu.vector_store %arg21[%c224_136, %c0_137], %232 {strides = array<i32>} : memref<400x256xf32, #tpu.memory_space<vmem>>, vector<16x256xf32>,
    %c0_138 = arith.constant 0 : index
    %c284 = arith.constant 284 : index
    %234 = vector.load %arg20[%c0_138, %c284] : memref<16x768xf32, #tpu.memory_space<vmem>>, vector<16x256xf32>
    %235 = vector.extract_strided_slice %20 {offsets = [40, 0], sizes = [1, 256], strides = [1, 1]} : vector<75x256xf32> to vector<1x256xf32>
    %236 = vector.broadcast %235 : vector<1x256xf32> to vector<16x256xf32>
    %237 = arith.mulf %234, %236 : vector<16x256xf32>
    %c240_139 = arith.constant 240 : index
    %c0_140 = arith.constant 0 : index
    %238 = vector.load %arg21[%c240_139, %c0_140] : memref<400x256xf32, #tpu.memory_space<vmem>>, vector<16x256xf32>
    tpu.vector_store %arg21[%c240_139, %c0_140], %237 {strides = array<i32>} : memref<400x256xf32, #tpu.memory_space<vmem>>, vector<16x256xf32>,
    %c0_141 = arith.constant 0 : index
    %c286_142 = arith.constant 286 : index
    %239 = vector.load %arg20[%c0_141, %c286_142] : memref<16x768xf32, #tpu.memory_space<vmem>>, vector<16x256xf32>
    %240 = vector.extract_strided_slice %20 {offsets = [41, 0], sizes = [1, 256], strides = [1, 1]} : vector<75x256xf32> to vector<1x256xf32>
    %241 = vector.broadcast %240 : vector<1x256xf32> to vector<16x256xf32>
    %242 = arith.mulf %239, %241 : vector<16x256xf32>
    %c256_143 = arith.constant 256 : index
    %c0_144 = arith.constant 0 : index
    %243 = vector.load %arg21[%c256_143, %c0_144] : memref<400x256xf32, #tpu.memory_space<vmem>>, vector<16x256xf32>
    tpu.vector_store %arg21[%c256_143, %c0_144], %242 {strides = array<i32>} : memref<400x256xf32, #tpu.memory_space<vmem>>, vector<16x256xf32>,
    %c0_145 = arith.constant 0 : index
    %c288_146 = arith.constant 288 : index
    %244 = vector.load %arg20[%c0_145, %c288_146] : memref<16x768xf32, #tpu.memory_space<vmem>>, vector<16x256xf32>
    %245 = vector.extract_strided_slice %20 {offsets = [42, 0], sizes = [1, 256], strides = [1, 1]} : vector<75x256xf32> to vector<1x256xf32>
    %246 = vector.broadcast %245 : vector<1x256xf32> to vector<16x256xf32>
    %247 = arith.mulf %244, %246 : vector<16x256xf32>
    %c272_147 = arith.constant 272 : index
    %c0_148 = arith.constant 0 : index
    %248 = vector.load %arg21[%c272_147, %c0_148] : memref<400x256xf32, #tpu.memory_space<vmem>>, vector<16x256xf32>
    tpu.vector_store %arg21[%c272_147, %c0_148], %247 {strides = array<i32>} : memref<400x256xf32, #tpu.memory_space<vmem>>, vector<16x256xf32>,
    %c0_149 = arith.constant 0 : index
    %c290_150 = arith.constant 290 : index
    %249 = vector.load %arg20[%c0_149, %c290_150] : memref<16x768xf32, #tpu.memory_space<vmem>>, vector<16x256xf32>
    %250 = vector.extract_strided_slice %20 {offsets = [43, 0], sizes = [1, 256], strides = [1, 1]} : vector<75x256xf32> to vector<1x256xf32>
    %251 = vector.broadcast %250 : vector<1x256xf32> to vector<16x256xf32>
    %252 = arith.mulf %249, %251 : vector<16x256xf32>
    %c288_151 = arith.constant 288 : index
    %c0_152 = arith.constant 0 : index
    %253 = vector.load %arg21[%c288_151, %c0_152] : memref<400x256xf32, #tpu.memory_space<vmem>>, vector<16x256xf32>
    tpu.vector_store %arg21[%c288_151, %c0_152], %252 {strides = array<i32>} : memref<400x256xf32, #tpu.memory_space<vmem>>, vector<16x256xf32>,
    %c0_153 = arith.constant 0 : index
    %c292 = arith.constant 292 : index
    %254 = vector.load %arg20[%c0_153, %c292] : memref<16x768xf32, #tpu.memory_space<vmem>>, vector<16x256xf32>
    %255 = vector.extract_strided_slice %20 {offsets = [44, 0], sizes = [1, 256], strides = [1, 1]} : vector<75x256xf32> to vector<1x256xf32>
    %256 = vector.broadcast %255 : vector<1x256xf32> to vector<16x256xf32>
    %257 = arith.mulf %254, %256 : vector<16x256xf32>
    %c304_154 = arith.constant 304 : index
    %c0_155 = arith.constant 0 : index
    %258 = vector.load %arg21[%c304_154, %c0_155] : memref<400x256xf32, #tpu.memory_space<vmem>>, vector<16x256xf32>
    tpu.vector_store %arg21[%c304_154, %c0_155], %257 {strides = array<i32>} : memref<400x256xf32, #tpu.memory_space<vmem>>, vector<16x256xf32>,
    %c0_156 = arith.constant 0 : index
    %c316 = arith.constant 316 : index
    %259 = vector.load %arg20[%c0_156, %c316] : memref<16x768xf32, #tpu.memory_space<vmem>>, vector<16x256xf32>
    %260 = vector.extract_strided_slice %20 {offsets = [45, 0], sizes = [1, 256], strides = [1, 1]} : vector<75x256xf32> to vector<1x256xf32>
    %261 = vector.broadcast %260 : vector<1x256xf32> to vector<16x256xf32>
    %262 = arith.mulf %259, %261 : vector<16x256xf32>
    %c320_157 = arith.constant 320 : index
    %c0_158 = arith.constant 0 : index
    %263 = vector.load %arg21[%c320_157, %c0_158] : memref<400x256xf32, #tpu.memory_space<vmem>>, vector<16x256xf32>
    tpu.vector_store %arg21[%c320_157, %c0_158], %262 {strides = array<i32>} : memref<400x256xf32, #tpu.memory_space<vmem>>, vector<16x256xf32>,
    %c0_159 = arith.constant 0 : index
    %c318 = arith.constant 318 : index
    %264 = vector.load %arg20[%c0_159, %c318] : memref<16x768xf32, #tpu.memory_space<vmem>>, vector<16x256xf32>
    %265 = vector.extract_strided_slice %20 {offsets = [46, 0], sizes = [1, 256], strides = [1, 1]} : vector<75x256xf32> to vector<1x256xf32>
    %266 = vector.broadcast %265 : vector<1x256xf32> to vector<16x256xf32>
    %267 = arith.mulf %264, %266 : vector<16x256xf32>
    %c336_160 = arith.constant 336 : index
    %c0_161 = arith.constant 0 : index
    %268 = vector.load %arg21[%c336_160, %c0_161] : memref<400x256xf32, #tpu.memory_space<vmem>>, vector<16x256xf32>
    tpu.vector_store %arg21[%c336_160, %c0_161], %267 {strides = array<i32>} : memref<400x256xf32, #tpu.memory_space<vmem>>, vector<16x256xf32>,
    %c0_162 = arith.constant 0 : index
    %c320_163 = arith.constant 320 : index
    %269 = vector.load %arg20[%c0_162, %c320_163] : memref<16x768xf32, #tpu.memory_space<vmem>>, vector<16x256xf32>
    %270 = vector.extract_strided_slice %20 {offsets = [47, 0], sizes = [1, 256], strides = [1, 1]} : vector<75x256xf32> to vector<1x256xf32>
    %271 = vector.broadcast %270 : vector<1x256xf32> to vector<16x256xf32>
    %272 = arith.mulf %269, %271 : vector<16x256xf32>
    %c352_164 = arith.constant 352 : index
    %c0_165 = arith.constant 0 : index
    %273 = vector.load %arg21[%c352_164, %c0_165] : memref<400x256xf32, #tpu.memory_space<vmem>>, vector<16x256xf32>
    tpu.vector_store %arg21[%c352_164, %c0_165], %272 {strides = array<i32>} : memref<400x256xf32, #tpu.memory_space<vmem>>, vector<16x256xf32>,
    %c0_166 = arith.constant 0 : index
    %c322 = arith.constant 322 : index
    %274 = vector.load %arg20[%c0_166, %c322] : memref<16x768xf32, #tpu.memory_space<vmem>>, vector<16x256xf32>
    %275 = vector.extract_strided_slice %20 {offsets = [48, 0], sizes = [1, 256], strides = [1, 1]} : vector<75x256xf32> to vector<1x256xf32>
    %276 = vector.broadcast %275 : vector<1x256xf32> to vector<16x256xf32>
    %277 = arith.mulf %274, %276 : vector<16x256xf32>
    %c368_167 = arith.constant 368 : index
    %c0_168 = arith.constant 0 : index
    %278 = vector.load %arg21[%c368_167, %c0_168] : memref<400x256xf32, #tpu.memory_space<vmem>>, vector<16x256xf32>
    tpu.vector_store %arg21[%c368_167, %c0_168], %277 {strides = array<i32>} : memref<400x256xf32, #tpu.memory_space<vmem>>, vector<16x256xf32>,
    %c0_169 = arith.constant 0 : index
    %c324 = arith.constant 324 : index
    %279 = vector.load %arg20[%c0_169, %c324] : memref<16x768xf32, #tpu.memory_space<vmem>>, vector<16x256xf32>
    %280 = vector.extract_strided_slice %20 {offsets = [49, 0], sizes = [1, 256], strides = [1, 1]} : vector<75x256xf32> to vector<1x256xf32>
    %281 = vector.broadcast %280 : vector<1x256xf32> to vector<16x256xf32>
    %282 = arith.mulf %279, %281 : vector<16x256xf32>
    %c384_170 = arith.constant 384 : index
    %c0_171 = arith.constant 0 : index
    %283 = vector.load %arg21[%c384_170, %c0_171] : memref<400x256xf32, #tpu.memory_space<vmem>>, vector<16x256xf32>
    tpu.vector_store %arg21[%c384_170, %c0_171], %282 {strides = array<i32>} : memref<400x256xf32, #tpu.memory_space<vmem>>, vector<16x256xf32>,
    %c1 = arith.constant 1 : index
    %c0_172 = arith.constant 0 : index
    %c0_173 = arith.constant 0 : index
    %284 = vector.load %arg6[%c1, %c0_172, %c0_173] : memref<3x16x400xbf16, #tpu.memory_space<vmem>>, vector<1x16x400xbf16>
    %285 = vector.shape_cast %284 : vector<1x16x400xbf16> to vector<16x400xbf16>
    %c0_174 = arith.constant 0 : index
    %c0_175 = arith.constant 0 : index
    %286 = vector.load %arg21[%c0_174, %c0_175] : memref<400x256xf32, #tpu.memory_space<vmem>>, vector<400x256xf32>
    %287 = arith.truncf %286 : vector<400x256xf32> to vector<400x256xbf16>
    %cst_176 = arith.constant dense<0.000000e+00> : vector<16x256xf32>
    %288 = tpu.matmul %285, %287, %cst_176 {dimension_numbers = #tpu.dot_dimension_numbers<[1], [0], [0], [1], [0, 0, 1, 1], [], []>} : vector<16x400xbf16>, vector<400x256xbf16>, vector<16x256xf32> -> vector<16x256xf32>
    %c1_177 = arith.constant 1 : index
    %c0_178 = arith.constant 0 : index
    %c0_179 = arith.constant 0 : index
    %289 = vector.load %arg7[%c1_177, %c0_178, %c0_179] : memref<3x16x1xf32, #tpu.memory_space<vmem>>, vector<1x16x1xf32>
    %290 = vector.shape_cast %289 : vector<1x16x1xf32> to vector<16x1xf32>
    %291 = vector.broadcast %290 : vector<16x1xf32> to vector<16x256xf32>
    %292 = arith.mulf %288, %291 : vector<16x256xf32>
    %c1_180 = arith.constant 1 : index
    %c0_181 = arith.constant 0 : index
    %c0_182 = arith.constant 0 : index
    %293 = vector.load %arg8[%c1_180, %c0_181, %c0_182] : memref<3x16x1xf32, #tpu.memory_space<vmem>>, vector<1x16x1xf32>
    %294 = vector.shape_cast %293 : vector<1x16x1xf32> to vector<16x1xf32>
    %295 = vector.broadcast %294 : vector<16x1xf32> to vector<16x256xf32>
    %296 = arith.addf %292, %295 : vector<16x256xf32>
    %c0_183 = arith.constant 0 : index
    %c120 = arith.constant 120 : index
    %297 = vector.load %arg20[%c0_183, %c120] : memref<16x768xf32, #tpu.memory_space<vmem>>, vector<16x256xf32>
    %298 = vector.extract_strided_slice %20 {offsets = [50, 0], sizes = [1, 256], strides = [1, 1]} : vector<75x256xf32> to vector<1x256xf32>
    %299 = vector.broadcast %298 : vector<1x256xf32> to vector<16x256xf32>
    %300 = arith.mulf %297, %299 : vector<16x256xf32>
    %c0_184 = arith.constant 0 : index
    %c0_185 = arith.constant 0 : index
    %301 = vector.load %arg21[%c0_184, %c0_185] : memref<400x256xf32, #tpu.memory_space<vmem>>, vector<16x256xf32>
    tpu.vector_store %arg21[%c0_184, %c0_185], %300 {strides = array<i32>} : memref<400x256xf32, #tpu.memory_space<vmem>>, vector<16x256xf32>,
    %c0_186 = arith.constant 0 : index
    %c124 = arith.constant 124 : index
    %302 = vector.load %arg20[%c0_186, %c124] : memref<16x768xf32, #tpu.memory_space<vmem>>, vector<16x256xf32>
    %303 = vector.extract_strided_slice %20 {offsets = [51, 0], sizes = [1, 256], strides = [1, 1]} : vector<75x256xf32> to vector<1x256xf32>
    %304 = vector.broadcast %303 : vector<1x256xf32> to vector<16x256xf32>
    %305 = arith.mulf %302, %304 : vector<16x256xf32>
    %c16_187 = arith.constant 16 : index
    %c0_188 = arith.constant 0 : index
    %306 = vector.load %arg21[%c16_187, %c0_188] : memref<400x256xf32, #tpu.memory_space<vmem>>, vector<16x256xf32>
    tpu.vector_store %arg21[%c16_187, %c0_188], %305 {strides = array<i32>} : memref<400x256xf32, #tpu.memory_space<vmem>>, vector<16x256xf32>,
    %c0_189 = arith.constant 0 : index
    %c128_190 = arith.constant 128 : index
    %307 = vector.load %arg20[%c0_189, %c128_190] : memref<16x768xf32, #tpu.memory_space<vmem>>, vector<16x256xf32>
    %308 = vector.extract_strided_slice %20 {offsets = [52, 0], sizes = [1, 256], strides = [1, 1]} : vector<75x256xf32> to vector<1x256xf32>
    %309 = vector.broadcast %308 : vector<1x256xf32> to vector<16x256xf32>
    %310 = arith.mulf %307, %309 : vector<16x256xf32>
    %c32_191 = arith.constant 32 : index
    %c0_192 = arith.constant 0 : index
    %311 = vector.load %arg21[%c32_191, %c0_192] : memref<400x256xf32, #tpu.memory_space<vmem>>, vector<16x256xf32>
    tpu.vector_store %arg21[%c32_191, %c0_192], %310 {strides = array<i32>} : memref<400x256xf32, #tpu.memory_space<vmem>>, vector<16x256xf32>,
    %c0_193 = arith.constant 0 : index
    %c132 = arith.constant 132 : index
    %312 = vector.load %arg20[%c0_193, %c132] : memref<16x768xf32, #tpu.memory_space<vmem>>, vector<16x256xf32>
    %313 = vector.extract_strided_slice %20 {offsets = [53, 0], sizes = [1, 256], strides = [1, 1]} : vector<75x256xf32> to vector<1x256xf32>
    %314 = vector.broadcast %313 : vector<1x256xf32> to vector<16x256xf32>
    %315 = arith.mulf %312, %314 : vector<16x256xf32>
    %c48_194 = arith.constant 48 : index
    %c0_195 = arith.constant 0 : index
    %316 = vector.load %arg21[%c48_194, %c0_195] : memref<400x256xf32, #tpu.memory_space<vmem>>, vector<16x256xf32>
    tpu.vector_store %arg21[%c48_194, %c0_195], %315 {strides = array<i32>} : memref<400x256xf32, #tpu.memory_space<vmem>>, vector<16x256xf32>,
    %c0_196 = arith.constant 0 : index
    %c136 = arith.constant 136 : index
    %317 = vector.load %arg20[%c0_196, %c136] : memref<16x768xf32, #tpu.memory_space<vmem>>, vector<16x256xf32>
    %318 = vector.extract_strided_slice %20 {offsets = [54, 0], sizes = [1, 256], strides = [1, 1]} : vector<75x256xf32> to vector<1x256xf32>
    %319 = vector.broadcast %318 : vector<1x256xf32> to vector<16x256xf32>
    %320 = arith.mulf %317, %319 : vector<16x256xf32>
    %c64_197 = arith.constant 64 : index
    %c0_198 = arith.constant 0 : index
    %321 = vector.load %arg21[%c64_197, %c0_198] : memref<400x256xf32, #tpu.memory_space<vmem>>, vector<16x256xf32>
    tpu.vector_store %arg21[%c64_197, %c0_198], %320 {strides = array<i32>} : memref<400x256xf32, #tpu.memory_space<vmem>>, vector<16x256xf32>,
    %c0_199 = arith.constant 0 : index
    %c184 = arith.constant 184 : index
    %322 = vector.load %arg20[%c0_199, %c184] : memref<16x768xf32, #tpu.memory_space<vmem>>, vector<16x256xf32>
    %323 = vector.extract_strided_slice %20 {offsets = [55, 0], sizes = [1, 256], strides = [1, 1]} : vector<75x256xf32> to vector<1x256xf32>
    %324 = vector.broadcast %323 : vector<1x256xf32> to vector<16x256xf32>
    %325 = arith.mulf %322, %324 : vector<16x256xf32>
    %c80_200 = arith.constant 80 : index
    %c0_201 = arith.constant 0 : index
    %326 = vector.load %arg21[%c80_200, %c0_201] : memref<400x256xf32, #tpu.memory_space<vmem>>, vector<16x256xf32>
    tpu.vector_store %arg21[%c80_200, %c0_201], %325 {strides = array<i32>} : memref<400x256xf32, #tpu.memory_space<vmem>>, vector<16x256xf32>,
    %c0_202 = arith.constant 0 : index
    %c188_203 = arith.constant 188 : index
    %327 = vector.load %arg20[%c0_202, %c188_203] : memref<16x768xf32, #tpu.memory_space<vmem>>, vector<16x256xf32>
    %328 = vector.extract_strided_slice %20 {offsets = [56, 0], sizes = [1, 256], strides = [1, 1]} : vector<75x256xf32> to vector<1x256xf32>
    %329 = vector.broadcast %328 : vector<1x256xf32> to vector<16x256xf32>
    %330 = arith.mulf %327, %329 : vector<16x256xf32>
    %c96_204 = arith.constant 96 : index
    %c0_205 = arith.constant 0 : index
    %331 = vector.load %arg21[%c96_204, %c0_205] : memref<400x256xf32, #tpu.memory_space<vmem>>, vector<16x256xf32>
    tpu.vector_store %arg21[%c96_204, %c0_205], %330 {strides = array<i32>} : memref<400x256xf32, #tpu.memory_space<vmem>>, vector<16x256xf32>,
    %c0_206 = arith.constant 0 : index
    %c192_207 = arith.constant 192 : index
    %332 = vector.load %arg20[%c0_206, %c192_207] : memref<16x768xf32, #tpu.memory_space<vmem>>, vector<16x256xf32>
    %333 = vector.extract_strided_slice %20 {offsets = [57, 0], sizes = [1, 256], strides = [1, 1]} : vector<75x256xf32> to vector<1x256xf32>
    %334 = vector.broadcast %333 : vector<1x256xf32> to vector<16x256xf32>
    %335 = arith.mulf %332, %334 : vector<16x256xf32>
    %c112_208 = arith.constant 112 : index
    %c0_209 = arith.constant 0 : index
    %336 = vector.load %arg21[%c112_208, %c0_209] : memref<400x256xf32, #tpu.memory_space<vmem>>, vector<16x256xf32>
    tpu.vector_store %arg21[%c112_208, %c0_209], %335 {strides = array<i32>} : memref<400x256xf32, #tpu.memory_space<vmem>>, vector<16x256xf32>,
    %c0_210 = arith.constant 0 : index
    %c196_211 = arith.constant 196 : index
    %337 = vector.load %arg20[%c0_210, %c196_211] : memref<16x768xf32, #tpu.memory_space<vmem>>, vector<16x256xf32>
    %338 = vector.extract_strided_slice %20 {offsets = [58, 0], sizes = [1, 256], strides = [1, 1]} : vector<75x256xf32> to vector<1x256xf32>
    %339 = vector.broadcast %338 : vector<1x256xf32> to vector<16x256xf32>
    %340 = arith.mulf %337, %339 : vector<16x256xf32>
    %c128_212 = arith.constant 128 : index
    %c0_213 = arith.constant 0 : index
    %341 = vector.load %arg21[%c128_212, %c0_213] : memref<400x256xf32, #tpu.memory_space<vmem>>, vector<16x256xf32>
    tpu.vector_store %arg21[%c128_212, %c0_213], %340 {strides = array<i32>} : memref<400x256xf32, #tpu.memory_space<vmem>>, vector<16x256xf32>,
    %c0_214 = arith.constant 0 : index
    %c200 = arith.constant 200 : index
    %342 = vector.load %arg20[%c0_214, %c200] : memref<16x768xf32, #tpu.memory_space<vmem>>, vector<16x256xf32>
    %343 = vector.extract_strided_slice %20 {offsets = [59, 0], sizes = [1, 256], strides = [1, 1]} : vector<75x256xf32> to vector<1x256xf32>
    %344 = vector.broadcast %343 : vector<1x256xf32> to vector<16x256xf32>
    %345 = arith.mulf %342, %344 : vector<16x256xf32>
    %c144_215 = arith.constant 144 : index
    %c0_216 = arith.constant 0 : index
    %346 = vector.load %arg21[%c144_215, %c0_216] : memref<400x256xf32, #tpu.memory_space<vmem>>, vector<16x256xf32>
    tpu.vector_store %arg21[%c144_215, %c0_216], %345 {strides = array<i32>} : memref<400x256xf32, #tpu.memory_space<vmem>>, vector<16x256xf32>,
    %c0_217 = arith.constant 0 : index
    %c248 = arith.constant 248 : index
    %347 = vector.load %arg20[%c0_217, %c248] : memref<16x768xf32, #tpu.memory_space<vmem>>, vector<16x256xf32>
    %348 = vector.extract_strided_slice %20 {offsets = [60, 0], sizes = [1, 256], strides = [1, 1]} : vector<75x256xf32> to vector<1x256xf32>
    %349 = vector.broadcast %348 : vector<1x256xf32> to vector<16x256xf32>
    %350 = arith.mulf %347, %349 : vector<16x256xf32>
    %c160_218 = arith.constant 160 : index
    %c0_219 = arith.constant 0 : index
    %351 = vector.load %arg21[%c160_218, %c0_219] : memref<400x256xf32, #tpu.memory_space<vmem>>, vector<16x256xf32>
    tpu.vector_store %arg21[%c160_218, %c0_219], %350 {strides = array<i32>} : memref<400x256xf32, #tpu.memory_space<vmem>>, vector<16x256xf32>,
    %c0_220 = arith.constant 0 : index
    %c252_221 = arith.constant 252 : index
    %352 = vector.load %arg20[%c0_220, %c252_221] : memref<16x768xf32, #tpu.memory_space<vmem>>, vector<16x256xf32>
    %353 = vector.extract_strided_slice %20 {offsets = [61, 0], sizes = [1, 256], strides = [1, 1]} : vector<75x256xf32> to vector<1x256xf32>
    %354 = vector.broadcast %353 : vector<1x256xf32> to vector<16x256xf32>
    %355 = arith.mulf %352, %354 : vector<16x256xf32>
    %c176_222 = arith.constant 176 : index
    %c0_223 = arith.constant 0 : index
    %356 = vector.load %arg21[%c176_222, %c0_223] : memref<400x256xf32, #tpu.memory_space<vmem>>, vector<16x256xf32>
    tpu.vector_store %arg21[%c176_222, %c0_223], %355 {strides = array<i32>} : memref<400x256xf32, #tpu.memory_space<vmem>>, vector<16x256xf32>,
    %c0_224 = arith.constant 0 : index
    %c256_225 = arith.constant 256 : index
    %357 = vector.load %arg20[%c0_224, %c256_225] : memref<16x768xf32, #tpu.memory_space<vmem>>, vector<16x256xf32>
    %358 = vector.extract_strided_slice %20 {offsets = [62, 0], sizes = [1, 256], strides = [1, 1]} : vector<75x256xf32> to vector<1x256xf32>
    %359 = vector.broadcast %358 : vector<1x256xf32> to vector<16x256xf32>
    %360 = arith.mulf %357, %359 : vector<16x256xf32>
    %c192_226 = arith.constant 192 : index
    %c0_227 = arith.constant 0 : index
    %361 = vector.load %arg21[%c192_226, %c0_227] : memref<400x256xf32, #tpu.memory_space<vmem>>, vector<16x256xf32>
    tpu.vector_store %arg21[%c192_226, %c0_227], %360 {strides = array<i32>} : memref<400x256xf32, #tpu.memory_space<vmem>>, vector<16x256xf32>,
    %c0_228 = arith.constant 0 : index
    %c260_229 = arith.constant 260 : index
    %362 = vector.load %arg20[%c0_228, %c260_229] : memref<16x768xf32, #tpu.memory_space<vmem>>, vector<16x256xf32>
    %363 = vector.extract_strided_slice %20 {offsets = [63, 0], sizes = [1, 256], strides = [1, 1]} : vector<75x256xf32> to vector<1x256xf32>
    %364 = vector.broadcast %363 : vector<1x256xf32> to vector<16x256xf32>
    %365 = arith.mulf %362, %364 : vector<16x256xf32>
    %c208_230 = arith.constant 208 : index
    %c0_231 = arith.constant 0 : index
    %366 = vector.load %arg21[%c208_230, %c0_231] : memref<400x256xf32, #tpu.memory_space<vmem>>, vector<16x256xf32>
    tpu.vector_store %arg21[%c208_230, %c0_231], %365 {strides = array<i32>} : memref<400x256xf32, #tpu.memory_space<vmem>>, vector<16x256xf32>,
    %c0_232 = arith.constant 0 : index
    %c264 = arith.constant 264 : index
    %367 = vector.load %arg20[%c0_232, %c264] : memref<16x768xf32, #tpu.memory_space<vmem>>, vector<16x256xf32>
    %368 = vector.extract_strided_slice %20 {offsets = [64, 0], sizes = [1, 256], strides = [1, 1]} : vector<75x256xf32> to vector<1x256xf32>
    %369 = vector.broadcast %368 : vector<1x256xf32> to vector<16x256xf32>
    %370 = arith.mulf %367, %369 : vector<16x256xf32>
    %c224_233 = arith.constant 224 : index
    %c0_234 = arith.constant 0 : index
    %371 = vector.load %arg21[%c224_233, %c0_234] : memref<400x256xf32, #tpu.memory_space<vmem>>, vector<16x256xf32>
    tpu.vector_store %arg21[%c224_233, %c0_234], %370 {strides = array<i32>} : memref<400x256xf32, #tpu.memory_space<vmem>>, vector<16x256xf32>,
    %c0_235 = arith.constant 0 : index
    %c312 = arith.constant 312 : index
    %372 = vector.load %arg20[%c0_235, %c312] : memref<16x768xf32, #tpu.memory_space<vmem>>, vector<16x256xf32>
    %373 = vector.extract_strided_slice %20 {offsets = [65, 0], sizes = [1, 256], strides = [1, 1]} : vector<75x256xf32> to vector<1x256xf32>
    %374 = vector.broadcast %373 : vector<1x256xf32> to vector<16x256xf32>
    %375 = arith.mulf %372, %374 : vector<16x256xf32>
    %c240_236 = arith.constant 240 : index
    %c0_237 = arith.constant 0 : index
    %376 = vector.load %arg21[%c240_236, %c0_237] : memref<400x256xf32, #tpu.memory_space<vmem>>, vector<16x256xf32>
    tpu.vector_store %arg21[%c240_236, %c0_237], %375 {strides = array<i32>} : memref<400x256xf32, #tpu.memory_space<vmem>>, vector<16x256xf32>,
    %c0_238 = arith.constant 0 : index
    %c316_239 = arith.constant 316 : index
    %377 = vector.load %arg20[%c0_238, %c316_239] : memref<16x768xf32, #tpu.memory_space<vmem>>, vector<16x256xf32>
    %378 = vector.extract_strided_slice %20 {offsets = [66, 0], sizes = [1, 256], strides = [1, 1]} : vector<75x256xf32> to vector<1x256xf32>
    %379 = vector.broadcast %378 : vector<1x256xf32> to vector<16x256xf32>
    %380 = arith.mulf %377, %379 : vector<16x256xf32>
    %c256_240 = arith.constant 256 : index
    %c0_241 = arith.constant 0 : index
    %381 = vector.load %arg21[%c256_240, %c0_241] : memref<400x256xf32, #tpu.memory_space<vmem>>, vector<16x256xf32>
    tpu.vector_store %arg21[%c256_240, %c0_241], %380 {strides = array<i32>} : memref<400x256xf32, #tpu.memory_space<vmem>>, vector<16x256xf32>,
    %c0_242 = arith.constant 0 : index
    %c320_243 = arith.constant 320 : index
    %382 = vector.load %arg20[%c0_242, %c320_243] : memref<16x768xf32, #tpu.memory_space<vmem>>, vector<16x256xf32>
    %383 = vector.extract_strided_slice %20 {offsets = [67, 0], sizes = [1, 256], strides = [1, 1]} : vector<75x256xf32> to vector<1x256xf32>
    %384 = vector.broadcast %383 : vector<1x256xf32> to vector<16x256xf32>
    %385 = arith.mulf %382, %384 : vector<16x256xf32>
    %c272_244 = arith.constant 272 : index
    %c0_245 = arith.constant 0 : index
    %386 = vector.load %arg21[%c272_244, %c0_245] : memref<400x256xf32, #tpu.memory_space<vmem>>, vector<16x256xf32>
    tpu.vector_store %arg21[%c272_244, %c0_245], %385 {strides = array<i32>} : memref<400x256xf32, #tpu.memory_space<vmem>>, vector<16x256xf32>,
    %c0_246 = arith.constant 0 : index
    %c324_247 = arith.constant 324 : index
    %387 = vector.load %arg20[%c0_246, %c324_247] : memref<16x768xf32, #tpu.memory_space<vmem>>, vector<16x256xf32>
    %388 = vector.extract_strided_slice %20 {offsets = [68, 0], sizes = [1, 256], strides = [1, 1]} : vector<75x256xf32> to vector<1x256xf32>
    %389 = vector.broadcast %388 : vector<1x256xf32> to vector<16x256xf32>
    %390 = arith.mulf %387, %389 : vector<16x256xf32>
    %c288_248 = arith.constant 288 : index
    %c0_249 = arith.constant 0 : index
    %391 = vector.load %arg21[%c288_248, %c0_249] : memref<400x256xf32, #tpu.memory_space<vmem>>, vector<16x256xf32>
    tpu.vector_store %arg21[%c288_248, %c0_249], %390 {strides = array<i32>} : memref<400x256xf32, #tpu.memory_space<vmem>>, vector<16x256xf32>,
    %c0_250 = arith.constant 0 : index
    %c328 = arith.constant 328 : index
    %392 = vector.load %arg20[%c0_250, %c328] : memref<16x768xf32, #tpu.memory_space<vmem>>, vector<16x256xf32>
    %393 = vector.extract_strided_slice %20 {offsets = [69, 0], sizes = [1, 256], strides = [1, 1]} : vector<75x256xf32> to vector<1x256xf32>
    %394 = vector.broadcast %393 : vector<1x256xf32> to vector<16x256xf32>
    %395 = arith.mulf %392, %394 : vector<16x256xf32>
    %c304_251 = arith.constant 304 : index
    %c0_252 = arith.constant 0 : index
    %396 = vector.load %arg21[%c304_251, %c0_252] : memref<400x256xf32, #tpu.memory_space<vmem>>, vector<16x256xf32>
    tpu.vector_store %arg21[%c304_251, %c0_252], %395 {strides = array<i32>} : memref<400x256xf32, #tpu.memory_space<vmem>>, vector<16x256xf32>,
    %c0_253 = arith.constant 0 : index
    %c376 = arith.constant 376 : index
    %397 = vector.load %arg20[%c0_253, %c376] : memref<16x768xf32, #tpu.memory_space<vmem>>, vector<16x256xf32>
    %398 = vector.extract_strided_slice %20 {offsets = [70, 0], sizes = [1, 256], strides = [1, 1]} : vector<75x256xf32> to vector<1x256xf32>
    %399 = vector.broadcast %398 : vector<1x256xf32> to vector<16x256xf32>
    %400 = arith.mulf %397, %399 : vector<16x256xf32>
    %c320_254 = arith.constant 320 : index
    %c0_255 = arith.constant 0 : index
    %401 = vector.load %arg21[%c320_254, %c0_255] : memref<400x256xf32, #tpu.memory_space<vmem>>, vector<16x256xf32>
    tpu.vector_store %arg21[%c320_254, %c0_255], %400 {strides = array<i32>} : memref<400x256xf32, #tpu.memory_space<vmem>>, vector<16x256xf32>,
    %c0_256 = arith.constant 0 : index
    %c380 = arith.constant 380 : index
    %402 = vector.load %arg20[%c0_256, %c380] : memref<16x768xf32, #tpu.memory_space<vmem>>, vector<16x256xf32>
    %403 = vector.extract_strided_slice %20 {offsets = [71, 0], sizes = [1, 256], strides = [1, 1]} : vector<75x256xf32> to vector<1x256xf32>
    %404 = vector.broadcast %403 : vector<1x256xf32> to vector<16x256xf32>
    %405 = arith.mulf %402, %404 : vector<16x256xf32>
    %c336_257 = arith.constant 336 : index
    %c0_258 = arith.constant 0 : index
    %406 = vector.load %arg21[%c336_257, %c0_258] : memref<400x256xf32, #tpu.memory_space<vmem>>, vector<16x256xf32>
    tpu.vector_store %arg21[%c336_257, %c0_258], %405 {strides = array<i32>} : memref<400x256xf32, #tpu.memory_space<vmem>>, vector<16x256xf32>,
    %c0_259 = arith.constant 0 : index
    %c384_260 = arith.constant 384 : index
    %407 = vector.load %arg20[%c0_259, %c384_260] : memref<16x768xf32, #tpu.memory_space<vmem>>, vector<16x256xf32>
    %408 = vector.extract_strided_slice %20 {offsets = [72, 0], sizes = [1, 256], strides = [1, 1]} : vector<75x256xf32> to vector<1x256xf32>
    %409 = vector.broadcast %408 : vector<1x256xf32> to vector<16x256xf32>
    %410 = arith.mulf %407, %409 : vector<16x256xf32>
    %c352_261 = arith.constant 352 : index
    %c0_262 = arith.constant 0 : index
    %411 = vector.load %arg21[%c352_261, %c0_262] : memref<400x256xf32, #tpu.memory_space<vmem>>, vector<16x256xf32>
    tpu.vector_store %arg21[%c352_261, %c0_262], %410 {strides = array<i32>} : memref<400x256xf32, #tpu.memory_space<vmem>>, vector<16x256xf32>,
    %c0_263 = arith.constant 0 : index
    %c388 = arith.constant 388 : index
    %412 = vector.load %arg20[%c0_263, %c388] : memref<16x768xf32, #tpu.memory_space<vmem>>, vector<16x256xf32>
    %413 = vector.extract_strided_slice %20 {offsets = [73, 0], sizes = [1, 256], strides = [1, 1]} : vector<75x256xf32> to vector<1x256xf32>
    %414 = vector.broadcast %413 : vector<1x256xf32> to vector<16x256xf32>
    %415 = arith.mulf %412, %414 : vector<16x256xf32>
    %c368_264 = arith.constant 368 : index
    %c0_265 = arith.constant 0 : index
    %416 = vector.load %arg21[%c368_264, %c0_265] : memref<400x256xf32, #tpu.memory_space<vmem>>, vector<16x256xf32>
    tpu.vector_store %arg21[%c368_264, %c0_265], %415 {strides = array<i32>} : memref<400x256xf32, #tpu.memory_space<vmem>>, vector<16x256xf32>,
    %c0_266 = arith.constant 0 : index
    %c392 = arith.constant 392 : index
    %417 = vector.load %arg20[%c0_266, %c392] : memref<16x768xf32, #tpu.memory_space<vmem>>, vector<16x256xf32>
    %418 = vector.extract_strided_slice %20 {offsets = [74, 0], sizes = [1, 256], strides = [1, 1]} : vector<75x256xf32> to vector<1x256xf32>
    %419 = vector.broadcast %418 : vector<1x256xf32> to vector<16x256xf32>
    %420 = arith.mulf %417, %419 : vector<16x256xf32>
    %c384_267 = arith.constant 384 : index
    %c0_268 = arith.constant 0 : index
    %421 = vector.load %arg21[%c384_267, %c0_268] : memref<400x256xf32, #tpu.memory_space<vmem>>, vector<16x256xf32>
    tpu.vector_store %arg21[%c384_267, %c0_268], %420 {strides = array<i32>} : memref<400x256xf32, #tpu.memory_space<vmem>>, vector<16x256xf32>,
    %c2 = arith.constant 2 : index
    %c0_269 = arith.constant 0 : index
    %c0_270 = arith.constant 0 : index
    %422 = vector.load %arg6[%c2, %c0_269, %c0_270] : memref<3x16x400xbf16, #tpu.memory_space<vmem>>, vector<1x16x400xbf16>
    %423 = vector.shape_cast %422 : vector<1x16x400xbf16> to vector<16x400xbf16>
    %c0_271 = arith.constant 0 : index
    %c0_272 = arith.constant 0 : index
    %424 = vector.load %arg21[%c0_271, %c0_272] : memref<400x256xf32, #tpu.memory_space<vmem>>, vector<400x256xf32>
    %425 = arith.truncf %424 : vector<400x256xf32> to vector<400x256xbf16>
    %cst_273 = arith.constant dense<0.000000e+00> : vector<16x256xf32>
    %426 = tpu.matmul %423, %425, %cst_273 {dimension_numbers = #tpu.dot_dimension_numbers<[1], [0], [0], [1], [0, 0, 1, 1], [], []>} : vector<16x400xbf16>, vector<400x256xbf16>, vector<16x256xf32> -> vector<16x256xf32>
    %c2_274 = arith.constant 2 : index
    %c0_275 = arith.constant 0 : index
    %c0_276 = arith.constant 0 : index
    %427 = vector.load %arg7[%c2_274, %c0_275, %c0_276] : memref<3x16x1xf32, #tpu.memory_space<vmem>>, vector<1x16x1xf32>
    %428 = vector.shape_cast %427 : vector<1x16x1xf32> to vector<16x1xf32>
    %429 = vector.broadcast %428 : vector<16x1xf32> to vector<16x256xf32>
    %430 = arith.mulf %426, %429 : vector<16x256xf32>
    %c2_277 = arith.constant 2 : index
    %c0_278 = arith.constant 0 : index
    %c0_279 = arith.constant 0 : index
    %431 = vector.load %arg8[%c2_277, %c0_278, %c0_279] : memref<3x16x1xf32, #tpu.memory_space<vmem>>, vector<1x16x1xf32>
    %432 = vector.shape_cast %431 : vector<1x16x1xf32> to vector<16x1xf32>
    %433 = vector.broadcast %432 : vector<16x1xf32> to vector<16x256xf32>
    %434 = arith.addf %430, %433 : vector<16x256xf32>
    %c0_280 = arith.constant 0 : index
    %c0_281 = arith.constant 0 : index
    %435 = vector.load %arg10[%c0_280, %c0_281] : memref<16x16xbf16, #tpu.memory_space<vmem>>, vector<16x16xbf16>
    %436 = arith.truncf %16 : vector<16x256xf32> to vector<16x256xbf16>
    %cst_282 = arith.constant dense<0.000000e+00> : vector<16x256xf32>
    %437 = tpu.matmul %435, %436, %cst_282 {dimension_numbers = #tpu.dot_dimension_numbers<[1], [0], [0], [1], [0, 0, 1, 1], [], []>} : vector<16x16xbf16>, vector<16x256xbf16>, vector<16x256xf32> -> vector<16x256xf32>
    %cst_283 = arith.constant dense<0.000000e+00> : vector<16xf32>
    %438 = vector.multi_reduction <add>, %437, %cst_283 [1] : vector<16x256xf32> to vector<16xf32>
    %439 = vector.shape_cast %438 : vector<16xf32> to vector<16x1xf32>
    %cst_284 = arith.constant 3.906250e-03 : f32
    %440 = vector.broadcast %cst_284 : f32 to vector<16x1xf32>
    %441 = arith.mulf %439, %440 : vector<16x1xf32>
    %c0_285 = arith.constant 0 : index
    %c0_286 = arith.constant 0 : index
    %442 = vector.load %arg11[%c0_285, %c0_286] : memref<16x1xf32, #tpu.memory_space<vmem>>, vector<16x1xf32>
    %443 = arith.addf %441, %442 : vector<16x1xf32>
    %444 = arith.negf %443 : vector<16x1xf32>
    %445 = math.exp %444 : vector<16x1xf32>
    %cst_287 = arith.constant 1.000000e+00 : f32
    %446 = vector.broadcast %cst_287 : f32 to vector<16x1xf32>
    %447 = arith.addf %446, %445 : vector<16x1xf32>
    %448 = arith.divf %446, %447 : vector<16x1xf32>
    %449 = vector.broadcast %448 : vector<16x1xf32> to vector<16x256xf32>
    %450 = arith.mulf %16, %449 : vector<16x256xf32>
    %451 = arith.addf %296, %158 : vector<16x256xf32>
    %452 = arith.addf %434, %451 : vector<16x256xf32>
    %453 = arith.addf %450, %452 : vector<16x256xf32>
    %454 = tpu.concatenate %158, %451, %452, %453 in 0 : vector<16x256xf32>, vector<16x256xf32>, vector<16x256xf32>, vector<16x256xf32> -> vector<64x256xf32>
    %c0_288 = arith.constant 0 : index
    %c0_289 = arith.constant 0 : index
    %455 = vector.load %arg12[%c0_288, %c0_289] : memref<64x1xf32, #tpu.memory_space<vmem>>, vector<64x1xf32>
    %456 = vector.broadcast %455 : vector<64x1xf32> to vector<64x256xf32>
    %457 = arith.mulf %454, %456 : vector<64x256xf32>
    %c0_290 = arith.constant 0 : index
    %c0_291 = arith.constant 0 : index
    %458 = vector.load %arg13[%c0_290, %c0_291] : memref<64x1xf32, #tpu.memory_space<vmem>>, vector<64x1xf32>
    %459 = vector.broadcast %458 : vector<64x1xf32> to vector<64x256xf32>
    %460 = arith.addf %457, %459 : vector<64x256xf32>
    %cst_292 = arith.constant 0.000000e+00 : f32
    %461 = vector.broadcast %cst_292 : f32 to vector<64x256xf32>
    %462 = arith.cmpf oge, %460, %461 : vector<64x256xf32>
    %c0_293 = arith.constant 0 : index
    %c0_294 = arith.constant 0 : index
    %463 = vector.load %arg14[%c0_293, %c0_294] : memref<64x1xf32, #tpu.memory_space<vmem>>, vector<64x1xf32>
    %464 = vector.broadcast %463 : vector<64x1xf32> to vector<64x256xf32>
    %465 = arith.mulf %464, %460 : vector<64x256xf32>
    %466 = arith.select %462, %460, %465 : vector<64x256xi1>, vector<64x256xf32>
    %c0_295 = arith.constant 0 : index
    %c0_296 = arith.constant 0 : index
    %467 = vector.load %arg15[%c0_295, %c0_296] : memref<8x64xbf16, #tpu.memory_space<vmem>>, vector<8x64xbf16>
    %468 = arith.truncf %466 : vector<64x256xf32> to vector<64x256xbf16>
    %cst_297 = arith.constant dense<0.000000e+00> : vector<8x256xf32>
    %469 = tpu.matmul %467, %468, %cst_297 {dimension_numbers = #tpu.dot_dimension_numbers<[1], [0], [0], [1], [0, 0, 1, 1], [], []>} : vector<8x64xbf16>, vector<64x256xbf16>, vector<8x256xf32> -> vector<8x256xf32>
    %c0_298 = arith.constant 0 : index
    %c0_299 = arith.constant 0 : index
    %470 = vector.load %arg16[%c0_298, %c0_299] : memref<8x1xf32, #tpu.memory_space<vmem>>, vector<8x1xf32>
    %471 = vector.broadcast %470 : vector<8x1xf32> to vector<8x256xf32>
    %472 = arith.mulf %469, %471 : vector<8x256xf32>
    %c0_300 = arith.constant 0 : index
    %c0_301 = arith.constant 0 : index
    %473 = vector.load %arg17[%c0_300, %c0_301] : memref<8x1xf32, #tpu.memory_space<vmem>>, vector<8x1xf32>
    %474 = vector.broadcast %473 : vector<8x1xf32> to vector<8x256xf32>
    %475 = arith.addf %472, %474 : vector<8x256xf32>
    %476 = arith.addf %475, %1 : vector<8x256xf32>
    %cst_302 = arith.constant 0.000000e+00 : f32
    %477 = vector.broadcast %cst_302 : f32 to vector<8x256xf32>
    %478 = arith.cmpf oge, %476, %477 : vector<8x256xf32>
    %c0_303 = arith.constant 0 : index
    %c0_304 = arith.constant 0 : index
    %479 = vector.load %arg18[%c0_303, %c0_304] : memref<8x1xf32, #tpu.memory_space<vmem>>, vector<8x1xf32>
    %480 = vector.broadcast %479 : vector<8x1xf32> to vector<8x256xf32>
    %481 = arith.mulf %480, %476 : vector<8x256xf32>
    %482 = arith.select %478, %476, %481 : vector<8x256xi1>, vector<8x256xf32>
    %c0_305 = arith.constant 0 : index
    %c0_306 = arith.constant 0 : index
    %c0_307 = arith.constant 0 : index
    %483 = vector.load %arg19[%c0_305, %c0_306, %c0_307] : memref<1x8x256xf32, #tpu.memory_space<vmem>>, vector<1x8x256xf32>
    %484 = vector.shape_cast %483 : vector<1x8x256xf32> to vector<8x256xf32>
    %485 = vector.shape_cast %482 : vector<8x256xf32> to vector<1x8x256xf32>
    tpu.vector_store %arg19[%c0_305, %c0_306, %c0_307], %485 {strides = array<i32>} : memref<1x8x256xf32, #tpu.memory_space<vmem>>, vector<1x8x256xf32>,
    return
  }
  func.func @transform_0(%arg0: i32) -> (i32, i32, i32) {
    %c0_i32 = arith.constant 0 : i32
    %c0_i32_0 = arith.constant 0 : i32
    %c0_i32_1 = arith.constant 0 : i32
    return %arg0, %c0_i32, %c0_i32_0 : i32, i32, i32
  }
  func.func @transform_1(%arg0: i32) -> (i32, i32) {
    %c0_i32 = arith.constant 0 : i32
    %c0_i32_0 = arith.constant 0 : i32
    %c0_i32_1 = arith.constant 0 : i32
    return %c0_i32, %c0_i32_0 : i32, i32
  }
  func.func @transform_2(%arg0: i32) -> (i32, i32) {
    %c0_i32 = arith.constant 0 : i32
    %c0_i32_0 = arith.constant 0 : i32
    %c0_i32_1 = arith.constant 0 : i32
    return %c0_i32, %c0_i32_0 : i32, i32
  }
  func.func @transform_3(%arg0: i32) -> (i32, i32) {
    %c0_i32 = arith.constant 0 : i32
    %c0_i32_0 = arith.constant 0 : i32
    %c0_i32_1 = arith.constant 0 : i32
    return %c0_i32, %c0_i32_0 : i32, i32
  }
  func.func @transform_4(%arg0: i32) -> (i32, i32) {
    %c0_i32 = arith.constant 0 : i32
    %c0_i32_0 = arith.constant 0 : i32
    %c0_i32_1 = arith.constant 0 : i32
    return %c0_i32, %c0_i32_0 : i32, i32
  }
  func.func @transform_5(%arg0: i32) -> (i32, i32, i32) {
    %c0_i32 = arith.constant 0 : i32
    %c0_i32_0 = arith.constant 0 : i32
    %c0_i32_1 = arith.constant 0 : i32
    %c0_i32_2 = arith.constant 0 : i32
    return %c0_i32, %c0_i32_0, %c0_i32_1 : i32, i32, i32
  }
  func.func @transform_6(%arg0: i32) -> (i32, i32, i32) {
    %c0_i32 = arith.constant 0 : i32
    %c0_i32_0 = arith.constant 0 : i32
    %c0_i32_1 = arith.constant 0 : i32
    %c0_i32_2 = arith.constant 0 : i32
    return %c0_i32, %c0_i32_0, %c0_i32_1 : i32, i32, i32
  }
  func.func @transform_7(%arg0: i32) -> (i32, i32, i32) {
    %c0_i32 = arith.constant 0 : i32
    %c0_i32_0 = arith.constant 0 : i32
    %c0_i32_1 = arith.constant 0 : i32
    %c0_i32_2 = arith.constant 0 : i32
    return %c0_i32, %c0_i32_0, %c0_i32_1 : i32, i32, i32
  }
  func.func @transform_8(%arg0: i32) -> (i32, i32) {
    %c0_i32 = arith.constant 0 : i32
    %c0_i32_0 = arith.constant 0 : i32
    %c0_i32_1 = arith.constant 0 : i32
    return %c0_i32, %c0_i32_0 : i32, i32
  }
  func.func @transform_9(%arg0: i32) -> (i32, i32) {
    %c0_i32 = arith.constant 0 : i32
    %c0_i32_0 = arith.constant 0 : i32
    %c0_i32_1 = arith.constant 0 : i32
    return %c0_i32, %c0_i32_0 : i32, i32
  }
  func.func @transform_10(%arg0: i32) -> (i32, i32) {
    %c0_i32 = arith.constant 0 : i32
    %c0_i32_0 = arith.constant 0 : i32
    %c0_i32_1 = arith.constant 0 : i32
    return %c0_i32, %c0_i32_0 : i32, i32
  }
  func.func @transform_11(%arg0: i32) -> (i32, i32) {
    %c0_i32 = arith.constant 0 : i32
    %c0_i32_0 = arith.constant 0 : i32
    %c0_i32_1 = arith.constant 0 : i32
    return %c0_i32, %c0_i32_0 : i32, i32
  }
  func.func @transform_12(%arg0: i32) -> (i32, i32) {
    %c0_i32 = arith.constant 0 : i32
    %c0_i32_0 = arith.constant 0 : i32
    %c0_i32_1 = arith.constant 0 : i32
    return %c0_i32, %c0_i32_0 : i32, i32
  }
  func.func @transform_13(%arg0: i32) -> (i32, i32) {
    %c0_i32 = arith.constant 0 : i32
    %c0_i32_0 = arith.constant 0 : i32
    %c0_i32_1 = arith.constant 0 : i32
    return %c0_i32, %c0_i32_0 : i32, i32
  }
  func.func @transform_14(%arg0: i32) -> (i32, i32) {
    %c0_i32 = arith.constant 0 : i32
    %c0_i32_0 = arith.constant 0 : i32
    %c0_i32_1 = arith.constant 0 : i32
    return %c0_i32, %c0_i32_0 : i32, i32
  }
  func.func @transform_15(%arg0: i32) -> (i32, i32) {
    %c0_i32 = arith.constant 0 : i32
    %c0_i32_0 = arith.constant 0 : i32
    %c0_i32_1 = arith.constant 0 : i32
    return %c0_i32, %c0_i32_0 : i32, i32
  }
  func.func @transform_16(%arg0: i32) -> (i32, i32) {
    %c0_i32 = arith.constant 0 : i32
    %c0_i32_0 = arith.constant 0 : i32
    %c0_i32_1 = arith.constant 0 : i32
    return %c0_i32, %c0_i32_0 : i32, i32
  }
  func.func @transform_17(%arg0: i32) -> (i32, i32) {
    %c0_i32 = arith.constant 0 : i32
    %c0_i32_0 = arith.constant 0 : i32
    %c0_i32_1 = arith.constant 0 : i32
    return %c0_i32, %c0_i32_0 : i32, i32
  }
  func.func @transform_18(%arg0: i32) -> (i32, i32, i32) {
    %c0_i32 = arith.constant 0 : i32
    %c0_i32_0 = arith.constant 0 : i32
    %c0_i32_1 = arith.constant 0 : i32
    return %arg0, %c0_i32, %c0_i32_0 : i32, i32, i32
  }
}

</mosaic_0001>

<bundles_post_ra>
// kernel: tpu_custom_call.1
= control target key start
LH: loop header
LB: loop body
LE: loop exit
PB: predicated region body
PF: predicated region fallthrough
CT: control target
= control target key end

     0   :  { %s10434_s0 = inlined_call_operand.vmem [shape: f32[2,8,256], index: 0, kind: input, shape index: {}]   ;;  %s10435_s1 = inlined_call_operand.vmem [shape: bf16[16,8], index: 1, kind: input, shape index: {}]   ;;  %s10436_s2 = inlined_call_operand.vmem [shape: f32[16,1], index: 2, kind: input, shape index: {}]   ;;  %s10437_s3 = inlined_call_operand.vmem [shape: f32[16,1], index: 3, kind: input, shape index: {}]   ;;  %s10438_s4 = inlined_call_operand.vmem [shape: f32[16,1], index: 4, kind: input, shape index: {}]   ;;  %s10439_s5 = inlined_call_operand.vmem [shape: bf16[3,16,400], index: 5, kind: input, shape index: {}]   ;;  %s10440_s6 = inlined_call_operand.vmem [shape: f32[3,16,1], index: 6, kind: input, shape index: {}]   ;;  %s10441_s7 = inlined_call_operand.vmem [shape: f32[3,16,1], index: 7, kind: input, shape index: {}]   ;;  %s10442_s8 = inlined_call_operand.vmem [shape: f32[75,256], index: 8, kind: input, shape index: {}]   ;;  %s10443_s9 = inlined_call_operand.vmem [shape: bf16[16,16], index: 9, kind: input, shape index: {}]   ;;  %s10444_s10 = inlined_call_operand.vmem [shape: f32[16,1], index: 10, kind: input, shape index: {}]   ;;  %s10445_s11 = inlined_call_operand.vmem [shape: f32[64,1], index: 11, kind: input, shape index: {}]   ;;  %s10446_s12 = inlined_call_operand.vmem [shape: f32[64,1], index: 12, kind: input, shape index: {}]   ;;  %s10447_s13 = inlined_call_operand.vmem [shape: f32[64,1], index: 13, kind: input, shape index: {}]   ;;  %s10448_s14 = inlined_call_operand.vmem [shape: bf16[8,64], index: 14, kind: input, shape index: {}]   ;;  %s10449_s15 = inlined_call_operand.vmem [shape: f32[8,1], index: 15, kind: input, shape index: {}]   ;;  %s10450_s16 = inlined_call_operand.vmem [shape: f32[8,1], index: 16, kind: input, shape index: {}]   ;;  %s10451_s17 = inlined_call_operand.vmem [shape: f32[8,1], index: 17, kind: input, shape index: {}]   ;;  %s10452_s18 = inlined_call_operand.hbm [shape: f32[2,8,256], index: 18, kind: output, shape index: {}]  }
   0x1   :  { %10592 = sst [smem:[#allocation48_spill]] %s10434_s0 }
   0x2   :  { %10593 = sst [smem:[#allocation49_spill]] %s10435_s1 }
   0x3   :  { %10594 = sst [smem:[#allocation50_spill]] %s10436_s2 }
   0x4   :  { %10595 = sst [smem:[#allocation51_spill]] %s10437_s3 }
   0x5   :  { %10596 = sst [smem:[#allocation52_spill]] %s10438_s4 }
   0x6   :  { %10597 = sst [smem:[#allocation53_spill]] %s10448_s14 }
   0x7   :  { %10598 = sst [smem:[#allocation54_spill]] %s10452_s18 }
   0x8   :  { %23 = vsyncpa [#allocation5], 0 }
   0x9   :  { %25 = vsyncpa [#allocation5 + $0x1], 0  ;;  %s7880_s27 = smov 0   ;;  %s7882_s28 = smov 0  }
   0xa   :  { %s7884_s29 = smov 0   ;;  %s7886_s30 = smov 0  }
   0xb LB: > { %10599 = sst [smem:[#allocation7_spill]] %s7730_s27  ;;  %s7901_s0 = sadd.s32 4294967295, %s7742_s30   ;;  %s7742_s30 = sphi %s7886_s30, %s10850_s30   ;;  %s7738_s29 = sphi %s7884_s29, %s10853_s29   ;;  %s7734_s28 = sphi %s7882_s28, %s10852_s28   ;;  %s7730_s27 = sphi %s7880_s27, %s10851_s27  }
   0xc   : > { %10600 = sst [smem:[#allocation8_spill]] %s7734_s28  ;;  %s6446_s19 = sadd.s32 4294967294, %s7742_s30  }
   0xd   : > { %10601 = sst [smem:[#allocation9_spill]] %s7738_s29  ;;  %s7905_s1 = sadd.s32 1, %s7742_s30  }
   0xe   : > { %10602 = sst [smem:[#allocation10_spill]] %s7742_s30  ;;  %s421_s20 = sadd.s32 1, %s7738_s29 }
   0xf   : > { %10603 = sst [smem:[#allocation11_spill]] %s7901_s0  ;;  %s418_s21 = ssub.s32 %s7742_s30, %s7905_s1 }
  0x10   : > { %10604 = sst [smem:[#allocation12_spill]] %s7905_s1  ;;  %p431_p0 = scmp.ne.s32.totalorder %s7738_s29, %s7734_s28 }
  0x11   : > { %p419_p1 = scmp.eq.s32.totalorder %s418_s21, 0  ;;  %p432_p2 = scmp.eq.s32.totalorder %s7901_s0, 1 }
  0x12   : > { %p437_p3 = scmp.ne.s32.totalorder %s7734_s28, %s7730_s27  ;;  %p438_p4 = scmp.eq.s32.totalorder %s6446_s19, 1 }
  0x13   : > { %s7916_s22 = scalar_select %p419_p1, %s7738_s29, %s421_s20  }
  0x14   : > { %p7918_p5 = por %p432_p2, %p431_p0  ;;  %p7922_p6 = por %p438_p4, %p437_p3 }
  0x15   : > { %10605 = sst [smem:[#allocation13_spill]] %s7916_s22  ;;  %p6449_p7 = scmp.ge.s32.totalorder %s7742_s30, 1 }
  0x16   : > { %s10606_s2 = scalar_select %p7918_p5, 1, 0 }
  0x17   : > { %s10608_s23 = scalar_select %p7922_p6, 1, 0 }
  0x18   : > { %10607 = sst [smem:[#allocation14_spill]] %s10606_s2  ;;  %p515_p8 = scmp.lt.s32.totalorder %s7742_s30, 3 }
  0x19   : > { %10609 = sst [smem:[#allocation15_spill]] %s10608_s23 }
  0x1a   : > { %p516_p9 = pnand %p6449_p7, %p515_p8 }
  0x1c   : > { %519 = sbr.rel (%p516_p9) target bundleno = 2511 (0x9cf), region = 92 }
  0x23   : > { %s10610_s3 = sld [smem:[#allocation51_spill]]  ;;  %s10611_s20 = sld [smem:[#allocation50_spill]]  ;;  %v738_v2 = vlaneseq  ;;  %v10487_v3 = vmov 0   ;;  %v7956_v8 = vld [vmem:[%s10442_s8 + $0x8] sm:$0xff]  ;;  %vm590_vm0 = vcmask 1043456   ;;  %v712_v13 = vld [vmem:[%s10442_s8] sm:$0xff] }
  0x24   : > { %p569_p10 = scmp.lt.s32.totalorder %s7901_s0, 1  ;;  %6591 = vset.pattern.permute.xlu1 %v10487_v3  ;;  %6590 = vset.pattern.permute.xlu0 %v10487_v3  ;;  %s10612_s23 = sld [smem:[#allocation48_spill]]  ;;  %vm10509_vm1 = vcmask 64512   ;;  %v8027_v41 = vld [vmem:[%s10442_s8 + $0x18] sm:$0xff]  ;;  %v8032_v42 = vld [vmem:[%s10442_s8 + $0x10] sm:$0xff]  ;;  %v716_v57 = vld [vmem:[%s10442_s8 + $0x20] sm:$0xff] }
  0x25   : > { %629 = vmatprep.mubr.bf16.mxu0 %v10487_v3  ;;  %v739_v6 = vshrl.u32 %v738_v2, 7  ;;  %s10614_s4 = sld [smem:[#allocation52_spill]]  ;;  %s10616_s25 = sld [smem:[#allocation49_spill]]  ;;  %10624 = vst [vmem:[#allocation25_spill] sm:$0xff] %v8027_v41  ;;  %10625 = vst [vmem:[#allocation26_spill] sm:$0xff] %v8032_v42  ;;  %v717_v58 = vld [vmem:[%s10442_s8 + $0x28] sm:$0xff] }
  0x26   : > { %s570_s21 = scalar_select %p569_p10, %s7901_s0, 1  ;;  %vm10510_vm3 = vcmask 769024   ;;  %vm10521_vm4 = vcmask 785408   ;;  %vm10524_vm5 = vcmask 801792   ;;  %vm10513_vm6 = vcmask 777216  }
  0x27   : > { %v7963_v12 = vsub.s32 0, %v739_v6  ;;  %v7973_v19 = vsub.s32 1, %v739_v6  ;;  %v7979_v22 = vsub.s32 2, %v739_v6  ;;  %s10467_s19 = smov 95   ;;  %v7987_v25 = vsub.s32 3, %v739_v6  ;;  %s10463_s29 = smov 96  }
  0x28   : > { %s6497_s26 = sshll.u32 %s570_s21, 4  ;;  %v7993_v28 = vsub.s32 4, %v739_v6  ;;  %s10471_s22 = smov 97   ;;  %v8001_v31 = vsub.s32 5, %v739_v6  ;;  %v8007_v34 = vsub.s32 6, %v739_v6  ;;  %v8015_v37 = vsub.s32 7, %v739_v6 }
  0x29   : > { %v656_v0 = vld [vmem:[%s10610_s3] sm:$0xff]  ;;  %v657_v4 = vld [vmem:[%s10610_s3 + $0x8] sm:$0xff]  ;;  %10615 = vst [vmem:[#allocation17_spill] sm:$0xff] %v7963_v12  ;;  %v745_v18 = vrot.slane %v7956_v8, %v7963_v12  ;;  %10617 = vst [vmem:[#allocation18_spill] sm:$0xff] %v7973_v19  ;;  %v741_v20 = vrot.slane %v712_v13, %v7963_v12  ;;  %v803_v21 = vrot.slane %v712_v13, %v7973_v19  ;;  %s10465_s21 = smov 98   ;;  %s10475_s1 = smov 110  }
  0x2a   : > { %v640_v1 = vld [vmem:[%s10611_s20] sm:$0xff]  ;;  %660 = vperm.xlu1 %6591, %v656_v0   ;;  %v641_v5 = vld [vmem:[%s10611_s20 + $0x8] sm:$0xff]  ;;  %s7948_s27 = scalar_lea.vmem %s10612_s23, %s6497_s26  ;;  %s10461_s26 = smov 94   ;;  %10618 = vst [vmem:[#allocation19_spill] sm:$0xff] %v7979_v22  ;;  %v807_v23 = vrot.slane %v7956_v8, %v7973_v19  ;;  %v869_v24 = vrot.slane %v7956_v8, %v7979_v22  ;;  %10619 = vst [vmem:[#allocation20_spill] sm:$0xff] %v7987_v25  ;;  %v865_v26 = vrot.slane %v712_v13, %v7979_v22  ;;  %vm10529_vm7 = vcmask 908288  }
  0x2b   : > { %644 = vperm.xlu0 %6590, %v640_v1   ;;  %10613 = sst [smem:[#allocation16_spill]] %s7948_s27  ;;  %v677_v7 = vld [vmem:[%s10614_s4 + $0x8] sm:$0xff]  ;;  %v575_v10 = vld [vmem:[%s7948_s27] sm:$0xff]  ;;  %v927_v27 = vrot.slane %v712_v13, %v7987_v25  ;;  %10620 = vst [vmem:[#allocation21_spill] sm:$0xff] %v7993_v28  ;;  %v931_v29 = vrot.slane %v7956_v8, %v7987_v25  ;;  %v993_v30 = vrot.slane %v7956_v8, %v7993_v28  ;;  %10621 = vst [vmem:[#allocation22_spill] sm:$0xff] %v8001_v31  ;;  %s10469_s18 = smov 111  }
  0x2c   : > { %v576_v9 = vld [vmem:[%s7948_s27 + $0x8] sm:$0xff]  ;;  %v676_v11 = vld [vmem:[%s10614_s4] sm:$0xff]  ;;  %v579_v15 = vpack.c.bf16 %v575_v10, %v575_v10  ;;  %v989_v32 = vrot.slane %v712_v13, %v7993_v28  ;;  %v1051_v33 = vrot.slane %v712_v13, %v8001_v31  ;;  %10622 = vst [vmem:[#allocation23_spill] sm:$0xff] %v8007_v34  ;;  %v1055_v35 = vrot.slane %v7956_v8, %v8001_v31  ;;  %s10481_s30 = smov 114   ;;  %s10477_s23 = smov 126  }
  0x2d   : > { %v580_v14 = vpack.c.bf16 %v576_v9, %v576_v9  ;;  %v7642_v17 = vld [vmem:[%s10616_s25] sm:$0xff]   ;;  %v1117_v36 = vrot.slane %v7956_v8, %v8007_v34  ;;  %10623 = vst [vmem:[#allocation24_spill] sm:$0xff] %v8015_v37  ;;  %v1113_v38 = vrot.slane %v712_v13, %v8007_v34  ;;  %v1175_v39 = vrot.slane %v712_v13, %v8015_v37  ;;  %s10483_s24 = smov 127   ;;  %s10485_s25 = smov 1  }
  0x2e   : > { %665 = vperm.xlu1 %6591, %v657_v4   ;;  %v592_v16 = vsel %vm590_vm0, %v579_v15, 0  ;;  %v1179_v40 = vrot.slane %v7956_v8, %v8015_v37  ;;  %v1241_v43 = vrot.slane %v8027_v41, %v7963_v12  ;;  %v1237_v44 = vrot.slane %v8032_v42, %v7963_v12  ;;  %s10653_s3 = smov 96   ;;  %s10655_s4 = smov 34  }
  0x2f   : > { %649 = vperm.xlu0 %6590, %v641_v5   ;;  %6454 = vmatprep.subr.msk.bf16.mxu0 %vm590_vm0, %v580_v14  ;;  %v1299_v45 = vrot.slane %v8032_v42, %v7973_v19  ;;  %v1303_v46 = vrot.slane %v8027_v41, %v7973_v19  ;;  %v1365_v47 = vrot.slane %v8027_v41, %v7979_v22  ;;  %vm10532_vm8 = vcmask 793600   ;;  %s10656_s20 = smov 32   ;;  %s10657_s2 = smov 30  }
  0x30   : > { %598 = vmatpush1.bf16.msra.mxu0 %v592_v16  ;;  %v1361_v48 = vrot.slane %v8032_v42, %v7979_v22  ;;  %v1423_v49 = vrot.slane %v8032_v42, %v7987_v25  ;;  %v1427_v50 = vrot.slane %v8027_v41, %v7987_v25  ;;  %v1509_v51 = vrot.slane %v8027_v41, %v8001_v31  ;;  %s10658_s0 = smov 33   ;;  %s10659_s14 = smov 17  }
  0x31   : > { %v1505_v52 = vrot.slane %v8032_v42, %v8001_v31  ;;  %v1565_v53 = vrot.slane %v8032_v42, %v8007_v34  ;;  %v1569_v54 = vrot.slane %v8027_v41, %v8007_v34  ;;  %v1629_v55 = vrot.slane %v8027_v41, %v8015_v37  ;;  %s10660_s27 = smov 31   ;;  %s10669_s28 = smov 16  }
  0x32   : > { %685 = vperm.xlu1 %6591, %v677_v7   ;;  %v1625_v56 = vrot.slane %v8032_v42, %v8015_v37  ;;  %v1685_v59 = vrot.slane %v716_v57, %v7963_v12  ;;  %v1689_v60 = vrot.slane %v717_v58, %v7963_v12  ;;  %v1749_v61 = vrot.slane %v717_v58, %v7973_v19 }
  0x33   : > { %680 = vperm.xlu0 %6590, %v676_v11   ;;  %6455 = vmatmul.mubr.msk.bf16.vlgmr.msra.gmra.mrb[0].mxu0 %vm10509_vm1, %v7642_v17  ;;  %v1745_v62 = vrot.slane %v716_v57, %v7973_v19  ;;  %v1805_v63 = vrot.slane %v716_v57, %v7979_v22  ;;  %v1809_v0 = vrot.slane %v717_v58, %v7979_v22  ;;  %vm1248_vm9 = vcmask 924672  }
  0x34   : > { %v1869_v1 = vrot.slane %v717_v58, %v7987_v25  ;;  %v1865_v2 = vrot.slane %v716_v57, %v7987_v25  ;;  %v1925_v4 = vrot.slane %v716_v57, %v7993_v28  ;;  %v1929_v5 = vrot.slane %v717_v58, %v7993_v28 }
  0x35   : > { %v1989_v6 = vrot.slane %v717_v58, %v8001_v31  ;;  %v1985_v7 = vrot.slane %v716_v57, %v8001_v31  ;;  %v2045_v8 = vrot.slane %v716_v57, %v8007_v34  ;;  %v2049_v9 = vrot.slane %v717_v58, %v8007_v34 }
  0x36   : > { %750 = vrot.lane.b32.xlu1 %v745_v18, %s10461_s26  ;;  %v2109_v10 = vrot.slane %v717_v58, %v8015_v37  ;;  %v2105_v11 = vrot.slane %v716_v57, %v8015_v37  ;;  %vm1062_vm10 = vcmask 900096   ;;  %vm10517_vm11 = vcmask 1031168  }
  0x37   : > { %748 = vrot.lane.b32.xlu0 %v741_v20, %s10461_s26  ;;  %s10479_s26 = smov 112   ;;  %vm1186_vm12 = vcmask 916480   ;;  %vm10512_vm14 = vcmask 932864   ;;  %vm1434_vm15 = vcmask 1039360   ;;  %vm1463_vm0 = vcmask 7168  }
  0x38   : > { %vm1401_vm1 = vcmask 15360  }
  0x3a   : > { %810 = vrot.lane.b32.xlu1 %v803_v21, %s10467_s19 }
  0x3b   : > { %812 = vrot.lane.b32.xlu0 %v807_v23, %s10467_s19  ;;  %s10516_s19 = smov 16  }
  0x3e   : > { %874 = vrot.lane.b32.xlu1 %v869_v24, %s10463_s29 }
  0x3f   : > { %872 = vrot.lane.b32.xlu0 %v865_v26, %s10463_s29  ;;  %s10473_s29 = smov 113  }
  0x42   : > { %934 = vrot.lane.b32.xlu1 %v927_v27, %s10471_s22 }
  0x43   : > { %936 = vrot.lane.b32.xlu0 %v931_v29, %s10471_s22  ;;  %s10525_s22 = smov 18  }
  0x46   : > { %998 = vrot.lane.b32.xlu1 %v993_v30, %s10465_s21 }
  0x47   : > { %996 = vrot.lane.b32.xlu0 %v989_v32, %s10465_s21  ;;  %s10522_s21 = smov 2  }
  0x4a   : > { %1058 = vrot.lane.b32.xlu1 %v1051_v33, %s10475_s1 }
  0x4b   : > { %1060 = vrot.lane.b32.xlu0 %v1055_v35, %s10475_s1  ;;  %s10511_s1 = smov 14  }
  0x4e   : > { %1122 = vrot.lane.b32.xlu1 %v1117_v36, %s10469_s18 }
  0x4f   : > { %1120 = vrot.lane.b32.xlu0 %v1113_v38, %s10469_s18  ;;  %s10538_s18 = smov 30  }
  0x52   : > { %1182 = vrot.lane.b32.xlu1 %v1175_v39, %s10479_s26 }
  0x53   : > { %1184 = vrot.lane.b32.xlu0 %v1179_v40, %s10479_s26  ;;  %s10533_s26 = smov 31  }
  0x56   : > { %1246 = vrot.lane.b32.xlu1 %v1241_v43, %s10473_s29 }
  0x57   : > { %1244 = vrot.lane.b32.xlu0 %v1237_v44, %s10473_s29  ;;  %s10536_s29 = smov 17  }
  0x5a   : > { %1306 = vrot.lane.b32.xlu1 %v1299_v45, %s10481_s30 }
  0x5b   : > { %1308 = vrot.lane.b32.xlu0 %v1303_v46, %s10481_s30  ;;  %s10540_s30 = smov 32  }
  0x5e   : > { %1370 = vrot.lane.b32.xlu1 %v1365_v47, %s10477_s23 }
  0x5f   : > { %1368 = vrot.lane.b32.xlu0 %v1361_v48, %s10477_s23  ;;  %s10531_s23 = smov 15  }
  0x62   : > { %1430 = vrot.lane.b32.xlu1 %v1423_v49, %s10483_s24 }
  0x63   : > { %1432 = vrot.lane.b32.xlu0 %v1427_v50, %s10483_s24  ;;  %s10508_s24 = smov 33  }
  0x66   : > { %1514 = vrot.lane.b32.xlu1 %v1509_v51, %s10485_s25 }
  0x67   : > { %1512 = vrot.lane.b32.xlu0 %v1505_v52, %s10485_s25  ;;  %s10542_s25 = smov 34  }
  0x6a   : > { %1572 = vrot.lane.b32.xlu1 %v1565_v53, %s10522_s21 }
  0x6b   : > { %1574 = vrot.lane.b32.xlu0 %v1569_v54, %s10522_s21 }
  0x6e   : > { %1634 = vrot.lane.b32.xlu1 %v1629_v55, %s10511_s1 }
  0x6f   : > { %1632 = vrot.lane.b32.xlu0 %v1625_v56, %s10511_s1 }
  0x72   : > { %1692 = vrot.lane.b32.xlu1 %v1685_v59, %s10531_s23 }
  0x73   : > { %1694 = vrot.lane.b32.xlu0 %v1689_v60, %s10531_s23 }
  0x76   : > { %1754 = vrot.lane.b32.xlu1 %v1749_v61, %s10516_s19 }
  0x77   : > { %1752 = vrot.lane.b32.xlu0 %v1745_v62, %s10516_s19 }
  0x7a   : > { %1812 = vrot.lane.b32.xlu1 %v1805_v63, %s10536_s29 }
  0x7b   : > { %1814 = vrot.lane.b32.xlu0 %v1809_v0, %s10536_s29 }
  0x7e   : > { %1874 = vrot.lane.b32.xlu1 %v1869_v1, %s10525_s22 }
  0x7f   : > { %1872 = vrot.lane.b32.xlu0 %v1865_v2, %s10525_s22 }
  0x82   : > { %1932 = vrot.lane.b32.xlu1 %v1925_v4, %s10538_s18 }
  0x83   : > { %1934 = vrot.lane.b32.xlu0 %v1929_v5, %s10538_s18 }
  0x86   : > { %1994 = vrot.lane.b32.xlu1 %v1989_v6, %s10533_s26 }
  0x87   : > { %1992 = vrot.lane.b32.xlu0 %v1985_v7, %s10533_s26 }
  0x8a   : > { %2052 = vrot.lane.b32.xlu1 %v2045_v8, %s10540_s30 }
  0x8b   : > { %2054 = vrot.lane.b32.xlu0 %v2049_v9, %s10540_s30 }
  0x8e   : > { %2114 = vrot.lane.b32.xlu1 %v2109_v10, %s10508_s24 }
  0x8f   : > { %2112 = vrot.lane.b32.xlu0 %v2105_v11, %s10508_s24 }
  0xa9   : > { %v8116_v13 = vpop.permute.xlu1 %660 }
  0xaa   : > { %v645_v14 = vpop.permute.xlu0 %644 }
  0xad   : > { %v8118_v15 = vpop.permute.xlu1 %665 }
  0xae   : > { %v8120_v16 = vpop.permute.xlu0 %649 }
  0xb1   : > { %v8122_v17 = vpop.permute.xlu1 %685 }
  0xb2   : > { %v8124_v18 = vpop.permute.xlu0 %680 }
  0xb5   : > { %v8126_v20 = vpop.permute.xlu1 %750 }
  0xb6   : > { %v749_v21 = vpop.permute.xlu0 %748 }
  0xb7   : > { %v8172_v60 = vsel %vm10510_vm3, %v749_v21, %v8126_v20  ;;  %v8176_v62 = vmul.f32 0.0, %v749_v21  ;;  %vm1091_vm3 = vcmask 146432  }
  0xb9   : > { %v811_v23 = vpop.permute.xlu1 %810 }
  0xba   : > { %v8128_v24 = vpop.permute.xlu0 %812 }
  0xbb   : > { %v8205_v11 = vsel %vm10513_vm6, %v811_v23, %v8128_v24  ;;  %vm967_vm6 = vcmask 252928  }
  0xbd   : > { %v8130_v26 = vpop.permute.xlu1 %874 }
  0xbe   : > { %v873_v27 = vpop.permute.xlu0 %872 }
  0xbf   : > { %v8184_v1 = vsel %vm10521_vm4, %v873_v27, %v8130_v26  ;;  %v8189_v5 = vmul.f32 0.0, %v873_v27  ;;  %vm843_vm4 = vcmask 269312  }
  0xc1   : > { %v8132_v29 = vpop.permute.xlu1 %934 }
  0xc2   : > { %v8134_v30 = vpop.permute.xlu0 %936  ;;  %v943_v3 = vmul.f32 0.0, %v8132_v29 }
  0xc5   : > { %v8136_v32 = vpop.permute.xlu1 %998 }
  0xc6   : > { %v997_v33 = vpop.permute.xlu0 %996 }
  0xc7   : > { %v8194_v6 = vsel %vm10524_vm5, %v997_v33, %v8136_v32  ;;  %vm1029_vm5 = vcmask 244736  }
  0xc9   : > { %v8138_v35 = vpop.permute.xlu1 %1058 }
  0xca   : > { %v8140_v36 = vpop.permute.xlu0 %1060  ;;  %v1067_v34 = vmul.f32 0.0, %v8138_v35 }
  0xcd   : > { %v8142_v38 = vpop.permute.xlu1 %1122 }
  0xce   : > { %v1121_v39 = vpop.permute.xlu0 %1120 }
  0xcf   : > { %v8209_v21 = vsel %vm10529_vm7, %v1121_v39, %v8142_v38 }
  0xd1   : > { %v8144_v40 = vpop.permute.xlu1 %1182 }
  0xd2   : > { %v8146_v43 = vpop.permute.xlu0 %1184  ;;  %v1191_v25 = vmul.f32 0.0, %v8144_v40 }
  0xd3   : > { %10626 = vst [vmem:[#allocation27_spill] sm:$0xff] %v8146_v43 }
  0xd5   : > { %v8148_v44 = vpop.permute.xlu1 %1246 }
  0xd6   : > { %v1245_v45 = vpop.permute.xlu0 %1244 }
  0xd9   : > { %v8150_v48 = vpop.permute.xlu1 %1306 }
  0xda   : > { %v8154_v50 = vpop.permute.xlu0 %1308 }
  0xdb   : > { %10627 = vst [vmem:[#allocation28_spill] sm:$0xff] %v8154_v50  ;;  %v8285_v19 = vsel %vm10512_vm14, %v8150_v48, %v8154_v50  ;;  %vm1277_vm14 = vcmask 121856  }
  0xdc   : > { %10631 = vst [vmem:[#allocation32_spill] sm:$0xff] %v8285_v19 }
  0xdd   : > { %v8159_v54 = vpop.permute.xlu1 %1370 }
  0xde   : > { %v8161_v55 = vpop.permute.xlu0 %1368 }
  0xe1   : > { %v8164_v57 = vpop.permute.xlu1 %1430 }
  0xe2   : > { %v8166_v58 = vpop.permute.xlu0 %1432 }
  0xe3   : > { %10628 = vst [vmem:[#allocation29_spill] sm:$0xff] %v8166_v58  ;;  %v8302_v42 = vsel %vm1434_vm15, %v8164_v57, %v8166_v58 }
  0xe4   : > { %10632 = vst [vmem:[#allocation33_spill] sm:$0xff] %v8302_v42 }
  0xe5   : > { %v8178_v63 = vpop.permute.xlu1 %1514 }
  0xe6   : > { %v8180_v0 = vpop.permute.xlu0 %1512 }
  0xe9   : > { %v8196_v7 = vpop.permute.xlu1 %1572 }
  0xea   : > { %v8198_v8 = vpop.permute.xlu0 %1574 }
 0x106   : > { %v631_v46 = vpop.f32.mrb[0].mxu0 }
 0x107   : > { %v633_v47 = vpop.f32.mrb[1].mxu0  ;;  %v652_v52 = vmul.f32 %v645_v14, %v631_v46  ;;  %v8211_v46 = vmul.f32 0.0, %v997_v33  ;;  %v8228_v33 = vsel %vm1248_vm9, %v1245_v45, %v8148_v44 }
 0x108   : > { %v8152_v49 = vpop.f32.mrb[2].mxu0  ;;  %v653_v27 = vmul.f32 %v645_v14, %v633_v47  ;;  %v8224_v14 = vsel %vm10532_vm8, %v8132_v29, %v8134_v30  ;;  %vm905_vm8 = vcmask 261120  }
 0x109   : > { %v8156_v51 = vpop.f32.mrb[3].mxu0  ;;  %v668_v53 = vadd.f32 %v8116_v13, %v652_v52 }
 0x10a   : > { %v669_v47 = vadd.f32 %v8116_v13, %v653_v27  ;;  %v8244_v13 = vmul.f32 0.0, %v1245_v45 }
 0x10b   : > { %v688_v56 = vmul.f32 %v8124_v18, %v668_v53  ;;  %vm672_vm2 = vcmp.ge.f32.partialorder %v668_v53, 0.0 }
 0x10c   : > { %v689_v37 = vmul.f32 %v8124_v18, %v669_v47  ;;  %vm673_vm13 = vcmp.ge.f32.partialorder %v669_v47, 0.0 }
 0x10d   : > { %v8168_v59 = vsel %vm672_vm2, %v668_v53, %v688_v56  ;;  %v819_v53 = vmul.f32 0.0, %v811_v23  ;;  %v8216_v56 = vmul.f32 0.0, %v1121_v39  ;;  %v8231_v23 = vpop.permute.xlu1 %1634  ;;  %v8233_v39 = vpop.permute.xlu0 %1632  ;;  %vm1339_vm2 = vcmask 113664  }
 0x10e   : > { %10629 = vst [vmem:[#allocation30_spill] sm:$0xff] %v8168_v59  ;;  %v758_v61 = vmul.f32 %v8172_v60, %v8168_v59  ;;  %v882_v2 = vmul.f32 %v8184_v1, %v8168_v59  ;;  %v1006_v9 = vmul.f32 %v8194_v6, %v8168_v59  ;;  %v820_v52 = vmul.f32 %v8205_v11, %v8168_v59 }
 0x10f   : > { %v1254_v27 = vmul.f32 %v8228_v33, %v8168_v59 }
 0x110   : > { %v6592_v4 = vpack.i.bf16 %v758_v61, %v8176_v62  ;;  %v6602_v10 = vpack.i.bf16 %v882_v2, %v8189_v5  ;;  %v1130_v61 = vmul.f32 %v8209_v21, %v8168_v59  ;;  %v6612_v2 = vpack.i.bf16 %v1006_v9, %v8211_v46 }
 0x111   : > { %v944_v9 = vmul.f32 %v8224_v14, %v8168_v59  ;;  %v8268_v31 = vpop.permute.xlu1 %1692  ;;  %v8270_v18 = vpop.permute.xlu0 %1694 }
 0x112   : > { %6593 = vrot.lane.b32.xlu0 %v6592_v4, %s10542_s25  ;;  %v6597_v4 = vpack.i.bf16 %v820_v52, %v819_v53  ;;  %v6622_v52 = vpack.i.bf16 %v1130_v61, %v8216_v56  ;;  %v8263_v61 = vsel %vm1186_vm12, %v8144_v40, %v8146_v43  ;;  %v1315_v40 = vmul.f32 0.0, %v8150_v48 }
 0x113   : > { %v6607_v29 = vpack.i.bf16 %v944_v9, %v943_v3  ;;  %v6632_v9 = vpack.i.bf16 %v1254_v27, %v8244_v13 }
 0x114   : > { %6598 = vrot.lane.b32.xlu1 %v6597_v4, %s10508_s24  ;;  %v8266_v4 = vmul.f32 0.0, %v8161_v55 }
 0x115   : > { %v8294_v27 = vpop.permute.xlu0 %1752 }
 0x116   : > { %6603 = vrot.lane.b32.xlu0 %v6602_v10, %s10540_s30  ;;  %v8241_v10 = vsel %vm1062_vm10, %v8138_v35, %v8140_v36 }
 0x117   : > { %v1068_v45 = vmul.f32 %v8241_v10, %v8168_v59 }
 0x118   : > { %6608 = vrot.lane.b32.xlu1 %v6607_v29, %s10533_s26 }
 0x119   : > { %v6617_v22 = vpack.i.bf16 %v1068_v45, %v1067_v34  ;;  %v8313_v28 = vpop.permute.xlu0 %1814 }
 0x11a   : > { %6613 = vrot.lane.b32.xlu0 %v6612_v2, %s10538_s18  ;;  %v8253_v2 = vsel %vm10517_vm11, %v8161_v55, %v8159_v54  ;;  %v1192_v55 = vmul.f32 %v8263_v61, %v8168_v59  ;;  %vm1153_vm11 = vcmask 138240  }
 0x11b   : > { %v1378_v35 = vmul.f32 %v8253_v2, %v8168_v59 }
 0x11c   : > { %6618 = vrot.lane.b32.xlu1 %v6617_v22, %s10525_s22  ;;  %v6627_v45 = vpack.i.bf16 %v1192_v55, %v1191_v25  ;;  %v1440_v55 = vmul.f32 %v8302_v42, %v8168_v59 }
 0x11e   : > { %6623 = vrot.lane.b32.xlu0 %v6622_v52, %s10536_s29  ;;  %v8276_v52 = vsel %vm673_vm13, %v669_v47, %v689_v37  ;;  %v6642_v37 = vpack.i.bf16 %v1378_v35, %v8266_v4  ;;  %v8292_v47 = vpop.permute.xlu1 %1754  ;;  %v1439_v35 = vmul.f32 0.0, %v8164_v57  ;;  %vm1215_vm13 = vcmask 130048  }
 0x11f   : > { %10630 = vst [vmem:[#allocation31_spill] sm:$0xff] %v8276_v52  ;;  %v821_v29 = vmul.f32 %v8128_v24, %v8276_v52  ;;  %v945_v22 = vmul.f32 %v8134_v30, %v8276_v52  ;;  %v1069_v12 = vmul.f32 %v8140_v36, %v8276_v52 }
 0x120   : > { %6628 = vrot.lane.b32.xlu1 %v6627_v45, %s10516_s19  ;;  %v6647_v57 = vpack.i.bf16 %v1440_v55, %v1439_v35 }
 0x121   : > { %v6657_v48 = vpack.i.bf16 %v819_v53, %v821_v29  ;;  %v759_v53 = vmul.f32 %v8126_v20, %v8276_v52  ;;  %v1193_v29 = vmul.f32 %v8146_v43, %v8276_v52  ;;  %v6677_v45 = vpack.i.bf16 %v1067_v34, %v1069_v12 }
 0x122   : > { %6633 = vrot.lane.b32.xlu0 %v6632_v9, %s10531_s23  ;;  %v1316_v9 = vmul.f32 %v8285_v19, %v8168_v59  ;;  %v6667_v19 = vpack.i.bf16 %v943_v3, %v945_v22  ;;  %v1007_v12 = vmul.f32 %v8136_v32, %v8276_v52 }
 0x123   : > { %v6652_v3 = vpack.i.bf16 %v8176_v62, %v759_v53  ;;  %v6687_v22 = vpack.i.bf16 %v1191_v25, %v1193_v29  ;;  %v1441_v62 = vmul.f32 %v8166_v58, %v8276_v52  ;;  %v8349_v25 = vsel %vm1463_vm0, %v8180_v0, %v8178_v63 }
 0x124   : > { %v6637_v41 = vpack.i.bf16 %v1316_v9, %v1315_v40  ;;  %10634 = vst [vmem:[#allocation34_spill] sm:$0xff] %v8349_v25  ;;  %v6672_v29 = vpack.i.bf16 %v8211_v46, %v1007_v12  ;;  %v1580_v58 = vmul.f32 %v8196_v7, %v8168_v59 }
 0x126   : > { %6643 = vrot.lane.b32.xlu0 %v6642_v37, %s10522_s21  ;;  %v8311_v37 = vpop.permute.xlu1 %1812  ;;  %6638 = vrot.lane.b32.xlu1 %v6637_v41, %s10511_s1  ;;  %v883_v41 = vmul.f32 %v8130_v26, %v8276_v52 }
 0x128   : > { %v6662_v34 = vpack.i.bf16 %v8189_v5, %v883_v41  ;;  %v1131_v5 = vmul.f32 %v8142_v38, %v8276_v52  ;;  %v6707_v41 = vpack.i.bf16 %v1439_v35, %v1441_v62  ;;  %v1640_v35 = vmul.f32 %v8233_v39, %v8168_v59 }
 0x12a   : > { %6658 = vrot.lane.b32.xlu0 %v6657_v48, %s10508_s24  ;;  %s10633_s24 = smov 1   ;;  %v8324_v9 = vpop.permute.xlu1 %1874  ;;  %v8326_v48 = vpop.permute.xlu0 %1872  ;;  %v6682_v12 = vpack.i.bf16 %v8216_v56, %v1131_v5  ;;  %v1379_v56 = vmul.f32 %v8159_v54, %v8276_v52 }
 0x12b   : > { %6648 = vrot.lane.b32.xlu1 %v6647_v57, %s10633_s24 }
 0x12e   : > { %6668 = vrot.lane.b32.xlu0 %v6667_v19, %s10533_s26  ;;  %v1317_v19 = vmul.f32 %v8154_v50, %v8276_v52  ;;  %v8339_v55 = vpop.permute.xlu1 %1932  ;;  %v8341_v57 = vpop.permute.xlu0 %1934  ;;  %s10647_s26 = smov 113  }
 0x12f   : > { %6653 = vrot.lane.b32.xlu1 %v6652_v3, %s10542_s25  ;;  %v8363_v3 = vsel %vm1339_vm2, %v8233_v39, %v8231_v23  ;;  %s10652_s25 = smov 98  }
 0x130   : > { %v6697_v53 = vpack.i.bf16 %v1315_v40, %v1317_v19  ;;  %v1521_v40 = vmul.f32 %v8349_v25, %v8276_v52  ;;  %10635 = vst [vmem:[#allocation35_spill] sm:$0xff] %v8363_v3  ;;  %v1641_v62 = vmul.f32 %v8363_v3, %v8276_v52 }
 0x132   : > { %6678 = vrot.lane.b32.xlu0 %v6677_v45, %s10525_s22  ;;  %v1520_v45 = vmul.f32 %v8180_v0, %v8168_v59  ;;  %v8365_v19 = vpop.permute.xlu1 %1994  ;;  %v8367_v46 = vpop.permute.xlu0 %1992  ;;  %s10645_s22 = smov 126  }
 0x133   : > { %6663 = vrot.lane.b32.xlu1 %v6662_v34, %s10540_s30  ;;  %s10651_s30 = smov 95  }
 0x134   : > { %v6712_v34 = vpack.i.bf16 %v1521_v40, %v1520_v45  ;;  %v1760_v45 = vmul.f32 %v8294_v27, %v8168_v59 }
 0x136   : > { %6688 = vrot.lane.b32.xlu0 %v6687_v22, %s10516_s19  ;;  %v1255_v22 = vmul.f32 %v8148_v44, %v8276_v52  ;;  %v8396_v40 = vpop.permute.xlu0 %2054  ;;  %s10640_s19 = smov 114  }
 0x137   : > { %6673 = vrot.lane.b32.xlu1 %v6672_v29, %s10538_s18  ;;  %v8390_v29 = vsel %vm1401_vm1, %v8196_v7, %v8198_v8  ;;  %s10650_s18 = smov 111  }
 0x138   : > { %v6692_v5 = vpack.i.bf16 %v8244_v13, %v1255_v22  ;;  %10638 = vst [vmem:[#allocation37_spill] sm:$0xff] %v8390_v29  ;;  %v8404_v22 = vsel %vm1091_vm3, %v8326_v48, %v8324_v9  ;;  %v1581_v42 = vmul.f32 %v8390_v29, %v8276_v52 }
 0x139   : > { %10639 = vst [vmem:[#allocation38_spill] sm:$0xff] %v8404_v22 }
 0x13a   : > { %6698 = vrot.lane.b32.xlu0 %v6697_v53, %s10511_s1  ;;  %v8381_v53 = vsel %vm1215_vm13, %v8294_v27, %v8292_v47  ;;  %s10637_s1 = smov 127  }
 0x13b   : > { %6683 = vrot.lane.b32.xlu1 %v6682_v12, %s10536_s29  ;;  %10636 = vst [vmem:[#allocation36_spill] sm:$0xff] %v8381_v53  ;;  %v6722_v12 = vpack.i.bf16 %v1641_v62, %v1640_v35  ;;  %v1761_v13 = vmul.f32 %v8381_v53, %v8276_v52  ;;  %v6702_v35 = vpack.i.bf16 %v8266_v4, %v1379_v56  ;;  %s10649_s29 = smov 97  }
 0x13c   : > { %v8417_v62 = vsel %vm1277_vm14, %v8268_v31, %v8270_v18  ;;  %v1881_v53 = vmul.f32 %v8404_v22, %v8276_v52  ;;  %v8427_v4 = vsel %vm967_vm6, %v8367_v46, %v8365_v19 }
 0x13d   : > { %10641 = vst [vmem:[#allocation39_spill] sm:$0xff] %v8417_v62  ;;  %10642 = vst [vmem:[#allocation40_spill] sm:$0xff] %v8427_v4  ;;  %v1701_v29 = vmul.f32 %v8417_v62, %v8276_v52  ;;  %v2001_v22 = vmul.f32 %v8427_v4, %v8276_v52 }
 0x13e   : > { %6708 = vrot.lane.b32.xlu0 %v6707_v41, %s10633_s24  ;;  %v8394_v41 = vpop.permute.xlu1 %2052 }
 0x13f   : > { %6693 = vrot.lane.b32.xlu1 %v6692_v5, %s10531_s23  ;;  %v6732_v5 = vpack.i.bf16 %v1761_v13, %v1760_v45  ;;  %v8436_v45 = vpop.permute.xlu0 %2112  ;;  %v6717_v13 = vpack.i.bf16 %v1581_v42, %v1580_v58  ;;  %v1820_v58 = vmul.f32 %v8311_v37, %v8168_v59  ;;  %s10646_s23 = smov 110   ;;  %v8480_v43 = vsel %vm905_vm8, %v8394_v41, %v8396_v40 }
 0x142   : > { %6713 = vrot.lane.b32.xlu0 %v6712_v34, %s10637_s1  ;;  %v654_v34 = vmul.f32 %v8120_v16, %v8152_v49  ;;  %v1880_v49 = vmul.f32 %v8326_v48, %v8168_v59  ;;  %v8434_v3 = vpop.permute.xlu1 %2114 }
 0x143   : > { %6703 = vrot.lane.b32.xlu1 %v6702_v35, %s10522_s21  ;;  %s10643_s21 = smov 112   ;;  %v8442_v35 = vsel %vm1153_vm11, %v8311_v37, %v8313_v28  ;;  %v8453_v42 = vsel %vm843_vm4, %v8436_v45, %v8434_v3 }
 0x144   : > { %v670_v56 = vadd.f32 %v8118_v15, %v654_v34  ;;  %10644 = vst [vmem:[#allocation41_spill] sm:$0xff] %v8442_v35  ;;  %v2000_v34 = vmul.f32 %v8367_v46, %v8168_v59  ;;  %v6742_v62 = vpack.i.bf16 %v1881_v53, %v1880_v49  ;;  %v8463_v53 = vsel %vm1029_vm5, %v8339_v55, %v8341_v57 }
 0x145   : > { %v2120_v49 = vmul.f32 %v8436_v45, %v8168_v59  ;;  %v2121_v4 = vmul.f32 %v8453_v42, %v8276_v52 }
 0x146   : > { %6723 = vrot.lane.b32.xlu0 %v6722_v12, %s10640_s19  ;;  %v1700_v12 = vmul.f32 %v8268_v31, %v8168_v59  ;;  %v690_v50 = vmul.f32 %v8122_v17, %v670_v56  ;;  %vm674_vm7 = vcmp.ge.f32.partialorder %v670_v56, 0.0 }
 0x147   : > { %6718 = vrot.lane.b32.xlu1 %v6717_v13, %s10645_s22  ;;  %v6752_v13 = vpack.i.bf16 %v2001_v22, %v2000_v34  ;;  %v6762_v22 = vpack.i.bf16 %v2121_v4, %v2120_v49  ;;  %v2061_v34 = vmul.f32 %v8480_v43, %v8276_v52  ;;  %v655_v4 = vmul.f32 %v8120_v16, %v8156_v51 }
 0x148   : > { %v6727_v25 = vpack.i.bf16 %v1701_v29, %v1700_v12  ;;  %v1940_v29 = vmul.f32 %v8339_v55, %v8168_v59  ;;  %v8503_v49 = vmul.f32 0.0, %v8178_v63  ;;  %v8517_v51 = vmul.f32 0.0, %v8231_v23 }
 0x149   : > { %v671_v16 = vadd.f32 %v8118_v15, %v655_v4 }
 0x14a   : > { %6733 = vrot.lane.b32.xlu0 %v6732_v5, %s10643_s21  ;;  %v1821_v5 = vmul.f32 %v8442_v35, %v8276_v52  ;;  %v8470_v35 = vsel %vm674_vm7, %v670_v56, %v690_v50  ;;  %v2060_v56 = vmul.f32 %v8394_v41, %v8168_v59 }
 0x14b   : > { %6728 = vrot.lane.b32.xlu1 %v6727_v25, %s10647_s26  ;;  %10648 = vst [vmem:[#allocation42_spill] sm:$0xff] %v8470_v35  ;;  %v8483_v25 = vmul.f32 0.0, %v8198_v8  ;;  %v1583_v50 = vmul.f32 %v8196_v7, %v8470_v35  ;;  %v1703_v8 = vmul.f32 %v8268_v31, %v8470_v35  ;;  %v1823_v31 = vmul.f32 %v8311_v37, %v8470_v35 }
 0x14c   : > { %v6737_v12 = vpack.i.bf16 %v1821_v5, %v1820_v58  ;;  %v8494_v5 = vmul.f32 0.0, %v8270_v18  ;;  %v8509_v18 = vmul.f32 0.0, %v8313_v28  ;;  %v1643_v63 = vmul.f32 %v8233_v39, %v8470_v35 }
 0x14d   : > { %v6772_v7 = vpack.i.bf16 %v1583_v50, %v8483_v25  ;;  %v8524_v28 = vmul.f32 0.0, %v8341_v57  ;;  %v1943_v37 = vmul.f32 %v8339_v55, %v8470_v35  ;;  %v691_v23 = vmul.f32 %v8122_v17, %v671_v16 }
 0x14e   : > { %6743 = vrot.lane.b32.xlu0 %v6742_v62, %s10646_s23  ;;  %v1941_v62 = vmul.f32 %v8463_v53, %v8276_v52  ;;  %v6792_v15 = vpack.i.bf16 %v1823_v31, %v8509_v18  ;;  %v1763_v39 = vmul.f32 %v8294_v27, %v8470_v35  ;;  %vm675_vm7 = vcmp.ge.f32.partialorder %v671_v16, 0.0 }
 0x14f   : > { %6738 = vrot.lane.b32.xlu1 %v6737_v12, %s10650_s18  ;;  %v8532_v12 = vmul.f32 0.0, %v8292_v47  ;;  %v6777_v50 = vpack.i.bf16 %v1643_v63, %v8517_v51  ;;  %v2063_v55 = vmul.f32 %v8394_v41, %v8470_v35  ;;  %v8541_v57 = vmul.f32 0.0, %v8396_v40 }
 0x150   : > { %v6747_v58 = vpack.i.bf16 %v1941_v62, %v1940_v29  ;;  %v6757_v29 = vpack.i.bf16 %v2061_v34, %v2060_v56  ;;  %v6782_v62 = vpack.i.bf16 %v1703_v8, %v8494_v5  ;;  %v6802_v17 = vpack.i.bf16 %v1943_v37, %v8524_v28 }
 0x151   : > { %v8545_v47 = vsel %vm675_vm7, %v671_v16, %v691_v23  ;;  %v1883_v27 = vmul.f32 %v8326_v48, %v8470_v35  ;;  %v6787_v56 = vpack.i.bf16 %v1763_v39, %v8532_v12  ;;  %v761_v41 = vmul.f32 %v8172_v60, %v8470_v35 }
 0x152   : > { %6753 = vrot.lane.b32.xlu0 %v6752_v13, %s10649_s29  ;;  %v1523_v13 = vmul.f32 %v8180_v0, %v8470_v35  ;;  %10654 = vst [vmem:[#allocation43_spill] sm:$0xff] %v8545_v47  ;;  %v762_v40 = vmul.f32 %v8126_v20, %v8545_v47  ;;  %v6812_v34 = vpack.i.bf16 %v2063_v55, %v8541_v57  ;;  %vm781_vm7 = vcmask 277504  }
 0x153   : > { %6748 = vrot.lane.b32.xlu1 %v6747_v58, %s10652_s25  ;;  %v2003_v48 = vmul.f32 %v8367_v46, %v8470_v35  ;;  %v885_v60 = vmul.f32 %v8184_v1, %v8470_v35  ;;  %v886_v20 = vmul.f32 %v8130_v26, %v8545_v47  ;;  %v1009_v4 = vmul.f32 %v8194_v6, %v8470_v35 }
 0x154   : > { %v6767_v0 = vpack.i.bf16 %v1523_v13, %v8503_v49  ;;  %v6822_v8 = vpack.i.bf16 %v762_v40, %v761_v41  ;;  %v1010_v1 = vmul.f32 %v8136_v32, %v8545_v47  ;;  %v824_v13 = vmul.f32 %v8128_v24, %v8545_v47  ;;  %v10670_v40 = vld [vmem:[#allocation33_spill] sm:$0xff] }
 0x155   : > { %v6832_v26 = vpack.i.bf16 %v886_v20, %v885_v60  ;;  %v1134_v6 = vmul.f32 %v8142_v38, %v8545_v47  ;;  %v947_v31 = vmul.f32 %v8224_v14, %v8470_v35  ;;  %v1071_v38 = vmul.f32 %v8241_v10, %v8470_v35  ;;  %v10661_v10 = vld [vmem:[#allocation27_spill] sm:$0xff]  ;;  %v10672_v20 = vld [vmem:[#allocation36_spill] sm:$0xff] }
 0x156   : > { %6763 = vrot.lane.b32.xlu0 %v6762_v22, %s10651_s30  ;;  %v8548_v22 = vmul.f32 0.0, %v8324_v9  ;;  %v8561_v9 = vmul.f32 0.0, %v8365_v19  ;;  %v2123_v19 = vmul.f32 %v8436_v45, %v8470_v35  ;;  %v6842_v32 = vpack.i.bf16 %v1010_v1, %v1009_v4 }
 0x157   : > { %6758 = vrot.lane.b32.xlu1 %v6757_v29, %s10653_s3  ;;  %v1133_v29 = vmul.f32 %v8209_v21, %v8470_v35  ;;  %v1258_v21 = vmul.f32 %v8148_v44, %v8545_v47  ;;  %v1072_v14 = vmul.f32 %v8140_v36, %v8545_v47  ;;  %v1195_v44 = vmul.f32 %v8263_v61, %v8470_v35  ;;  %v10663_v36 = vld [vmem:[#allocation34_spill] sm:$0xff]  ;;  %v10668_v61 = vld [vmem:[#allocation35_spill] sm:$0xff] }
 0x158   : > { %v6797_v58 = vpack.i.bf16 %v1883_v27, %v8548_v22  ;;  %v6807_v46 = vpack.i.bf16 %v2003_v48, %v8561_v9  ;;  %v1196_v37 = vmul.f32 %v10661_v10, %v8545_v47  ;;  %v1524_v23 = vmul.f32 %v10663_v36, %v8545_v47  ;;  %v10671_v48 = vld [vmem:[#allocation29_spill] sm:$0xff] }
 0x159   : > { %v6852_v16 = vpack.i.bf16 %v1134_v6, %v1133_v29  ;;  %v1644_v27 = vmul.f32 %v10668_v61, %v8545_v47  ;;  %v10676_v29 = vld [vmem:[#allocation39_spill] sm:$0xff] }
 0x15a   : > { %6773 = vrot.lane.b32.xlu0 %v6772_v7, %s10645_s22  ;;  %v8573_v7 = vmul.f32 0.0, %v8434_v3  ;;  %v823_v3 = vmul.f32 %v8205_v11, %v8470_v35  ;;  %v948_v11 = vmul.f32 %v8134_v30, %v8545_v47  ;;  %v1381_v30 = vmul.f32 %v8253_v2, %v8470_v35 }
 0x15b   : > { %6768 = vrot.lane.b32.xlu1 %v6767_v0, %s10637_s1  ;;  %v6882_v41 = vpack.i.bf16 %v8503_v49, %v1524_v23  ;;  %v10674_v49 = vld [vmem:[#allocation37_spill] sm:$0xff]  ;;  %v1704_v6 = vmul.f32 %v10676_v29, %v8545_v47 }
 0x15c   : > { %v6817_v45 = vpack.i.bf16 %v2123_v19, %v8573_v7  ;;  %v6827_v24 = vpack.i.bf16 %v824_v13, %v823_v3  ;;  %v6837_v63 = vpack.i.bf16 %v948_v11, %v947_v31  ;;  %v1584_v4 = vmul.f32 %v10674_v49, %v8545_v47  ;;  %v10677_v31 = vld [vmem:[#allocation40_spill] sm:$0xff] }
 0x15d   : > { %v2004_v11 = vmul.f32 %v10677_v31, %v8545_v47  ;;  %v10686_v31 = vld [vmem:[#allocation21_spill] sm:$0xff] }
 0x15e   : > { %6783 = vrot.lane.b32.xlu0 %v6782_v62, %s10647_s26  ;;  %v1257_v62 = vmul.f32 %v8228_v33, %v8470_v35  ;;  %v1382_v33 = vmul.f32 %v8159_v54, %v8545_v47  ;;  %v10665_v54 = vld [vmem:[#allocation32_spill] sm:$0xff] }
 0x15f   : > { %6778 = vrot.lane.b32.xlu1 %v6777_v50, %s10640_s19  ;;  %v1319_v2 = vmul.f32 %v10665_v54, %v8470_v35  ;;  %v10666_v50 = vld [vmem:[#allocation28_spill] sm:$0xff] }
 0x160   : > { %v6862_v0 = vpack.i.bf16 %v1258_v21, %v1257_v62  ;;  %v6872_v39 = vpack.i.bf16 %v1382_v33, %v1381_v30  ;;  %v1320_v55 = vmul.f32 %v10666_v50, %v8545_v47 }
 0x162   : > { %6793 = vrot.lane.b32.xlu0 %v6792_v15, %s10650_s18  ;;  %v6847_v15 = vpack.i.bf16 %v1072_v14, %v1071_v38  ;;  %v6867_v60 = vpack.i.bf16 %v1320_v55, %v1319_v2 }
 0x163   : > { %6788 = vrot.lane.b32.xlu1 %v6787_v56, %s10643_s21 }
 0x166   : > { %6803 = vrot.lane.b32.xlu0 %v6802_v17, %s10652_s25  ;;  %v6857_v17 = vpack.i.bf16 %v1196_v37, %v1195_v44  ;;  %v10679_v44 = vld [vmem:[#allocation17_spill] sm:$0xff] }
 0x167   : > { %6798 = vrot.lane.b32.xlu1 %v6797_v58, %s10646_s23  ;;  %v1444_v58 = vmul.f32 %v10671_v48, %v8545_v47 }
 0x16a   : > { %6813 = vrot.lane.b32.xlu0 %v6812_v34, %s10653_s3  ;;  %v1443_v34 = vmul.f32 %v10670_v40, %v8470_v35 }
 0x16b   : > { %6808 = vrot.lane.b32.xlu1 %v6807_v46, %s10649_s29  ;;  %v6892_v46 = vpack.i.bf16 %v8517_v51, %v1644_v27  ;;  %v6887_v51 = vpack.i.bf16 %v8483_v25, %v1584_v4  ;;  %v2124_v25 = vmul.f32 %v8453_v42, %v8545_v47 }
 0x16c   : > { %v6877_v1 = vpack.i.bf16 %v1444_v58, %v1443_v34 }
 0x16e   : > { %6823 = vrot.lane.b32.xlu0 %v6822_v8, %s10655_s4  ;;  %v1764_v8 = vmul.f32 %v10672_v20, %v8545_v47 }
 0x16f   : > { %6818 = vrot.lane.b32.xlu1 %v6817_v45, %s10651_s30 }
 0x170   : > { %v6902_v45 = vpack.i.bf16 %v8532_v12, %v1764_v8  ;;  %v10678_v12 = vld [vmem:[#allocation41_spill] sm:$0xff] }
 0x171   : > { %v1824_v21 = vmul.f32 %v10678_v12, %v8545_v47  ;;  %v10688_v12 = vld [vmem:[#allocation26_spill] sm:$0xff] }
 0x172   : > { %6833 = vrot.lane.b32.xlu0 %v6832_v26, %s10656_s20  ;;  %v10675_v26 = vld [vmem:[#allocation38_spill] sm:$0xff] }
 0x173   : > { %6828 = vrot.lane.b32.xlu1 %v6827_v24, %s10658_s0  ;;  %s10662_s0 = smov 15   ;;  %v1884_v3 = vmul.f32 %v10675_v26, %v8545_v47  ;;  %v6907_v30 = vpack.i.bf16 %v8509_v18, %v1824_v21  ;;  %v1483_v21 = vrot.slane %v10688_v12, %v10686_v31 }
 0x175   : > { %v6912_v62 = vpack.i.bf16 %v8548_v22, %v1884_v3  ;;  %v1944_v22 = vmul.f32 %v8463_v53, %v8545_v47  ;;  %v2064_v53 = vmul.f32 %v8480_v43, %v8545_v47 }
 0x176   : > { %6843 = vrot.lane.b32.xlu0 %v6842_v32, %s10657_s2 }
 0x177   : > { %6838 = vrot.lane.b32.xlu1 %v6837_v63, %s10660_s27  ;;  %s10667_s27 = smov 2   ;;  %v6922_v63 = vpack.i.bf16 %v8561_v9, %v2004_v11  ;;  %v6932_v9 = vpack.i.bf16 %v8573_v7, %v2124_v25  ;;  %v6917_v18 = vpack.i.bf16 %v8524_v28, %v1944_v22  ;;  %v8707_v7 = vld [vmem:[%s10442_s8 + $0x30] sm:$0xff]  ;;  %v6927_v43 = vpack.i.bf16 %v8541_v57, %v2064_v53  ;;  %v10687_v11 = vld [vmem:[#allocation25_spill] sm:$0xff] }
 0x178   : > { %10680 = vst [vmem:[#allocation27_spill] sm:$0xff] %v8707_v7  ;;  %v2165_v28 = vrot.slane %v8707_v7, %v10679_v44 }
 0x17a   : > { %6853 = vrot.lane.b32.xlu0 %v6852_v16, %s10659_s14  ;;  %s10664_s14 = smov 18   ;;  %v6897_v16 = vpack.i.bf16 %v8494_v5, %v1704_v6  ;;  %v8687_v5 = vld [vmem:[%s10442_s8 + $0x38] sm:$0xff] }
 0x17b   : > { %6848 = vrot.lane.b32.xlu1 %v6847_v15, %s10664_s14  ;;  %v2169_v10 = vrot.slane %v8687_v5, %v10679_v44  ;;  %s10590_s14 = smov 68  }
 0x17e   : > { %6863 = vrot.lane.b32.xlu0 %v6862_v0, %s10662_s0  ;;  %s10673_s0 = smov 14  }
 0x17f   : > { %6858 = vrot.lane.b32.xlu1 %v6857_v17, %s10669_s28  ;;  %s7772_s28 = smov 66  }
 0x182   : > { %6873 = vrot.lane.b32.xlu0 %v6872_v39, %s10667_s27 }
 0x183   : > { %6868 = vrot.lane.b32.xlu1 %v6867_v60, %s10673_s0  ;;  %s7771_s0 = smov 62  }
 0x184   : > { %v8631_v56 = vpop.permute.xlu0 %6593 }
 0x185   : > { %v6596_v22 = vunpack.i.h.bf16 %v8631_v56 }
 0x186   : > { %6883 = vrot.lane.b32.xlu0 %v6882_v41, %s10637_s1  ;;  %v8657_v32 = vpop.permute.xlu1 %6598  ;;  %s10588_s1 = smov 124  }
 0x187   : > { %6878 = vrot.lane.b32.xlu1 %v6877_v1, %s10633_s24 }
 0x188   : > { %v8642_v19 = vpop.permute.xlu0 %6603 }
 0x189   : > { %v6605_v53 = vunpack.i.l.bf16 %v8642_v19 }
 0x18a   : > { %6893 = vrot.lane.b32.xlu0 %v6892_v46, %s10640_s19  ;;  %v8669_v38 = vpop.permute.xlu1 %6608 }
 0x18b   : > { %6888 = vrot.lane.b32.xlu1 %v6887_v51, %s10645_s22 }
 0x18c   : > { %v8651_v13 = vpop.permute.xlu0 %6613 }
 0x18e   : > { %6903 = vrot.lane.b32.xlu0 %v6902_v45, %s10643_s21  ;;  %v8681_v33 = vpop.permute.xlu1 %6618  ;;  %s7773_s21 = smov 64  }
 0x18f   : > { %6898 = vrot.lane.b32.xlu1 %v6897_v16, %s10647_s26  ;;  %s10586_s26 = smov 100  }
 0x190   : > { %v8663_v24 = vpop.permute.xlu0 %6623 }
 0x192   : > { %6913 = vrot.lane.b32.xlu0 %v6912_v62, %s10646_s23  ;;  %v8696_v0 = vpop.permute.xlu1 %6628  ;;  %v1487_v62 = vrot.slane %v10687_v11, %v10686_v31  ;;  %v6600_v31 = vunpack.i.l.bf16 %v8657_v32  ;;  %v6615_v11 = vunpack.i.l.bf16 %v8651_v13  ;;  %s7769_s23 = smov 60  }
 0x193   : > { %6908 = vrot.lane.b32.xlu1 %v6907_v30, %s10650_s18  ;;  %v6595_v30 = vunpack.i.l.bf16 %v8631_v56  ;;  %s7775_s18 = smov 36  }
 0x194   : > { %v8675_v14 = vpop.permute.xlu0 %6633  ;;  %v8782_v25 = vmul.f32 %v1487_v62, %v8545_v47 }
 0x195   : > { %v782_v12 = vsel %vm781_vm7, %v6595_v30, %v6596_v22 }
 0x196   : > { %6923 = vrot.lane.b32.xlu0 %v6922_v63, %s10649_s29  ;;  %10689 = vst [vmem:[#allocation29_spill] sm:$0xff] %v8782_v25  ;;  %v8785_v63 = vmul.f32 %v1483_v21, %v8470_v35  ;;  %s10584_s29 = smov 92  }
 0x197   : > { %6918 = vrot.lane.b32.xlu1 %v6917_v18, %s10652_s25 }
 0x198   : > { %v8690_v42 = vpop.permute.xlu0 %6643  ;;  %v8710_v15 = vpop.permute.xlu1 %6638  ;;  %10690 = vst [vmem:[#allocation36_spill] sm:$0xff] %v8785_v63 }
 0x199   : > { %v10576_v35 = vunpack.i.h.bf16 %v8690_v42 }
 0x19a   : > { %6933 = vrot.lane.b32.xlu0 %v6932_v9, %s10651_s30  ;;  %v10560_v9 = vunpack.i.h.bf16 %v8642_v19  ;;  %s10753_s30 = smov 94  }
 0x19b   : > { %6928 = vrot.lane.b32.xlu1 %v6927_v43, %s10653_s3  ;;  %v8797_v43 = vmul.f32 %v1483_v21, %v8168_v59  ;;  %v6601_v21 = vunpack.i.h.bf16 %v8657_v32 }
 0x19c   : > { %v8702_v37 = vpop.permute.xlu0 %6658  ;;  %v8808_v44 = vsel %vm905_vm8, %v6605_v53, %v10560_v9  ;;  %v6611_v53 = vunpack.i.h.bf16 %v8669_v38  ;;  %v6610_v9 = vunpack.i.l.bf16 %v8669_v38 }
 0x19d   : > { %v8718_v23 = vpop.permute.xlu1 %6648  ;;  %10693 = vst [vmem:[#allocation39_spill] sm:$0xff] %v8797_v43  ;;  %v6645_v43 = vunpack.i.l.bf16 %v8690_v42 }
 0x19e   : > { %2174 = vrot.lane.b32.xlu0 %v2169_v10, %s10655_s4  ;;  %v8794_v10 = vmul.f32 %v1487_v62, %v8276_v52  ;;  %v6625_v62 = vunpack.i.l.bf16 %v8663_v24 }
 0x19f   : > { %2172 = vrot.lane.b32.xlu1 %v2165_v28, %s10655_s4 }
 0x1a0   : > { %v8716_v36 = vpop.permute.xlu0 %6668  ;;  %10692 = vst [vmem:[#allocation38_spill] sm:$0xff] %v8794_v10 }
 0x1a1   : > { %v8723_v54 = vpop.permute.xlu1 %6653 }
 0x1a2   : > { %v6655_v56 = vunpack.i.l.bf16 %v8723_v54  ;;  %v6656_v30 = vunpack.i.h.bf16 %v8723_v54 }
 0x1a4   : > { %v8721_v39 = vpop.permute.xlu0 %6678  ;;  %v783_v63 = vsel %vm781_vm7, %v6596_v22, %v6655_v56 }
 0x1a5   : > { %v8727_v2 = vpop.permute.xlu1 %6663 }
 0x1a8   : > { %v8725_v57 = vpop.permute.xlu0 %6688 }
 0x1a9   : > { %v8731_v55 = vpop.permute.xlu1 %6673 }
 0x1ac   : > { %v8729_v50 = vpop.permute.xlu0 %6698 }
 0x1ad   : > { %v8735_v61 = vpop.permute.xlu1 %6683 }
 0x1b0   : > { %v8733_v17 = vpop.permute.xlu0 %6708 }
 0x1b1   : > { %v8739_v41 = vpop.permute.xlu1 %6693 }
 0x1b4   : > { %v8737_v27 = vpop.permute.xlu0 %6713 }
 0x1b5   : > { %v8743_v34 = vpop.permute.xlu1 %6703 }
 0x1b8   : > { %v8741_v40 = vpop.permute.xlu0 %6723 }
 0x1b9   : > { %v8747_v58 = vpop.permute.xlu1 %6718 }
 0x1bc   : > { %v8745_v48 = vpop.permute.xlu0 %6733 }
 0x1bd   : > { %v8751_v20 = vpop.permute.xlu1 %6728 }
 0x1c0   : > { %v8749_v60 = vpop.permute.xlu0 %6743 }
 0x1c1   : > { %v8755_v46 = vpop.permute.xlu1 %6738 }
 0x1c4   : > { %v8753_v8 = vpop.permute.xlu0 %6753 }
 0x1c5   : > { %v8759_v4 = vpop.permute.xlu1 %6748 }
 0x1c8   : > { %v8757_v49 = vpop.permute.xlu0 %6763 }
 0x1c9   : > { %10681 = vst [vmem:[#allocation34_spill] sm:$0xff] %v8757_v49  ;;  %v8763_v26 = vpop.permute.xlu1 %6758  ;;  %v6635_v49 = vunpack.i.l.bf16 %v8675_v14 }
 0x1cc   : > { %v8761_v1 = vpop.permute.xlu0 %6773 }
 0x1cd   : > { %v8767_v45 = vpop.permute.xlu1 %6768 }
 0x1ce   : > { %10682 = vst [vmem:[#allocation32_spill] sm:$0xff] %v8767_v45 }
 0x1d0   : > { %v8765_v3 = vpop.permute.xlu0 %6783 }
 0x1d1   : > { %v8771_v6 = vpop.permute.xlu1 %6778 }
 0x1d2   : > { %10684 = vst [vmem:[#allocation35_spill] sm:$0xff] %v8771_v6 }
 0x1d4   : > { %v8769_v29 = vpop.permute.xlu0 %6793 }
 0x1d5   : > { %10683 = vst [vmem:[#allocation28_spill] sm:$0xff] %v8769_v29  ;;  %v8779_v16 = vpop.permute.xlu1 %6788 }
 0x1d8   : > { %v8773_v51 = vpop.permute.xlu0 %6803 }
 0x1d9   : > { %10685 = vst [vmem:[#allocation33_spill] sm:$0xff] %v8773_v51  ;;  %v8799_v28 = vpop.permute.xlu1 %6798  ;;  %v10696_v51 = vunpack.i.h.bf16 %v8651_v13 }
 0x1da   : > { %10694 = vst [vmem:[#allocation40_spill] sm:$0xff] %v8799_v28 }
 0x1db   : > { %v8836_v22 = vsel %vm1029_vm5, %v6615_v11, %v10696_v51  ;;  %v8851_v51 = vsel %vm967_vm6, %v6610_v9, %v6611_v53 }
 0x1dc   : > { %v8791_v18 = vpop.permute.xlu0 %6813 }
 0x1dd   : > { %10691 = vst [vmem:[#allocation37_spill] sm:$0xff] %v8791_v18  ;;  %v8822_v32 = vpop.permute.xlu1 %6808  ;;  %v6620_v18 = vunpack.i.l.bf16 %v8681_v33 }
 0x1de   : > { %10695 = vst [vmem:[#allocation41_spill] sm:$0xff] %v8822_v32  ;;  %v844_v32 = vsel %vm843_vm4, %v6600_v31, %v6601_v21 }
 0x1e0   : > { %v6824_v6 = vpop.permute.xlu0 %6823 }
 0x1e1   : > { %v6826_v25 = vunpack.i.h.bf16 %v6824_v6  ;;  %v6825_v47 = vunpack.i.l.bf16 %v6824_v6  ;;  %v6621_v6 = vunpack.i.h.bf16 %v8681_v33  ;;  %v6660_v33 = vunpack.i.l.bf16 %v8702_v37  ;;  %v8841_v56 = vpop.permute.xlu1 %6818 }
 0x1e2   : > { %10697 = vst [vmem:[#allocation25_spill] sm:$0xff] %v8841_v56 }
 0x1e3   : > { %v785_v10 = vsel %vm781_vm7, %v6825_v47, %v6826_v25  ;;  %v784_v54 = vsel %vm781_vm7, %v6656_v30, %v6825_v47  ;;  %v6631_v47 = vunpack.i.h.bf16 %v8696_v0  ;;  %v6630_v25 = vunpack.i.l.bf16 %v8696_v0 }
 0x1e4   : > { %v6834_v52 = vpop.permute.xlu0 %6833  ;;  %v2321_v38 = vpack.c.bf16 %v785_v10, %v783_v63  ;;  %v2320_v59 = vpack.c.bf16 %v784_v54, %v782_v12  ;;  %v10698_v63 = vunpack.i.h.bf16 %v8663_v24  ;;  %v6640_v12 = vunpack.i.l.bf16 %v8710_v15 }
 0x1e5   : > { %v10699_v0 = vunpack.i.h.bf16 %v8675_v14  ;;  %v6650_v54 = vunpack.i.l.bf16 %v8718_v23  ;;  %v6836_v9 = vunpack.i.h.bf16 %v6834_v52  ;;  %v6835_v31 = vunpack.i.l.bf16 %v6834_v52  ;;  %v6829_v56 = vpop.permute.xlu1 %6828 }
 0x1e6   : > { %2392 = vmatprep.subr.bf16.mxu1 %v2321_v38  ;;  %v8846_v10 = vsel %vm1153_vm11, %v6625_v62, %v10698_v63  ;;  %v6670_v62 = vunpack.i.l.bf16 %v8716_v36  ;;  %v8864_v63 = vsel %vm1091_vm3, %v6620_v18, %v6621_v6  ;;  %v6680_v30 = vunpack.i.l.bf16 %v8721_v39 }
 0x1e7   : > { %2393 = vmatpush1.bf16.msra.mxu1 %v2320_v59  ;;  %v8856_v11 = vsel %vm1277_vm14, %v6635_v49, %v10699_v0  ;;  %v6661_v59 = vunpack.i.h.bf16 %v8702_v37  ;;  %v8870_v49 = vsel %vm1401_vm1, %v6645_v43, %v10576_v35  ;;  %v6671_v0 = vunpack.i.h.bf16 %v8716_v36 }
 0x1e8   : > { %10700 = vst [vmem:[#allocation26_spill] sm:$0xff] %v8856_v11  ;;  %v8861_v38 = vpop.permute.xlu0 %6843  ;;  %10701 = vst [vmem:[#allocation44_spill] sm:$0xff] %v8870_v49  ;;  %v845_v28 = vsel %vm843_vm4, %v6601_v21, %v6660_v33  ;;  %v8876_v11 = vsel %vm1215_vm13, %v6630_v25, %v6631_v47  ;;  %v6665_v18 = vunpack.i.l.bf16 %v8727_v2  ;;  %v6831_v37 = vunpack.i.h.bf16 %v6829_v56  ;;  %v10707_v33 = vld [vmem:[#allocation18_spill] sm:$0xff] }
 0x1e9   : > { %10702 = vst [vmem:[#allocation45_spill] sm:$0xff] %v8876_v11  ;;  %v6830_v29 = vunpack.i.l.bf16 %v6829_v56  ;;  %v10703_v52 = vunpack.i.h.bf16 %v8710_v15  ;;  %v969_v35 = vsel %vm967_vm6, %v6611_v53, %v6670_v62  ;;  %v10705_v21 = vunpack.i.h.bf16 %v8718_v23 }
 0x1ea   : > { %v6690_v56 = vunpack.i.l.bf16 %v8725_v57  ;;  %v6666_v43 = vunpack.i.h.bf16 %v8727_v2  ;;  %v8901_v62 = vsel %vm1091_vm3, %v6621_v6, %v6680_v30  ;;  %v6845_v30 = vunpack.i.l.bf16 %v8861_v38 }
 0x1eb   : > { %v8882_v45 = vsel %vm1339_vm2, %v6640_v12, %v10703_v52  ;;  %v8891_v25 = vsel %vm1463_vm0, %v6650_v54, %v10705_v21  ;;  %v847_v11 = vsel %vm843_vm4, %v6830_v29, %v6831_v37  ;;  %v846_v12 = vsel %vm843_vm4, %v6661_v59, %v6830_v29 }
 0x1ec   : > { %10704 = vst [vmem:[#allocation46_spill] sm:$0xff] %v8882_v45  ;;  %v8885_v36 = vpop.permute.xlu0 %6853  ;;  %10706 = vst [vmem:[#allocation47_spill] sm:$0xff] %v8891_v25  ;;  %v909_v52 = vsel %vm905_vm8, %v6835_v31, %v6836_v9  ;;  %v6839_v45 = vpop.permute.xlu1 %6838  ;;  %v2323_v53 = vpack.c.bf16 %v847_v11, %v845_v28  ;;  %v2322_v7 = vpack.c.bf16 %v846_v12, %v844_v32  ;;  %v10708_v25 = vunpack.i.h.bf16 %v8642_v19 }
 0x1ed   : > { %v6841_v21 = vunpack.i.h.bf16 %v6839_v45  ;;  %v6840_v49 = vunpack.i.l.bf16 %v6839_v45  ;;  %v6691_v29 = vunpack.i.h.bf16 %v8725_v57  ;;  %v6700_v59 = vunpack.i.l.bf16 %v8729_v50 }
 0x1ee   : > { %v907_v37 = vsel %vm905_vm8, %v10708_v25, %v6665_v18  ;;  %2394 = vmatprep.subr.bf16.mxu1 %v2323_v53  ;;  %v908_v28 = vsel %vm905_vm8, %v6666_v43, %v6835_v31  ;;  %v6846_v11 = vunpack.i.h.bf16 %v8861_v38  ;;  %v8917_v19 = vsel %vm1215_vm13, %v6631_v47, %v6690_v56 }
 0x1ef   : > { %v2325_v2 = vpack.c.bf16 %v909_v52, %v907_v37  ;;  %2395 = vmatpush1.bf16.msra.mxu1 %v2322_v7  ;;  %v971_v45 = vsel %vm967_vm6, %v6840_v49, %v6841_v21  ;;  %v6676_v32 = vunpack.i.h.bf16 %v8731_v55  ;;  %v6675_v9 = vunpack.i.l.bf16 %v8731_v55 }
 0x1f0   : > { %v8911_v6 = vpop.permute.xlu0 %6863  ;;  %v6710_v31 = vunpack.i.l.bf16 %v8733_v17  ;;  %v6849_v43 = vpop.permute.xlu1 %6848  ;;  %v6685_v25 = vunpack.i.l.bf16 %v8735_v61  ;;  %v10583_v38 = vunpack.i.h.bf16 %v8737_v27  ;;  %v6715_v7 = vunpack.i.l.bf16 %v8737_v27 }
 0x1f1   : > { %2396 = vmatprep.subr.bf16.mxu1 %v2325_v2  ;;  %v2324_v12 = vpack.c.bf16 %v908_v28, %v8808_v44  ;;  %v2327_v56 = vpack.c.bf16 %v971_v45, %v969_v35  ;;  %v970_v52 = vsel %vm967_vm6, %v6671_v0, %v6840_v49  ;;  %v10709_v53 = vunpack.i.h.bf16 %v8710_v15 }
 0x1f2   : > { %v6695_v37 = vunpack.i.l.bf16 %v8739_v41  ;;  %v6851_v2 = vunpack.i.h.bf16 %v6849_v43  ;;  %v6850_v54 = vunpack.i.l.bf16 %v6849_v43  ;;  %v1033_v18 = vsel %vm1029_vm5, %v6845_v30, %v6846_v11 }
 0x1f3   : > { %v8934_v21 = vsel %vm1339_vm2, %v10709_v53, %v6700_v59  ;;  %2397 = vmatpush1.bf16.msra.mxu1 %v2324_v12  ;;  %v6686_v44 = vunpack.i.h.bf16 %v8735_v61  ;;  %v6705_v35 = vunpack.i.l.bf16 %v8743_v34  ;;  %v10710_v49 = vunpack.i.h.bf16 %v8651_v13 }
 0x1f4   : > { %v8929_v55 = vpop.permute.xlu0 %6873  ;;  %v8940_v28 = vpop.permute.xlu1 %6858  ;;  %2398 = vmatprep.subr.bf16.mxu1 %v2327_v56  ;;  %v10711_v0 = vunpack.i.h.bf16 %v8718_v23  ;;  %v6696_v45 = vunpack.i.h.bf16 %v8739_v41  ;;  %v2326_v11 = vpack.c.bf16 %v970_v52, %v8851_v51  ;;  %v10712_v61 = vunpack.i.h.bf16 %v8663_v24 }
 0x1f5   : > { %v1031_v15 = vsel %vm1029_vm5, %v10710_v49, %v6675_v9  ;;  %v8958_v12 = vsel %vm1434_vm15, %v6715_v7, %v10583_v38  ;;  %v6856_v51 = vunpack.i.h.bf16 %v8885_v36  ;;  %v6855_v24 = vunpack.i.l.bf16 %v8885_v36 }
 0x1f6   : > { %v8948_v59 = vsel %vm1463_vm0, %v10711_v0, %v6710_v31  ;;  %v1155_v43 = vsel %vm1153_vm11, %v10712_v61, %v6685_v25  ;;  %v2329_v9 = vpack.c.bf16 %v1033_v18, %v1031_v15  ;;  %v1032_v31 = vsel %vm1029_vm5, %v6676_v32, %v6845_v30 }
 0x1f7   : > { %2399 = vmatpush1.bf16.msra.mxu1 %v2326_v11  ;;  %v1095_v25 = vsel %vm1091_vm3, %v6850_v54, %v6851_v2  ;;  %v10713_v52 = vunpack.i.h.bf16 %v8675_v14  ;;  %v6736_v18 = vunpack.i.h.bf16 %v8745_v48  ;;  %v6735_v30 = vunpack.i.l.bf16 %v8745_v48 }
 0x1f8   : > { %v8963_v56 = vpop.permute.xlu0 %6883  ;;  %v8976_v32 = vpop.permute.xlu1 %6868  ;;  %2400 = vmatprep.subr.bf16.mxu1 %v2329_v9  ;;  %v10714_v49 = vunpack.i.h.bf16 %v8690_v42  ;;  %v6731_v2 = vunpack.i.h.bf16 %v8751_v20  ;;  %v10581_v14 = vunpack.i.h.bf16 %v8749_v60  ;;  %v2328_v15 = vpack.c.bf16 %v1032_v31, %v8836_v22 }
 0x1f9   : > { %v8971_v7 = vsel %vm1277_vm14, %v10713_v52, %v6695_v37  ;;  %v6745_v37 = vunpack.i.l.bf16 %v8749_v60  ;;  %v6730_v0 = vunpack.i.l.bf16 %v8751_v20  ;;  %v10579_v11 = vunpack.i.h.bf16 %v8753_v8 }
 0x1fa   : > { %v8981_v36 = vsel %vm1401_vm1, %v10714_v49, %v6705_v35  ;;  %v2331_v61 = vpack.c.bf16 %v1095_v25, %v8901_v62  ;;  %v10715_v9 = vunpack.i.h.bf16 %v8721_v39  ;;  %v6755_v52 = vunpack.i.l.bf16 %v8753_v8 }
 0x1fb   : > { %v6861_v49 = vunpack.i.h.bf16 %v8940_v28  ;;  %v6860_v23 = vunpack.i.l.bf16 %v8940_v28  ;;  %2401 = vmatpush1.bf16.msra.mxu1 %v2328_v15  ;;  %v1157_v22 = vsel %vm1153_vm11, %v6855_v24, %v6856_v51  ;;  %v10582_v20 = vunpack.i.h.bf16 %v8755_v46 }
 0x1fc   : > { %v1094_v42 = vsel %vm1091_vm3, %v10715_v9, %v6850_v54  ;;  %v8993_v35 = vpop.permute.xlu0 %6893  ;;  %v6740_v31 = vunpack.i.l.bf16 %v8755_v46  ;;  %v10580_v62 = vunpack.i.h.bf16 %v8759_v4  ;;  %v6750_v39 = vunpack.i.l.bf16 %v8759_v4  ;;  %v9003_v54 = vpop.permute.xlu1 %6878  ;;  %2402 = vmatprep.subr.bf16.mxu1 %v2331_v61 }
 0x1fd   : > { %v9010_v28 = vsel %vm1186_vm12, %v6735_v30, %v6736_v18  ;;  %v2330_v51 = vpack.c.bf16 %v1094_v42, %v8864_v63  ;;  %v9014_v15 = vsel %vm1248_vm9, %v6730_v0, %v6731_v2  ;;  %v9019_v13 = vsel %vm1062_vm10, %v6745_v37, %v10581_v14 }
 0x1fe   : > { %v2333_v61 = vpack.c.bf16 %v1157_v22, %v1155_v43  ;;  %v1156_v25 = vsel %vm1153_vm11, %v6686_v44, %v6855_v24  ;;  %vm10716_vm3 = vcmask 793600   ;;  %v6866_v30 = vunpack.i.h.bf16 %v8911_v6 }
 0x1ff   : > { %v9025_v9 = vsel %vm10716_vm3, %v6755_v52, %v10579_v11  ;;  %v6865_v63 = vunpack.i.l.bf16 %v8911_v6  ;;  %2403 = vmatpush1.bf16.msra.mxu1 %v2330_v51  ;;  %v1219_v0 = vsel %vm1215_vm13, %v6860_v23, %v6861_v49  ;;  %vm10717_vm4 = vcmask 908288  }
 0x200   : > { %v6904_v47 = vpop.permute.xlu0 %6903  ;;  %v9033_v37 = vsel %vm10717_vm4, %v6740_v31, %v10582_v20  ;;  %vm10718_vm6 = vcmask 801792   ;;  %v6785_v24 = vunpack.i.l.bf16 %v8765_v3  ;;  %v9042_v42 = vpop.permute.xlu1 %6888  ;;  %2404 = vmatprep.subr.bf16.mxu1 %v2333_v61  ;;  %v2332_v52 = vpack.c.bf16 %v1156_v25, %v8846_v10  ;;  %v10719_v25 = vld [vmem:[#allocation32_spill] sm:$0xff]  ;;  %vm10729_vm11 = vmmov %vm10717_vm4 }
 0x201   : > { %v9038_v44 = vsel %vm10718_vm6, %v6750_v39, %v10580_v62  ;;  %v6906_v49 = vunpack.i.h.bf16 %v6904_v47  ;;  %v6905_v22 = vunpack.i.l.bf16 %v6904_v47  ;;  %v6786_v51 = vunpack.i.h.bf16 %v8765_v3  ;;  %v10720_v62 = vld [vmem:[#allocation45_spill] sm:$0xff] }
 0x202   : > { %v2335_v39 = vpack.c.bf16 %v1219_v0, %v8917_v19  ;;  %v1218_v43 = vsel %vm1215_vm13, %v6691_v29, %v6860_v23  ;;  %v6790_v61 = vunpack.i.l.bf16 %v8779_v16  ;;  %v6871_v6 = vunpack.i.h.bf16 %v8976_v32 }
 0x203   : > { %v6870_v10 = vunpack.i.l.bf16 %v8976_v32  ;;  %2405 = vmatpush1.bf16.msra.mxu1 %v2332_v52  ;;  %v1281_v47 = vsel %vm1277_vm14, %v6865_v63, %v6866_v30  ;;  %v6770_v31 = vunpack.i.l.bf16 %v10719_v25  ;;  %v6876_v3 = vunpack.i.h.bf16 %v8929_v55  ;;  %v10721_v52 = vld [vmem:[#allocation28_spill] sm:$0xff] }
 0x204   : > { %v9052_v11 = vpop.permute.xlu0 %6913  ;;  %v6875_v19 = vunpack.i.l.bf16 %v8929_v55  ;;  %v6899_v57 = vpop.permute.xlu1 %6898  ;;  %2406 = vmatprep.subr.bf16.mxu1 %v2335_v39  ;;  %v1725_v29 = vsel %vm1248_vm9, %v6731_v2, %v6785_v24  ;;  %v2334_v14 = vpack.c.bf16 %v1218_v43, %v10720_v62  ;;  %v1787_v53 = vsel %vm1186_vm12, %v6905_v22, %v6906_v49 }
 0x205   : > { %v6901_v23 = vunpack.i.h.bf16 %v6899_v57  ;;  %v6900_v0 = vunpack.i.l.bf16 %v6899_v57  ;;  %v6791_v32 = vunpack.i.h.bf16 %v8779_v16  ;;  %v6795_v30 = vunpack.i.l.bf16 %v10721_v52 }
 0x206   : > { %v2337_v20 = vpack.c.bf16 %v1281_v47, %v8971_v7  ;;  %v1280_v55 = vsel %vm1277_vm14, %v6696_v45, %v6865_v63  ;;  %v1785_v62 = vsel %vm1186_vm12, %v6736_v18, %v6790_v61  ;;  %v1343_v16 = vsel %vm1339_vm2, %v6870_v10, %v6871_v6  ;;  %vm10737_vm14 = vmmov %vm10718_vm6 }
 0x207   : > { %v1726_v2 = vsel %vm1248_vm9, %v6786_v51, %v6900_v0  ;;  %v1727_v24 = vsel %vm1248_vm9, %v6900_v0, %v6901_v23  ;;  %2407 = vmatpush1.bf16.msra.mxu1 %v2334_v14  ;;  %v1786_v7 = vsel %vm1186_vm12, %v6791_v32, %v6905_v22  ;;  %v2355_v45 = vpack.c.bf16 %v1787_v53, %v1785_v62  ;;  %v10722_v51 = vld [vmem:[#allocation26_spill] sm:$0xff]  ;;  %vm10724_vm9 = vmmov %vm10717_vm4  ;;  %v10727_v32 = vld [vmem:[#allocation33_spill] sm:$0xff] }
 0x208   : > { %v9070_v38 = vpop.permute.xlu0 %6923  ;;  %v6909_v43 = vpop.permute.xlu1 %6908  ;;  %v2353_v49 = vpack.c.bf16 %v1727_v24, %v1725_v29  ;;  %v2352_v41 = vpack.c.bf16 %v1726_v2, %v9014_v15  ;;  %2408 = vmatprep.subr.bf16.mxu1 %v2337_v20  ;;  %v2336_v47 = vpack.c.bf16 %v1280_v55, %v10722_v51  ;;  %v1405_v14 = vsel %vm1401_vm1, %v6875_v19, %v6876_v3  ;;  %v10730_v24 = vld [vmem:[#allocation46_spill] sm:$0xff]  ;;  %vm10731_vm12 = vmmov %vm10717_vm4 }
 0x209   : > { %v6911_v63 = vunpack.i.h.bf16 %v6909_v43  ;;  %v6910_v39 = vunpack.i.l.bf16 %v6909_v43  ;;  %v6881_v48 = vunpack.i.h.bf16 %v9003_v54  ;;  %v6880_v18 = vunpack.i.l.bf16 %v9003_v54 }
 0x20a   : > { %2435 = vmatprep.subr.bf16.mxu0 %v2353_v49  ;;  %v2339_v6 = vpack.c.bf16 %v1343_v16, %v8934_v21  ;;  %v10723_v22 = vunpack.i.h.bf16 %v8729_v50  ;;  %v6916_v53 = vunpack.i.h.bf16 %v9052_v11  ;;  %v6915_v20 = vunpack.i.l.bf16 %v9052_v11  ;;  %v10726_v11 = vld [vmem:[#allocation40_spill] sm:$0xff] }
 0x20b   : > { %2436 = vmatpush1.bf16.msra.mxu0 %v2352_v41  ;;  %2409 = vmatpush1.bf16.msra.mxu1 %v2336_v47  ;;  %v2354_v3 = vpack.c.bf16 %v1786_v7, %v9010_v28  ;;  %v1847_v57 = vsel %vm10724_vm9, %v6910_v39, %v6911_v63  ;;  %v6760_v54 = vunpack.i.l.bf16 %v8763_v26  ;;  %v6771_v21 = vunpack.i.h.bf16 %v10719_v25 }
 0x20c   : > { %v1342_v61 = vsel %vm1339_vm2, %v10723_v22, %v6870_v10  ;;  %v9088_v15 = vpop.permute.xlu0 %6933  ;;  %v6796_v50 = vunpack.i.h.bf16 %v10721_v52  ;;  %v6919_v29 = vpop.permute.xlu1 %6918  ;;  %2437 = vmatprep.subr.bf16.mxu0 %v2355_v45  ;;  %2410 = vmatprep.subr.bf16.mxu1 %v2339_v6  ;;  %v10725_v10 = vunpack.i.h.bf16 %v8737_v27  ;;  %v6800_v0 = vunpack.i.l.bf16 %v10726_v11  ;;  %vm10738_vm2 = vmmov %vm10718_vm6 }
 0x20d   : > { %v6805_v28 = vunpack.i.l.bf16 %v10727_v32  ;;  %v10728_v55 = vunpack.i.h.bf16 %v8755_v46  ;;  %v2338_v62 = vpack.c.bf16 %v1342_v61, %v10730_v24  ;;  %v2341_v43 = vpack.c.bf16 %v1405_v14, %v8981_v36  ;;  %v10734_v14 = vld [vmem:[#allocation44_spill] sm:$0xff]  ;;  %v10743_v24 = vld [vmem:[#allocation30_spill] sm:$0xff] }
 0x20e   : > { %v9100_v23 = vsel %vm1434_vm15, %v10725_v10, %v6770_v31  ;;  %v1846_v52 = vsel %vm10731_vm12, %v6796_v50, %v6910_v39  ;;  %v10732_v27 = vunpack.i.h.bf16 %v8743_v34  ;;  %v6921_v7 = vunpack.i.h.bf16 %v6919_v29 }
 0x20f   : > { %v1845_v2 = vsel %vm10729_vm11, %v10728_v55, %v6795_v30  ;;  %v6920_v49 = vunpack.i.l.bf16 %v6919_v29  ;;  %2438 = vmatpush1.bf16.msra.mxu0 %v2354_v3  ;;  %2411 = vmatpush1.bf16.msra.mxu1 %v2338_v62  ;;  %v1907_v41 = vsel %vm1062_vm10, %v6915_v20, %v6916_v53  ;;  %v1467_v46 = vsel %vm1463_vm0, %v6880_v18, %v6881_v48  ;;  %v10739_v29 = vld [vmem:[#allocation41_spill] sm:$0xff] }
 0x210   : > { %v2357_v16 = vpack.c.bf16 %v1847_v57, %v1845_v2  ;;  %v1404_v31 = vsel %vm1401_vm1, %v10732_v27, %v6875_v19  ;;  %v6801_v30 = vunpack.i.h.bf16 %v10726_v11  ;;  %v6806_v45 = vunpack.i.h.bf16 %v10727_v32  ;;  %v9119_v39 = vpop.permute.xlu1 %6928  ;;  %2412 = vmatprep.subr.bf16.mxu1 %v2341_v43  ;;  %v2175_v34 = vpop.permute.xlu0 %2174  ;;  %v10741_v32 = vld [vmem:[#allocation42_spill] sm:$0xff] }
 0x211   : > { %v6886_v63 = vunpack.i.h.bf16 %v8963_v56  ;;  %v6885_v36 = vunpack.i.l.bf16 %v8963_v56  ;;  %v2356_v19 = vpack.c.bf16 %v1846_v52, %v9033_v37  ;;  %v10733_v51 = vunpack.i.h.bf16 %v8749_v60  ;;  %v10744_v52 = vld [vmem:[#allocation31_spill] sm:$0xff] }
 0x212   : > { %2439 = vmatprep.subr.bf16.mxu0 %v2357_v16  ;;  %v2340_v48 = vpack.c.bf16 %v1404_v31, %v10734_v14  ;;  %v10735_v6 = vunpack.i.h.bf16 %v8733_v17  ;;  %v1906_v61 = vsel %vm1062_vm10, %v6801_v30, %v6915_v20  ;;  %v2343_v53 = vpack.c.bf16 %v1467_v46, %v8948_v59  ;;  %v10740_v59 = vld [vmem:[#allocation47_spill] sm:$0xff] }
 0x213   : > { %v1905_v47 = vsel %vm1062_vm10, %v10733_v51, %v6800_v0  ;;  %v10736_v3 = vunpack.i.h.bf16 %v8759_v4  ;;  %v6926_v37 = vunpack.i.h.bf16 %v9070_v38  ;;  %v6925_v60 = vunpack.i.l.bf16 %v9070_v38  ;;  %2440 = vmatpush1.bf16.msra.mxu0 %v2356_v19  ;;  %vm10742_vm10 = vmmov %vm10738_vm2  ;;  %v10747_v30 = vld [vmem:[#allocation43_spill] sm:$0xff] }
 0x214   : > { %v1466_v22 = vsel %vm1463_vm0, %v10735_v6, %v6880_v18  ;;  %v2359_v56 = vpack.c.bf16 %v1907_v41, %v1905_v47  ;;  %2413 = vmatpush1.bf16.msra.mxu1 %v2340_v48  ;;  %v2182_v50 = vmul.f32 0.0, %v2175_v34  ;;  %v1967_v17 = vsel %vm10738_vm2, %v6920_v49, %v6921_v7  ;;  %v2173_v10 = vpop.permute.xlu1 %2172  ;;  %vm10745_vm0 = vmmov %vm10716_vm3  ;;  %v10746_v41 = vld [vmem:[#allocation37_spill] sm:$0xff] }
 0x215   : > { %v1965_v57 = vsel %vm10737_vm14, %v10736_v3, %v6805_v28  ;;  %v6810_v18 = vunpack.i.l.bf16 %v10739_v29  ;;  %v6891_v20 = vunpack.i.h.bf16 %v9042_v42  ;;  %2414 = vmatprep.subr.bf16.mxu1 %v2343_v53  ;;  %v2342_v4 = vpack.c.bf16 %v1466_v22, %v10740_v59  ;;  %vm10752_vm3 = vmmov %vm10745_vm0  ;;  %v10755_v53 = vld [vmem:[#allocation36_spill] sm:$0xff] }
 0x216   : > { %2441 = vmatprep.subr.bf16.mxu0 %v2359_v56  ;;  %v1547_v11 = vsel %vm1434_vm15, %v6885_v36, %v6886_v63  ;;  %v6890_v0 = vunpack.i.l.bf16 %v9042_v42  ;;  %v2183_v38 = vmul.f32 %v2173_v10, %v10741_v32  ;;  %v2358_v28 = vpack.c.bf16 %v1906_v61, %v9019_v13  ;;  %v10748_v63 = vld [vmem:[#allocation29_spill] sm:$0xff]  ;;  %vm10754_vm4 = vmmov %vm10745_vm0 }
 0x217   : > { %v2176_v55 = vsel %vm781_vm7, %v2173_v10, %v2175_v34  ;;  %v1966_v2 = vsel %vm10742_vm10, %v6806_v45, %v6920_v49  ;;  %v2180_v62 = vmul.f32 %v2173_v10, %v10743_v24  ;;  %v2361_v43 = vpack.c.bf16 %v1967_v17, %v1965_v57  ;;  %v10749_v34 = vld [vmem:[#allocation38_spill] sm:$0xff] }
 0x218   : > { %v2181_v16 = vmul.f32 %v2176_v55, %v10744_v52  ;;  %v6931_v27 = vunpack.i.h.bf16 %v9119_v39  ;;  %v6930_v31 = vunpack.i.l.bf16 %v9119_v39  ;;  %2442 = vmatpush1.bf16.msra.mxu0 %v2358_v28  ;;  %v6942_v7 = vpack.i.bf16 %v2183_v38, %v2182_v50  ;;  %2415 = vmatpush1.bf16.msra.mxu1 %v2342_v4 }
 0x219   : > { %v2027_v42 = vsel %vm10745_vm0, %v6925_v60, %v6926_v37  ;;  %v6811_v13 = vunpack.i.h.bf16 %v10739_v29  ;;  %v6815_v46 = vunpack.i.l.bf16 %v10746_v41  ;;  %v2184_v49 = vmul.f32 %v2176_v55, %v10747_v30  ;;  %2443 = vmatprep.subr.bf16.mxu0 %v2361_v43  ;;  %v10764_v29 = vld [vmem:[#allocation25_spill] sm:$0xff] }
 0x21a   : > { %v6937_v45 = vpack.i.bf16 %v2181_v16, %v2180_v62  ;;  %v10750_v19 = vpack.c.bf16 %v10748_v63, %v10749_v34  ;;  %v2360_v51 = vpack.c.bf16 %v1966_v2, %v9038_v44  ;;  %v10751_v39 = vunpack.i.h.bf16 %v8753_v8  ;;  %6943 = vrot.lane.b32.xlu0 %v6942_v7, %s10753_s30  ;;  %v10772_v62 = vld [vmem:[#allocation34_spill] sm:$0xff] }
 0x21b   : > { %v2347_v14 = vpack.c.bf16 %v1547_v11, %v9100_v23  ;;  %v1546_v48 = vsel %vm1434_vm15, %v6771_v21, %v6885_v36  ;;  %v6896_v6 = vunpack.i.h.bf16 %v8993_v35  ;;  %v6895_v22 = vunpack.i.l.bf16 %v8993_v35  ;;  %v10756_v23 = vld [vmem:[#allocation39_spill] sm:$0xff] }
 0x21c   : > { %2416 = vmatprep.subr.bf16.mxu1 %v10750_v19  ;;  %v2025_v47 = vsel %vm10752_vm3, %v10751_v39, %v6810_v18  ;;  %v2026_v61 = vsel %vm10754_vm4, %v6811_v13, %v6925_v60  ;;  %6938 = vrot.lane.b32.xlu1 %v6937_v45, %s10753_s30  ;;  %v6936_v8 = vunpack.i.h.bf16 %v9088_v15  ;;  %v6935_v44 = vunpack.i.l.bf16 %v9088_v15  ;;  %v10760_v36 = vld [vmem:[#allocation35_spill] sm:$0xff] }
 0x21d   : > { %v2363_v56 = vpack.c.bf16 %v2027_v42, %v2025_v47  ;;  %2444 = vmatpush1.bf16.msra.mxu0 %v2360_v51  ;;  %v10757_v3 = vpack.c.bf16 %v10755_v53, %v10756_v23  ;;  %vm10758_vm6 = vcmask 785408   ;;  %vm10759_vm15 = vcmask 1031168  }
 0x21e   : > { %v2087_v25 = vsel %vm10758_vm6, %v6930_v31, %v6931_v27  ;;  %v1607_v21 = vsel %vm10759_vm15, %v6890_v0, %v6891_v20  ;;  %v6780_v35 = vunpack.i.l.bf16 %v10760_v36  ;;  %v6816_v57 = vunpack.i.h.bf16 %v10746_v41  ;;  %vm10763_vm9 = vmmov %vm10759_vm15 }
 0x21f   : > { %2417 = vmatpush1.bf16.msra.mxu1 %v10757_v3  ;;  %v6947_v37 = vpack.i.bf16 %v2182_v50, %v2184_v49  ;;  %2445 = vmatprep.subr.bf16.mxu0 %v2363_v56  ;;  %v10761_v60 = vunpack.i.l.bf16 %v8761_v1  ;;  %v10762_v15 = vunpack.i.h.bf16 %v8747_v58  ;;  %v6820_v18 = vunpack.i.l.bf16 %v10764_v29  ;;  %vm10766_vm11 = vmmov %vm10758_vm6  ;;  %v10767_v50 = vld [vmem:[#allocation27_spill] sm:$0xff] }
 0x220   : > { %2418 = vmatprep.subr.bf16.mxu1 %v2347_v14  ;;  %v2362_v10 = vpack.c.bf16 %v2026_v61, %v9025_v9  ;;  %v10765_v59 = vunpack.i.h.bf16 %v8763_v26  ;;  %v2346_v4 = vpack.c.bf16 %v1546_v48, %v8958_v12  ;;  %v10768_v11 = vrot.slane %v10767_v50, %v10707_v33  ;;  %vm10769_vm12 = vmmov %vm10758_vm6 }
 0x221   : > { %v1605_v17 = vsel %vm10763_vm9, %v10762_v15, %v10761_v60  ;;  %v2086_v38 = vsel %vm10769_vm12, %v6816_v57, %v6930_v31  ;;  %6948 = vrot.lane.b32.xlu1 %v6947_v37, %s10753_s30  ;;  %v10770_v9 = vunpack.i.h.bf16 %v8761_v1  ;;  %vm10771_vm14 = vmmov %vm10763_vm9  ;;  %v6766_v16 = vunpack.i.h.bf16 %v10772_v62 }
 0x222   : > { %v2085_v20 = vsel %vm10766_vm11, %v10765_v59, %v6815_v46  ;;  %2526 = vrot.lane.b32.xlu0 %v10768_v11, %s7769_s23  ;;  %v2349_v55 = vpack.c.bf16 %v1607_v21, %v1605_v17  ;;  %2446 = vmatpush1.bf16.msra.mxu0 %v2362_v10  ;;  %vm10773_vm2 = vcmask 777216   ;;  %v10774_v43 = vmov %v10762_v15  ;;  %vm10776_vm10 = vmmov %vm10763_vm9 }
 0x223   : > { %v2365_v28 = vpack.c.bf16 %v2087_v25, %v2085_v20  ;;  %v1606_v2 = vsel %vm10771_vm14, %v10770_v9, %v6890_v0  ;;  %2419 = vmatpush1.bf16.msra.mxu1 %v2346_v4  ;;  %v2147_v12 = vsel %vm10773_vm2, %v6935_v44, %v6936_v8  ;;  %v10775_v27 = vunpack.i.l.bf16 %v8747_v58  ;;  %vm10779_vm3 = vmmov %vm10758_vm6  ;;  %v7643_v20 = vld [vmem:[%s10439_s5 + $0xc] ss:$16 sps:$4 sm:$0xff]   ;;  %v7645_v4 = vld [vmem:[%s10439_s5 + $0x8] ss:$16 sps:$4 sm:$0xff]  }
 0x224   : > { %vm10777_vm0 = vcmask 932864   ;;  %v10778_v42 = vmov %v10765_v59  ;;  %v6765_v0 = vunpack.i.l.bf16 %v10772_v62  ;;  %v6781_v13 = vunpack.i.h.bf16 %v10760_v36  ;;  %2420 = vmatprep.subr.bf16.mxu1 %v2349_v55  ;;  %vm10780_vm4 = vmmov %vm10773_vm2  ;;  %6460 = vmatprep.mubr.msk.bf16.mxu0 %vm1215_vm13, %v7643_v20  ;;  %v10794_v9 = vld [vmem:[#allocation19_spill] sm:$0xff] }
 0x225   : > { %v1604_v31 = vsel %vm10776_vm10, %v10775_v27, %v10774_v43  ;;  %v1667_v7 = vsel %vm10777_vm0, %v6895_v22, %v6896_v6  ;;  %v2084_v1 = vsel %vm10779_vm3, %v6760_v54, %v10778_v42  ;;  %v6821_v41 = vunpack.i.h.bf16 %v10764_v29  ;;  %2447 = vmatprep.subr.bf16.mxu0 %v2365_v28  ;;  %vm10782_vm6 = vmmov %vm10777_vm0 }
 0x226   : > { %v2364_v46 = vpack.c.bf16 %v2086_v38, %v2084_v1  ;;  %v2145_v58 = vsel %vm10780_vm4, %v6766_v16, %v6820_v18  ;;  %v2348_v49 = vpack.c.bf16 %v1606_v2, %v1604_v31  ;;  %v10781_v45 = vunpack.i.h.bf16 %v8741_v40  ;;  %vm10783_vm15 = vmmov %vm10773_vm2 }
 0x227   : > { %v2146_v26 = vsel %vm10783_vm15, %v6821_v41, %v6935_v44  ;;  %v2367_v34 = vpack.c.bf16 %v2147_v12, %v2145_v58  ;;  %v10784_v54 = vrot.slane %v8687_v5, %v10707_v33  ;;  %vm10785_vm9 = vmmov %vm10777_vm0  ;;  %v10788_v14 = vunpack.i.l.bf16 %v8741_v40 }
 0x228   : > { %v1665_v63 = vsel %vm10782_vm6, %v10781_v45, %v6780_v35  ;;  %v1666_v51 = vsel %vm10785_vm9, %v6781_v13, %v6895_v22  ;;  %2448 = vmatpush1.bf16.msra.mxu0 %v2364_v46  ;;  %2421 = vmatpush1.bf16.msra.mxu1 %v2348_v49  ;;  %vm10786_vm11 = vmmov %vm10773_vm2  ;;  %v10787_v47 = vmov %v10781_v45  ;;  %vm10790_vm14 = vcmask 769024  }
 0x229   : > { %2528 = vrot.lane.b32.xlu1 %v10784_v54, %s7769_s23  ;;  %v2351_v19 = vpack.c.bf16 %v1667_v7, %v1665_v63  ;;  %v2144_v39 = vsel %vm10786_vm11, %v6765_v0, %v6766_v16  ;;  %2449 = vmatprep.subr.bf16.mxu0 %v2367_v34  ;;  %vm10789_vm12 = vmmov %vm10777_vm0  ;;  %vm2530_vm2 = vcmask 490496   ;;  %v2581_v2 = vrot.slane %v10767_v50, %v10794_v9 }
 0x22a   : > { %v1664_v48 = vsel %vm10789_vm12, %v10788_v14, %v10787_v47  ;;  %v2366_v6 = vpack.c.bf16 %v2146_v26, %v2144_v39  ;;  %vm10791_vm10 = vmmov %vm10790_vm14  ;;  %v2585_v16 = vrot.slane %v8687_v5, %v10794_v9  ;;  %vm2559_vm4 = vcmask 556032  }
 0x22b   : > { %2422 = vmatprep.subr.bf16.mxu1 %v2351_v19  ;;  %v2350_v61 = vpack.c.bf16 %v1666_v51, %v1664_v48  ;;  %vm10792_vm0 = vmmov %vm10791_vm10  ;;  %vm2592_vm6 = vcmask 506880   ;;  %vm2621_vm15 = vcmask 539648   ;;  %vm2654_vm9 = vcmask 523264  }
 0x22c   : > { %2450 = vmatpush1.bf16.msra.mxu0 %v2366_v6  ;;  %vm10793_vm3 = vmmov %vm10792_vm0  ;;  %vm2835_vm11 = vcmask 752640  }
 0x22d   : > { %2423 = vmatpush1.bf16.msra.mxu1 %v2350_v61  ;;  %v10795_v61 = vld [vmem:[#allocation20_spill] sm:$0xff]  ;;  %vm10801_vm12 = vmmov %vm10792_vm0 }
 0x28c   : > { %v6944_v56 = vpop.permute.xlu0 %6943 }
 0x28d   : > { %v6945_v53 = vunpack.i.l.bf16 %v6944_v56  ;;  %v6946_v25 = vunpack.i.h.bf16 %v6944_v56  ;;  %v2643_v56 = vrot.slane %v10767_v50, %v10795_v61 }
 0x28e   : > { %v6939_v8 = vpop.permute.xlu1 %6938 }
 0x28f   : > { %v6941_v44 = vunpack.i.h.bf16 %v6939_v8  ;;  %v6940_v22 = vunpack.i.l.bf16 %v6939_v8 }
 0x291   : > { %v2204_v35 = vsel %vm10790_vm14, %v6940_v22, %v6941_v44  ;;  %v2205_v37 = vsel %vm10792_vm0, %v6941_v44, %v6945_v53  ;;  %v2647_v44 = vrot.slane %v8687_v5, %v10795_v61  ;;  %vm10802_vm14 = vcmask 785408  }
 0x292   : > { %vm3077_vm0 = vcmask 818176  }
 0x293   : > { %v6949_v23 = vpop.permute.xlu1 %6948 }
 0x294   : > { %v2527_v3 = vpop.permute.xlu0 %2526  ;;  %v6951_v21 = vunpack.i.h.bf16 %v6949_v23  ;;  %v6950_v36 = vunpack.i.l.bf16 %v6949_v23 }
 0x295   : > { %v2535_v57 = vmul.f32 0.0, %v2527_v3 }
 0x296   : > { %v2206_v40 = vsel %vm10791_vm10, %v6946_v25, %v6950_v36  ;;  %v2207_v60 = vsel %vm10793_vm3, %v6950_v36, %v6951_v21  ;;  %vm10803_vm10 = vcmask 801792   ;;  %vm2864_vm3 = vcmask 293888  }
 0x297   : > { %v2369_v17 = vpack.c.bf16 %v2207_v60, %v2205_v37  ;;  %v2368_v29 = vpack.c.bf16 %v2206_v40, %v2204_v35 }
 0x299   : > { %2451 = vmatprep.subr.bf16.mxu0 %v2369_v17 }
 0x29a   : > { %2452 = vmatpush1.bf16.msra.mxu0 %v2368_v29 }
 0x29b   : > { %v2529_v15 = vpop.permute.xlu1 %2528 }
 0x29c   : > { %v2531_v18 = vsel %vm2530_vm2, %v2527_v3, %v2529_v15  ;;  %v2537_v10 = vmul.f32 %v2529_v15, %v10744_v52  ;;  %v2540_v28 = vmul.f32 %v2529_v15, %v10747_v30 }
 0x29d   : > { %v2536_v59 = vmul.f32 %v2531_v18, %v10743_v24  ;;  %v2539_v38 = vmul.f32 %v2531_v18, %v10741_v32  ;;  %2468 = vmatmul.mubr.bf16.vlgmr.msra.gmra.mrb[4].mxu0 %v7645_v4 }
 0x29e   : > { %v6957_v11 = vpack.i.bf16 %v2535_v57, %v2537_v10 }
 0x29f   : > { %v6952_v55 = vpack.i.bf16 %v2536_v59, %v2535_v57  ;;  %v6962_v62 = vpack.i.bf16 %v2540_v28, %v2539_v38 }
 0x2a0   : > { %6958 = vrot.lane.b32.xlu1 %v6957_v11, %s10590_s14 }
 0x2a1   : > { %6953 = vrot.lane.b32.xlu0 %v6952_v55, %s10590_s14  ;;  %v9287_v55 = vld [vmem:[%s10442_s8 + $0x30] sm:$0xff] }
 0x2a4   : > { %2588 = vrot.lane.b32.xlu1 %v2581_v2, %s7771_s0  ;;  %v10796_v2 = vld [vmem:[#allocation21_spill] sm:$0xff] }
 0x2a5   : > { %6963 = vrot.lane.b32.xlu0 %v6962_v62, %s10590_s14  ;;  %v2704_v62 = vrot.slane %v9287_v55, %v10796_v2 }
 0x2a9   : > { %2590 = vrot.lane.b32.xlu0 %v2585_v16, %s7771_s0 }
 0x312   : > { %v6959_v12 = vpop.permute.xlu1 %6958 }
 0x313   : > { %v6954_v43 = vpop.permute.xlu0 %6953  ;;  %v6960_v7 = vunpack.i.l.bf16 %v6959_v12  ;;  %v6961_v0 = vunpack.i.h.bf16 %v6959_v12  ;;  %v9297_v12 = vld [vmem:[%s10442_s8 + $0x38] sm:$0xff] }
 0x314   : > { %v6956_v27 = vunpack.i.h.bf16 %v6954_v43  ;;  %v6955_v31 = vunpack.i.l.bf16 %v6954_v43  ;;  %v2708_v43 = vrot.slane %v9297_v12, %v10796_v2 }
 0x316   : > { %v2589_v1 = vpop.permute.xlu1 %2588  ;;  %v2560_v46 = vsel %vm2559_vm4, %v6955_v31, %v6956_v27  ;;  %v2561_v45 = vsel %vm2559_vm4, %v6956_v27, %v6960_v7 }
 0x317   : > { %v6964_v42 = vpop.permute.xlu0 %6963  ;;  %v2597_v49 = vmul.f32 0.0, %v2589_v1 }
 0x318   : > { %v6966_v13 = vunpack.i.h.bf16 %v6964_v42  ;;  %v6965_v41 = vunpack.i.l.bf16 %v6964_v42 }
 0x31a   : > { %v2562_v58 = vsel %vm2559_vm4, %v6961_v0, %v6965_v41  ;;  %v2563_v63 = vsel %vm2559_vm4, %v6965_v41, %v6966_v13 }
 0x31b   : > { %v2591_v26 = vpop.permute.xlu0 %2590  ;;  %v4087_v34 = vpack.c.bf16 %v2563_v63, %v2561_v45  ;;  %v4086_v54 = vpack.c.bf16 %v2562_v58, %v2560_v46 }
 0x31c   : > { %v2593_v19 = vsel %vm2592_vm6, %v2589_v1, %v2591_v26  ;;  %v2599_v51 = vmul.f32 %v2591_v26, %v10744_v52  ;;  %v2602_v48 = vmul.f32 %v2591_v26, %v10747_v30 }
 0x31d   : > { %v2598_v39 = vmul.f32 %v2593_v19, %v10743_v24  ;;  %4158 = vmatprep.subr.bf16.mxu0 %v4087_v34  ;;  %v2601_v14 = vmul.f32 %v2593_v19, %v10741_v32 }
 0x31e   : > { %4159 = vmatpush1.bf16.msra.mxu0 %v4086_v54  ;;  %v6972_v47 = vpack.i.bf16 %v2597_v49, %v2599_v51 }
 0x31f   : > { %v6967_v6 = vpack.i.bf16 %v2598_v39, %v2597_v49  ;;  %v6977_v8 = vpack.i.bf16 %v2602_v48, %v2601_v14 }
 0x320   : > { %6973 = vrot.lane.b32.xlu0 %v6972_v47, %s7772_s28 }
 0x321   : > { %6968 = vrot.lane.b32.xlu1 %v6967_v6, %s7772_s28 }
 0x324   : > { %2650 = vrot.lane.b32.xlu0 %v2643_v56, %s7773_s21 }
 0x325   : > { %6978 = vrot.lane.b32.xlu1 %v6977_v8, %s7772_s28 }
 0x329   : > { %2652 = vrot.lane.b32.xlu1 %v2647_v44, %s7773_s21  ;;  %v10797_v44 = vld [vmem:[#allocation22_spill] sm:$0xff] }
 0x392   : > { %v6974_v22 = vpop.permute.xlu0 %6973 }
 0x393   : > { %v6969_v53 = vpop.permute.xlu1 %6968  ;;  %v6975_v25 = vunpack.i.l.bf16 %v6974_v22  ;;  %v6976_v36 = vunpack.i.h.bf16 %v6974_v22  ;;  %v2764_v22 = vrot.slane %v9287_v55, %v10797_v44 }
 0x394   : > { %v6971_v23 = vunpack.i.h.bf16 %v6969_v53  ;;  %v6970_v3 = vunpack.i.l.bf16 %v6969_v53 }
 0x396   : > { %v2651_v21 = vpop.permute.xlu0 %2650  ;;  %v2622_v57 = vsel %vm2621_vm15, %v6970_v3, %v6971_v23  ;;  %v2623_v5 = vsel %vm2621_vm15, %v6971_v23, %v6975_v25  ;;  %v2768_v23 = vrot.slane %v9297_v12, %v10797_v44 }
 0x397   : > { %v6979_v50 = vpop.permute.xlu1 %6978  ;;  %v2659_v60 = vmul.f32 0.0, %v2651_v21 }
 0x398   : > { %v6981_v35 = vunpack.i.h.bf16 %v6979_v50  ;;  %v6980_v40 = vunpack.i.l.bf16 %v6979_v50 }
 0x39a   : > { %v2624_v37 = vsel %vm2621_vm15, %v6976_v36, %v6980_v40  ;;  %v2625_v15 = vsel %vm2621_vm15, %v6980_v40, %v6981_v35 }
 0x39b   : > { %v2653_v17 = vpop.permute.xlu1 %2652  ;;  %v4089_v29 = vpack.c.bf16 %v2625_v15, %v2623_v5  ;;  %v4088_v18 = vpack.c.bf16 %v2624_v37, %v2622_v57 }
 0x39c   : > { %v2655_v10 = vsel %vm2654_vm9, %v2651_v21, %v2653_v17  ;;  %v2661_v59 = vmul.f32 %v2653_v17, %v10744_v52  ;;  %v2664_v38 = vmul.f32 %v2653_v17, %v10747_v30 }
 0x39d   : > { %v2660_v20 = vmul.f32 %v2655_v10, %v10743_v24  ;;  %4160 = vmatprep.subr.bf16.mxu0 %v4089_v29  ;;  %v2663_v11 = vmul.f32 %v2655_v10, %v10741_v32 }
 0x39e   : > { %4161 = vmatpush1.bf16.msra.mxu0 %v4088_v18  ;;  %v6987_v4 = vpack.i.bf16 %v2659_v60, %v2661_v59 }
 0x39f   : > { %v6982_v28 = vpack.i.bf16 %v2660_v20, %v2659_v60  ;;  %v6992_v16 = vpack.i.bf16 %v2664_v38, %v2663_v11 }
 0x3a0   : > { %6988 = vrot.lane.b32.xlu1 %v6987_v4, %s7773_s21 }
 0x3a1   : > { %6983 = vrot.lane.b32.xlu0 %v6982_v28, %s7773_s21 }
 0x3a4   : > { %2711 = vrot.lane.b32.xlu1 %v2704_v62, %s7772_s28 }
 0x3a5   : > { %6993 = vrot.lane.b32.xlu0 %v6992_v16, %s7773_s21 }
 0x3a9   : > { %2713 = vrot.lane.b32.xlu0 %v2708_v43, %s7772_s28 }
 0x412   : > { %v6989_v27 = vpop.permute.xlu1 %6988 }
 0x413   : > { %v6984_v31 = vpop.permute.xlu0 %6983  ;;  %v6990_v1 = vunpack.i.l.bf16 %v6989_v27  ;;  %v6991_v41 = vunpack.i.h.bf16 %v6989_v27  ;;  %v10798_v27 = vld [vmem:[#allocation23_spill] sm:$0xff] }
 0x414   : > { %v6986_v7 = vunpack.i.h.bf16 %v6984_v31  ;;  %v6985_v42 = vunpack.i.l.bf16 %v6984_v31  ;;  %v2824_v31 = vrot.slane %v9287_v55, %v10798_v27 }
 0x416   : > { %v2712_v13 = vpop.permute.xlu1 %2711  ;;  %v2683_v49 = vsel %vm2654_vm9, %v6985_v42, %v6986_v7  ;;  %v2684_v26 = vsel %vm2654_vm9, %v6986_v7, %v6990_v1  ;;  %v2828_v42 = vrot.slane %v9297_v12, %v10798_v27 }
 0x417   : > { %v6994_v0 = vpop.permute.xlu0 %6993  ;;  %v2719_v63 = vmul.f32 0.0, %v2712_v13 }
 0x418   : > { %v6996_v46 = vunpack.i.h.bf16 %v6994_v0  ;;  %v6995_v58 = vunpack.i.l.bf16 %v6994_v0 }
 0x41a   : > { %v2685_v45 = vsel %vm2654_vm9, %v6991_v41, %v6995_v58  ;;  %v2686_v34 = vsel %vm2654_vm9, %v6995_v58, %v6996_v46 }
 0x41b   : > { %v2714_v54 = vpop.permute.xlu0 %2713  ;;  %v4091_v19 = vpack.c.bf16 %v2686_v34, %v2684_v26  ;;  %v4090_v51 = vpack.c.bf16 %v2685_v45, %v2683_v49 }
 0x41c   : > { %v2715_v39 = vsel %vm2621_vm15, %v2712_v13, %v2714_v54  ;;  %v2721_v47 = vmul.f32 %v2714_v54, %v10744_v52  ;;  %v2724_v56 = vmul.f32 %v2714_v54, %v10747_v30 }
 0x41d   : > { %v2720_v14 = vmul.f32 %v2715_v39, %v10743_v24  ;;  %4162 = vmatprep.subr.bf16.mxu0 %v4091_v19  ;;  %v2723_v6 = vmul.f32 %v2715_v39, %v10741_v32 }
 0x41e   : > { %4163 = vmatpush1.bf16.msra.mxu0 %v4090_v51  ;;  %v7002_v48 = vpack.i.bf16 %v2719_v63, %v2721_v47 }
 0x41f   : > { %v6997_v8 = vpack.i.bf16 %v2720_v14, %v2719_v63  ;;  %v7007_v53 = vpack.i.bf16 %v2724_v56, %v2723_v6 }
 0x420   : > { %7003 = vrot.lane.b32.xlu0 %v7002_v48, %s7771_s0 }
 0x421   : > { %6998 = vrot.lane.b32.xlu1 %v6997_v8, %s7771_s0 }
 0x424   : > { %2771 = vrot.lane.b32.xlu0 %v2764_v22, %s10590_s14 }
 0x425   : > { %7008 = vrot.lane.b32.xlu1 %v7007_v53, %s7771_s0 }
 0x429   : > { %2773 = vrot.lane.b32.xlu1 %v2768_v23, %s10590_s14  ;;  %v10799_v23 = vld [vmem:[#allocation24_spill] sm:$0xff]  ;;  %s7779_s14 = smov 28  }
 0x492   : > { %v7004_v3 = vpop.permute.xlu0 %7003 }
 0x493   : > { %v6999_v25 = vpop.permute.xlu1 %6998  ;;  %v7005_v36 = vunpack.i.l.bf16 %v7004_v3  ;;  %v7006_v57 = vunpack.i.h.bf16 %v7004_v3  ;;  %v2890_v3 = vrot.slane %v9297_v12, %v10799_v23 }
 0x494   : > { %v7001_v50 = vunpack.i.h.bf16 %v6999_v25  ;;  %v7000_v21 = vunpack.i.l.bf16 %v6999_v25  ;;  %v2886_v25 = vrot.slane %v9287_v55, %v10799_v23 }
 0x496   : > { %v2772_v40 = vpop.permute.xlu0 %2771  ;;  %v2743_v5 = vsel %vm2592_vm6, %v7000_v21, %v7001_v50  ;;  %v2744_v29 = vsel %vm2592_vm6, %v7001_v50, %v7005_v36  ;;  %v9354_v50 = vld [vmem:[%s10442_s8 + $0x48] sm:$0xff]  ;;  %v10800_v21 = vld [vmem:[#allocation17_spill] sm:$0xff] }
 0x497   : > { %v7009_v35 = vpop.permute.xlu1 %7008  ;;  %v2779_v17 = vmul.f32 0.0, %v2772_v40  ;;  %v2950_v36 = vrot.slane %v9354_v50, %v10800_v21  ;;  %v3010_v12 = vrot.slane %v9354_v50, %v10707_v33 }
 0x498   : > { %v7011_v37 = vunpack.i.h.bf16 %v7009_v35  ;;  %v7010_v60 = vunpack.i.l.bf16 %v7009_v35  ;;  %v9362_v35 = vld [vmem:[%s10442_s8 + $0x40] sm:$0xff] }
 0x499   : > { %v2946_v55 = vrot.slane %v9362_v35, %v10800_v21 }
 0x49a   : > { %v2745_v15 = vsel %vm2592_vm6, %v7006_v57, %v7010_v60  ;;  %v2746_v18 = vsel %vm2592_vm6, %v7010_v60, %v7011_v37  ;;  %v3070_v57 = vrot.slane %v9354_v50, %v10794_v9  ;;  %v3066_v37 = vrot.slane %v9362_v35, %v10794_v9 }
 0x49b   : > { %v2774_v10 = vpop.permute.xlu1 %2773  ;;  %v4093_v59 = vpack.c.bf16 %v2746_v18, %v2744_v29  ;;  %v4092_v20 = vpack.c.bf16 %v2745_v15, %v2743_v5  ;;  %v3132_v60 = vrot.slane %v9354_v50, %v10795_v61  ;;  %v3128_v5 = vrot.slane %v9362_v35, %v10795_v61 }
 0x49c   : > { %v2775_v4 = vsel %vm2559_vm4, %v2772_v40, %v2774_v10  ;;  %v2781_v11 = vmul.f32 %v2774_v10, %v10744_v52  ;;  %v2784_v16 = vmul.f32 %v2774_v10, %v10747_v30  ;;  %v3006_v40 = vrot.slane %v9362_v35, %v10707_v33 }
 0x49d   : > { %v2780_v38 = vmul.f32 %v2775_v4, %v10743_v24  ;;  %4164 = vmatprep.subr.bf16.mxu0 %v4093_v59  ;;  %v2783_v62 = vmul.f32 %v2775_v4, %v10741_v32  ;;  %v3194_v15 = vrot.slane %v9354_v50, %v10796_v2  ;;  %v3270_v10 = vrot.slane %v9362_v35, %v10798_v27 }
 0x49e   : > { %4165 = vmatpush1.bf16.msra.mxu0 %v4092_v20  ;;  %v7017_v28 = vpack.i.bf16 %v2779_v17, %v2781_v11  ;;  %v3330_v20 = vrot.slane %v9362_v35, %v10799_v23  ;;  %v3274_v4 = vrot.slane %v9354_v50, %v10798_v27  ;;  %v722_v11 = vld [vmem:[%s10442_s8 + $0x50] sm:$0xff] }
 0x49f   : > { %v7012_v43 = vpack.i.bf16 %v2780_v38, %v2779_v17  ;;  %v7022_v7 = vpack.i.bf16 %v2784_v16, %v2783_v62  ;;  %v3190_v17 = vrot.slane %v9362_v35, %v10796_v2  ;;  %v3390_v38 = vrot.slane %v722_v11, %v10800_v21  ;;  %v723_v62 = vld [vmem:[%s10442_s8 + $0x58] sm:$0xff] }
 0x4a0   : > { %7018 = vrot.lane.b32.xlu1 %v7017_v28, %s7769_s23  ;;  %v3334_v28 = vrot.slane %v9354_v50, %v10799_v23  ;;  %v3450_v16 = vrot.slane %v722_v11, %v10707_v33 }
 0x4a1   : > { %7013 = vrot.lane.b32.xlu0 %v7012_v43, %s7769_s23  ;;  %v3394_v43 = vrot.slane %v723_v62, %v10800_v21 }
 0x4a4   : > { %2831 = vrot.lane.b32.xlu1 %v2824_v31, %s10584_s29  ;;  %v3510_v31 = vrot.slane %v722_v11, %v10794_v9 }
 0x4a5   : > { %7023 = vrot.lane.b32.xlu0 %v7022_v7, %s7769_s23  ;;  %v3454_v7 = vrot.slane %v723_v62, %v10707_v33 }
 0x4a9   : > { %2833 = vrot.lane.b32.xlu0 %v2828_v42, %s10584_s29  ;;  %s7778_s29 = smov 4   ;;  %v3570_v42 = vrot.slane %v722_v11, %v10795_v61 }
 0x512   : > { %v7019_v1 = vpop.permute.xlu1 %7018 }
 0x513   : > { %v7014_v0 = vpop.permute.xlu0 %7013  ;;  %v7020_v46 = vunpack.i.l.bf16 %v7019_v1  ;;  %v7021_v45 = vunpack.i.h.bf16 %v7019_v1  ;;  %v3514_v1 = vrot.slane %v723_v62, %v10794_v9 }
 0x514   : > { %v7016_v13 = vunpack.i.h.bf16 %v7014_v0  ;;  %v7015_v41 = vunpack.i.l.bf16 %v7014_v0  ;;  %v3630_v0 = vrot.slane %v722_v11, %v10796_v2 }
 0x516   : > { %v2832_v49 = vpop.permute.xlu1 %2831  ;;  %v2803_v34 = vsel %vm2530_vm2, %v7015_v41, %v7016_v13  ;;  %v2804_v51 = vsel %vm2530_vm2, %v7016_v13, %v7020_v46  ;;  %v3574_v13 = vrot.slane %v723_v62, %v10795_v61  ;;  %v3690_v41 = vrot.slane %v722_v11, %v10797_v44 }
 0x517   : > { %v7024_v58 = vpop.permute.xlu0 %7023  ;;  %v2840_v19 = vmul.f32 0.0, %v2832_v49  ;;  %v3634_v46 = vrot.slane %v723_v62, %v10796_v2 }
 0x518   : > { %v7026_v63 = vunpack.i.h.bf16 %v7024_v58  ;;  %v7025_v26 = vunpack.i.l.bf16 %v7024_v58  ;;  %v3750_v58 = vrot.slane %v722_v11, %v10798_v27 }
 0x51a   : > { %v2805_v54 = vsel %vm2530_vm2, %v7021_v45, %v7025_v26  ;;  %v2806_v39 = vsel %vm2530_vm2, %v7025_v26, %v7026_v63  ;;  %v3754_v45 = vrot.slane %v723_v62, %v10798_v27 }
 0x51b   : > { %v2834_v47 = vpop.permute.xlu0 %2833  ;;  %v4095_v14 = vpack.c.bf16 %v2806_v39, %v2804_v51  ;;  %v4094_v48 = vpack.c.bf16 %v2805_v54, %v2803_v34 }
 0x51c   : > { %v2836_v6 = vsel %vm2835_vm11, %v2832_v49, %v2834_v47  ;;  %v2842_v56 = vmul.f32 %v2834_v47, %v10744_v52  ;;  %v2845_v18 = vmul.f32 %v2834_v47, %v10747_v30  ;;  %v3694_v49 = vrot.slane %v723_v62, %v10797_v44 }
 0x51d   : > { %v2841_v8 = vmul.f32 %v2836_v6, %v10743_v24  ;;  %4166 = vmatprep.subr.bf16.mxu0 %v4095_v14  ;;  %v2844_v29 = vmul.f32 %v2836_v6, %v10741_v32 }
 0x51e   : > { %4167 = vmatpush1.bf16.msra.mxu0 %v4094_v48  ;;  %v7032_v22 = vpack.i.bf16 %v2840_v19, %v2842_v56 }
 0x51f   : > { %v7027_v53 = vpack.i.bf16 %v2841_v8, %v2840_v19  ;;  %v7037_v59 = vpack.i.bf16 %v2845_v18, %v2844_v29  ;;  %v9467_v18 = vld [vmem:[%s10442_s8 + $0x60] sm:$0xff] }
 0x520   : > { %7033 = vrot.lane.b32.xlu0 %v7032_v22, %s7775_s18 }
 0x521   : > { %7028 = vrot.lane.b32.xlu1 %v7027_v53, %s7775_s18 }
 0x524   : > { %2895 = vrot.lane.b32.xlu0 %v2890_v3, %s10753_s30  ;;  %v3810_v3 = vrot.slane %v722_v11, %v10799_v23  ;;  %v3870_v11 = vrot.slane %v9467_v18, %v10800_v21 }
 0x525   : > { %2893 = vrot.lane.b32.xlu1 %v2886_v25, %s10753_s30 }
 0x528   : > { %2955 = vrot.lane.b32.xlu0 %v2950_v36, %s10653_s3 }
 0x529   : > { %2953 = vrot.lane.b32.xlu1 %v2946_v55, %s10653_s3 }
 0x52c   : > { %3015 = vrot.lane.b32.xlu0 %v3010_v12, %s10652_s25 }
 0x52d   : > { %3013 = vrot.lane.b32.xlu1 %v3006_v40, %s10652_s25 }
 0x530   : > { %3075 = vrot.lane.b32.xlu0 %v3070_v57, %s10586_s26  ;;  %v3814_v57 = vrot.slane %v723_v62, %v10799_v23 }
 0x531   : > { %3073 = vrot.lane.b32.xlu1 %v3066_v37, %s10586_s26 }
 0x534   : > { %3137 = vrot.lane.b32.xlu0 %v3132_v60, %s10588_s1 }
 0x535   : > { %3135 = vrot.lane.b32.xlu1 %v3128_v5, %s10588_s1 }
 0x538   : > { %3199 = vrot.lane.b32.xlu0 %v3194_v15, %s10645_s22 }
 0x539   : > { %3197 = vrot.lane.b32.xlu1 %v3190_v17, %s10645_s22 }
 0x53c   : > { %3277 = vrot.lane.b32.xlu0 %v3270_v10, %s10667_s27 }
 0x53d   : > { %7038 = vrot.lane.b32.xlu1 %v7037_v59, %s7775_s18 }
 0x540   : > { %3337 = vrot.lane.b32.xlu0 %v3330_v20, %s7778_s29 }
 0x541   : > { %3279 = vrot.lane.b32.xlu1 %v3274_v4, %s10667_s27  ;;  %v9473_v4 = vld [vmem:[%s10442_s8 + $0x68] sm:$0xff] }
 0x544   : > { %3397 = vrot.lane.b32.xlu0 %v3390_v38, %s7779_s14  ;;  %v3874_v38 = vrot.slane %v9473_v4, %v10800_v21 }
 0x545   : > { %3339 = vrot.lane.b32.xlu1 %v3334_v28, %s7778_s29 }
 0x548   : > { %3457 = vrot.lane.b32.xlu0 %v3450_v16, %s10657_s2 }
 0x549   : > { %3399 = vrot.lane.b32.xlu1 %v3394_v43, %s7779_s14 }
 0x54c   : > { %3517 = vrot.lane.b32.xlu0 %v3510_v31, %s10656_s20 }
 0x54d   : > { %3459 = vrot.lane.b32.xlu1 %v3454_v7, %s10657_s2 }
 0x550   : > { %3577 = vrot.lane.b32.xlu0 %v3570_v42, %s10655_s4 }
 0x551   : > { %3519 = vrot.lane.b32.xlu1 %v3514_v1, %s10656_s20 }
 0x554   : > { %3637 = vrot.lane.b32.xlu0 %v3630_v0, %s7775_s18 }
 0x555   : > { %3579 = vrot.lane.b32.xlu1 %v3574_v13, %s10655_s4 }
 0x558   : > { %3697 = vrot.lane.b32.xlu0 %v3690_v41, %s7769_s23 }
 0x559   : > { %3639 = vrot.lane.b32.xlu1 %v3634_v46, %s7775_s18 }
 0x55c   : > { %3757 = vrot.lane.b32.xlu0 %v3750_v58, %s7771_s0 }
 0x55d   : > { %3699 = vrot.lane.b32.xlu1 %v3694_v49, %s7769_s23 }
 0x561   : > { %3759 = vrot.lane.b32.xlu1 %v3754_v45, %s7771_s0 }
 0x592   : > { %v9442_v63 = vpop.permute.xlu0 %7033 }
 0x593   : > { %v9444_v26 = vpop.permute.xlu1 %7028  ;;  %v7035_v42 = vunpack.i.l.bf16 %v9442_v63  ;;  %v7036_v49 = vunpack.i.h.bf16 %v9442_v63 }
 0x594   : > { %v7031_v1 = vunpack.i.h.bf16 %v9444_v26  ;;  %v7030_v0 = vunpack.i.l.bf16 %v9444_v26 }
 0x596   : > { %v2896_v34 = vpop.permute.xlu0 %2895  ;;  %v2865_v26 = vsel %vm2864_vm3, %v7030_v0, %v7031_v1 }
 0x597   : > { %v2894_v54 = vpop.permute.xlu1 %2893  ;;  %v2903_v51 = vmul.f32 %v2896_v34, %v10744_v52  ;;  %v2906_v39 = vmul.f32 %v2896_v34, %v10747_v30 }
 0x598   : > { %v2897_v19 = vsel %vm10801_vm12, %v2894_v54, %v2896_v34  ;;  %v2901_v6 = vmul.f32 0.0, %v2894_v54  ;;  %vm3139_vm12 = vcmask 1014784  }
 0x599   : > { %v2905_v47 = vmul.f32 %v2897_v19, %v10741_v32  ;;  %v2902_v14 = vmul.f32 %v2897_v19, %v10743_v24  ;;  %v3930_v19 = vrot.slane %v9467_v18, %v10707_v33 }
 0x59a   : > { %v2956_v48 = vpop.permute.xlu0 %2955  ;;  %v7052_v25 = vpack.i.bf16 %v2901_v6, %v2901_v6 }
 0x59b   : > { %v7047_v56 = vpack.i.bf16 %v2906_v39, %v2905_v47  ;;  %v7042_v8 = vpack.i.bf16 %v2903_v51, %v2902_v14  ;;  %v2954_v22 = vpop.permute.xlu1 %2953  ;;  %v2963_v12 = vmul.f32 %v2956_v48, %v10744_v52  ;;  %v2966_v15 = vmul.f32 %v2956_v48, %v10747_v30 }
 0x59c   : > { %v2957_v53 = vsel %vm10802_vm14, %v2954_v22, %v2956_v48  ;;  %v2961_v40 = vmul.f32 0.0, %v2954_v22  ;;  %v2866_v39 = vsel %vm2864_vm3, %v7031_v1, %v7035_v42  ;;  %vm10805_vm14 = vcmask 1031168  }
 0x59d   : > { %7048 = vrot.lane.b32.xlu1 %v7047_v56, %s10655_s4  ;;  %7043 = vrot.lane.b32.xlu0 %v7042_v8, %s10655_s4  ;;  %v2962_v36 = vmul.f32 %v2957_v53, %v10743_v24  ;;  %v2965_v37 = vmul.f32 %v2957_v53, %v10741_v32  ;;  %v3934_v53 = vrot.slane %v9473_v4, %v10707_v33 }
 0x59e   : > { %v7067_v17 = vpack.i.bf16 %v2961_v40, %v2961_v40  ;;  %v3016_v29 = vpop.permute.xlu0 %3015 }
 0x59f   : > { %v3014_v55 = vpop.permute.xlu1 %3013  ;;  %v7057_v60 = vpack.i.bf16 %v2963_v12, %v2962_v36  ;;  %v7062_v10 = vpack.i.bf16 %v2966_v15, %v2965_v37  ;;  %v3023_v43 = vmul.f32 %v3016_v29, %v10744_v52  ;;  %v3026_v31 = vmul.f32 %v3016_v29, %v10747_v30 }
 0x5a0   : > { %v3017_v20 = vsel %vm10803_vm10, %v3014_v55, %v3016_v29  ;;  %v3021_v13 = vmul.f32 0.0, %v3014_v55  ;;  %vm3168_vm10 = vcmask 31744  }
 0x5a1   : > { %3817 = vrot.lane.b32.xlu1 %v3810_v3, %s7773_s21  ;;  %7053 = vrot.lane.b32.xlu0 %v7052_v25, %s10655_s4  ;;  %v3025_v28 = vmul.f32 %v3017_v20, %v10741_v32  ;;  %v3022_v62 = vmul.f32 %v3017_v20, %v10743_v24  ;;  %s7782_s4 = smov 56  }
 0x5a2   : > { %v3076_v7 = vpop.permute.xlu0 %3075  ;;  %v7082_v63 = vpack.i.bf16 %v3021_v13, %v3021_v13 }
 0x5a3   : > { %v3074_v5 = vpop.permute.xlu1 %3073  ;;  %v7077_v41 = vpack.i.bf16 %v3026_v31, %v3025_v28  ;;  %v7072_v46 = vpack.i.bf16 %v3023_v43, %v3022_v62  ;;  %v3084_v8 = vmul.f32 %v3076_v7, %v10744_v52  ;;  %v3087_v55 = vmul.f32 %v3076_v7, %v10747_v30 }
 0x5a4   : > { %v3078_v45 = vsel %vm3077_vm0, %v3074_v5, %v3076_v7  ;;  %v3082_v22 = vmul.f32 0.0, %v3074_v5 }
 0x5a5   : > { %3819 = vrot.lane.b32.xlu0 %v3814_v57, %s7773_s21  ;;  %7058 = vrot.lane.b32.xlu1 %v7057_v60, %s10656_s20  ;;  %v3083_v14 = vmul.f32 %v3078_v45, %v10743_v24  ;;  %v3086_v3 = vmul.f32 %v3078_v45, %v10741_v32 }
 0x5a6   : > { %v3138_v48 = vpop.permute.xlu0 %3137  ;;  %v7097_v12 = vpack.i.bf16 %v3082_v22, %v3082_v22 }
 0x5a7   : > { %v3136_v59 = vpop.permute.xlu1 %3135  ;;  %v7087_v25 = vpack.i.bf16 %v3084_v8, %v3083_v14  ;;  %v7092_v57 = vpack.i.bf16 %v3087_v55, %v3086_v3  ;;  %v3146_v15 = vmul.f32 %v3138_v48, %v10744_v52 }
 0x5a8   : > { %v3140_v36 = vsel %vm3139_vm12, %v3136_v59, %v3138_v48  ;;  %v3144_v29 = vmul.f32 0.0, %v3136_v59 }
 0x5a9   : > { %7063 = vrot.lane.b32.xlu0 %v7062_v10, %s10656_s20  ;;  %7068 = vrot.lane.b32.xlu1 %v7067_v17, %s10656_s20  ;;  %s10804_s20 = smov 68   ;;  %v3148_v37 = vmul.f32 %v3140_v36, %v10741_v32  ;;  %v3145_v60 = vmul.f32 %v3140_v36, %v10743_v24  ;;  %v3149_v17 = vmul.f32 %v3138_v48, %v10747_v30 }
 0x5aa   : > { %v3200_v40 = vpop.permute.xlu0 %3199  ;;  %v7112_v28 = vpack.i.bf16 %v3144_v29, %v3144_v29 }
 0x5ab   : > { %v3198_v16 = vpop.permute.xlu1 %3197  ;;  %v7107_v10 = vpack.i.bf16 %v3149_v17, %v3148_v37  ;;  %v7102_v20 = vpack.i.bf16 %v3146_v15, %v3145_v60  ;;  %v3207_v62 = vmul.f32 %v3200_v40, %v10744_v52  ;;  %v3210_v1 = vmul.f32 %v3200_v40, %v10747_v30 }
 0x5ac   : > { %v3201_v5 = vsel %vm10805_vm14, %v3198_v16, %v3200_v40  ;;  %v3205_v43 = vmul.f32 0.0, %v3198_v16  ;;  %vm3106_vm14 = vcmask 228352  }
 0x5ad   : > { %3877 = vrot.lane.b32.xlu0 %v3870_v11, %s7772_s28  ;;  %3879 = vrot.lane.b32.xlu1 %v3874_v38, %s7772_s28  ;;  %v3206_v11 = vmul.f32 %v3201_v5, %v10743_v24  ;;  %v3209_v59 = vmul.f32 %v3201_v5, %v10741_v32 }
 0x5ae   : > { %v3278_v31 = vpop.permute.xlu0 %3277  ;;  %v7127_v0 = vpack.i.bf16 %v3205_v43, %v3205_v43 }
 0x5af   : > { %v7039_v58 = vpop.permute.xlu1 %7038  ;;  %v7117_v7 = vpack.i.bf16 %v3207_v62, %v3206_v11  ;;  %v7122_v16 = vpack.i.bf16 %v3210_v1, %v3209_v59  ;;  %v7648_v11 = vld [vmem:[%s10439_s5 + $0x24] ss:$16 sps:$4 sm:$0xff]   ;;  %v7649_v1 = vld [vmem:[%s10439_s5] ss:$16 sps:$4 sm:$0xff]  }
 0x5b0   : > { %v7041_v34 = vunpack.i.h.bf16 %v7039_v58  ;;  %v7040_v54 = vunpack.i.l.bf16 %v7039_v58  ;;  %4190 = vmatprep.mubr.bf16.mxu0 %v7648_v11 }
 0x5b1   : > { %7078 = vrot.lane.b32.xlu1 %v7077_v41, %s10657_s2  ;;  %7073 = vrot.lane.b32.xlu0 %v7072_v46, %s10657_s2 }
 0x5b2   : > { %v2867_v51 = vsel %vm2864_vm3, %v7036_v49, %v7040_v54  ;;  %v2868_v47 = vsel %vm2864_vm3, %v7040_v54, %v7041_v34  ;;  %v3338_v41 = vpop.permute.xlu0 %3337  ;;  %v3285_v34 = vmul.f32 %v3278_v31, %v10743_v24  ;;  %v3288_v54 = vmul.f32 %v3278_v31, %v10741_v32 }
 0x5b3   : > { %v4097_v6 = vpack.c.bf16 %v2868_v47, %v2866_v39  ;;  %v4096_v56 = vpack.c.bf16 %v2867_v51, %v2865_v26  ;;  %v3280_v38 = vpop.permute.xlu1 %3279  ;;  %v3345_v14 = vmul.f32 %v3338_v41, %v10743_v24  ;;  %v3348_v48 = vmul.f32 %v3338_v41, %v10741_v32 }
 0x5b4   : > { %v3281_v42 = vsel %vm1401_vm1, %v3278_v31, %v3280_v38  ;;  %v3287_v46 = vmul.f32 0.0, %v3280_v38  ;;  %v7142_v8 = vpack.i.bf16 %v3288_v54, %v3285_v34 }
 0x5b5   : > { %3937 = vrot.lane.b32.xlu1 %v3930_v19, %s10804_s20  ;;  %7083 = vrot.lane.b32.xlu0 %v7082_v63, %s10657_s2  ;;  %v3289_v58 = vmul.f32 %v3281_v42, %v10747_v30  ;;  %v3286_v49 = vmul.f32 %v3281_v42, %v10744_v52  ;;  %s10806_s2 = smov 124   ;;  %v7157_v3 = vpack.i.bf16 %v3348_v48, %v3345_v14 }
 0x5b6   : > { %4168 = vmatprep.subr.bf16.mxu0 %v4097_v6  ;;  %v3398_v63 = vpop.permute.xlu0 %3397 }
 0x5b7   : > { %4169 = vmatpush1.bf16.msra.mxu0 %v4096_v56  ;;  %v3340_v13 = vpop.permute.xlu1 %3339  ;;  %v7137_v19 = vpack.i.bf16 %v3287_v46, %v3289_v58  ;;  %v7132_v26 = vpack.i.bf16 %v3287_v46, %v3286_v49  ;;  %v3405_v37 = vmul.f32 %v3398_v63, %v10743_v24  ;;  %v3408_v60 = vmul.f32 %v3398_v63, %v10741_v32 }
 0x5b8   : > { %v3341_v45 = vsel %vm3168_vm10, %v3338_v41, %v3340_v13  ;;  %v3347_v51 = vmul.f32 0.0, %v3340_v13 }
 0x5b9   : > { %3939 = vrot.lane.b32.xlu0 %v3934_v53, %s10804_s20  ;;  %7088 = vrot.lane.b32.xlu1 %v7087_v25, %s7779_s14  ;;  %v3346_v39 = vmul.f32 %v3341_v45, %v10744_v52  ;;  %v3349_v6 = vmul.f32 %v3341_v45, %v10747_v30  ;;  %v7172_v31 = vpack.i.bf16 %v3408_v60, %v3405_v37 }
 0x5ba   : > { %v3458_v36 = vpop.permute.xlu0 %3457 }
 0x5bb   : > { %v3400_v47 = vpop.permute.xlu1 %3399  ;;  %v7147_v56 = vpack.i.bf16 %v3347_v51, %v3346_v39  ;;  %v7152_v25 = vpack.i.bf16 %v3347_v51, %v3349_v6  ;;  %v3465_v38 = vmul.f32 %v3458_v36, %v10743_v24 }
 0x5bc   : > { %v3401_v22 = vsel %vm3106_vm14, %v3398_v63, %v3400_v47  ;;  %v3407_v55 = vmul.f32 0.0, %v3400_v47 }
 0x5bd   : > { %7093 = vrot.lane.b32.xlu0 %v7092_v57, %s7779_s14  ;;  %7098 = vrot.lane.b32.xlu1 %v7097_v12, %s7779_s14  ;;  %v3409_v12 = vmul.f32 %v3401_v22, %v10747_v30  ;;  %v3406_v40 = vmul.f32 %v3401_v22, %v10744_v52 }
 0x5bf   : > { %v3460_v53 = vpop.permute.xlu1 %3459  ;;  %v7167_v5 = vpack.i.bf16 %v3407_v55, %v3409_v12  ;;  %v7162_v15 = vpack.i.bf16 %v3407_v55, %v3406_v40 }
 0x5c0   : > { %v3461_v57 = vsel %vm1029_vm5, %v3458_v36, %v3460_v53  ;;  %v3467_v17 = vmul.f32 0.0, %v3460_v53 }
 0x5c1   : > { %7108 = vrot.lane.b32.xlu1 %v7107_v10, %s7778_s29  ;;  %7103 = vrot.lane.b32.xlu0 %v7102_v20, %s7778_s29  ;;  %v3466_v29 = vmul.f32 %v3461_v57, %v10744_v52  ;;  %v3518_v20 = vpop.permute.xlu0 %3517  ;;  %v3469_v62 = vmul.f32 %v3461_v57, %v10747_v30 }
 0x5c2   : > { %v3525_v45 = vmul.f32 %v3518_v20, %v10743_v24  ;;  %v3528_v34 = vmul.f32 %v3518_v20, %v10741_v32 }
 0x5c3   : > { %v3520_v10 = vpop.permute.xlu1 %3519  ;;  %v7177_v43 = vpack.i.bf16 %v3467_v17, %v3466_v29  ;;  %v7182_v13 = vpack.i.bf16 %v3467_v17, %v3469_v62 }
 0x5c4   : > { %v3521_v59 = vsel %vm905_vm8, %v3518_v20, %v3520_v10  ;;  %v3527_v41 = vmul.f32 0.0, %v3520_v10 }
 0x5c5   : > { %7113 = vrot.lane.b32.xlu0 %v7112_v28, %s7778_s29  ;;  %7118 = vrot.lane.b32.xlu1 %v7117_v7, %s10667_s27  ;;  %v3468_v28 = vmul.f32 %v3458_v36, %v10741_v32  ;;  %v3529_v46 = vmul.f32 %v3521_v59, %v10747_v30  ;;  %v3526_v58 = vmul.f32 %v3521_v59, %v10744_v52 }
 0x5c7   : > { %v3580_v7 = vpop.permute.xlu1 %3579  ;;  %v7187_v42 = vpack.i.bf16 %v3468_v28, %v3465_v38  ;;  %v7197_v54 = vpack.i.bf16 %v3527_v41, %v3529_v46 }
 0x5c9   : > { %7123 = vrot.lane.b32.xlu0 %v7122_v16, %s10667_s27  ;;  %7128 = vrot.lane.b32.xlu1 %v7127_v0, %s10667_s27  ;;  %v7651_v0 = vld [vmem:[%s10439_s5 + $0x4] ss:$16 sps:$4 sm:$0xff]   ;;  %v3578_v16 = vpop.permute.xlu0 %3577  ;;  %s7783_s27 = smov 72  }
 0x5ca   : > { %v3581_v49 = vsel %vm781_vm7, %v3578_v16, %v3580_v7  ;;  %2424 = vmatprep.mubr.bf16.mxu1 %v7651_v0  ;;  %v3585_v63 = vmul.f32 %v3578_v16, %v10743_v24  ;;  %v3588_v14 = vmul.f32 %v3578_v16, %v10741_v32 }
 0x5cb   : > { %2425 = vmatmul.mubr.bf16.vlgmr.msra.gmra.mrb[0].mxu1 %v7649_v1  ;;  %v3586_v51 = vmul.f32 %v3581_v49, %v10744_v52  ;;  %v3640_v39 = vpop.permute.xlu1 %3639  ;;  %v3589_v48 = vmul.f32 %v3581_v49, %v10747_v30 }
 0x5cc   : > { %v7217_v53 = vpack.i.bf16 %v3588_v14, %v3585_v63  ;;  %v3647_v36 = vmul.f32 0.0, %v3640_v39 }
 0x5cd   : > { %7138 = vrot.lane.b32.xlu1 %v7137_v19, %s10645_s22  ;;  %7133 = vrot.lane.b32.xlu0 %v7132_v26, %s10645_s22  ;;  %v7192_v19 = vpack.i.bf16 %v3527_v41, %v3526_v58  ;;  %v3587_v26 = vmul.f32 0.0, %v3580_v7  ;;  %v3638_v47 = vpop.permute.xlu0 %3637 }
 0x5ce   : > { %v3645_v57 = vmul.f32 %v3638_v47, %v10743_v24  ;;  %v3648_v37 = vmul.f32 %v3638_v47, %v10741_v32 }
 0x5cf   : > { %v7207_v6 = vpack.i.bf16 %v3587_v26, %v3586_v51  ;;  %v3700_v22 = vpop.permute.xlu1 %3699 }
 0x5d0   : > { %v7232_v62 = vpack.i.bf16 %v3648_v37, %v3645_v57 }
 0x5d1   : > { %7143 = vrot.lane.b32.xlu0 %v7142_v8, %s10645_s22  ;;  %7148 = vrot.lane.b32.xlu1 %v7147_v56, %s10806_s2  ;;  %s10807_s22 = smov 100   ;;  %v7202_v56 = vpack.i.bf16 %v3528_v34, %v3525_v45  ;;  %v3641_v8 = vsel %vm2864_vm3, %v3638_v47, %v3640_v39 }
 0x5d2   : > { %v3649_v55 = vmul.f32 %v3641_v8, %v10747_v30  ;;  %v3646_v12 = vmul.f32 %v3641_v8, %v10744_v52 }
 0x5d3   : > { %v3760_v29 = vpop.permute.xlu1 %3759 }
 0x5d4   : > { %v7227_v60 = vpack.i.bf16 %v3647_v36, %v3649_v55  ;;  %v3767_v7 = vmul.f32 0.0, %v3760_v29 }
 0x5d5   : > { %7153 = vrot.lane.b32.xlu0 %v7152_v25, %s10806_s2  ;;  %7158 = vrot.lane.b32.xlu1 %v7157_v3, %s10806_s2  ;;  %v7212_v3 = vpack.i.bf16 %v3587_v26, %v3589_v48  ;;  %v3698_v25 = vpop.permute.xlu0 %3697 }
 0x5d6   : > { %v3701_v40 = vsel %vm2530_vm2, %v3698_v25, %v3700_v22  ;;  %v3705_v10 = vmul.f32 %v3698_v25, %v10743_v24  ;;  %v3708_v20 = vmul.f32 %v3698_v25, %v10741_v32 }
 0x5d7   : > { %v3706_v17 = vmul.f32 %v3701_v40, %v10744_v52  ;;  %v3709_v38 = vmul.f32 %v3701_v40, %v10747_v30 }
 0x5d9   : > { %7168 = vrot.lane.b32.xlu1 %v7167_v5, %s10807_s22  ;;  %7163 = vrot.lane.b32.xlu0 %v7162_v15, %s10807_s22  ;;  %v7222_v5 = vpack.i.bf16 %v3647_v36, %v3646_v12  ;;  %v3707_v15 = vmul.f32 0.0, %v3700_v22  ;;  %v3758_v11 = vpop.permute.xlu0 %3757 }
 0x5da   : > { %v3765_v0 = vmul.f32 %v3758_v11, %v10743_v24 }
 0x5db   : > { %v7237_v28 = vpack.i.bf16 %v3707_v15, %v3706_v17  ;;  %v7242_v59 = vpack.i.bf16 %v3707_v15, %v3709_v38 }
 0x5dd   : > { %7173 = vrot.lane.b32.xlu0 %v7172_v31, %s10807_s22  ;;  %7178 = vrot.lane.b32.xlu1 %v7177_v43, %s10652_s25  ;;  %v3761_v43 = vsel %vm2592_vm6, %v3758_v11, %v3760_v29  ;;  %v7247_v31 = vpack.i.bf16 %v3708_v20, %v3705_v10 }
 0x5de   : > { %v3766_v1 = vmul.f32 %v3761_v43, %v10744_v52 }
 0x5e0   : > { %v7252_v41 = vpack.i.bf16 %v3767_v7, %v3766_v1 }
 0x5e1   : > { %7183 = vrot.lane.b32.xlu0 %v7182_v13, %s10652_s25  ;;  %7188 = vrot.lane.b32.xlu1 %v7187_v42, %s10652_s25  ;;  %v3769_v42 = vmul.f32 %v3761_v43, %v10747_v30  ;;  %v3768_v13 = vmul.f32 %v3758_v11, %v10741_v32  ;;  %s7780_s25 = smov 120  }
 0x5e3   : > { %v7257_v16 = vpack.i.bf16 %v3767_v7, %v3769_v42  ;;  %v7262_v46 = vpack.i.bf16 %v3768_v13, %v3765_v0 }
 0x5e5   : > { %7198 = vrot.lane.b32.xlu1 %v7197_v54, %s10653_s3  ;;  %7193 = vrot.lane.b32.xlu0 %v7192_v19, %s10653_s3 }
 0x5e9   : > { %7203 = vrot.lane.b32.xlu0 %v7202_v56, %s10653_s3  ;;  %7208 = vrot.lane.b32.xlu1 %v7207_v6, %s10753_s30  ;;  %s10808_s3 = smov 92  }
 0x5ed   : > { %7213 = vrot.lane.b32.xlu0 %v7212_v3, %s10753_s30  ;;  %7218 = vrot.lane.b32.xlu1 %v7217_v53, %s10753_s30  ;;  %s7781_s30 = smov 8  }
 0x5f1   : > { %7228 = vrot.lane.b32.xlu1 %v7227_v60, %s10808_s3  ;;  %7223 = vrot.lane.b32.xlu0 %v7222_v5, %s10808_s3 }
 0x5f5   : > { %7233 = vrot.lane.b32.xlu0 %v7232_v62, %s10808_s3  ;;  %7238 = vrot.lane.b32.xlu1 %v7237_v28, %s10804_s20 }
 0x5f9   : > { %7243 = vrot.lane.b32.xlu0 %v7242_v59, %s10804_s20  ;;  %7248 = vrot.lane.b32.xlu1 %v7247_v31, %s10804_s20 }
 0x5fd   : > { %7258 = vrot.lane.b32.xlu1 %v7257_v16, %s7772_s28  ;;  %7253 = vrot.lane.b32.xlu0 %v7252_v41, %s7772_s28 }
 0x601   : > { %7263 = vrot.lane.b32.xlu0 %v7262_v46, %s7772_s28  ;;  %s10845_s28 = sld [smem:[#allocation54_spill]] }
 0x607   : > { %s10846_s1 = smov %s10845_s28 }
 0x60f   : > { %v7044_v58 = vpop.permute.xlu0 %7043  ;;  %v7049_v49 = vpop.permute.xlu1 %7048 }
 0x610   : > { %v7046_v45 = vunpack.i.h.bf16 %v7044_v58  ;;  %v7045_v34 = vunpack.i.l.bf16 %v7044_v58  ;;  %v7051_v54 = vunpack.i.h.bf16 %v7049_v49  ;;  %v7050_v19 = vunpack.i.l.bf16 %v7049_v49 }
 0x612   : > { %v2926_v26 = vsel %vm781_vm7, %v7045_v34, %v7046_v45  ;;  %v2928_v51 = vsel %vm781_vm7, %v7050_v19, %v7051_v54 }
 0x613   : > { %v7054_v39 = vpop.permute.xlu0 %7053  ;;  %v3818_v47 = vpop.permute.xlu1 %3817  ;;  %v4099_v63 = vpack.c.bf16 %v2928_v51, %v2926_v26 }
 0x614   : > { %v7056_v14 = vunpack.i.h.bf16 %v7054_v39  ;;  %v7055_v48 = vunpack.i.l.bf16 %v7054_v39  ;;  %v3825_v57 = vmul.f32 %v3818_v47, %v10743_v24  ;;  %v3828_v37 = vmul.f32 %v3818_v47, %v10741_v32 }
 0x615   : > { %4170 = vmatprep.subr.bf16.mxu0 %v4099_v63 }
 0x616   : > { %v2925_v6 = vsel %vm781_vm7, %v7055_v48, %v7045_v34  ;;  %v2927_v56 = vsel %vm781_vm7, %v7056_v14, %v7050_v19  ;;  %v7277_v7 = vpack.i.bf16 %v3828_v37, %v3825_v57 }
 0x617   : > { %v3820_v8 = vpop.permute.xlu0 %3819  ;;  %v7059_v22 = vpop.permute.xlu1 %7058  ;;  %v4098_v53 = vpack.c.bf16 %v2927_v56, %v2925_v6 }
 0x618   : > { %v3821_v3 = vsel %vm2654_vm9, %v3818_v47, %v3820_v8  ;;  %v3827_v25 = vmul.f32 0.0, %v3820_v8  ;;  %v7061_v12 = vunpack.i.h.bf16 %v7059_v22  ;;  %v7060_v40 = vunpack.i.l.bf16 %v7059_v22 }
 0x619   : > { %v3829_v36 = vmul.f32 %v3821_v3, %v10747_v30  ;;  %v3826_v55 = vmul.f32 %v3821_v3, %v10744_v52  ;;  %4171 = vmatpush1.bf16.msra.mxu0 %v4098_v53 }
 0x61a   : > { %v2986_v62 = vsel %vm905_vm8, %v7060_v40, %v7061_v12 }
 0x61b   : > { %v7272_v60 = vpack.i.bf16 %v3827_v25, %v3829_v36  ;;  %v7267_v5 = vpack.i.bf16 %v3827_v25, %v3826_v55  ;;  %v7064_v15 = vpop.permute.xlu0 %7063  ;;  %v7069_v17 = vpop.permute.xlu1 %7068 }
 0x61c   : > { %v7066_v29 = vunpack.i.h.bf16 %v7064_v15  ;;  %v7065_v10 = vunpack.i.l.bf16 %v7064_v15  ;;  %v7071_v20 = vunpack.i.h.bf16 %v7069_v17  ;;  %v7070_v11 = vunpack.i.l.bf16 %v7069_v17 }
 0x61d   : > { %7273 = vrot.lane.b32.xlu0 %v7272_v60, %s7773_s21  ;;  %7268 = vrot.lane.b32.xlu1 %v7267_v5, %s7773_s21 }
 0x61e   : > { %v2987_v38 = vsel %vm905_vm8, %v7071_v20, %v7065_v10  ;;  %v2985_v28 = vsel %vm905_vm8, %v7070_v11, %v7060_v40  ;;  %v2988_v43 = vsel %vm905_vm8, %v7065_v10, %v7066_v29 }
 0x61f   : > { %v3878_v31 = vpop.permute.xlu0 %3877  ;;  %v3880_v59 = vpop.permute.xlu1 %3879  ;;  %v4101_v42 = vpack.c.bf16 %v2988_v43, %v2986_v62  ;;  %v4100_v1 = vpack.c.bf16 %v2987_v38, %v2985_v28 }
 0x620   : > { %v3881_v0 = vsel %vm2621_vm15, %v3878_v31, %v3880_v59  ;;  %v3887_v13 = vmul.f32 0.0, %v3880_v59  ;;  %v3885_v46 = vmul.f32 %v3878_v31, %v10743_v24  ;;  %v3888_v58 = vmul.f32 %v3878_v31, %v10741_v32 }
 0x621   : > { %v3889_v16 = vmul.f32 %v3881_v0, %v10747_v30  ;;  %v3886_v41 = vmul.f32 %v3881_v0, %v10744_v52  ;;  %7278 = vrot.lane.b32.xlu1 %v7277_v7, %s7773_s21  ;;  %4172 = vmatprep.subr.bf16.mxu0 %v4101_v42  ;;  %v4287_v31 = vrot.slane %v9467_v18, %v10794_v9 }
 0x622   : > { %4173 = vmatpush1.bf16.msra.mxu0 %v4100_v1  ;;  %v7292_v6 = vpack.i.bf16 %v3888_v58, %v3885_v46 }
 0x623   : > { %v7287_v49 = vpack.i.bf16 %v3887_v13, %v3889_v16  ;;  %v7282_v45 = vpack.i.bf16 %v3887_v13, %v3886_v41  ;;  %v7074_v34 = vpop.permute.xlu0 %7073  ;;  %v7079_v54 = vpop.permute.xlu1 %7078 }
 0x624   : > { %v7076_v19 = vunpack.i.h.bf16 %v7074_v34  ;;  %v7075_v26 = vunpack.i.l.bf16 %v7074_v34  ;;  %v7081_v51 = vunpack.i.h.bf16 %v7079_v54  ;;  %v7080_v39 = vunpack.i.l.bf16 %v7079_v54 }
 0x625   : > { %7288 = vrot.lane.b32.xlu1 %v7287_v49, %s7771_s0  ;;  %7283 = vrot.lane.b32.xlu0 %v7282_v45, %s7771_s0  ;;  %v4348_v54 = vrot.slane %v9467_v18, %v10795_v61 }
 0x626   : > { %v3046_v47 = vsel %vm1029_vm5, %v7075_v26, %v7076_v19  ;;  %v3048_v63 = vsel %vm1029_vm5, %v7080_v39, %v7081_v51  ;;  %v4291_v19 = vrot.slane %v9473_v4, %v10794_v9 }
 0x627   : > { %v7084_v14 = vpop.permute.xlu0 %7083  ;;  %v3938_v48 = vpop.permute.xlu1 %3937  ;;  %v4103_v56 = vpack.c.bf16 %v3048_v63, %v3046_v47 }
 0x628   : > { %v7086_v8 = vunpack.i.h.bf16 %v7084_v14  ;;  %v7085_v22 = vunpack.i.l.bf16 %v7084_v14  ;;  %v3945_v15 = vmul.f32 %v3938_v48, %v10743_v24  ;;  %v3948_v17 = vmul.f32 %v3938_v48, %v10741_v32 }
 0x629   : > { %7293 = vrot.lane.b32.xlu0 %v7292_v6, %s7771_s0  ;;  %4174 = vmatprep.subr.bf16.mxu0 %v4103_v56  ;;  %v4428_v6 = vrot.slane %v9467_v18, %v10797_v44  ;;  %v4352_v56 = vrot.slane %v9473_v4, %v10795_v61 }
 0x62a   : > { %v3045_v53 = vsel %vm1029_vm5, %v7085_v22, %v7075_v26  ;;  %v3047_v3 = vsel %vm1029_vm5, %v7086_v8, %v7080_v39  ;;  %v7307_v16 = vpack.i.bf16 %v3948_v17, %v3945_v15  ;;  %v4488_v15 = vrot.slane %v9467_v18, %v10798_v27 }
 0x62b   : > { %v3940_v25 = vpop.permute.xlu0 %3939  ;;  %v7089_v36 = vpop.permute.xlu1 %7088  ;;  %v4102_v55 = vpack.c.bf16 %v3047_v3, %v3045_v53  ;;  %v4432_v17 = vrot.slane %v9473_v4, %v10797_v44 }
 0x62c   : > { %v3941_v12 = vsel %vm2559_vm4, %v3938_v48, %v3940_v25  ;;  %v3947_v40 = vmul.f32 0.0, %v3940_v25  ;;  %v7091_v60 = vunpack.i.h.bf16 %v7089_v36  ;;  %v7090_v5 = vunpack.i.l.bf16 %v7089_v36 }
 0x62d   : > { %v3949_v57 = vmul.f32 %v3941_v12, %v10747_v30  ;;  %v3946_v37 = vmul.f32 %v3941_v12, %v10744_v52  ;;  %4175 = vmatpush1.bf16.msra.mxu0 %v4102_v55  ;;  %v3252_v12 = vrot.slane %v9354_v50, %v10797_v44 }
 0x62e   : > { %v3108_v42 = vsel %vm3106_vm14, %v7090_v5, %v7091_v60 }
 0x62f   : > { %v7302_v29 = vpack.i.bf16 %v3947_v40, %v3949_v57  ;;  %v7297_v10 = vpack.i.bf16 %v3947_v40, %v3946_v37  ;;  %v7094_v20 = vpop.permute.xlu0 %7093  ;;  %v7099_v11 = vpop.permute.xlu1 %7098  ;;  %v3248_v40 = vrot.slane %v9362_v35, %v10797_v44 }
 0x630   : > { %v7096_v38 = vunpack.i.h.bf16 %v7094_v20  ;;  %v7095_v28 = vunpack.i.l.bf16 %v7094_v20  ;;  %v7101_v62 = vunpack.i.h.bf16 %v7099_v11  ;;  %v7100_v43 = vunpack.i.l.bf16 %v7099_v11 }
 0x631   : > { %7303 = vrot.lane.b32.xlu0 %v7302_v29, %s7769_s23  ;;  %7298 = vrot.lane.b32.xlu1 %v7297_v10, %s7769_s23  ;;  %v3256_v29 = vmul.f32 %v3252_v12, %v10747_v30 }
 0x632   : > { %v3109_v59 = vsel %vm3106_vm14, %v7101_v62, %v7095_v28  ;;  %v3107_v7 = vsel %vm3106_vm14, %v7100_v43, %v7090_v5  ;;  %v3110_v1 = vsel %vm3106_vm14, %v7095_v28, %v7096_v38  ;;  %v3254_v43 = vmul.f32 %v3252_v12, %v10744_v52 }
 0x633   : > { %v7104_v0 = vpop.permute.xlu0 %7103  ;;  %v7109_v13 = vpop.permute.xlu1 %7108  ;;  %v4105_v41 = vpack.c.bf16 %v3110_v1, %v3108_v42  ;;  %v4104_v46 = vpack.c.bf16 %v3109_v59, %v3107_v7 }
 0x634   : > { %v7106_v58 = vunpack.i.h.bf16 %v7104_v0  ;;  %v7105_v49 = vunpack.i.l.bf16 %v7104_v0  ;;  %v7111_v45 = vunpack.i.h.bf16 %v7109_v13  ;;  %v7110_v34 = vunpack.i.l.bf16 %v7109_v13 }
 0x635   : > { %4294 = vrot.lane.b32.xlu0 %v4287_v31, %s7780_s25  ;;  %7308 = vrot.lane.b32.xlu1 %v7307_v16, %s7769_s23  ;;  %v3255_v31 = vmul.f32 %v3248_v40, %v10741_v32  ;;  %v4548_v0 = vrot.slane %v9467_v18, %v10799_v23  ;;  %v4492_v13 = vrot.slane %v9473_v4, %v10798_v27  ;;  %v9695_v18 = vld [vmem:[%s10442_s8 + $0x70] sm:$0xff] }
 0x636   : > { %4176 = vmatprep.subr.bf16.mxu0 %v4105_v41  ;;  %v3170_v26 = vsel %vm3168_vm10, %v7105_v49, %v7106_v58  ;;  %v3172_v51 = vsel %vm3168_vm10, %v7110_v34, %v7111_v45  ;;  %v4111_v16 = vpack.c.bf16 %v3256_v29, %v3254_v43  ;;  %v3253_v41 = vmul.f32 %v3248_v40, %v10743_v24 }
 0x637   : > { %4177 = vmatpush1.bf16.msra.mxu0 %v4104_v46  ;;  %v7114_v39 = vpop.permute.xlu0 %7113  ;;  %v7119_v47 = vpop.permute.xlu1 %7118  ;;  %v4107_v63 = vpack.c.bf16 %v3172_v51, %v3170_v26  ;;  %v4610_v51 = vrot.slane %v9695_v18, %v10800_v21 }
 0x638   : > { %v7116_v14 = vunpack.i.h.bf16 %v7114_v39  ;;  %v7115_v48 = vunpack.i.l.bf16 %v7114_v39  ;;  %v7121_v53 = vunpack.i.h.bf16 %v7119_v47  ;;  %v7120_v3 = vunpack.i.l.bf16 %v7119_v47 }
 0x639   : > { %4355 = vrot.lane.b32.xlu0 %v4348_v54, %s10806_s2  ;;  %4296 = vrot.lane.b32.xlu1 %v4291_v19, %s7780_s25  ;;  %v4110_v19 = vpack.c.bf16 %v3255_v31, %v3253_v41  ;;  %v4552_v39 = vrot.slane %v9473_v4, %v10799_v23  ;;  %v4670_v4 = vrot.slane %v9695_v18, %v10707_v33 }
 0x63a   : > { %v3169_v8 = vsel %vm3168_vm10, %v7115_v48, %v7105_v49  ;;  %v3171_v22 = vsel %vm3168_vm10, %v7116_v14, %v7110_v34  ;;  %4178 = vmatprep.subr.bf16.mxu0 %v4107_v63  ;;  %v3230_v10 = vsel %vm1401_vm1, %v7120_v3, %v7121_v53 }
 0x63b   : > { %v7124_v25 = vpop.permute.xlu0 %7123  ;;  %v7129_v36 = vpop.permute.xlu1 %7128  ;;  %v4106_v55 = vpack.c.bf16 %v3171_v22, %v3169_v8 }
 0x63c   : > { %v7126_v57 = vunpack.i.h.bf16 %v7124_v25  ;;  %v7125_v37 = vunpack.i.l.bf16 %v7124_v25  ;;  %v7131_v60 = vunpack.i.h.bf16 %v7129_v36  ;;  %v7130_v5 = vunpack.i.l.bf16 %v7129_v36  ;;  %v9708_v36 = vld [vmem:[%s10442_s8 + $0x78] sm:$0xff] }
 0x63d   : > { %4435 = vrot.lane.b32.xlu0 %v4428_v6, %s7778_s29  ;;  %4357 = vrot.lane.b32.xlu1 %v4352_v56, %s10806_s2 }
 0x63e   : > { %v3231_v50 = vsel %vm1401_vm1, %v7131_v60, %v7125_v37  ;;  %v3229_v35 = vsel %vm1401_vm1, %v7130_v5, %v7120_v3  ;;  %4179 = vmatpush1.bf16.msra.mxu0 %v4106_v55  ;;  %v3232_v20 = vsel %vm1401_vm1, %v7125_v37, %v7126_v57  ;;  %vm10809_vm1 = vcmask 1031168  }
 0x63f   : > { %v7134_v11 = vpop.permute.xlu0 %7133  ;;  %v7139_v38 = vpop.permute.xlu1 %7138  ;;  %v4109_v28 = vpack.c.bf16 %v3232_v20, %v3230_v10  ;;  %v4108_v62 = vpack.c.bf16 %v3231_v50, %v3229_v35  ;;  %vm10810_vm5 = vmmov %vm10809_vm1  ;;  %v4614_v55 = vrot.slane %v9708_v36, %v10800_v21  ;;  %v4730_v20 = vrot.slane %v9695_v18, %v10794_v9 }
 0x640   : > { %v7136_v59 = vunpack.i.h.bf16 %v7134_v11  ;;  %v7135_v7 = vunpack.i.l.bf16 %v7134_v11  ;;  %v7141_v42 = vunpack.i.h.bf16 %v7139_v38  ;;  %v7140_v1 = vunpack.i.l.bf16 %v7139_v38  ;;  %vm10811_vm8 = vmmov %vm10809_vm1 }
 0x641   : > { %4495 = vrot.lane.b32.xlu0 %v4488_v15, %s7781_s30  ;;  %4437 = vrot.lane.b32.xlu1 %v4432_v17, %s7778_s29  ;;  %vm10812_vm7 = vmmov %vm10809_vm1  ;;  %v4674_v11 = vrot.slane %v9708_v36, %v10707_v33 }
 0x642   : > { %4180 = vmatprep.subr.bf16.mxu0 %v4109_v28  ;;  %v3310_v46 = vsel %vm10809_vm1, %v7135_v7, %v7136_v59  ;;  %v3312_v58 = vsel %vm10810_vm5, %v7140_v1, %v7141_v42  ;;  %v4790_v42 = vrot.slane %v9695_v18, %v10795_v61  ;;  %vm10817_vm5 = vcmask 785408  }
 0x643   : > { %4181 = vmatpush1.bf16.msra.mxu0 %v4108_v62  ;;  %v7144_v49 = vpop.permute.xlu0 %7143  ;;  %v7149_v45 = vpop.permute.xlu1 %7148  ;;  %v4113_v26 = vpack.c.bf16 %v3312_v58, %v3310_v46 }
 0x644   : > { %v7146_v34 = vunpack.i.h.bf16 %v7144_v49  ;;  %v7145_v54 = vunpack.i.l.bf16 %v7144_v49  ;;  %4182 = vmatprep.subr.bf16.mxu0 %v4111_v16  ;;  %v7151_v14 = vunpack.i.h.bf16 %v7149_v45  ;;  %v7150_v48 = vunpack.i.l.bf16 %v7149_v45 }
 0x645   : > { %4555 = vrot.lane.b32.xlu0 %v4548_v0, %s7782_s4  ;;  %4497 = vrot.lane.b32.xlu1 %v4492_v13, %s7781_s30 }
 0x646   : > { %v3309_v47 = vsel %vm10811_vm8, %v7145_v54, %v7135_v7  ;;  %v3311_v63 = vsel %vm10812_vm7, %v7146_v34, %v7140_v1  ;;  %v3370_v57 = vsel %vm3139_vm12, %v7150_v48, %v7151_v14  ;;  %v4734_v1 = vrot.slane %v9708_v36, %v10794_v9  ;;  %vm10818_vm8 = vmmov %vm10817_vm5 }
 0x647   : > { %4183 = vmatpush1.bf16.msra.mxu0 %v4110_v19  ;;  %v7154_v6 = vpop.permute.xlu0 %7153  ;;  %v7159_v56 = vpop.permute.xlu1 %7158  ;;  %v4112_v8 = vpack.c.bf16 %v3311_v63, %v3309_v47  ;;  %v7646_v63 = vld [vmem:[%s10439_s5 + $0x20] ss:$16 sps:$4 sm:$0xff]   ;;  %vm10819_vm7 = vmmov %vm10817_vm5 }
 0x648   : > { %v7156_v22 = vunpack.i.h.bf16 %v7154_v6  ;;  %v7155_v53 = vunpack.i.l.bf16 %v7154_v6  ;;  %v7161_v3 = vunpack.i.h.bf16 %v7159_v56  ;;  %v7160_v25 = vunpack.i.l.bf16 %v7159_v56  ;;  %4184 = vmatprep.subr.bf16.mxu0 %v4113_v26 }
 0x649   : > { %4617 = vrot.lane.b32.xlu0 %v4610_v51, %s7769_s23  ;;  %4557 = vrot.lane.b32.xlu1 %v4552_v39, %s7782_s4  ;;  %v4850_v26 = vrot.slane %v9695_v18, %v10796_v2  ;;  %v4794_v51 = vrot.slane %v9708_v36, %v10795_v61 }
 0x64a   : > { %v3371_v12 = vsel %vm3139_vm12, %v7161_v3, %v7155_v53  ;;  %v3369_v40 = vsel %vm3139_vm12, %v7160_v25, %v7150_v48  ;;  %v3372_v37 = vsel %vm3139_vm12, %v7155_v53, %v7156_v22  ;;  %v7652_v53 = vld [vmem:[%s10439_s5 + $0x2c] ss:$16 sps:$4 sm:$0xff]  }
 0x64b   : > { %4185 = vmatpush1.bf16.msra.mxu0 %v4112_v8  ;;  %v7164_v60 = vpop.permute.xlu0 %7163  ;;  %v7169_v5 = vpop.permute.xlu1 %7168  ;;  %v4115_v15 = vpack.c.bf16 %v3372_v37, %v3370_v57  ;;  %v4114_v17 = vpack.c.bf16 %v3371_v12, %v3369_v40  ;;  %v4910_v12 = vrot.slane %v9695_v18, %v10797_v44  ;;  %v4854_v40 = vrot.slane %v9708_v36, %v10796_v2 }
 0x64c   : > { %v7166_v29 = vunpack.i.h.bf16 %v7164_v60  ;;  %v7165_v50 = vunpack.i.l.bf16 %v7164_v60  ;;  %v7171_v35 = vunpack.i.h.bf16 %v7169_v5  ;;  %v7170_v10 = vunpack.i.l.bf16 %v7169_v5 }
 0x64d   : > { %4677 = vrot.lane.b32.xlu0 %v4670_v4, %s7773_s21  ;;  %4619 = vrot.lane.b32.xlu1 %v4614_v55, %s7769_s23 }
 0x64e   : > { %4186 = vmatprep.subr.bf16.mxu0 %v4115_v15  ;;  %v3430_v38 = vsel %vm3077_vm0, %v7165_v50, %v7166_v29  ;;  %v3432_v28 = vsel %vm3077_vm0, %v7170_v10, %v7171_v35  ;;  %v4914_v35 = vrot.slane %v9708_v36, %v10797_v44 }
 0x64f   : > { %4187 = vmatpush1.bf16.msra.mxu0 %v4114_v17  ;;  %v7174_v62 = vpop.permute.xlu0 %7173  ;;  %v7179_v43 = vpop.permute.xlu1 %7178  ;;  %v4117_v31 = vpack.c.bf16 %v3432_v28, %v3430_v38  ;;  %v9772_v28 = vld [vmem:[%s10442_s8 + $0x80] sm:$0xff] }
 0x650   : > { %v7176_v59 = vunpack.i.h.bf16 %v7174_v62  ;;  %v7175_v7 = vunpack.i.l.bf16 %v7174_v62  ;;  %v7181_v16 = vunpack.i.h.bf16 %v7179_v43  ;;  %v7180_v41 = vunpack.i.l.bf16 %v7179_v43 }
 0x651   : > { %4737 = vrot.lane.b32.xlu0 %v4730_v20, %s10804_s20  ;;  %4679 = vrot.lane.b32.xlu1 %v4674_v11, %s7773_s21 }
 0x652   : > { %v3429_v0 = vsel %vm3077_vm0, %v7175_v7, %v7165_v50  ;;  %v3431_v13 = vsel %vm3077_vm0, %v7176_v59, %v7170_v10  ;;  %4188 = vmatprep.subr.bf16.mxu0 %v4117_v31  ;;  %vm10813_vm0 = vcmask 801792   ;;  %v4990_v50 = vrot.slane %v9695_v18, %v10799_v23 }
 0x653   : > { %v7184_v46 = vpop.permute.xlu0 %7183  ;;  %v7189_v58 = vpop.permute.xlu1 %7188  ;;  %v4116_v49 = vpack.c.bf16 %v3431_v13, %v3429_v0  ;;  %vm10814_vm3 = vmmov %vm10813_vm0  ;;  %v4994_v0 = vrot.slane %v9708_v36, %v10799_v23 }
 0x654   : > { %v7186_v45 = vunpack.i.h.bf16 %v7184_v46  ;;  %v7185_v34 = vunpack.i.l.bf16 %v7184_v46  ;;  %v7191_v54 = vunpack.i.h.bf16 %v7189_v58  ;;  %v7190_v19 = vunpack.i.l.bf16 %v7189_v58  ;;  %vm10815_vm14 = vmmov %vm10813_vm0  ;;  %v9787_v58 = vld [vmem:[%s10442_s8 + $0x88] sm:$0xff] }
 0x655   : > { %4797 = vrot.lane.b32.xlu0 %v4790_v42, %s7783_s27  ;;  %4739 = vrot.lane.b32.xlu1 %v4734_v1, %s10804_s20  ;;  %v3490_v14 = vsel %vm10815_vm14, %v7180_v41, %v7181_v16  ;;  %vm10816_vm1 = vmmov %vm10813_vm0  ;;  %v5050_v1 = vrot.slane %v9772_v28, %v10800_v21 }
 0x656   : > { %v3491_v39 = vsel %vm10813_vm0, %v7191_v54, %v7185_v34  ;;  %v3489_v47 = vsel %vm10814_vm3, %v7190_v19, %v7180_v41  ;;  %4189 = vmatpush1.bf16.msra.mxu0 %v4116_v49  ;;  %v3492_v48 = vsel %vm10816_vm1, %v7185_v34, %v7186_v45  ;;  %vm10820_vm0 = vmmov %vm10817_vm5  ;;  %vm10821_vm3 = vcmask 769024  }
 0x657   : > { %v7194_v6 = vpop.permute.xlu0 %7193  ;;  %v7199_v56 = vpop.permute.xlu1 %7198  ;;  %v4119_v8 = vpack.c.bf16 %v3492_v48, %v3490_v14  ;;  %v4118_v22 = vpack.c.bf16 %v3491_v39, %v3489_v47  ;;  %vm10822_vm14 = vmmov %vm10821_vm3  ;;  %v5110_v39 = vrot.slane %v9772_v28, %v10707_v33  ;;  %v5054_v47 = vrot.slane %v9787_v58, %v10800_v21 }
 0x658   : > { %v7196_v3 = vunpack.i.h.bf16 %v7194_v6  ;;  %v7195_v25 = vunpack.i.l.bf16 %v7194_v6  ;;  %v7201_v4 = vunpack.i.h.bf16 %v7199_v56  ;;  %v7200_v55 = vunpack.i.l.bf16 %v7199_v56  ;;  %vm10823_vm1 = vmmov %vm10821_vm3 }
 0x659   : > { %4857 = vrot.lane.b32.xlu0 %v4850_v26, %s7780_s25  ;;  %4799 = vrot.lane.b32.xlu1 %v4794_v51, %s7783_s27 }
 0x65a   : > { %4201 = vmatprep.subr.bf16.mxu0 %v4119_v8  ;;  %4191 = vmatmul.mubr.bf16.vlgmr.msra.gmra.mrb[8].mxu0 %v7646_v63  ;;  %v3550_v57 = vsel %vm10817_vm5, %v7195_v25, %v7196_v3  ;;  %v3552_v37 = vsel %vm10818_vm8, %v7200_v55, %v7201_v4  ;;  %vm10824_vm5 = vmmov %vm10823_vm1  ;;  %vm4588_vm8 = vcmask 588800  }
 0x65b   : > { %4202 = vmatpush1.bf16.msra.mxu0 %v4118_v22  ;;  %v7204_v60 = vpop.permute.xlu0 %7203  ;;  %v7209_v5 = vpop.permute.xlu1 %7208  ;;  %v4121_v15 = vpack.c.bf16 %v3552_v37, %v3550_v57  ;;  %6469 = vmatprep.mubr.msk.bf16.mxu0 %vm1215_vm13, %v7652_v53  ;;  %v5114_v53 = vrot.slane %v9787_v58, %v10707_v33 }
 0x65c   : > { %v7206_v17 = vunpack.i.h.bf16 %v7204_v60  ;;  %v7205_v29 = vunpack.i.l.bf16 %v7204_v60  ;;  %v7211_v11 = vunpack.i.h.bf16 %v7209_v5  ;;  %v7210_v38 = vunpack.i.l.bf16 %v7209_v5 }
 0x65d   : > { %4917 = vrot.lane.b32.xlu0 %v4910_v12, %s10806_s2  ;;  %4859 = vrot.lane.b32.xlu1 %v4854_v40, %s7780_s25 }
 0x65e   : > { %v3549_v10 = vsel %vm10819_vm7, %v7205_v29, %v7195_v25  ;;  %v3551_v20 = vsel %vm10820_vm0, %v7206_v17, %v7200_v55  ;;  %4203 = vmatprep.subr.bf16.mxu0 %v4121_v15  ;;  %v3610_v41 = vsel %vm10823_vm1, %v7210_v38, %v7211_v11 }
 0x65f   : > { %v7214_v62 = vpop.permute.xlu0 %7213  ;;  %v7219_v43 = vpop.permute.xlu1 %7218  ;;  %v4120_v31 = vpack.c.bf16 %v3551_v20, %v3549_v10 }
 0x660   : > { %v7216_v59 = vunpack.i.h.bf16 %v7214_v62  ;;  %v7215_v18 = vunpack.i.l.bf16 %v7214_v62  ;;  %v7221_v7 = vunpack.i.h.bf16 %v7219_v43  ;;  %v7220_v42 = vunpack.i.l.bf16 %v7219_v43 }
 0x661   : > { %4997 = vrot.lane.b32.xlu0 %v4990_v50, %s7778_s29  ;;  %4919 = vrot.lane.b32.xlu1 %v4914_v35, %s10806_s2 }
 0x662   : > { %v3611_v13 = vsel %vm10821_vm3, %v7221_v7, %v7215_v18  ;;  %v3609_v16 = vsel %vm10822_vm14, %v7220_v42, %v7210_v38  ;;  %4204 = vmatpush1.bf16.msra.mxu0 %v4120_v31  ;;  %v3612_v46 = vsel %vm10824_vm5, %v7215_v18, %v7216_v59 }
 0x663   : > { %v7224_v49 = vpop.permute.xlu0 %7223  ;;  %v7229_v45 = vpop.permute.xlu1 %7228  ;;  %v4123_v34 = vpack.c.bf16 %v3612_v46, %v3610_v41  ;;  %v4122_v54 = vpack.c.bf16 %v3611_v13, %v3609_v16 }
 0x664   : > { %v7226_v19 = vunpack.i.h.bf16 %v7224_v49  ;;  %v7225_v36 = vunpack.i.l.bf16 %v7224_v49  ;;  %v7231_v26 = vunpack.i.h.bf16 %v7229_v45  ;;  %v7230_v51 = vunpack.i.l.bf16 %v7229_v45 }
 0x665   : > { %5057 = vrot.lane.b32.xlu0 %v5050_v1, %s7781_s30  ;;  %4999 = vrot.lane.b32.xlu1 %v4994_v0, %s7778_s29 }
 0x666   : > { %4205 = vmatprep.subr.bf16.mxu0 %v4123_v34  ;;  %v3670_v63 = vsel %vm2835_vm11, %v7225_v36, %v7226_v19  ;;  %v3672_v14 = vsel %vm2835_vm11, %v7230_v51, %v7231_v26 }
 0x667   : > { %4206 = vmatpush1.bf16.msra.mxu0 %v4122_v54  ;;  %v7234_v48 = vpop.permute.xlu0 %7233  ;;  %v7239_v6 = vpop.permute.xlu1 %7238  ;;  %v4125_v56 = vpack.c.bf16 %v3672_v14, %v3670_v63 }
 0x668   : > { %v7236_v8 = vunpack.i.h.bf16 %v7234_v48  ;;  %v7235_v22 = vunpack.i.l.bf16 %v7234_v48  ;;  %v7241_v4 = vunpack.i.h.bf16 %v7239_v6  ;;  %v7240_v55 = vunpack.i.l.bf16 %v7239_v6 }
 0x669   : > { %5117 = vrot.lane.b32.xlu0 %v5110_v39, %s7782_s4  ;;  %5059 = vrot.lane.b32.xlu1 %v5054_v47, %s7781_s30 }
 0x66a   : > { %v3669_v3 = vsel %vm2835_vm11, %v7235_v22, %v7225_v36  ;;  %v3671_v25 = vsel %vm2835_vm11, %v7236_v8, %v7230_v51  ;;  %4207 = vmatprep.subr.bf16.mxu0 %v4125_v56  ;;  %v3730_v50 = vsel %vm2559_vm4, %v7240_v55, %v7241_v4  ;;  %vm4559_vm11 = vcmask 457728  }
 0x66b   : > { %v7244_v12 = vpop.permute.xlu0 %7243  ;;  %v7249_v40 = vpop.permute.xlu1 %7248  ;;  %v4124_v57 = vpack.c.bf16 %v3671_v25, %v3669_v3 }
 0x66c   : > { %v7246_v37 = vunpack.i.h.bf16 %v7244_v12  ;;  %v7245_v60 = vunpack.i.l.bf16 %v7244_v12  ;;  %v7251_v5 = vunpack.i.h.bf16 %v7249_v40  ;;  %v7250_v15 = vunpack.i.l.bf16 %v7249_v40 }
 0x66d   : > { %5119 = vrot.lane.b32.xlu1 %v5114_v53, %s7782_s4  ;;  %4208 = vmatpush1.bf16.msra.mxu0 %v4124_v57 }
 0x66e   : > { %v3731_v17 = vsel %vm2559_vm4, %v7251_v5, %v7245_v60  ;;  %v3729_v29 = vsel %vm2559_vm4, %v7250_v15, %v7240_v55  ;;  %v3732_v35 = vsel %vm2559_vm4, %v7245_v60, %v7246_v37 }
 0x66f   : > { %v7254_v10 = vpop.permute.xlu0 %7253  ;;  %v7259_v20 = vpop.permute.xlu1 %7258  ;;  %v4127_v11 = vpack.c.bf16 %v3732_v35, %v3730_v50  ;;  %v4126_v38 = vpack.c.bf16 %v3731_v17, %v3729_v29 }
 0x670   : > { %v7256_v62 = vunpack.i.h.bf16 %v7254_v10  ;;  %v7255_v43 = vunpack.i.l.bf16 %v7254_v10  ;;  %v7261_v31 = vunpack.i.h.bf16 %v7259_v20  ;;  %v7260_v59 = vunpack.i.l.bf16 %v7259_v20 }
 0x671   : > { %4209 = vmatprep.subr.bf16.mxu0 %v4127_v11 }
 0x672   : > { %4210 = vmatpush1.bf16.msra.mxu0 %v4126_v38  ;;  %v3790_v18 = vsel %vm2621_vm15, %v7255_v43, %v7256_v62  ;;  %v3792_v7 = vsel %vm2621_vm15, %v7260_v59, %v7261_v31 }
 0x673   : > { %v7264_v42 = vpop.permute.xlu0 %7263  ;;  %v4129_v1 = vpack.c.bf16 %v3792_v7, %v3790_v18 }
 0x674   : > { %v7266_v0 = vunpack.i.h.bf16 %v7264_v42  ;;  %v7265_v13 = vunpack.i.l.bf16 %v7264_v42 }
 0x675   : > { %4211 = vmatprep.subr.bf16.mxu0 %v4129_v1 }
 0x676   : > { %v3789_v16 = vsel %vm2621_vm15, %v7265_v13, %v7255_v43  ;;  %v3791_v41 = vsel %vm2621_vm15, %v7266_v0, %v7260_v59  ;;  %vm4298_vm15 = vcmask 982016  }
 0x677   : > { %v4128_v46 = vpack.c.bf16 %v3791_v41, %v3789_v16 }
 0x679   : > { %4212 = vmatpush1.bf16.msra.mxu0 %v4128_v46 }
 0x68f   : > { %v7274_v49 = vpop.permute.xlu0 %7273  ;;  %v7269_v45 = vpop.permute.xlu1 %7268 }
 0x690   : > { %v7276_v34 = vunpack.i.h.bf16 %v7274_v49  ;;  %v7275_v54 = vunpack.i.l.bf16 %v7274_v49  ;;  %v7271_v19 = vunpack.i.h.bf16 %v7269_v45  ;;  %v7270_v36 = vunpack.i.l.bf16 %v7269_v45  ;;  %v7654_v45 = vld [vmem:[%s10439_s5 + $0x28] ss:$16 sps:$4 sm:$0xff]  }
 0x691   : > { %v5961_v49 = vpack.c.bf16 %v10747_v30, %v10744_v52 }
 0x692   : > { %v3850_v26 = vsel %vm2654_vm9, %v7270_v36, %v7271_v19  ;;  %v3852_v51 = vsel %vm2654_vm9, %v7275_v54, %v7276_v34 }
 0x693   : > { %v7279_v39 = vpop.permute.xlu1 %7278  ;;  %v4131_v47 = vpack.c.bf16 %v3852_v51, %v3850_v26 }
 0x694   : > { %v7281_v63 = vunpack.i.h.bf16 %v7279_v39  ;;  %v7280_v14 = vunpack.i.l.bf16 %v7279_v39 }
 0x695   : > { %4213 = vmatprep.subr.bf16.mxu0 %v4131_v47  ;;  %v5960_v47 = vpack.c.bf16 %v10741_v32, %v10743_v24 }
 0x696   : > { %v3851_v48 = vsel %vm2654_vm9, %v7281_v63, %v7275_v54  ;;  %v3849_v6 = vsel %vm2654_vm9, %v7280_v14, %v7270_v36  ;;  %v5170_v63 = vrot.slane %v9772_v28, %v10794_v9  ;;  %v10825_v14 = vmov 0  }
 0x697   : > { %v7284_v56 = vpop.permute.xlu0 %7283  ;;  %v7289_v8 = vpop.permute.xlu1 %7288  ;;  %v4130_v22 = vpack.c.bf16 %v3851_v48, %v3849_v6 }
 0x698   : > { %v7286_v53 = vunpack.i.h.bf16 %v7284_v56  ;;  %v7285_v3 = vunpack.i.l.bf16 %v7284_v56  ;;  %v7291_v25 = vunpack.i.h.bf16 %v7289_v8  ;;  %v7290_v4 = vunpack.i.l.bf16 %v7289_v8  ;;  %v2469_v48 = vpop.f32.mrb[4].mxu0 }
 0x699   : > { %4214 = vmatpush1.bf16.msra.mxu0 %v4130_v22  ;;  %v7655_v22 = vld [vmem:[%s10443_s9] sm:$0xff]  }
 0x69a   : > { %v3910_v55 = vsel %vm2592_vm6, %v7285_v3, %v7286_v53  ;;  %v3912_v12 = vsel %vm2592_vm6, %v7290_v4, %v7291_v25  ;;  %v2471_v53 = vpop.f32.mrb[5].mxu0 }
 0x69b   : > { %v7294_v40 = vpop.permute.xlu0 %7293  ;;  %v4133_v57 = vpack.c.bf16 %v3912_v12, %v3910_v55 }
 0x69c   : > { %v7296_v37 = vunpack.i.h.bf16 %v7294_v40  ;;  %v7295_v60 = vunpack.i.l.bf16 %v7294_v40 }
 0x69d   : > { %4215 = vmatprep.subr.bf16.mxu0 %v4133_v57 }
 0x69e   : > { %v3909_v5 = vsel %vm2592_vm6, %v7295_v60, %v7285_v3  ;;  %v3911_v15 = vsel %vm2592_vm6, %v7296_v37, %v7290_v4  ;;  %v5174_v3 = vrot.slane %v9787_v58, %v10794_v9  ;;  %v2426_v25 = vpop.f32.mrb[0].mxu1  ;;  %v2473_v4 = vpop.f32.mrb[6].mxu0  ;;  %vm10826_vm6 = vcmask 64512  }
 0x69f   : > { %v4132_v17 = vpack.c.bf16 %v3911_v15, %v3909_v5  ;;  %v9848_v55 = vadd.f32 %v2469_v48, %v2426_v25  ;;  %v2428_v12 = vpop.f32.mrb[1].mxu1  ;;  %v2475_v15 = vpop.f32.mrb[7].mxu0  ;;  %vm10827_vm7 = vmmov %vm10826_vm6 }
 0x6a0   : > { %v9851_v60 = vadd.f32 %v2471_v53, %v2428_v12  ;;  %v2430_v5 = vpop.f32.mrb[2].mxu1  ;;  %vm10828_vm0 = vmmov %vm10826_vm6 }
 0x6a1   : > { %4216 = vmatpush1.bf16.msra.mxu0 %v4132_v17  ;;  %v9856_v17 = vadd.f32 %v2473_v4, %v2430_v5  ;;  %v5470_v5 = vrot.slane %v9772_v28, %v10799_v23  ;;  %vm10829_vm3 = vmmov %vm10828_vm0 }
 0x6a2   : > { %vm10830_vm14 = vmmov %vm10828_vm0 }
 0x6a3   : > { %v7304_v29 = vpop.permute.xlu0 %7303  ;;  %v7299_v50 = vpop.permute.xlu1 %7298  ;;  %vm10831_vm1 = vmmov %vm10828_vm0 }
 0x6a4   : > { %v7306_v35 = vunpack.i.h.bf16 %v7304_v29  ;;  %v7305_v10 = vunpack.i.l.bf16 %v7304_v29  ;;  %v7301_v20 = vunpack.i.h.bf16 %v7299_v50  ;;  %v7300_v11 = vunpack.i.l.bf16 %v7299_v50  ;;  %v2432_v29 = vpop.f32.mrb[3].mxu1  ;;  %vm10832_vm5 = vmmov %vm10828_vm0 }
 0x6a5   : > { %v9858_v50 = vadd.f32 %v2475_v15, %v2432_v29 }
 0x6a6   : > { %v3970_v38 = vsel %vm2530_vm2, %v7300_v11, %v7301_v20  ;;  %v3972_v62 = vsel %vm2530_vm2, %v7305_v10, %v7306_v35 }
 0x6a7   : > { %v7309_v43 = vpop.permute.xlu1 %7308  ;;  %v4135_v31 = vpack.c.bf16 %v3972_v62, %v3970_v38  ;;  %v4295_v7 = vpop.permute.xlu0 %4294  ;;  %v5234_v38 = vrot.slane %v9787_v58, %v10795_v61 }
 0x6a8   : > { %v7311_v59 = vunpack.i.h.bf16 %v7309_v43  ;;  %v7310_v18 = vunpack.i.l.bf16 %v7309_v43  ;;  %v4303_v54 = vmul.f32 0.0, %v4295_v7 }
 0x6a9   : > { %4217 = vmatprep.subr.bf16.mxu0 %v4135_v31  ;;  %v5290_v31 = vrot.slane %v9772_v28, %v10796_v2 }
 0x6aa   : > { %v3971_v42 = vsel %vm2530_vm2, %v7311_v59, %v7305_v10  ;;  %v3969_v1 = vsel %vm2530_vm2, %v7310_v18, %v7300_v11  ;;  %v7322_v6 = vpack.i.bf16 %v4303_v54, %v4303_v54  ;;  %v5230_v11 = vrot.slane %v9772_v28, %v10795_v61 }
 0x6ab   : > { %v4297_v0 = vpop.permute.xlu1 %4296  ;;  %v4134_v13 = vpack.c.bf16 %v3971_v42, %v3969_v1  ;;  %v4356_v19 = vpop.permute.xlu0 %4355  ;;  %v5294_v59 = vrot.slane %v9787_v58, %v10796_v2 }
 0x6ac   : > { %v4299_v16 = vsel %vm4298_vm15, %v4295_v7, %v4297_v0  ;;  %v4305_v41 = vmul.f32 %v4297_v0, %v10743_v24  ;;  %v4308_v46 = vmul.f32 %v4297_v0, %v10741_v32  ;;  %v4363_v40 = vmul.f32 0.0, %v4356_v19 }
 0x6ad   : > { %v4304_v34 = vmul.f32 0.0, %v4299_v16  ;;  %4218 = vmatpush1.bf16.msra.mxu0 %v4134_v13 }
 0x6ae   : > { %5970 = vmatprep.subr.bf16.mxu0 %v5961_v49  ;;  %v7337_v35 = vpack.i.bf16 %v4363_v40, %v4363_v40  ;;  %v5350_v49 = vrot.slane %v9772_v28, %v10797_v44 }
 0x6af   : > { %v4358_v36 = vpop.permute.xlu1 %4357  ;;  %v7317_v26 = vpack.i.bf16 %v4308_v46, %v4304_v34  ;;  %v7312_v51 = vpack.i.bf16 %v4305_v41, %v4304_v34  ;;  %v4436_v62 = vpop.permute.xlu0 %4435 }
 0x6b0   : > { %v4359_v39 = vsel %vm3139_vm12, %v4356_v19, %v4358_v36  ;;  %4234 = vmatmul.mubr.bf16.vlgmr.msra.gmra.mrb[8].mxu0 %v7654_v45  ;;  %v4365_v8 = vmul.f32 %v4358_v36, %v10743_v24  ;;  %v4368_v57 = vmul.f32 %v4358_v36, %v10741_v32  ;;  %v4443_v0 = vmul.f32 0.0, %v4436_v62 }
 0x6b1   : > { %7318 = vrot.lane.b32.xlu1 %v7317_v26, %s7781_s30  ;;  %7313 = vrot.lane.b32.xlu0 %v7312_v51, %s7781_s30  ;;  %v4364_v56 = vmul.f32 0.0, %v4359_v39  ;;  %v5354_v19 = vrot.slane %v9787_v58, %v10797_v44  ;;  %v5410_v44 = vrot.slane %v9772_v28, %v10798_v27 }
 0x6b2   : > { %5971 = vmatpush1.bf16.msra.mxu0 %v5960_v47  ;;  %6002 = vmatprep.mubr.bf16.mxu0 %v10825_v14  ;;  %v7352_v45 = vpack.i.bf16 %v4443_v0, %v4443_v0 }
 0x6b3   : > { %v7327_v37 = vpack.i.bf16 %v4365_v8, %v4364_v56  ;;  %v7332_v10 = vpack.i.bf16 %v4368_v57, %v4364_v56  ;;  %v4438_v20 = vpop.permute.xlu1 %4437  ;;  %v4496_v13 = vpop.permute.xlu0 %4495  ;;  %v5414_v56 = vrot.slane %v9787_v58, %v10798_v27 }
 0x6b4   : > { %v4439_v43 = vsel %vm3168_vm10, %v4436_v62, %v4438_v20  ;;  %v4445_v7 = vmul.f32 %v4438_v20, %v10744_v52  ;;  %v4448_v61 = vmul.f32 %v4438_v20, %v10747_v30  ;;  %v4503_v36 = vmul.f32 0.0, %v4496_v13 }
 0x6b5   : > { %5177 = vrot.lane.b32.xlu1 %v5170_v63, %s7769_s23  ;;  %7323 = vrot.lane.b32.xlu0 %v7322_v6, %s7781_s30  ;;  %v4444_v18 = vmul.f32 %v4439_v43, %v10743_v24  ;;  %v4447_v42 = vmul.f32 %v4439_v43, %v10741_v32  ;;  %v5474_v20 = vrot.slane %v9787_v58, %v10799_v23 }
 0x6b6   : > { %v7367_v63 = vpack.i.bf16 %v4503_v36, %v4503_v36 }
 0x6b7   : > { %v4498_v1 = vpop.permute.xlu1 %4497  ;;  %v7347_v16 = vpack.i.bf16 %v4448_v61, %v4447_v42  ;;  %v7342_v41 = vpack.i.bf16 %v4445_v7, %v4444_v18 }
 0x6b8   : > { %6488 = vmatmul.mubr.msk.bf16.vlgmr.msra.gmra.mrb[12].mxu0 %vm1215_vm13, %v7655_v22  ;;  %v4499_v46 = vsel %vm10826_vm6, %v4496_v13, %v4498_v1  ;;  %v4505_v54 = vmul.f32 %v4498_v1, %v10744_v52  ;;  %v4508_v51 = vmul.f32 %v4498_v1, %v10747_v30  ;;  %vm10833_vm6 = vmmov %vm10828_vm0 }
 0x6b9   : > { %5179 = vrot.lane.b32.xlu0 %v5174_v3, %s7769_s23  ;;  %7328 = vrot.lane.b32.xlu1 %v7327_v37, %s7778_s29  ;;  %v4504_v34 = vmul.f32 %v4499_v46, %v10743_v24  ;;  %v4507_v26 = vmul.f32 %v4499_v46, %v10741_v32  ;;  %v730_v46 = vld [vmem:[%s10442_s8 + $0x90] sm:$0x7] }
 0x6ba   : > { %6331 = vmatprep.mubr.bf16.mxu0 %v10825_v14  ;;  %v4556_v14 = vpop.permute.xlu0 %4555 }
 0x6bb   : > { %v7357_v39 = vpack.i.bf16 %v4505_v54, %v4504_v34  ;;  %v4558_v47 = vpop.permute.xlu1 %4557  ;;  %v7362_v48 = vpack.i.bf16 %v4508_v51, %v4507_v26  ;;  %v4564_v4 = vmul.f32 0.0, %v4556_v14 }
 0x6bc   : > { %v4560_v6 = vsel %vm4559_vm11, %v4556_v14, %v4558_v47  ;;  %v4566_v22 = vmul.f32 %v4558_v47, %v10744_v52  ;;  %v4569_v3 = vmul.f32 %v4558_v47, %v10747_v30 }
 0x6bd   : > { %7333 = vrot.lane.b32.xlu0 %v7332_v10, %s7778_s29  ;;  %7338 = vrot.lane.b32.xlu1 %v7337_v35, %s7778_s29  ;;  %v4565_v8 = vmul.f32 %v4560_v6, %v10743_v24  ;;  %v4568_v53 = vmul.f32 %v4560_v6, %v10741_v32  ;;  %v7382_v15 = vpack.i.bf16 %v4564_v4, %v4564_v4 }
 0x6be   : > { %v4618_v12 = vpop.permute.xlu0 %4617 }
 0x6bf   : > { %v4620_v25 = vpop.permute.xlu1 %4619  ;;  %v7377_v40 = vpack.i.bf16 %v4569_v3, %v4568_v53  ;;  %v7372_v57 = vpack.i.bf16 %v4566_v22, %v4565_v8 }
 0x6c0   : > { %v4621_v37 = vsel %vm2530_vm2, %v4618_v12, %v4620_v25  ;;  %v4627_v35 = vmul.f32 %v4620_v25, %v10744_v52  ;;  %v4630_v62 = vmul.f32 %v4620_v25, %v10747_v30 }
 0x6c1   : > { %5237 = vrot.lane.b32.xlu0 %v5230_v11, %s7773_s21  ;;  %5239 = vrot.lane.b32.xlu1 %v5234_v38, %s7773_s21  ;;  %v4626_v29 = vmul.f32 %v4621_v37, %v10743_v24  ;;  %v4625_v11 = vmul.f32 0.0, %v4618_v12  ;;  %v4629_v38 = vmul.f32 %v4621_v37, %v10741_v32 }
 0x6c2   : > { %v4678_v43 = vpop.permute.xlu0 %4677 }
 0x6c3   : > { %v4680_v10 = vpop.permute.xlu1 %4679  ;;  %v7387_v28 = vpack.i.bf16 %v4627_v35, %v4626_v29  ;;  %v7392_v18 = vpack.i.bf16 %v4630_v62, %v4629_v38  ;;  %v4685_v1 = vmul.f32 0.0, %v4678_v43 }
 0x6c4   : > { %v4687_v42 = vmul.f32 %v4680_v10, %v10744_v52  ;;  %v4690_v58 = vmul.f32 %v4680_v10, %v10747_v30 }
 0x6c5   : > { %5297 = vrot.lane.b32.xlu0 %v5290_v31, %s10804_s20  ;;  %5299 = vrot.lane.b32.xlu1 %v5294_v59, %s10804_s20  ;;  %v4681_v31 = vsel %vm2654_vm9, %v4678_v43, %v4680_v10  ;;  %v7397_v59 = vpack.i.bf16 %v4625_v11, %v4625_v11  ;;  %v7412_v34 = vpack.i.bf16 %v4685_v1, %v4685_v1 }
 0x6c6   : > { %v4686_v7 = vmul.f32 %v4681_v31, %v10743_v24  ;;  %v4689_v23 = vmul.f32 %v4681_v31, %v10741_v32  ;;  %v4738_v0 = vpop.permute.xlu0 %4737 }
 0x6c7   : > { %v4740_v61 = vpop.permute.xlu1 %4739  ;;  %v4745_v26 = vmul.f32 0.0, %v4738_v0 }
 0x6c8   : > { %v7407_v13 = vpack.i.bf16 %v4690_v58, %v4689_v23 }
 0x6c9   : > { %7348 = vrot.lane.b32.xlu1 %v7347_v16, %s10806_s2  ;;  %7343 = vrot.lane.b32.xlu0 %v7342_v41, %s10806_s2  ;;  %v7402_v16 = vpack.i.bf16 %v4687_v42, %v4686_v7  ;;  %v4741_v41 = vsel %vm2559_vm4, %v4738_v0, %v4740_v61 }
 0x6ca   : > { %v4746_v54 = vmul.f32 %v4741_v41, %v10743_v24  ;;  %v4749_v51 = vmul.f32 %v4741_v41, %v10741_v32  ;;  %v4798_v14 = vpop.permute.xlu0 %4797 }
 0x6cb   : > { %v4800_v47 = vpop.permute.xlu1 %4799 }
 0x6cc   : > { %v4807_v3 = vmul.f32 %v4800_v47, %v10744_v52  ;;  %v4810_v4 = vmul.f32 %v4800_v47, %v10747_v30 }
 0x6cd   : > { %5357 = vrot.lane.b32.xlu1 %v5350_v49, %s7783_s27  ;;  %7353 = vrot.lane.b32.xlu0 %v7352_v45, %s10806_s2  ;;  %v5550_v49 = vrot.slane %v730_v46, %v10707_v33  ;;  %v731_v45 = vld [vmem:[%s10442_s8 + $0x98] sm:$0x7] }
 0x6ce   : > { %v5554_v36 = vrot.slane %v731_v45, %v10707_v33  ;;  %v5610_v33 = vrot.slane %v730_v46, %v10794_v9  ;;  %v5614_v8 = vrot.slane %v731_v45, %v10794_v9  ;;  %v4858_v22 = vpop.permute.xlu0 %4857 }
 0x6cf   : > { %v4865_v35 = vmul.f32 0.0, %v4858_v22 }
 0x6d1   : > { %5359 = vrot.lane.b32.xlu0 %v5354_v19, %s7783_s27  ;;  %7358 = vrot.lane.b32.xlu1 %v7357_v39, %s7780_s25  ;;  %v4747_v19 = vmul.f32 %v4740_v61, %v10744_v52  ;;  %v4750_v39 = vmul.f32 %v4740_v61, %v10747_v30  ;;  %v7457_v43 = vpack.i.bf16 %v4865_v35, %v4865_v35 }
 0x6d2   : > { %v4918_v10 = vpop.permute.xlu0 %4917 }
 0x6d3   : > { %v7422_v6 = vpack.i.bf16 %v4750_v39, %v4749_v51  ;;  %v4925_v61 = vmul.f32 0.0, %v4918_v10 }
 0x6d5   : > { %7363 = vrot.lane.b32.xlu0 %v7362_v48, %s7780_s25  ;;  %7368 = vrot.lane.b32.xlu1 %v7367_v63, %s7780_s25  ;;  %v7417_v63 = vpack.i.bf16 %v4747_v19, %v4746_v54  ;;  %v7427_v48 = vpack.i.bf16 %v4745_v26, %v4745_v26  ;;  %v7472_v46 = vpack.i.bf16 %v4925_v61, %v4925_v61 }
 0x6d9   : > { %5417 = vrot.lane.b32.xlu0 %v5410_v44, %s7780_s25  ;;  %5419 = vrot.lane.b32.xlu1 %v5414_v56, %s7780_s25  ;;  %v4801_v44 = vsel %vm4588_vm8, %v4798_v14, %v4800_v47  ;;  %v4860_v56 = vpop.permute.xlu1 %4859 }
 0x6da   : > { %v4806_v53 = vmul.f32 %v4801_v44, %v10743_v24  ;;  %v4809_v25 = vmul.f32 %v4801_v44, %v10741_v32  ;;  %v4861_v12 = vsel %vm4298_vm15, %v4858_v22, %v4860_v56  ;;  %v4867_v9 = vmul.f32 %v4860_v56, %v10744_v52 }
 0x6db   : > { %v4870_v11 = vmul.f32 %v4860_v56, %v10747_v30 }
 0x6dd   : > { %7378 = vrot.lane.b32.xlu1 %v7377_v40, %s7783_s27  ;;  %7373 = vrot.lane.b32.xlu0 %v7372_v57, %s7783_s27  ;;  %v4805_v40 = vmul.f32 0.0, %v4798_v14  ;;  %v4866_v57 = vmul.f32 %v4861_v12, %v10743_v24  ;;  %v4920_v37 = vpop.permute.xlu1 %4919 }
 0x6de   : > { %v4921_v62 = vsel %vm3139_vm12, %v4918_v10, %v4920_v37  ;;  %v4927_v7 = vmul.f32 %v4920_v37, %v10744_v52  ;;  %v4930_v23 = vmul.f32 %v4920_v37, %v10747_v30 }
 0x6df   : > { %v7442_v29 = vpack.i.bf16 %v4805_v40, %v4805_v40  ;;  %v7447_v38 = vpack.i.bf16 %v4867_v9, %v4866_v57  ;;  %v4929_v42 = vmul.f32 %v4921_v62, %v10741_v32 }
 0x6e1   : > { %5477 = vrot.lane.b32.xlu1 %v5470_v5, %s10806_s2  ;;  %7383 = vrot.lane.b32.xlu0 %v7382_v15, %s7783_s27  ;;  %v7437_v5 = vpack.i.bf16 %v4810_v4, %v4809_v25  ;;  %v7432_v15 = vpack.i.bf16 %v4807_v3, %v4806_v53 }
 0x6e5   : > { %5479 = vrot.lane.b32.xlu0 %v5474_v20, %s10806_s2  ;;  %7388 = vrot.lane.b32.xlu1 %v7387_v28, %s10804_s20  ;;  %v4869_v20 = vmul.f32 %v4861_v12, %v10741_v32  ;;  %v5000_v28 = vpop.permute.xlu1 %4999 }
 0x6e6   : > { %v5007_v1 = vmul.f32 0.0, %v5000_v28 }
 0x6e7   : > { %v7452_v31 = vpack.i.bf16 %v4870_v11, %v4869_v20 }
 0x6e9   : > { %7393 = vrot.lane.b32.xlu0 %v7392_v18, %s10804_s20  ;;  %7398 = vrot.lane.b32.xlu1 %v7397_v59, %s10804_s20  ;;  %v4998_v59 = vpop.permute.xlu0 %4997  ;;  %v4926_v18 = vmul.f32 %v4921_v62, %v10743_v24 }
 0x6ea   : > { %v5001_v58 = vsel %vm3168_vm10, %v4998_v59, %v5000_v28  ;;  %v5005_v45 = vmul.f32 %v4998_v59, %v10743_v24 }
 0x6eb   : > { %v5006_v0 = vmul.f32 %v5001_v58, %v10744_v52  ;;  %v7462_v41 = vpack.i.bf16 %v4927_v7, %v4926_v18  ;;  %v5009_v54 = vmul.f32 %v5001_v58, %v10747_v30 }
 0x6ed   : > { %7408 = vrot.lane.b32.xlu1 %v7407_v13, %s7773_s21  ;;  %7403 = vrot.lane.b32.xlu0 %v7402_v16, %s7773_s21  ;;  %v5060_v13 = vpop.permute.xlu1 %5059  ;;  %v7467_v16 = vpack.i.bf16 %v4930_v23, %v4929_v42  ;;  %v7477_v19 = vpack.i.bf16 %v5007_v1, %v5006_v0  ;;  %v7482_v39 = vpack.i.bf16 %v5007_v1, %v5009_v54  ;;  %v7658_v1 = vld [vmem:[%s10439_s5 + $0x44] ss:$16 sps:$4 sm:$0xff]  }
 0x6ee   : > { %5870 = vmatprep.mubr.bf16.mxu1 %v7658_v1 }
 0x6f1   : > { %5557 = vrot.lane.b32.xlu1 %v5550_v49, %s7778_s29  ;;  %7413 = vrot.lane.b32.xlu0 %v7412_v34, %s7773_s21  ;;  %v5058_v49 = vpop.permute.xlu0 %5057  ;;  %v5008_v34 = vmul.f32 %v4998_v59, %v10741_v32  ;;  %v5120_v26 = vpop.permute.xlu1 %5119 }
 0x6f2   : > { %v5065_v44 = vmul.f32 %v5058_v49, %v10743_v24  ;;  %v5068_v56 = vmul.f32 %v5058_v49, %v10741_v32  ;;  %v5127_v22 = vmul.f32 0.0, %v5120_v26 }
 0x6f3   : > { %v7487_v51 = vpack.i.bf16 %v5008_v34, %v5005_v45  ;;  %v7673_v45 = vld [vmem:[%s10442_s8 + $0x68] sm:$0xff] }
 0x6f4   : > { %v7502_v3 = vpack.i.bf16 %v5068_v56, %v5065_v44  ;;  %v4410_v34 = vrot.slane %v7673_v45, %v10796_v2 }
 0x6f5   : > { %5559 = vrot.lane.b32.xlu0 %v5554_v36, %s7778_s29  ;;  %7418 = vrot.lane.b32.xlu1 %v7417_v63, %s7769_s23  ;;  %v5061_v36 = vsel %vm10827_vm7, %v5058_v49, %v5060_v13  ;;  %v5118_v47 = vpop.permute.xlu0 %5117  ;;  %v5067_v63 = vmul.f32 0.0, %v5060_v13  ;;  %vm10834_vm7 = vmmov %vm10828_vm0 }
 0x6f6   : > { %v5069_v14 = vmul.f32 %v5061_v36, %v10747_v30  ;;  %v5125_v25 = vmul.f32 %v5118_v47, %v10743_v24  ;;  %v5128_v4 = vmul.f32 %v5118_v47, %v10741_v32 }
 0x6f8   : > { %v7517_v9 = vpack.i.bf16 %v5128_v4, %v5125_v25 }
 0x6f9   : > { %7423 = vrot.lane.b32.xlu0 %v7422_v6, %s7769_s23  ;;  %7428 = vrot.lane.b32.xlu1 %v7427_v48, %s7769_s23  ;;  %v5066_v48 = vmul.f32 %v5061_v36, %v10744_v52  ;;  %v5121_v6 = vsel %vm4559_vm11, %v5118_v47, %v5120_v26 }
 0x6fa   : > { %v5126_v53 = vmul.f32 %v5121_v6, %v10744_v52  ;;  %v5129_v12 = vmul.f32 %v5121_v6, %v10747_v30  ;;  %v4414_v6 = vmul.f32 %v4410_v34, %v10741_v32 }
 0x6fc   : > { %v7507_v40 = vpack.i.bf16 %v5127_v22, %v5126_v53  ;;  %v7512_v57 = vpack.i.bf16 %v5127_v22, %v5129_v12  ;;  %v4412_v12 = vmul.f32 %v4410_v34, %v10743_v24 }
 0x6fd   : > { %5617 = vrot.lane.b32.xlu0 %v5610_v33, %s7781_s30  ;;  %5619 = vrot.lane.b32.xlu1 %v5614_v8, %s7781_s30  ;;  %v7497_v33 = vpack.i.bf16 %v5067_v63, %v5069_v14  ;;  %v7492_v8 = vpack.i.bf16 %v5067_v63, %v5066_v48 }
 0x701   : > { %7438 = vrot.lane.b32.xlu1 %v7437_v5, %s7782_s4  ;;  %7433 = vrot.lane.b32.xlu0 %v7432_v15, %s7782_s4 }
 0x705   : > { %7443 = vrot.lane.b32.xlu0 %v7442_v29, %s7782_s4  ;;  %7448 = vrot.lane.b32.xlu1 %v7447_v38, %s7781_s30 }
 0x709   : > { %7453 = vrot.lane.b32.xlu0 %v7452_v31, %s7781_s30  ;;  %7458 = vrot.lane.b32.xlu1 %v7457_v43, %s7781_s30 }
 0x70d   : > { %7468 = vrot.lane.b32.xlu1 %v7467_v16, %s7778_s29  ;;  %7463 = vrot.lane.b32.xlu0 %v7462_v41, %s7778_s29  ;;  %v7672_v16 = vld [vmem:[%s10442_s8 + $0x60] sm:$0xff] }
 0x70e   : > { %v4406_v41 = vrot.slane %v7672_v16, %v10796_v2 }
 0x710   : > { %v4411_v2 = vmul.f32 0.0, %v4406_v41 }
 0x711   : > { %7473 = vrot.lane.b32.xlu0 %v7472_v46, %s7778_s29  ;;  %7478 = vrot.lane.b32.xlu1 %v7477_v19, %s10806_s2 }
 0x715   : > { %7483 = vrot.lane.b32.xlu0 %v7482_v39, %s10806_s2  ;;  %7488 = vrot.lane.b32.xlu1 %v7487_v51, %s10806_s2 }
 0x719   : > { %7498 = vrot.lane.b32.xlu1 %v7497_v33, %s7780_s25  ;;  %7493 = vrot.lane.b32.xlu0 %v7492_v8, %s7780_s25 }
 0x71d   : > { %7503 = vrot.lane.b32.xlu0 %v7502_v3, %s7780_s25  ;;  %7508 = vrot.lane.b32.xlu1 %v7507_v40, %s7783_s27 }
 0x721   : > { %7513 = vrot.lane.b32.xlu0 %v7512_v57, %s7783_s27  ;;  %7518 = vrot.lane.b32.xlu1 %v7517_v9, %s7783_s27 }
 0x723   : > { %v7314_v37 = vpop.permute.xlu0 %7313  ;;  %v7319_v5 = vpop.permute.xlu1 %7318 }
 0x724   : > { %v7316_v15 = vunpack.i.h.bf16 %v7314_v37  ;;  %v7315_v29 = vunpack.i.l.bf16 %v7314_v37  ;;  %v7321_v35 = vunpack.i.h.bf16 %v7319_v5  ;;  %v7320_v10 = vunpack.i.l.bf16 %v7319_v5 }
 0x725   : > { %v5771_v5 = vpack.c.bf16 %v4414_v6, %v4412_v12 }
 0x726   : > { %v4328_v20 = vsel %vm10828_vm0, %v7315_v29, %v7316_v15  ;;  %v4330_v11 = vsel %vm10829_vm3, %v7320_v10, %v7321_v35  ;;  %v5770_v35 = vpack.c.bf16 %v4411_v2, %v4411_v2  ;;  %vm10835_vm3 = vmmov %vm10828_vm0 }
 0x727   : > { %v7324_v38 = vpop.permute.xlu0 %7323  ;;  %v5178_v62 = vpop.permute.xlu1 %5177  ;;  %v5767_v43 = vpack.c.bf16 %v4330_v11, %v4328_v20 }
 0x728   : > { %v7326_v28 = vunpack.i.h.bf16 %v7324_v38  ;;  %v7325_v31 = vunpack.i.l.bf16 %v7324_v38  ;;  %v5185_v54 = vmul.f32 %v5178_v62, %v10743_v24  ;;  %v5188_v19 = vmul.f32 %v5178_v62, %v10741_v32 }
 0x729   : > { %5838 = vmatprep.subr.bf16.mxu1 %v5767_v43 }
 0x72a   : > { %v4327_v59 = vsel %vm10830_vm14, %v7325_v31, %v7315_v29  ;;  %v4329_v18 = vsel %vm10831_vm1, %v7326_v28, %v7320_v10  ;;  %v7532_v3 = vpack.i.bf16 %v5188_v19, %v5185_v54 }
 0x72b   : > { %v5180_v7 = vpop.permute.xlu0 %5179  ;;  %v7329_v42 = vpop.permute.xlu1 %7328  ;;  %v5766_v23 = vpack.c.bf16 %v4329_v18, %v4327_v59 }
 0x72c   : > { %v5181_v58 = vsel %vm2530_vm2, %v5178_v62, %v5180_v7  ;;  %v5187_v61 = vmul.f32 0.0, %v5180_v7  ;;  %v7331_v46 = vunpack.i.h.bf16 %v7329_v42  ;;  %v7330_v49 = vunpack.i.l.bf16 %v7329_v42 }
 0x72d   : > { %v5189_v0 = vmul.f32 %v5181_v58, %v10747_v30  ;;  %v5186_v13 = vmul.f32 %v5181_v58, %v10744_v52  ;;  %5839 = vmatpush1.bf16.msra.mxu1 %v5766_v23 }
 0x72e   : > { %v4388_v33 = vsel %vm3168_vm10, %v7330_v49, %v7331_v46 }
 0x72f   : > { %v7527_v36 = vpack.i.bf16 %v5187_v61, %v5189_v0  ;;  %v7522_v26 = vpack.i.bf16 %v5187_v61, %v5186_v13  ;;  %v7334_v51 = vpop.permute.xlu0 %7333  ;;  %v7339_v39 = vpop.permute.xlu1 %7338 }
 0x730   : > { %v7336_v47 = vunpack.i.h.bf16 %v7334_v51  ;;  %v7335_v63 = vunpack.i.l.bf16 %v7334_v51  ;;  %v7341_v14 = vunpack.i.h.bf16 %v7339_v39  ;;  %v7340_v48 = vunpack.i.l.bf16 %v7339_v39 }
 0x731   : > { %7528 = vrot.lane.b32.xlu1 %v7527_v36, %s10804_s20  ;;  %7523 = vrot.lane.b32.xlu0 %v7522_v26, %s10804_s20 }
 0x732   : > { %v4389_v44 = vsel %vm3168_vm10, %v7341_v14, %v7335_v63  ;;  %v4387_v56 = vsel %vm3168_vm10, %v7340_v48, %v7330_v49  ;;  %v4390_v8 = vsel %vm3168_vm10, %v7335_v63, %v7336_v47 }
 0x733   : > { %v5238_v22 = vpop.permute.xlu0 %5237  ;;  %v5240_v53 = vpop.permute.xlu1 %5239  ;;  %v5769_v25 = vpack.c.bf16 %v4390_v8, %v4388_v33  ;;  %v5768_v4 = vpack.c.bf16 %v4389_v44, %v4387_v56 }
 0x734   : > { %v5241_v40 = vsel %vm2654_vm9, %v5238_v22, %v5240_v53  ;;  %v5247_v57 = vmul.f32 0.0, %v5240_v53  ;;  %v5245_v15 = vmul.f32 %v5238_v22, %v10743_v24  ;;  %v5248_v29 = vmul.f32 %v5238_v22, %v10741_v32 }
 0x735   : > { %v5249_v9 = vmul.f32 %v5241_v40, %v10747_v30  ;;  %v5246_v37 = vmul.f32 %v5241_v40, %v10744_v52  ;;  %7533 = vrot.lane.b32.xlu0 %v7532_v3, %s10804_s20  ;;  %5840 = vmatprep.subr.bf16.mxu1 %v5769_v25 }
 0x736   : > { %5841 = vmatpush1.bf16.msra.mxu1 %v5768_v4  ;;  %v7547_v31 = vpack.i.bf16 %v5248_v29, %v5245_v15 }
 0x737   : > { %v7542_v10 = vpack.i.bf16 %v5247_v57, %v5249_v9  ;;  %v7537_v20 = vpack.i.bf16 %v5247_v57, %v5246_v37  ;;  %v5298_v11 = vpop.permute.xlu0 %5297  ;;  %v5300_v38 = vpop.permute.xlu1 %5299  ;;  %5842 = vmatprep.subr.bf16.mxu1 %v5771_v5 }
 0x738   : > { %v5301_v62 = vsel %vm2559_vm4, %v5298_v11, %v5300_v38  ;;  %v5307_v43 = vmul.f32 0.0, %v5300_v38  ;;  %v5305_v59 = vmul.f32 %v5298_v11, %v10743_v24  ;;  %v5308_v18 = vmul.f32 %v5298_v11, %v10741_v32 }
 0x739   : > { %v5306_v28 = vmul.f32 %v5301_v62, %v10744_v52  ;;  %7543 = vrot.lane.b32.xlu0 %v7542_v10, %s7773_s21  ;;  %7538 = vrot.lane.b32.xlu1 %v7537_v20, %s7773_s21  ;;  %v5309_v7 = vmul.f32 %v5301_v62, %v10747_v30 }
 0x73a   : > { %5843 = vmatpush1.bf16.msra.mxu1 %v5770_v35  ;;  %v7562_v34 = vpack.i.bf16 %v5308_v18, %v5305_v59 }
 0x73b   : > { %v7552_v42 = vpack.i.bf16 %v5307_v43, %v5306_v28  ;;  %v7344_v23 = vpop.permute.xlu0 %7343  ;;  %v7349_v58 = vpop.permute.xlu1 %7348  ;;  %v7557_v46 = vpack.i.bf16 %v5307_v43, %v5309_v7 }
 0x73c   : > { %v7346_v61 = vunpack.i.h.bf16 %v7344_v23  ;;  %v7345_v1 = vunpack.i.l.bf16 %v7344_v23  ;;  %v7351_v0 = vunpack.i.h.bf16 %v7349_v58  ;;  %v7350_v13 = vunpack.i.l.bf16 %v7349_v58 }
 0x73d   : > { %7548 = vrot.lane.b32.xlu1 %v7547_v31, %s7773_s21  ;;  %7553 = vrot.lane.b32.xlu0 %v7552_v42, %s7769_s23  ;;  %s10840_s21 = sld [smem:[#allocation8_spill]] }
 0x73e   : > { %v4468_v16 = vsel %vm3139_vm12, %v7345_v1, %v7346_v61  ;;  %v4470_v41 = vsel %vm3139_vm12, %v7350_v13, %v7351_v0 }
 0x73f   : > { %v7354_v49 = vpop.permute.xlu0 %7353  ;;  %v5358_v45 = vpop.permute.xlu1 %5357  ;;  %v5773_v54 = vpack.c.bf16 %v4470_v41, %v4468_v16 }
 0x740   : > { %v7356_v19 = vunpack.i.h.bf16 %v7354_v49  ;;  %v7355_v36 = vunpack.i.l.bf16 %v7354_v49  ;;  %v5365_v33 = vmul.f32 %v5358_v45, %v10743_v24  ;;  %v5368_v8 = vmul.f32 %v5358_v45, %v10741_v32 }
 0x741   : > { %7558 = vrot.lane.b32.xlu1 %v7557_v46, %s7769_s23  ;;  %7563 = vrot.lane.b32.xlu0 %v7562_v34, %s7769_s23 }
 0x742   : > { %v4467_v26 = vsel %vm3139_vm12, %v7355_v36, %v7345_v1  ;;  %v4469_v51 = vsel %vm3139_vm12, %v7356_v19, %v7350_v13  ;;  %5844 = vmatprep.subr.bf16.mxu1 %v5773_v54  ;;  %v7577_v10 = vpack.i.bf16 %v5368_v8, %v5365_v33 }
 0x743   : > { %v5360_v39 = vpop.permute.xlu0 %5359  ;;  %v7359_v47 = vpop.permute.xlu1 %7358  ;;  %v5772_v63 = vpack.c.bf16 %v4469_v51, %v4467_v26 }
 0x744   : > { %v5361_v14 = vsel %vm4588_vm8, %v5358_v45, %v5360_v39  ;;  %v5367_v48 = vmul.f32 0.0, %v5360_v39  ;;  %v7361_v44 = vunpack.i.h.bf16 %v7359_v47  ;;  %v7360_v56 = vunpack.i.l.bf16 %v7359_v47 }
 0x745   : > { %v5369_v6 = vmul.f32 %v5361_v14, %v10747_v30  ;;  %v5366_v2 = vmul.f32 %v5361_v14, %v10744_v52  ;;  %5845 = vmatpush1.bf16.msra.mxu1 %v5772_v63 }
 0x746   : > { %v4528_v5 = vsel %vm4298_vm15, %v7360_v56, %v7361_v44 }
 0x747   : > { %v7572_v22 = vpack.i.bf16 %v5367_v48, %v5369_v6  ;;  %v7567_v53 = vpack.i.bf16 %v5367_v48, %v5366_v2  ;;  %v7364_v3 = vpop.permute.xlu0 %7363  ;;  %v7369_v25 = vpop.permute.xlu1 %7368 }
 0x748   : > { %v7366_v4 = vunpack.i.h.bf16 %v7364_v3  ;;  %v7365_v12 = vunpack.i.l.bf16 %v7364_v3  ;;  %v7371_v40 = vunpack.i.h.bf16 %v7369_v25  ;;  %v7370_v57 = vunpack.i.l.bf16 %v7369_v25 }
 0x749   : > { %7573 = vrot.lane.b32.xlu0 %v7572_v22, %s7782_s4  ;;  %7568 = vrot.lane.b32.xlu1 %v7567_v53, %s7782_s4 }
 0x74a   : > { %v4529_v9 = vsel %vm4298_vm15, %v7371_v40, %v7365_v12  ;;  %v4527_v37 = vsel %vm4298_vm15, %v7370_v57, %v7360_v56  ;;  %v4530_v15 = vsel %vm4298_vm15, %v7365_v12, %v7366_v4 }
 0x74b   : > { %v5418_v29 = vpop.permute.xlu0 %5417  ;;  %v5420_v35 = vpop.permute.xlu1 %5419  ;;  %v5775_v20 = vpack.c.bf16 %v4530_v15, %v4528_v5  ;;  %v5774_v11 = vpack.c.bf16 %v4529_v9, %v4527_v37 }
 0x74c   : > { %v5421_v38 = vsel %vm4298_vm15, %v5418_v29, %v5420_v35  ;;  %v5427_v62 = vmul.f32 0.0, %v5420_v35  ;;  %v5425_v31 = vmul.f32 %v5418_v29, %v10743_v24  ;;  %v5428_v59 = vmul.f32 %v5418_v29, %v10741_v32 }
 0x74d   : > { %v5429_v43 = vmul.f32 %v5421_v38, %v10747_v30  ;;  %v5426_v28 = vmul.f32 %v5421_v38, %v10744_v52  ;;  %7578 = vrot.lane.b32.xlu1 %v7577_v10, %s7782_s4  ;;  %5846 = vmatprep.subr.bf16.mxu1 %v5775_v20  ;;  %s10843_s4 = sld [smem:[#allocation11_spill]] }
 0x74e   : > { %5847 = vmatpush1.bf16.msra.mxu1 %v5774_v11  ;;  %v7592_v49 = vpack.i.bf16 %v5428_v59, %v5425_v31 }
 0x74f   : > { %v7587_v18 = vpack.i.bf16 %v5427_v62, %v5429_v43  ;;  %v7582_v7 = vpack.i.bf16 %v5427_v62, %v5426_v28  ;;  %v7374_v42 = vpop.permute.xlu0 %7373  ;;  %v7379_v23 = vpop.permute.xlu1 %7378 }
 0x750   : > { %v7376_v58 = vunpack.i.h.bf16 %v7374_v42  ;;  %v7375_v61 = vunpack.i.l.bf16 %v7374_v42  ;;  %v7381_v1 = vunpack.i.h.bf16 %v7379_v23  ;;  %v7380_v0 = vunpack.i.l.bf16 %v7379_v23 }
 0x751   : > { %7588 = vrot.lane.b32.xlu1 %v7587_v18, %s7781_s30  ;;  %7583 = vrot.lane.b32.xlu0 %v7582_v7, %s7781_s30 }
 0x752   : > { %v4590_v13 = vsel %vm4588_vm8, %v7375_v61, %v7376_v58  ;;  %v4592_v16 = vsel %vm4588_vm8, %v7380_v0, %v7381_v1 }
 0x753   : > { %v7384_v41 = vpop.permute.xlu0 %7383  ;;  %v5478_v46 = vpop.permute.xlu1 %5477  ;;  %v5777_v45 = vpack.c.bf16 %v4592_v16, %v4590_v13  ;;  %s6498_s19 = sshll.u32 %s10843_s4, 8 }
 0x754   : > { %v7386_v34 = vunpack.i.h.bf16 %v7384_v41  ;;  %v7385_v54 = vunpack.i.l.bf16 %v7384_v41  ;;  %v5485_v44 = vmul.f32 %v5478_v46, %v10743_v24  ;;  %v5488_v56 = vmul.f32 %v5478_v46, %v10741_v32  ;;  %s10390_s22 = scalar_lea.hbm %s10845_s28, %s6498_s19 }
 0x755   : > { %7593 = vrot.lane.b32.xlu0 %v7592_v49, %s7781_s30  ;;  %5848 = vmatprep.subr.bf16.mxu1 %v5777_v45  ;;  %s566_s30 = sand.u32 1, %s10840_s21  }
 0x756   : > { %v4589_v19 = vsel %vm4588_vm8, %v7385_v54, %v7375_v61  ;;  %v4591_v36 = vsel %vm4588_vm8, %v7386_v34, %v7380_v0  ;;  %v7607_v35 = vpack.i.bf16 %v5488_v56, %v5485_v44  ;;  %s6450_s24 = sshll.u32 %s566_s30, 4  ;;  %s6373_s14 = scalar_lea.sflag [#allocation5], %s566_s30 }
 0x757   : > { %v5480_v26 = vpop.permute.xlu0 %5479  ;;  %v7389_v51 = vpop.permute.xlu1 %7388  ;;  %v5776_v39 = vpack.c.bf16 %v4591_v36, %v4589_v19  ;;  %s568_s26 = scalar_lea.vmem [#allocation4], %s6450_s24 }
 0x758   : > { %v5481_v47 = vsel %vm3139_vm12, %v5478_v46, %v5480_v26  ;;  %v5487_v63 = vmul.f32 0.0, %v5480_v26  ;;  %v7391_v6 = vunpack.i.h.bf16 %v7389_v51  ;;  %v7390_v2 = vunpack.i.l.bf16 %v7389_v51  ;;  %s6387_s3 = sshll.u32 %s568_s26, 4  ;;  %s10392_s3 = int_to_ptr.vmem [resolvable:$true] %s6387_s3 }
 0x759   : > { %v5489_v14 = vmul.f32 %v5481_v47, %v10747_v30  ;;  %v5486_v48 = vmul.f32 %v5481_v47, %v10744_v52  ;;  %5849 = vmatpush1.bf16.msra.mxu1 %v5776_v39  ;;  %s7680_s23 = scalar_lea.vmem %s10392_s3, 256 }
 0x75a   : > { %v4650_v9 = vsel %vm2559_vm4, %v7390_v2, %v7391_v6  ;;  %p7681_p11 = scmp.ne.s32.totalorder %s10392_s3, %s7680_s23 }
 0x75b   : > { %v7602_v33 = vpack.i.bf16 %v5487_v63, %v5489_v14  ;;  %v7597_v8 = vpack.i.bf16 %v5487_v63, %v5486_v48  ;;  %v7394_v22 = vpop.permute.xlu0 %7393  ;;  %v7399_v53 = vpop.permute.xlu1 %7398 }
 0x75c   : > { %v7396_v3 = vunpack.i.h.bf16 %v7394_v22  ;;  %v7395_v25 = vunpack.i.l.bf16 %v7394_v22  ;;  %v7401_v4 = vunpack.i.h.bf16 %v7399_v53  ;;  %v7400_v12 = vunpack.i.l.bf16 %v7399_v53  ;;  %p7682_p12 = pnand %p7681_p11, %p7918_p5 }
 0x75d   : > { %7603 = vrot.lane.b32.xlu0 %v7602_v33, %s7778_s29  ;;  %7598 = vrot.lane.b32.xlu1 %v7597_v8, %s7778_s29 }
 0x75e   : > { %v4651_v40 = vsel %vm2559_vm4, %v7401_v4, %v7395_v25  ;;  %v4649_v57 = vsel %vm2559_vm4, %v7400_v12, %v7390_v2  ;;  %v4652_v37 = vsel %vm2559_vm4, %v7395_v25, %v7396_v3  ;;  %p7683_p13 = pneg %p7682_p12 }
 0x75f   : > { %v5778_v5 = vpack.c.bf16 %v4651_v40, %v4649_v57  ;;  %v7404_v15 = vpop.permute.xlu0 %7403  ;;  %v7409_v29 = vpop.permute.xlu1 %7408  ;;  %v5779_v10 = vpack.c.bf16 %v4652_v37, %v4650_v9 }
 0x760   : > { %v7406_v20 = vunpack.i.h.bf16 %v7404_v15  ;;  %v7405_v11 = vunpack.i.l.bf16 %v7404_v15  ;;  %v7411_v38 = vunpack.i.h.bf16 %v7409_v29  ;;  %v7410_v62 = vunpack.i.l.bf16 %v7409_v29 }
 0x761   : > { %7608 = vrot.lane.b32.xlu1 %v7607_v35, %s7778_s29  ;;  %5850 = vmatprep.subr.bf16.mxu1 %v5779_v10  ;;  %s10841_s29 = sld [smem:[#allocation16_spill]] }
 0x762   : > { %5851 = vmatpush1.bf16.msra.mxu1 %v5778_v5  ;;  %v4710_v43 = vsel %vm2654_vm9, %v7405_v11, %v7406_v20  ;;  %v4712_v28 = vsel %vm2654_vm9, %v7410_v62, %v7411_v38 }
 0x763   : > { %v7414_v31 = vpop.permute.xlu0 %7413  ;;  %v5558_v59 = vpop.permute.xlu1 %5557  ;;  %v5781_v18 = vpack.c.bf16 %v4712_v28, %v4710_v43 }
 0x764   : > { %v7416_v7 = vunpack.i.h.bf16 %v7414_v31  ;;  %v7415_v42 = vunpack.i.l.bf16 %v7414_v31  ;;  %v5565_v45 = vmul.f32 %v5558_v59, %v10744_v52  ;;  %v5568_v34 = vmul.f32 %v5558_v59, %v10747_v30 }
 0x765   : > { %5852 = vmatprep.subr.bf16.mxu1 %v5781_v18 }
 0x766   : > { %v4709_v23 = vsel %vm2654_vm9, %v7415_v42, %v7405_v11  ;;  %v4711_v58 = vsel %vm2654_vm9, %v7416_v7, %v7410_v62  ;;  %v7622_v2 = vpack.i.bf16 %v5568_v34, %v5565_v45 }
 0x767   : > { %v5780_v61 = vpack.c.bf16 %v4711_v58, %v4709_v23  ;;  %v5560_v1 = vpop.permute.xlu0 %5559  ;;  %v7419_v0 = vpop.permute.xlu1 %7418 }
 0x768   : > { %v5561_v13 = vsel %vm3168_vm10, %v5558_v59, %v5560_v1  ;;  %v5567_v16 = vmul.f32 0.0, %v5560_v1  ;;  %v7421_v46 = vunpack.i.h.bf16 %v7419_v0  ;;  %v7420_v49 = vunpack.i.l.bf16 %v7419_v0 }
 0x769   : > { %v5566_v41 = vmul.f32 0.0, %v5561_v13  ;;  %5853 = vmatpush1.bf16.msra.mxu1 %v5780_v61 }
 0x76a   : > { %v4770_v48 = vsel %vm2530_vm2, %v7420_v49, %v7421_v46 }
 0x76b   : > { %v7617_v54 = vpack.i.bf16 %v5567_v16, %v5566_v41  ;;  %v7424_v19 = vpop.permute.xlu0 %7423  ;;  %v7429_v36 = vpop.permute.xlu1 %7428 }
 0x76c   : > { %v7426_v26 = vunpack.i.h.bf16 %v7424_v19  ;;  %v7425_v51 = vunpack.i.l.bf16 %v7424_v19  ;;  %v7431_v39 = vunpack.i.h.bf16 %v7429_v36  ;;  %v7430_v47 = vunpack.i.l.bf16 %v7429_v36 }
 0x76d   : > { %7618 = vrot.lane.b32.xlu1 %v7617_v54, %s10806_s2  ;;  %7613 = vrot.lane.b32.xlu0 %v7617_v54, %s10806_s2 }
 0x76e   : > { %v4771_v63 = vsel %vm2530_vm2, %v7431_v39, %v7425_v51  ;;  %v4769_v14 = vsel %vm2530_vm2, %v7430_v47, %v7420_v49  ;;  %v4772_v6 = vsel %vm2530_vm2, %v7425_v51, %v7426_v26  ;;  %v7674_v39 = vld [vmem:[%s10442_s8 + $0x78] sm:$0xff] }
 0x76f   : > { %v5782_v44 = vpack.c.bf16 %v4771_v63, %v4769_v14  ;;  %v5618_v56 = vpop.permute.xlu0 %5617  ;;  %v5620_v33 = vpop.permute.xlu1 %5619  ;;  %v5783_v8 = vpack.c.bf16 %v4772_v6, %v4770_v48  ;;  %v4972_v47 = vrot.slane %v7674_v39, %v10798_v27 }
 0x770   : > { %v5621_v22 = vsel %vm10832_vm5, %v5618_v56, %v5620_v33  ;;  %v5627_v53 = vmul.f32 0.0, %v5620_v33  ;;  %v5625_v25 = vmul.f32 %v5618_v56, %v10744_v52  ;;  %v5628_v4 = vmul.f32 %v5618_v56, %v10747_v30 }
 0x771   : > { %v5626_v3 = vmul.f32 0.0, %v5621_v22  ;;  %7623 = vrot.lane.b32.xlu0 %v7622_v2, %s10806_s2  ;;  %5854 = vmatprep.subr.bf16.mxu1 %v5783_v8  ;;  %v4976_v8 = vmul.f32 %v4972_v47, %v10747_v30 }
 0x772   : > { %5855 = vmatpush1.bf16.msra.mxu1 %v5782_v44  ;;  %v7637_v10 = vpack.i.bf16 %v5628_v4, %v5625_v25 }
 0x773   : > { %v7632_v12 = vpack.i.bf16 %v5627_v53, %v5626_v3  ;;  %v7434_v40 = vpop.permute.xlu0 %7433  ;;  %v7439_v57 = vpop.permute.xlu1 %7438  ;;  %v4974_v53 = vmul.f32 %v4972_v47, %v10744_v52  ;;  %v7675_v3 = vld [vmem:[%s10442_s8 + $0x70] sm:$0xff] }
 0x774   : > { %v7436_v9 = vunpack.i.h.bf16 %v7434_v40  ;;  %v7435_v37 = vunpack.i.l.bf16 %v7434_v40  ;;  %v7441_v5 = vunpack.i.h.bf16 %v7439_v57  ;;  %v7440_v15 = vunpack.i.l.bf16 %v7439_v57 }
 0x775   : > { %7633 = vrot.lane.b32.xlu0 %v7632_v12, %s7780_s25  ;;  %7628 = vrot.lane.b32.xlu1 %v7632_v12, %s7780_s25  ;;  %v4968_v25 = vrot.slane %v7675_v3, %v10798_v27 }
 0x776   : > { %v4830_v29 = vsel %vm4559_vm11, %v7435_v37, %v7436_v9  ;;  %v4832_v35 = vsel %vm4559_vm11, %v7440_v15, %v7441_v5 }
 0x777   : > { %v7444_v20 = vpop.permute.xlu0 %7443  ;;  %v7449_v11 = vpop.permute.xlu1 %7448  ;;  %v5785_v38 = vpack.c.bf16 %v4832_v35, %v4830_v29  ;;  %v4975_v29 = vmul.f32 %v4968_v25, %v10741_v32 }
 0x778   : > { %v7446_v62 = vunpack.i.h.bf16 %v7444_v20  ;;  %v7445_v43 = vunpack.i.l.bf16 %v7444_v20  ;;  %v7451_v59 = vunpack.i.h.bf16 %v7449_v11  ;;  %v7450_v18 = vunpack.i.l.bf16 %v7449_v11 }
 0x779   : > { %7638 = vrot.lane.b32.xlu1 %v7637_v10, %s7780_s25  ;;  %5856 = vmatprep.subr.bf16.mxu1 %v5785_v38  ;;  %v5791_v11 = vpack.c.bf16 %v4976_v8, %v4974_v53  ;;  %s10842_s25 = sld [smem:[#allocation53_spill]] }
 0x77a   : > { %v4829_v28 = vsel %vm4559_vm11, %v7445_v43, %v7435_v37  ;;  %v4831_v31 = vsel %vm4559_vm11, %v7446_v62, %v7440_v15  ;;  %v4890_v41 = vsel %vm10828_vm0, %v7450_v18, %v7451_v59  ;;  %v4973_v62 = vmul.f32 %v4968_v25, %v10743_v24 }
 0x77b   : > { %v5784_v7 = vpack.c.bf16 %v4831_v31, %v4829_v28  ;;  %v7454_v42 = vpop.permute.xlu0 %7453  ;;  %v7459_v23 = vpop.permute.xlu1 %7458 }
 0x77c   : > { %v7456_v58 = vunpack.i.h.bf16 %v7454_v42  ;;  %v7455_v61 = vunpack.i.l.bf16 %v7454_v42  ;;  %v7461_v1 = vunpack.i.h.bf16 %v7459_v23  ;;  %v7460_v0 = vunpack.i.l.bf16 %v7459_v23 }
 0x77d   : > { %5857 = vmatpush1.bf16.msra.mxu1 %v5784_v7  ;;  %v5790_v59 = vpack.c.bf16 %v4975_v29, %v4973_v62  ;;  %v7656_v29 = vld [vmem:[%s10439_s5 + $0x40] ss:$16 sps:$4 sm:$0xff]  }
 0x77e   : > { %v4891_v13 = vsel %vm10833_vm6, %v7461_v1, %v7455_v61  ;;  %v4889_v16 = vsel %vm10834_vm7, %v7460_v0, %v7450_v18  ;;  %v4892_v46 = vsel %vm10835_vm3, %v7455_v61, %v7456_v58 }
 0x77f   : > { %v5786_v49 = vpack.c.bf16 %v4891_v13, %v4889_v16  ;;  %v7464_v45 = vpop.permute.xlu0 %7463  ;;  %v7469_v34 = vpop.permute.xlu1 %7468  ;;  %v5787_v54 = vpack.c.bf16 %v4892_v46, %v4890_v41 }
 0x780   : > { %v7466_v19 = vunpack.i.h.bf16 %v7464_v45  ;;  %v7465_v36 = vunpack.i.l.bf16 %v7464_v45  ;;  %v7471_v26 = vunpack.i.h.bf16 %v7469_v34  ;;  %v7470_v51 = vunpack.i.l.bf16 %v7469_v34 }
 0x781   : > { %5858 = vmatprep.subr.bf16.mxu1 %v5787_v54 }
 0x782   : > { %5859 = vmatpush1.bf16.msra.mxu1 %v5786_v49  ;;  %v4950_v63 = vsel %vm3168_vm10, %v7465_v36, %v7466_v19  ;;  %v4952_v14 = vsel %vm3168_vm10, %v7470_v51, %v7471_v26 }
 0x783   : > { %v7474_v48 = vpop.permute.xlu0 %7473  ;;  %v7479_v6 = vpop.permute.xlu1 %7478  ;;  %v5789_v2 = vpack.c.bf16 %v4952_v14, %v4950_v63 }
 0x784   : > { %v7476_v44 = vunpack.i.h.bf16 %v7474_v48  ;;  %v7475_v56 = vunpack.i.l.bf16 %v7474_v48  ;;  %v10122_v33 = vpop.f32.mrb[8].mxu0  ;;  %v7481_v40 = vunpack.i.h.bf16 %v7479_v6  ;;  %v7480_v57 = vunpack.i.l.bf16 %v7479_v6 }
 0x785   : > { %v10125_v22 = vpop.f32.mrb[9].mxu0  ;;  %5860 = vmatprep.subr.bf16.mxu1 %v5789_v2 }
 0x786   : > { %v4949_v4 = vsel %vm3168_vm10, %v7475_v56, %v7465_v36  ;;  %v4951_v12 = vsel %vm3168_vm10, %v7476_v44, %v7470_v51  ;;  %v10134_v9 = vpop.f32.mrb[10].mxu0  ;;  %v5030_v43 = vsel %vm3139_vm12, %v7480_v57, %v7481_v40 }
 0x787   : > { %v5788_v37 = vpack.c.bf16 %v4951_v12, %v4949_v4  ;;  %v10136_v5 = vpop.f32.mrb[11].mxu0  ;;  %v7484_v15 = vpop.permute.xlu0 %7483 }
 0x788   : > { %v7486_v35 = vunpack.i.h.bf16 %v7484_v15  ;;  %v7485_v10 = vunpack.i.l.bf16 %v7484_v15  ;;  %v7489_v20 = vpop.permute.xlu1 %7488 }
 0x789   : > { %v7491_v38 = vunpack.i.h.bf16 %v7489_v20  ;;  %v7490_v27 = vunpack.i.l.bf16 %v7489_v20  ;;  %5861 = vmatpush1.bf16.msra.mxu1 %v5788_v37 }
 0x78a   : > { %5862 = vmatprep.subr.bf16.mxu1 %v5791_v11  ;;  %v5032_v28 = vsel %vm3139_vm12, %v7485_v10, %v7486_v35  ;;  %v7659_v35 = vld [vmem:[%s10439_s5 + $0x4c] ss:$16 sps:$4 sm:$0xff]  }
 0x78b   : > { %v7494_v31 = vpop.permute.xlu0 %7493  ;;  %v5793_v18 = vpack.c.bf16 %v5032_v28, %v5030_v43  ;;  %v6004_v7 = vpop.f32.mrb[12].mxu0  ;;  %v5031_v42 = vsel %vm3139_vm12, %v7491_v38, %v7485_v10  ;;  %v5029_v23 = vsel %vm3139_vm12, %v7490_v27, %v7480_v57 }
 0x78c   : > { %v7496_v58 = vunpack.i.h.bf16 %v7494_v31  ;;  %v7495_v61 = vunpack.i.l.bf16 %v7494_v31  ;;  %v7499_v1 = vpop.permute.xlu1 %7498  ;;  %v6006_v0 = vpop.f32.mrb[13].mxu0  ;;  %v5792_v34 = vpack.c.bf16 %v5031_v42, %v5029_v23 }
 0x78d   : > { %v7501_v13 = vunpack.i.h.bf16 %v7499_v1  ;;  %v7500_v16 = vunpack.i.l.bf16 %v7499_v1  ;;  %5863 = vmatpush1.bf16.msra.mxu1 %v5790_v59  ;;  %v6013_v41 = vadd.f32 %v6006_v0, %v6004_v7  ;;  %v6008_v46 = vpop.f32.mrb[14].mxu0 }
 0x78e   : > { %5864 = vmatprep.subr.bf16.mxu1 %v5793_v18  ;;  %v5090_v49 = vsel %vm4298_vm15, %v7495_v61, %v7496_v58  ;;  %v6010_v45 = vpop.f32.mrb[15].mxu0  ;;  %v2478_v18 = vld [vmem:[%s10440_s6] sm:$0xff] }
 0x78f   : > { %v7504_v54 = vpop.permute.xlu0 %7503  ;;  %v5092_v19 = vsel %vm4298_vm15, %v7500_v16, %v7501_v13  ;;  %v6016_v36 = vadd.f32 %v6010_v45, %v6008_v46  ;;  %v2494_v13 = vld [vmem:[%s10441_s7] sm:$0xff] }
 0x790   : > { %v7506_v26 = vunpack.i.h.bf16 %v7504_v54  ;;  %v7505_v51 = vunpack.i.l.bf16 %v7504_v54  ;;  %v7509_v39 = vpop.permute.xlu1 %7508  ;;  %v5795_v47 = vpack.c.bf16 %v5092_v19, %v5090_v49 }
 0x791   : > { %5865 = vmatpush1.bf16.msra.mxu1 %v5792_v34  ;;  %v7511_v48 = vunpack.i.h.bf16 %v7509_v39  ;;  %v7510_v6 = vunpack.i.l.bf16 %v7509_v39  ;;  %v2495_v39 = vld [vmem:[%s10441_s7 + $0x8] sm:$0xff] }
 0x792   : > { %v5089_v63 = vsel %vm4298_vm15, %v7505_v51, %v7495_v61  ;;  %v5091_v14 = vsel %vm4298_vm15, %v7506_v26, %v7500_v16  ;;  %5866 = vmatprep.subr.bf16.mxu1 %v5795_v47  ;;  %v2479_v16 = vld [vmem:[%s10440_s6 + $0x8] sm:$0xff]  ;;  %v6470_v51 = vld [vmem:[%s10440_s6 + $0x10] sm:$0xff] }
 0x793   : > { %v5794_v2 = vpack.c.bf16 %v5091_v14, %v5089_v63  ;;  %v7514_v44 = vpop.permute.xlu0 %7513  ;;  %v5150_v4 = vsel %vm4588_vm8, %v7510_v6, %v7511_v48 }
 0x794   : > { %v7516_v56 = vunpack.i.h.bf16 %v7514_v44  ;;  %v7515_v8 = vunpack.i.l.bf16 %v7514_v44  ;;  %v7519_v53 = vpop.permute.xlu1 %7518  ;;  %6014 = vadd.xlane.f32.xlu0 %v6013_v41 }
 0x795   : > { %v7521_v3 = vunpack.i.h.bf16 %v7519_v53  ;;  %v7520_v25 = vunpack.i.l.bf16 %v7519_v53  ;;  %5867 = vmatpush1.bf16.msra.mxu1 %v5794_v2  ;;  %v6472_v53 = vld [vmem:[%s10441_s7 + $0x10] sm:$0xff] }
 0x796   : > { %v5152_v12 = vsel %vm4588_vm8, %v7515_v8, %v7516_v56 }
 0x797   : > { %v5151_v40 = vsel %vm4588_vm8, %v7521_v3, %v7515_v8  ;;  %v5149_v57 = vsel %vm4588_vm8, %v7520_v25, %v7510_v6  ;;  %v5797_v37 = vpack.c.bf16 %v5152_v12, %v5150_v4  ;;  %v6471_v3 = vld [vmem:[%s10440_s6 + $0x18] sm:$0xff] }
 0x798   : > { %v5796_v15 = vpack.c.bf16 %v5151_v40, %v5149_v57 }
 0x799   : > { %5868 = vmatprep.subr.bf16.mxu1 %v5797_v37 }
 0x79a   : > { %5869 = vmatpush1.bf16.msra.mxu1 %v5796_v15 }
 0x79d   : > { %6017 = vadd.xlane.f32.xlu1 %v6016_v36  ;;  %5871 = vmatmul.mubr.bf16.vlgmr.msra.gmra.mrb[4].mxu1 %v7656_v29 }
 0x79e   : > { %6482 = vmatprep.mubr.msk.bf16.mxu1 %vm1215_vm13, %v7659_v35  ;;  %vm10836_vm13 = vmmov %vm10828_vm0 }
 0x7a3   : > { %v7524_v10 = vpop.permute.xlu0 %7523  ;;  %v7529_v20 = vpop.permute.xlu1 %7528 }
 0x7a4   : > { %v7526_v11 = vunpack.i.h.bf16 %v7524_v10  ;;  %v7525_v38 = vunpack.i.l.bf16 %v7524_v10  ;;  %v7531_v27 = vunpack.i.h.bf16 %v7529_v20  ;;  %v7530_v62 = vunpack.i.l.bf16 %v7529_v20  ;;  %v6063_v20 = vld [vmem:[%s10445_s11] sm:$0xff] }
 0x7a6   : > { %v5210_v43 = vsel %vm2559_vm4, %v7525_v38, %v7526_v11  ;;  %v5212_v28 = vsel %vm2559_vm4, %v7530_v62, %v7531_v27  ;;  %v6473_v11 = vld [vmem:[%s10441_s7 + $0x18] sm:$0xff] }
 0x7a7   : > { %v7534_v31 = vpop.permute.xlu0 %7533  ;;  %v5799_v59 = vpack.c.bf16 %v5212_v28, %v5210_v43  ;;  %v6064_v43 = vld [vmem:[%s10445_s11 + $0x8] sm:$0xff] }
 0x7a8   : > { %v7536_v7 = vunpack.i.h.bf16 %v7534_v31  ;;  %v7535_v42 = vunpack.i.l.bf16 %v7534_v31 }
 0x7a9   : > { %5881 = vmatprep.subr.bf16.mxu1 %v5799_v59 }
 0x7aa   : > { %v5209_v23 = vsel %vm2559_vm4, %v7535_v42, %v7525_v38  ;;  %v5211_v58 = vsel %vm2559_vm4, %v7536_v7, %v7530_v62  ;;  %2482 = vperm.xlu0 %6590, %v2478_v18   ;;  %v6483_v62 = vld [vmem:[%s10440_s6 + $0x20] sm:$0xff]  ;;  %vm10838_vm4 = vmmov %vm10828_vm0 }
 0x7ab   : > { %v5798_v61 = vpack.c.bf16 %v5211_v58, %v5209_v23  ;;  %v7544_v1 = vpop.permute.xlu0 %7543  ;;  %v7539_v0 = vpop.permute.xlu1 %7538 }
 0x7ac   : > { %v7546_v41 = vunpack.i.h.bf16 %v7544_v1  ;;  %v7545_v46 = vunpack.i.l.bf16 %v7544_v1  ;;  %v7541_v49 = vunpack.i.h.bf16 %v7539_v0  ;;  %v7540_v45 = vunpack.i.l.bf16 %v7539_v0  ;;  %v6484_v1 = vld [vmem:[%s10440_s6 + $0x28] sm:$0xff] }
 0x7ad   : > { %5882 = vmatpush1.bf16.msra.mxu1 %v5798_v61  ;;  %v6127_v61 = vld [vmem:[%s10446_s12] sm:$0xff] }
 0x7ae   : > { %2498 = vperm.xlu0 %6590, %v2494_v13   ;;  %2487 = vperm.xlu1 %6591, %v2479_v16   ;;  %v5270_v34 = vsel %vm2654_vm9, %v7540_v45, %v7541_v49  ;;  %v5272_v54 = vsel %vm2654_vm9, %v7545_v46, %v7546_v41 }
 0x7af   : > { %v7554_v19 = vpop.permute.xlu0 %7553  ;;  %v7549_v36 = vpop.permute.xlu1 %7548  ;;  %v5801_v26 = vpack.c.bf16 %v5272_v54, %v5270_v34  ;;  %v6485_v34 = vld [vmem:[%s10441_s7 + $0x20] sm:$0xff]  ;;  %v6128_v54 = vld [vmem:[%s10446_s12 + $0x8] sm:$0xff] }
 0x7b0   : > { %v7551_v47 = vunpack.i.h.bf16 %v7549_v36  ;;  %v7550_v63 = vunpack.i.l.bf16 %v7549_v36  ;;  %v7556_v14 = vunpack.i.h.bf16 %v7554_v19  ;;  %v7555_v48 = vunpack.i.l.bf16 %v7554_v19 }
 0x7b1   : > { %5883 = vmatprep.subr.bf16.mxu1 %v5801_v26 }
 0x7b2   : > { %v5271_v6 = vsel %vm2654_vm9, %v7551_v47, %v7545_v46  ;;  %v5269_v2 = vsel %vm2654_vm9, %v7550_v63, %v7540_v45  ;;  %4249 = vperm.xlu0 %6590, %v6470_v51   ;;  %2503 = vperm.xlu1 %6591, %v2495_v39   ;;  %v5330_v57 = vsel %vm2530_vm2, %v7555_v48, %v7556_v14 }
 0x7b3   : > { %v5800_v44 = vpack.c.bf16 %v5271_v6, %v5269_v2  ;;  %v7564_v56 = vpop.permute.xlu0 %7563  ;;  %v7559_v8 = vpop.permute.xlu1 %7558  ;;  %v6486_v6 = vld [vmem:[%s10441_s7 + $0x28] sm:$0xff] }
 0x7b4   : > { %v7566_v25 = vunpack.i.h.bf16 %v7564_v56  ;;  %v7565_v4 = vunpack.i.l.bf16 %v7564_v56  ;;  %v7561_v12 = vunpack.i.h.bf16 %v7559_v8  ;;  %v7560_v40 = vunpack.i.l.bf16 %v7559_v8 }
 0x7b5   : > { %5884 = vmatpush1.bf16.msra.mxu1 %v5800_v44 }
 0x7b6   : > { %v5329_v37 = vsel %vm2530_vm2, %v7565_v4, %v7555_v48  ;;  %v5331_v15 = vsel %vm2530_vm2, %v7566_v25, %v7560_v40  ;;  %4266 = vperm.xlu0 %6590, %v6472_v53   ;;  %4254 = vperm.xlu1 %6591, %v6471_v3   ;;  %v5332_v29 = vsel %vm2530_vm2, %v7560_v40, %v7561_v12  ;;  %vm10837_vm2 = vmmov %vm10828_vm0  ;;  %v6065_v48 = vld [vmem:[%s10445_s11 + $0x10] sm:$0xff]  ;;  %v6207_v3 = vld [vmem:[%s10447_s13] sm:$0xff] }
 0x7b7   : > { %v5802_v35 = vpack.c.bf16 %v5331_v15, %v5329_v37  ;;  %v5803_v10 = vpack.c.bf16 %v5332_v29, %v5330_v57  ;;  %v6066_v25 = vld [vmem:[%s10445_s11 + $0x18] sm:$0xff]  ;;  %v6129_v40 = vld [vmem:[%s10446_s12 + $0x10] sm:$0xff]  ;;  %v6208_v57 = vld [vmem:[%s10447_s13 + $0x8] sm:$0xff] }
 0x7b8   : > { %v7676_v37 = vld [vmem:[%s10442_s8 + $0x98] sm:$0x7] }
 0x7b9   : > { %5885 = vmatprep.subr.bf16.mxu1 %v5803_v10  ;;  %v5532_v15 = vrot.slane %v7676_v37, %v10800_v21 }
 0x7ba   : > { %6073 = vperm.xlu0 %6590, %v6063_v20   ;;  %4271 = vperm.xlu1 %6591, %v6473_v11  }
 0x7bb   : > { %5886 = vmatpush1.bf16.msra.mxu1 %v5802_v35  ;;  %v7574_v38 = vpop.permute.xlu0 %7573  ;;  %v7569_v27 = vpop.permute.xlu1 %7568 }
 0x7bc   : > { %v7576_v28 = vunpack.i.h.bf16 %v7574_v38  ;;  %v7575_v31 = vunpack.i.l.bf16 %v7574_v38  ;;  %v7571_v59 = vunpack.i.h.bf16 %v7569_v27  ;;  %v7570_v18 = vunpack.i.l.bf16 %v7569_v27 }
 0x7be   : > { %5929 = vperm.xlu0 %6590, %v6483_v62   ;;  %6078 = vperm.xlu1 %6591, %v6064_v43   ;;  %v5390_v7 = vsel %vm4559_vm11, %v7570_v18, %v7571_v59  ;;  %v5392_v42 = vsel %vm4559_vm11, %v7575_v31, %v7576_v28  ;;  %v6067_v43 = vld [vmem:[%s10445_s11 + $0x20] sm:$0xff]  ;;  %v6130_v28 = vld [vmem:[%s10446_s12 + $0x18] sm:$0xff] }
 0x7bf   : > { %v7579_v23 = vpop.permute.xlu1 %7578  ;;  %v5805_v58 = vpack.c.bf16 %v5392_v42, %v5390_v7  ;;  %v7677_v7 = vld [vmem:[%s10442_s8 + $0x90] sm:$0x7] }
 0x7c0   : > { %v7581_v0 = vunpack.i.h.bf16 %v7579_v23  ;;  %v7580_v13 = vunpack.i.l.bf16 %v7579_v23  ;;  %v5528_v42 = vrot.slane %v7677_v7, %v10800_v21 }
 0x7c1   : > { %5887 = vmatprep.subr.bf16.mxu1 %v5805_v58 }
 0x7c2   : > { %v5391_v16 = vsel %vm4559_vm11, %v7581_v0, %v7575_v31  ;;  %v5389_v41 = vsel %vm4559_vm11, %v7580_v13, %v7570_v18  ;;  %6137 = vperm.xlu0 %6590, %v6127_v61   ;;  %5934 = vperm.xlu1 %6591, %v6484_v1   ;;  %vm10839_vm11 = vmmov %vm10828_vm0  ;;  %v5534_v31 = vmul.f32 0.0, %v5532_v15  ;;  %v6209_v1 = vld [vmem:[%s10447_s13 + $0x10] sm:$0xff]  ;;  %v6068_v0 = vld [vmem:[%s10445_s11 + $0x28] sm:$0xff]  ;;  %v5533_v21 = vmul.f32 %v5528_v42, %v10744_v52 }
 0x7c3   : > { %v5804_v46 = vpack.c.bf16 %v5391_v16, %v5389_v41  ;;  %v7584_v49 = vpop.permute.xlu0 %7583  ;;  %v7589_v45 = vpop.permute.xlu1 %7588  ;;  %v5535_v16 = vmul.f32 %v5528_v42, %v10747_v30 }
 0x7c4   : > { %v7586_v19 = vunpack.i.h.bf16 %v7584_v49  ;;  %v7585_v36 = vunpack.i.l.bf16 %v7584_v49  ;;  %v7591_v26 = vunpack.i.h.bf16 %v7589_v45  ;;  %v7590_v51 = vunpack.i.l.bf16 %v7589_v45  ;;  %v6210_v49 = vld [vmem:[%s10447_s13 + $0x18] sm:$0xff] }
 0x7c5   : > { %5888 = vmatpush1.bf16.msra.mxu1 %v5804_v46  ;;  %v5811_v13 = vpack.c.bf16 %v5534_v31, %v5534_v31  ;;  %v5810_v41 = vpack.c.bf16 %v5535_v16, %v5533_v21  ;;  %v6131_v46 = vld [vmem:[%s10446_s12 + $0x20] sm:$0xff] }
 0x7c6   : > { %5946 = vperm.xlu0 %6590, %v6485_v34   ;;  %6142 = vperm.xlu1 %6591, %v6128_v54   ;;  %v5450_v39 = vsel %vm10836_vm13, %v7585_v36, %v7586_v19  ;;  %v5452_v47 = vsel %vm10837_vm2, %v7590_v51, %v7591_v26  ;;  %v6069_v54 = vld [vmem:[%s10445_s11 + $0x30] sm:$0xff]  ;;  %v6132_v19 = vld [vmem:[%s10446_s12 + $0x28] sm:$0xff]  ;;  %v6021_v31 = vld [vmem:[%s10444_s10] sm:$0xff] }
 0x7c7   : > { %v7594_v63 = vpop.permute.xlu0 %7593  ;;  %v5807_v14 = vpack.c.bf16 %v5452_v47, %v5450_v39 }
 0x7c8   : > { %v7596_v2 = vunpack.i.h.bf16 %v7594_v63  ;;  %v7595_v44 = vunpack.i.l.bf16 %v7594_v63 }
 0x7c9   : > { %5889 = vmatprep.subr.bf16.mxu1 %v5807_v14 }
 0x7ca   : > { %v5449_v56 = vsel %vm10838_vm4, %v7595_v44, %v7585_v36  ;;  %v5451_v8 = vsel %vm10839_vm11, %v7596_v2, %v7590_v51  ;;  %6083 = vperm.xlu0 %6590, %v6065_v48   ;;  %5951 = vperm.xlu1 %6591, %v6486_v6   ;;  %v6211_v6 = vld [vmem:[%s10447_s13 + $0x20] sm:$0xff]  ;;  %v6070_v2 = vld [vmem:[%s10445_s11 + $0x38] sm:$0xff] }
 0x7cb   : > { %v5806_v53 = vpack.c.bf16 %v5451_v8, %v5449_v56 }
 0x7cd   : > { %5890 = vmatpush1.bf16.msra.mxu1 %v5806_v53 }
 0x7ce   : > { %6217 = vperm.xlu0 %6590, %v6207_v3   ;;  %6088 = vperm.xlu1 %6591, %v6066_v25  }
 0x7cf   : > { %v7604_v4 = vpop.permute.xlu0 %7603  ;;  %v7599_v12 = vpop.permute.xlu1 %7598 }
 0x7d0   : > { %v7606_v29 = vunpack.i.h.bf16 %v7604_v4  ;;  %v7605_v35 = vunpack.i.l.bf16 %v7604_v4  ;;  %v7601_v10 = vunpack.i.h.bf16 %v7599_v12  ;;  %v7600_v20 = vunpack.i.l.bf16 %v7599_v12  ;;  %v6212_v12 = vld [vmem:[%s10447_s13 + $0x28] sm:$0xff] }
 0x7d2   : > { %6147 = vperm.xlu0 %6590, %v6129_v40   ;;  %6222 = vperm.xlu1 %6591, %v6208_v57   ;;  %v5510_v11 = vsel %vm3168_vm10, %v7600_v20, %v7601_v10  ;;  %v5512_v38 = vsel %vm3168_vm10, %v7605_v35, %v7606_v29 }
 0x7d3   : > { %v7609_v27 = vpop.permute.xlu1 %7608  ;;  %v5809_v62 = vpack.c.bf16 %v5512_v38, %v5510_v11 }
 0x7d4   : > { %v7611_v59 = vunpack.i.h.bf16 %v7609_v27  ;;  %v7610_v18 = vunpack.i.l.bf16 %v7609_v27 }
 0x7d5   : > { %5891 = vmatprep.subr.bf16.mxu1 %v5809_v62 }
 0x7d6   : > { %v5511_v23 = vsel %vm3168_vm10, %v7611_v59, %v7605_v35  ;;  %v5509_v58 = vsel %vm3168_vm10, %v7610_v18, %v7600_v20  ;;  %6093 = vperm.xlu0 %6590, %v6067_v43   ;;  %6152 = vperm.xlu1 %6591, %v6130_v28   ;;  %v7661_v28 = vld [vmem:[%s10439_s5 + $0x48] ss:$16 sps:$4 sm:$0xff]  }
 0x7d7   : > { %v5808_v61 = vpack.c.bf16 %v5511_v23, %v5509_v58  ;;  %v6022_v58 = vld [vmem:[%s10444_s10 + $0x8] sm:$0xff] }
 0x7d9   : > { %5892 = vmatpush1.bf16.msra.mxu1 %v5808_v61 }
 0x7da   : > { %6227 = vperm.xlu0 %6590, %v6209_v1   ;;  %6098 = vperm.xlu1 %6591, %v6068_v0  }
 0x7db   : > { %5893 = vmatprep.subr.bf16.mxu1 %v5811_v13 }
 0x7dd   : > { %5894 = vmatpush1.bf16.msra.mxu1 %v5810_v41 }
 0x7de   : > { %6157 = vperm.xlu0 %6590, %v6131_v46   ;;  %6232 = vperm.xlu1 %6591, %v6210_v49  }
 0x7df   : > { %v7614_v45 = vpop.permute.xlu0 %7613  ;;  %v7619_v34 = vpop.permute.xlu1 %7618 }
 0x7e0   : > { %v7616_v36 = vunpack.i.h.bf16 %v7614_v45  ;;  %v7615_v26 = vunpack.i.l.bf16 %v7614_v45  ;;  %v7621_v51 = vunpack.i.h.bf16 %v7619_v34  ;;  %v7620_v39 = vunpack.i.l.bf16 %v7619_v34 }
 0x7e2   : > { %6103 = vperm.xlu0 %6590, %v6069_v54   ;;  %6162 = vperm.xlu1 %6591, %v6132_v19   ;;  %v5590_v47 = vsel %vm3139_vm12, %v7615_v26, %v7616_v36  ;;  %v5592_v63 = vsel %vm3139_vm12, %v7620_v39, %v7621_v51 }
 0x7e3   : > { %v7624_v14 = vpop.permute.xlu0 %7623  ;;  %v5813_v48 = vpack.c.bf16 %v5592_v63, %v5590_v47 }
 0x7e4   : > { %v7626_v44 = vunpack.i.h.bf16 %v7624_v14  ;;  %v7625_v56 = vunpack.i.l.bf16 %v7624_v14 }
 0x7e5   : > { %5895 = vmatprep.subr.bf16.mxu1 %v5813_v48 }
 0x7e6   : > { %v5589_v8 = vsel %vm3139_vm12, %v7625_v56, %v7615_v26  ;;  %v5591_v53 = vsel %vm3139_vm12, %v7626_v44, %v7620_v39  ;;  %6237 = vperm.xlu0 %6590, %v6211_v6   ;;  %6108 = vperm.xlu1 %6591, %v6070_v2  }
 0x7e7   : > { %v5812_v3 = vpack.c.bf16 %v5591_v53, %v5589_v8  ;;  %v7634_v25 = vpop.permute.xlu0 %7633  ;;  %v7629_v4 = vpop.permute.xlu1 %7628 }
 0x7e8   : > { %v7636_v40 = vunpack.i.h.bf16 %v7634_v25  ;;  %v7635_v57 = vunpack.i.l.bf16 %v7634_v25  ;;  %v7631_v37 = vunpack.i.h.bf16 %v7629_v4  ;;  %v7630_v15 = vunpack.i.l.bf16 %v7629_v4 }
 0x7e9   : > { %5896 = vmatpush1.bf16.msra.mxu1 %v5812_v3 }
 0x7ea   : > { %6242 = vperm.xlu1 %6591, %v6212_v12   ;;  %v5650_v29 = vsel %vm4298_vm15, %v7630_v15, %v7631_v37  ;;  %v5652_v35 = vsel %vm4298_vm15, %v7635_v57, %v7636_v40 }
 0x7eb   : > { %v7639_v10 = vpop.permute.xlu1 %7638  ;;  %v5815_v20 = vpack.c.bf16 %v5652_v35, %v5650_v29  ;;  %v6213_v29 = vld [vmem:[%s10447_s13 + $0x30] sm:$0xff] }
 0x7ec   : > { %v7641_v11 = vunpack.i.h.bf16 %v7639_v10  ;;  %v7640_v38 = vunpack.i.l.bf16 %v7639_v10 }
 0x7ed   : > { %5897 = vmatprep.subr.bf16.mxu1 %v5815_v20 }
 0x7ee   : > { %v5651_v27 = vsel %vm4298_vm15, %v7641_v11, %v7635_v57  ;;  %v5649_v62 = vsel %vm4298_vm15, %v7640_v38, %v7630_v15  ;;  %v6340_v11 = vld [vmem:[%s10449_s15] sm:$0xff] }
 0x7ef   : > { %v5814_v43 = vpack.c.bf16 %v5651_v27, %v5649_v62  ;;  %v6134_v27 = vld [vmem:[%s10446_s12 + $0x38] sm:$0xff] }
 0x7f1   : > { %5898 = vmatpush1.bf16.msra.mxu1 %v5814_v43 }
 0x7f4   : > { %5914 = vmatmul.mubr.bf16.vlgmr.msra.gmra.mrb[4].mxu1 %v7661_v28 }
 0x821   : > { %v6015_v59 = vpop.xlane.xlu0 %6014 }
 0x822   : > { %v6019_v18 = vmul.f32 0.00390625, %v6015_v59 }
 0x824   : > { %v6023_v7 = vadd.f32 %v6021_v31, %v6019_v18  ;;  %v6360_v31 = vld [vmem:[%s10451_s17] sm:$0xff] }
 0x826   : > { %v6489_v42 = vmul.f32 -1.442695, %v6023_v7 }
 0x828   : > { %7662 = vpow2.f32 %v6489_v42  ;;  %v6214_v42 = vld [vmem:[%s10447_s13 + $0x38] sm:$0xff] }
 0x829   : > { %v2483_v23 = vpop.permute.xlu0 %2482 }
 0x82a   : > { %v6018_v61 = vpop.xlane.xlu1 %6017  ;;  %v2490_v34 = vmul.f32 %v2483_v23, %v9848_v55  ;;  %v2491_v54 = vmul.f32 %v2483_v23, %v9851_v60 }
 0x82b   : > { %v6020_v1 = vmul.f32 0.00390625, %v6018_v61 }
 0x82d   : > { %v6024_v0 = vadd.f32 %v6022_v58, %v6020_v1  ;;  %v2499_v13 = vpop.permute.xlu0 %2498 }
 0x82e   : > { %v2488_v16 = vpop.permute.xlu1 %2487  ;;  %v2506_v51 = vadd.f32 %v2499_v13, %v2490_v34  ;;  %v2507_v39 = vadd.f32 %v2499_v13, %v2491_v54 }
 0x82f   : > { %v6490_v21 = vmul.f32 -1.442695, %v6024_v0  ;;  %v2492_v2 = vmul.f32 %v2488_v16, %v9856_v17  ;;  %v2493_v55 = vmul.f32 %v2488_v16, %v9858_v50 }
 0x831   : > { %7664 = vpow2.f32 %v6490_v21  ;;  %v4250_v41 = vpop.permute.xlu0 %4249 }
 0x832   : > { %v7663_v46 = vpop.eup %7662  ;;  %v2504_v49 = vpop.permute.xlu1 %2503  ;;  %v4257_v19 = vmul.f32 %v4250_v41, %v10122_v33  ;;  %v4258_v36 = vmul.f32 %v4250_v41, %v10125_v22  ;;  %v6348_v41 = vld [vmem:[%s10450_s16] sm:$0xff] }
 0x833   : > { %v6031_v45 = vadd.f32 1.0, %v7663_v46  ;;  %v2508_v8 = vadd.f32 %v2504_v49, %v2492_v2  ;;  %v2509_v53 = vadd.f32 %v2504_v49, %v2493_v55 }
 0x835   : > { %7666 = vrcp.f32 %v6031_v45  ;;  %v4267_v26 = vpop.permute.xlu0 %4266 }
 0x836   : > { %v4274_v47 = vadd.f32 %v4267_v26, %v4257_v19  ;;  %v4275_v63 = vadd.f32 %v4267_v26, %v4258_v36  ;;  %v4255_v14 = vpop.permute.xlu1 %4254 }
 0x837   : > { %v4259_v60 = vmul.f32 %v4255_v14, %v10134_v9  ;;  %v4260_v33 = vmul.f32 %v4255_v14, %v10136_v5  ;;  %v6133_v5 = vld [vmem:[%s10446_s12 + $0x30] sm:$0xff] }
 0x838   : > { %v10310_v48 = vadd.f32 %v4274_v47, %v2506_v51  ;;  %v10312_v6 = vadd.f32 %v4275_v63, %v2507_v39 }
 0x839   : > { %v6074_v22 = vpop.permute.xlu0 %6073 }
 0x83a   : > { %v4272_v44 = vpop.permute.xlu1 %4271  ;;  %v6111_v62 = vmul.f32 %v6074_v22, %v2506_v51  ;;  %v6112_v43 = vmul.f32 %v6074_v22, %v2507_v39 }
 0x83b   : > { %v7665_v56 = vpop.eup %7664  ;;  %v4276_v3 = vadd.f32 %v4272_v44, %v4259_v60  ;;  %v4277_v25 = vadd.f32 %v4272_v44, %v4260_v33 }
 0x83c   : > { %v6032_v4 = vadd.f32 1.0, %v7665_v56 }
 0x83d   : > { %v10318_v12 = vpop.permute.xlu0 %5929  ;;  %v10320_v40 = vadd.f32 %v4276_v3, %v2508_v8  ;;  %v10322_v57 = vadd.f32 %v4277_v25, %v2509_v53 }
 0x83e   : > { %7668 = vrcp.f32 %v6032_v4  ;;  %v6079_v17 = vpop.permute.xlu1 %6078 }
 0x83f   : > { %v7667_v50 = vpop.eup %7666  ;;  %v6113_v59 = vmul.f32 %v6079_v17, %v2508_v8  ;;  %v6114_v18 = vmul.f32 %v6079_v17, %v2509_v53 }
 0x840   : > { %6039 = vperm.xlu0 %6590, %v7667_v50  }
 0x841   : > { %v6138_v9 = vpop.permute.xlu0 %6137 }
 0x842   : > { %v10327_v37 = vpop.permute.xlu1 %5934  ;;  %v6175_v23 = vadd.f32 %v6138_v9, %v6111_v62  ;;  %v6176_v58 = vadd.f32 %v6138_v9, %v6112_v43 }
 0x844   : > { %6167 = vperm.xlu0 %6590, %v6133_v5   ;;  %vm6191_vm12 = vcmp.ge.f32.partialorder %v6175_v23, 0.0  ;;  %vm6192_vm10 = vcmp.ge.f32.partialorder %v6176_v58, 0.0 }
 0x845   : > { %v10329_v15 = vpop.permute.xlu0 %5946 }
 0x846   : > { %v6143_v35 = vpop.permute.xlu1 %6142 }
 0x847   : > { %v6177_v61 = vadd.f32 %v6143_v35, %v6113_v59  ;;  %v6178_v1 = vadd.f32 %v6143_v35, %v6114_v18 }
 0x848   : > { %v7669_v10 = vpop.eup %7668  ;;  %6247 = vperm.xlu0 %6590, %v6213_v29  }
 0x849   : > { %v6084_v20 = vpop.permute.xlu0 %6083  ;;  %6044 = vperm.xlu1 %6591, %v7669_v10   ;;  %vm6193_vm15 = vcmp.ge.f32.partialorder %v6177_v61, 0.0  ;;  %vm6194_vm8 = vcmp.ge.f32.partialorder %v6178_v1, 0.0 }
 0x84a   : > { %v10337_v38 = vpop.permute.xlu1 %5951  ;;  %v6115_v47 = vmul.f32 %v6084_v20, %v10310_v48  ;;  %v6116_v63 = vmul.f32 %v6084_v20, %v10312_v6 }
 0x84c   : > { %6343 = vperm.xlu0 %6590, %v6340_v11  }
 0x84d   : > { %v6218_v28 = vpop.permute.xlu0 %6217  ;;  %6172 = vperm.xlu1 %6591, %v6134_v27  }
 0x84e   : > { %v6089_v7 = vpop.permute.xlu1 %6088  ;;  %v6255_v0 = vmul.f32 %v6218_v28, %v6175_v23  ;;  %v6256_v13 = vmul.f32 %v6218_v28, %v6176_v58 }
 0x84f   : > { %v6117_v14 = vmul.f32 %v6089_v7, %v10320_v40  ;;  %v6118_v2 = vmul.f32 %v6089_v7, %v10322_v57 }
 0x850   : > { %6363 = vperm.xlu0 %6590, %v6360_v31   ;;  %v6271_v45 = vsel %vm6191_vm12, %v6175_v23, %v6255_v0  ;;  %v6272_v19 = vsel %vm6192_vm10, %v6176_v58, %v6256_v13 }
 0x851   : > { %v6148_v16 = vpop.permute.xlu0 %6147  ;;  %6252 = vperm.xlu1 %6591, %v6214_v42  }
 0x852   : > { %v6223_v21 = vpop.permute.xlu1 %6222  ;;  %v6179_v33 = vadd.f32 %v6148_v16, %v6115_v47  ;;  %v6180_v22 = vadd.f32 %v6148_v16, %v6116_v63 }
 0x853   : > { %v6257_v46 = vmul.f32 %v6223_v21, %v6177_v61  ;;  %v6258_v49 = vmul.f32 %v6223_v21, %v6178_v1 }
 0x854   : > { %vm6195_vm14 = vcmp.ge.f32.partialorder %v6179_v33, 0.0  ;;  %vm6196_vm1 = vcmp.ge.f32.partialorder %v6180_v22, 0.0 }
 0x855   : > { %v6273_v34 = vsel %vm6193_vm15, %v6177_v61, %v6257_v46  ;;  %v10351_v54 = vpop.permute.xlu0 %6093  ;;  %6351 = vperm.xlu1 %6591, %v6348_v41   ;;  %v6274_v36 = vsel %vm6194_vm8, %v6178_v1, %v6258_v49 }
 0x856   : > { %v6288_v26 = vpack.c.bf16 %v6273_v34, %v6271_v45  ;;  %v6153_v51 = vpop.permute.xlu1 %6152  ;;  %v6289_v39 = vpack.c.bf16 %v6274_v36, %v6272_v19 }
 0x857   : > { %v6181_v44 = vadd.f32 %v6153_v51, %v6117_v14  ;;  %v6182_v56 = vadd.f32 %v6153_v51, %v6118_v2 }
 0x858   : > { %6299 = vmatprep.subr.bf16.mxu0 %v6289_v39 }
 0x859   : > { %6300 = vmatpush1.bf16.msra.mxu0 %v6288_v26  ;;  %v6228_v55 = vpop.permute.xlu0 %6227  ;;  %vm6197_vm5 = vcmp.ge.f32.partialorder %v6181_v44, 0.0  ;;  %vm6198_vm6 = vcmp.ge.f32.partialorder %v6182_v56, 0.0 }
 0x85a   : > { %v6099_v60 = vpop.permute.xlu1 %6098  ;;  %v6259_v8 = vmul.f32 %v6228_v55, %v6179_v33  ;;  %v6260_v53 = vmul.f32 %v6228_v55, %v6180_v22 }
 0x85c   : > { %v6275_v17 = vsel %vm6195_vm14, %v6179_v33, %v6259_v8  ;;  %v6276_v9 = vsel %vm6196_vm1, %v6180_v22, %v6260_v53 }
 0x85d   : > { %v6158_v10 = vpop.permute.xlu0 %6157 }
 0x85e   : > { %v6233_v3 = vpop.permute.xlu1 %6232 }
 0x85f   : > { %v6261_v25 = vmul.f32 %v6233_v3, %v6181_v44  ;;  %v6262_v4 = vmul.f32 %v6233_v3, %v6182_v56 }
 0x861   : > { %v6277_v50 = vsel %vm6197_vm5, %v6181_v44, %v6261_v25  ;;  %v6278_v5 = vsel %vm6198_vm6, %v6182_v56, %v6262_v4  ;;  %v6104_v11 = vpop.permute.xlu0 %6103 }
 0x862   : > { %v6290_v29 = vpack.c.bf16 %v6277_v50, %v6275_v17  ;;  %v6291_v35 = vpack.c.bf16 %v6278_v5, %v6276_v9  ;;  %v6163_v20 = vpop.permute.xlu1 %6162 }
 0x864   : > { %6301 = vmatprep.subr.bf16.mxu0 %v6291_v35 }
 0x865   : > { %6302 = vmatpush1.bf16.msra.mxu0 %v6290_v29  ;;  %v6238_v62 = vpop.permute.xlu0 %6237 }
 0x866   : > { %v6109_v27 = vpop.permute.xlu1 %6108 }
 0x86a   : > { %v6243_v43 = vpop.permute.xlu1 %6242 }
 0x8bf   : > { %v6040_v28 = vpop.permute.xlu0 %6039 }
 0x8c0   : > { %v6047_v16 = vmul.f32 %v6040_v28, %v10743_v24  ;;  %v6048_v46 = vmul.f32 %v6040_v28, %v10744_v52 }
 0x8c3   : > { %v6168_v49 = vpop.permute.xlu0 %6167 }
 0x8c7   : > { %v5915_v31 = vpop.f32.mrb[4].mxu1 }
 0x8c8   : > { %v5937_v59 = vmul.f32 %v10318_v12, %v5915_v31  ;;  %v5917_v18 = vpop.f32.mrb[5].mxu1  ;;  %v6045_v7 = vpop.permute.xlu1 %6044 }
 0x8c9   : > { %v5938_v42 = vmul.f32 %v10318_v12, %v5917_v18  ;;  %v5919_v23 = vpop.f32.mrb[6].mxu1  ;;  %v6050_v24 = vmul.f32 %v6045_v7, %v10747_v30 }
 0x8ca   : > { %v5954_v58 = vadd.f32 %v10329_v15, %v5937_v59  ;;  %v5939_v61 = vmul.f32 %v10327_v37, %v5919_v23  ;;  %v5921_v1 = vpop.f32.mrb[7].mxu1 }
 0x8cb   : > { %v5955_v0 = vadd.f32 %v10329_v15, %v5938_v42  ;;  %v5940_v13 = vmul.f32 %v10327_v37, %v5921_v1  ;;  %v6049_v15 = vmul.f32 %v6045_v7, %v10741_v32 }
 0x8cc   : > { %v6055_v21 = vadd.f32 %v10310_v48, %v5954_v58  ;;  %v5956_v41 = vadd.f32 %v10337_v38, %v5939_v61  ;;  %v6173_v52 = vpop.permute.xlu1 %6172 }
 0x8cd   : > { %v6056_v12 = vadd.f32 %v10312_v6, %v5955_v0  ;;  %v5957_v45 = vadd.f32 %v10337_v38, %v5940_v13 }
 0x8ce   : > { %v6059_v34 = vadd.f32 %v6055_v21, %v6047_v16  ;;  %v6119_v19 = vmul.f32 %v10351_v54, %v6055_v21  ;;  %v6057_v37 = vadd.f32 %v10320_v40, %v5956_v41  ;;  %v6248_v40 = vpop.permute.xlu0 %6247  ;;  %v7678_v21 = vld [vmem:[%s10841_s29] sm:$0xff] }
 0x8cf   : > { %v6060_v36 = vadd.f32 %v6056_v12, %v6048_v46  ;;  %v6120_v48 = vmul.f32 %v10351_v54, %v6056_v12  ;;  %v6058_v26 = vadd.f32 %v10322_v57, %v5957_v45 }
 0x8d0   : > { %v6123_v51 = vmul.f32 %v6104_v11, %v6059_v34  ;;  %v6183_v39 = vadd.f32 %v6158_v10, %v6119_v19  ;;  %v6121_v6 = vmul.f32 %v6099_v60, %v6057_v37  ;;  %v6061_v47 = vadd.f32 %v6057_v37, %v6049_v15  ;;  %v6253_v8 = vpop.permute.xlu1 %6252 }
 0x8d1   : > { %v6184_v38 = vadd.f32 %v6158_v10, %v6120_v48  ;;  %v6122_v63 = vmul.f32 %v6099_v60, %v6058_v26  ;;  %v6062_v14 = vadd.f32 %v6058_v26, %v6050_v24  ;;  %v6124_v55 = vmul.f32 %v6104_v11, %v6060_v36 }
 0x8d2   : > { %v6187_v2 = vadd.f32 %v6168_v49, %v6123_v51  ;;  %v6185_v32 = vadd.f32 %v6163_v20, %v6121_v6  ;;  %v6125_v33 = vmul.f32 %v6109_v27, %v6061_v47  ;;  %vm6199_vm3 = vcmp.ge.f32.partialorder %v6183_v39, 0.0  ;;  %v6344_v18 = vpop.permute.xlu0 %6343 }
 0x8d3   : > { %v6186_v22 = vadd.f32 %v6163_v20, %v6122_v63  ;;  %v6126_v30 = vmul.f32 %v6109_v27, %v6062_v14  ;;  %vm6200_vm7 = vcmp.ge.f32.partialorder %v6184_v38, 0.0  ;;  %v6264_v44 = vmul.f32 %v6238_v62, %v6184_v38 }
 0x8d4   : > { %v6189_v54 = vadd.f32 %v6173_v52, %v6125_v33  ;;  %vm6203_vm0 = vcmp.ge.f32.partialorder %v6187_v2, 0.0  ;;  %v6267_v57 = vmul.f32 %v6248_v40, %v6187_v2  ;;  %vm6201_vm2 = vcmp.ge.f32.partialorder %v6185_v32, 0.0  ;;  %v6352_v58 = vpop.permute.xlu1 %6351 }
 0x8d5   : > { %v6190_v56 = vadd.f32 %v6173_v52, %v6126_v30  ;;  %vm6202_vm13 = vcmp.ge.f32.partialorder %v6186_v22, 0.0  ;;  %v6266_v53 = vmul.f32 %v6243_v43, %v6186_v22  ;;  %v6280_v3 = vsel %vm6200_vm7, %v6184_v38, %v6264_v44 }
 0x8d6   : > { %vm6205_vm4 = vcmp.ge.f32.partialorder %v6189_v54, 0.0  ;;  %v6269_v60 = vmul.f32 %v6253_v8, %v6189_v54  ;;  %v6263_v25 = vmul.f32 %v6238_v62, %v6183_v39  ;;  %v6265_v50 = vmul.f32 %v6243_v43, %v6185_v32  ;;  %v6287_v43 = vld [vmem:[%s10842_s25] sm:$0xf]  ;;  %v6364_v46 = vpop.permute.xlu0 %6363 }
 0x8d7   : > { %vm6206_vm11 = vcmp.ge.f32.partialorder %v6190_v56, 0.0  ;;  %v6270_v4 = vmul.f32 %v6253_v8, %v6190_v56  ;;  %v6282_v17 = vsel %vm6202_vm13, %v6186_v22, %v6266_v53  ;;  %v6283_v9 = vsel %vm6203_vm0, %v6187_v2, %v6267_v57 }
 0x8d8   : > { %v6285_v5 = vsel %vm6205_vm4, %v6189_v54, %v6269_v60  ;;  %v6293_v29 = vpack.c.bf16 %v6282_v17, %v6280_v3  ;;  %v6188_v35 = vadd.f32 %v6168_v49, %v6124_v55  ;;  %v6279_v20 = vsel %vm6199_vm3, %v6183_v39, %v6263_v25  ;;  %v7679_v49 = vld [vmem:[%s10841_s29 + $0x8] sm:$0xff]  ;;  %s7784_s29 = smov [#allocation4]  }
 0x8d9   : > { %v6294_v10 = vpack.c.bf16 %v6285_v5, %v6283_v9  ;;  %v6281_v11 = vsel %vm6201_vm2, %v6185_v32, %v6265_v50  ;;  %v6286_v62 = vsel %vm6206_vm11, %v6190_v56, %v6270_v4  ;;  %s7684_s20 = sshll.u32 %s7784_s29, 4  ;;  %s7685_s20 = int_to_ptr.vmem [resolvable:$false] %s7684_s20 }
 0x8da   : > { %6303 = vmatprep.subr.bf16.mxu0 %v6293_v29  ;;  %v6292_v27 = vpack.c.bf16 %v6281_v11, %v6279_v20  ;;  %vm6204_vm12 = vcmp.ge.f32.partialorder %v6188_v35, 0.0  ;;  %v6268_v28 = vmul.f32 %v6248_v40, %v6188_v35  ;;  %s7686_s2 = scalar_lea.vmem %s7685_s20, 512  ;;  %p7687_p0 = scmp.lt.s32.totalorder %s10392_s3, %s7685_s20 }
 0x8db   : > { %p7688_p1 = scmp.lt.s32.totalorder %s7686_s2, %s7680_s23 }
 0x8dc   : > { %6304 = vmatpush1.bf16.msra.mxu0 %v6292_v27  ;;  %v6284_v31 = vsel %vm6204_vm12, %v6188_v35, %v6268_v28 }
 0x8dd   : > { %v6295_v59 = vpack.c.bf16 %v6286_v62, %v6284_v31  ;;  %p7689_p2 = por %p7688_p1, %p7687_p0 }
 0x8df   : > { %6305 = vmatprep.subr.bf16.mxu0 %v6295_v59  ;;  %p7690_p3 = pnand %p7689_p2, %p7683_p13 }
 0x8e0   : > { %6306 = vmatpush1.bf16.msra.mxu0 %v6294_v10 }
 0x8e3   : > { %6491 = vmatmul.mubr.msk.bf16.vlgmr.msra.gmra.mrb[16].mxu0 %vm2654_vm9, %v6287_v43 }
 0x9b6   : > { %v6333_v7 = vpop.f32.mrb[16].mxu0 }
 0x9b7   : > { %v6346_v42 = vmul.f32 %v6344_v18, %v6333_v7  ;;  %v6335_v23 = vpop.f32.mrb[17].mxu0 }
 0x9b8   : > { %v6347_v61 = vmul.f32 %v6344_v18, %v6335_v23  ;;  %v6337_v1 = vpop.f32.mrb[18].mxu0 }
 0x9b9   : > { %v6354_v0 = vadd.f32 %v6352_v58, %v6346_v42  ;;  %v6338_v13 = vpop.f32.mrb[19].mxu0 }
 0x9ba   : > { %v6355_v16 = vadd.f32 %v6352_v58, %v6347_v61 }
 0x9bb   : > { %v6356_v41 = vadd.f32 %v7678_v21, %v6354_v0 }
 0x9bc   : > { %v6357_v12 = vadd.f32 %v7679_v49, %v6355_v16 }
 0x9bd   : > { %v6366_v45 = vmul.f32 %v6364_v46, %v6356_v41  ;;  %vm6358_vm9 = vcmp.ge.f32.partialorder %v6356_v41, 0.0 }
 0x9be   : > { %v6367_v34 = vmul.f32 %v6364_v46, %v6357_v12  ;;  %vm6359_vm10 = vcmp.ge.f32.partialorder %v6357_v12, 0.0 }
 0x9bf   : > { %v6368_v19 = vsel %vm6358_vm9, %v6356_v41, %v6366_v45 }
 0x9c0   : > { %v6369_v15 = vsel %vm6359_vm10, %v6357_v12, %v6367_v34  ;;  %6370 = vst [vmem:[%s568_s26] sm:$0xff] %v6368_v19 }
 0x9c1   : > { %6371 = vst [vmem:[%s568_s26 + $0x8] sm:$0xff] %v6369_v15 }
 0x9c2   : > { %7693 = shalt.err (!%p7690_p3)
}
 0x9c3   : > { %s7694_s21 = scalar_lea.hbm %s10390_s22, 256  ;;  %s7698_s4 = scalar_lea.hbm %s10846_s1, 512 }
 0x9c4   : > { %p7695_p4 = scmp.ne.s32.totalorder %s10390_s22, %s7694_s21  ;;  %p7699_p9 = scmp.lt.u32.totalorder %s10390_s22, %s10846_s1 }
 0x9c5   : > { %p7700_p10 = scmp.lt.u32.totalorder %s7698_s4, %s7694_s21  ;;  %p7702_p12 = scmp.lt.u32.totalorder %s7694_s21, %s10390_s22 }
 0x9c6   : > { %p7696_p7 = pnand %p7695_p4, %p7918_p5 }
 0x9c7   : > { %p7701_p11 = por %p7700_p10, %p7699_p9 }
 0x9c8   : > { %p7697_p8 = pneg %p7696_p7 }
 0x9c9   : > { %p7703_p13 = por %p7702_p12, %p7701_p11 }
 0x9cb   : > { %p7704_p0 = pnand %p7703_p13, %p7697_p8 }
 0x9cd   : > { %7707 = shalt.err (!%p7704_p0)
}
 0x9ce   : > { %6511 = dma.vmem_to_hbm [thread:$0]  (%p7918_p5), %s10392_s3, 256, %s10390_s22, %s6373_s14  }
 0x9cf PF: > { %s10847_s26 = sld [smem:[#allocation10_spill]]  ;;  %s10848_s27 = sld [smem:[#allocation7_spill]] }
 0x9d5   : > { %p6517_p1 = scmp.ge.s32.totalorder %s10847_s26, 2  ;;  %s6399_s28 = sand.u32 1, %s10848_s27  }
 0x9d6   : > { %s6400_s23 = scalar_lea.sflag [#allocation5], %s6399_s28 }
 0x9d7   : > { %p6514_p2 = pnand %p6517_p1, %p7922_p6 }
 0x9d9   : > { %7725 = dma.done.wait (!%p6514_p2), %s6400_s23, 256  }
 0x9da   : > { %7727 = vsyncadd (!%p6514_p2), %s6400_s23, 4294967040  ;;  %s10850_s30 = sld [smem:[#allocation12_spill]]  ;;  %s10851_s27 = sld [smem:[#allocation8_spill]] }
 0x9db   : > { %s10852_s28 = sld [smem:[#allocation9_spill]]  ;;  %s10853_s29 = sld [smem:[#allocation13_spill]] }
 0x9e0   : > { %p28_p3 = scmp.ge.s32.totalorder %s10850_s30, 4  }
 0x9e2   :  { %30 = sbr.rel (!%p28_p3) target bundleno = 11 (0xb), region = 133 }
 0x9e9   :  { %6405 = vsyncpa [#allocation5], 1 }
 0x9ea   :  { %6407 = vsyncpa [#allocation5 + $0x1], 1 }

</bundles_post_ra>
